<compile_context>
chip_gen: v7x
topology: tpu7x:2x2x1
jax: 0.10.0
libtpu: 0.0.40
codegen_flags: <defaults>
</compile_context>

<pallas_src>
import functools

import jax
import jax.numpy as jnp
from jax.experimental import pallas as pl
from jax.experimental.pallas import tpu as pltpu

# ----------------------------- configuration -------------------------------
BATCH = 2
IN_CH = 3
PATCH = 2
Z_SIZE = (4, 4)       # (W, H) template feature grid   -> template image  8x8
X_SIZE = (8, 8)       # (W, H) search-region grid      -> search image  16x16
EMBED_DIM = 32
NUM_HEADS = 2
MLP_RATIO = 4
DEPTH = 2             # number of DINOv2 transformer blocks
LN_EPS = 1e-6         # DINOv2 LayerNorm eps

K_RAW = IN_CH * PATCH * PATCH          # 12
K_PAD = 16                             # patch vector padded for aligned slicing
MLP_DIM = MLP_RATIO * EMBED_DIM        # 128
LANES = 128

N_Z = Z_SIZE[0] * Z_SIZE[1]            # 16
N_X = X_SIZE[0] * X_SIZE[1]            # 64
N_TOT = N_Z + N_X                      # 80

# packed-slab row layout (shared by pack_params and the kernel)
LAYER_W_ROWS = 5 * EMBED_DIM + MLP_DIM            # Wq,Wk,Wv,Wproj,Wfc1 + Wfc2
HEAD_W_BASE = DEPTH * LAYER_W_ROWS                # 576
W_ROWS = HEAD_W_BASE + K_PAD + 3 * EMBED_DIM      # + pe_w + W1(head) + W2(head)
C_GLOBAL = N_TOT                                  # 80
C_LAYER_BASE = C_GLOBAL + 8                       # 88
C_ROWS_RAW = C_LAYER_BASE + DEPTH * 12            # 112
C_ROWS = ((C_ROWS_RAW + 7) // 8) * 8              # 112


# ------------------------------ kernel helpers ------------------------------
def _layernorm(x, gamma, beta):
    mean = jnp.mean(x, axis=-1, keepdims=True)
    xc = x - mean
    var = jnp.mean(xc * xc, axis=-1, keepdims=True)
    return xc * jax.lax.rsqrt(var + LN_EPS) * gamma + beta


# ------------------------------ fused kernel --------------------------------
def fused_forward_kernel(patches_ref, zmask_ref, w_ref, c_ref, out_ref, *,
                         batch, depth, num_heads, n_z, n_x, d, mlp_dim, k_pad):
    bf16 = jnp.bfloat16
    f32 = jnp.float32
    n_tot = n_z + n_x
    hd = d // num_heads
    lw = 5 * d + mlp_dim                 # weight rows per layer
    hb = depth * lw                      # head/global weight base row
    G = n_tot                            # consts: global-row base
    PL = G + 8                           # consts: per-layer row base

    # per-head lane masks (heads are packed along the lanes of q / k / v)
    lane = jax.lax.broadcasted_iota(jnp.int32, (1, d), 1)
    head_mask = [(lane >= hh * hd) & (lane < (hh + 1) * hd)
                 for hh in range(num_heads)]

    # ---- patch embed (Conv2d k=s=P as a single matmul) ----------------------
    x = (jnp.dot(patches_ref[...], w_ref[hb:hb + k_pad, 0:d],
                 preferred_element_type=f32)
         + c_ref[G:G + 1, 0:d])

    # ---- pos-embed (+ tte[2] on search rows) + template token-type add ------
    pos_tt = c_ref[0:n_tot, 0:d]                      # pos (z-crop | x) + tte2 on x
    tte0 = c_ref[G + 3:G + 4, 0:d]
    dtte = c_ref[G + 4:G + 5, 0:d]
    parts = []
    for b in range(batch):
        r0 = b * n_tot
        xb = x[r0:r0 + n_tot, :] + pos_tt
        zadd = tte0 + zmask_ref[b * n_z:(b + 1) * n_z, :] * dtte
        parts.append(xb[0:n_z, :] + zadd)
        parts.append(xb[n_z:n_tot, :])
    x = jnp.concatenate(parts, axis=0)                # (batch*n_tot, d) f32

    # ---- DEPTH transformer blocks (unrolled) --------------------------------
    for l in range(depth):
        W = l * lw
        V = PL + l * 12

        # pre-LN MHSA + LayerScale (full-width q/k/v & proj matmuls)
        h = _layernorm(x, c_ref[V:V + 1, 0:d], c_ref[V + 1:V + 2, 0:d]).astype(bf16)
        q = (jnp.dot(h, w_ref[W:W + d, 0:d], preferred_element_type=f32)
             + c_ref[V + 2:V + 3, 0:d]).astype(bf16)      # scale pre-folded
        k = (jnp.dot(h, w_ref[W + d:W + 2 * d, 0:d], preferred_element_type=f32)
             + c_ref[V + 3:V + 4, 0:d]).astype(bf16)
        v = (jnp.dot(h, w_ref[W + 2 * d:W + 3 * d, 0:d], preferred_element_type=f32)
             + c_ref[V + 4:V + 5, 0:d]).astype(bf16)

        outs = []
        for b in range(batch):
            r0 = b * n_tot
            qb = q[r0:r0 + n_tot, :]
            kb = k[r0:r0 + n_tot, :]
            vb = v[r0:r0 + n_tot, :]
            ob = None
            for hh in range(num_heads):
                qh = jnp.where(head_mask[hh], qb, 0)
                s = jax.lax.dot_general(qh, kb, (((1,), (1,)), ((), ())),
                                        preferred_element_type=f32)
                s = s - jnp.max(s, axis=-1, keepdims=True)
                p = jnp.exp(s)
                # TODO(synk): approx reciprocal (EUP) -> ~1e-4 rel. error vs exact div.
                p = p * pl.reciprocal(jnp.sum(p, axis=-1, keepdims=True), approx=True)
                vh = jnp.where(head_mask[hh], vb, 0)
                contrib = jnp.dot(p.astype(bf16), vh, preferred_element_type=f32)
                ob = contrib if ob is None else ob + contrib   # heads land in own lanes
            outs.append(ob)
        o = jnp.concatenate(outs, axis=0).astype(bf16)         # (batch*n_tot, d)
        attn = (jnp.dot(o, w_ref[W + 3 * d:W + 4 * d, 0:d],
                        preferred_element_type=f32)
                + c_ref[V + 5:V + 6, 0:d])
        x = x + c_ref[V + 6:V + 7, 0:d] * attn                 # ls1

        # pre-LN MLP + LayerScale
        h2 = _layernorm(x, c_ref[V + 7:V + 8, 0:d], c_ref[V + 8:V + 9, 0:d]).astype(bf16)
        h2 = (jnp.dot(h2, w_ref[W + 4 * d:W + 5 * d, 0:mlp_dim],
                      preferred_element_type=f32)
              + c_ref[V + 9:V + 10, 0:mlp_dim])
        # TODO(synk): PyTorch nn.GELU default is exact (erf); tanh approximation used
        #             for guaranteed Mosaic lowering.
        h2 = jax.nn.gelu(h2, approximate=True)
        h2 = (jnp.dot(h2.astype(bf16), w_ref[W + 5 * d:W + 5 * d + mlp_dim, 0:d],
                      preferred_element_type=f32)
              + c_ref[V + 10:V + 11, 0:d])
        x = x + c_ref[V + 11:V + 12, 0:d] * h2                 # ls2

    # ---- final norm, keep search-region tokens ------------------------------
    x = _layernorm(x, c_ref[G + 1:G + 2, 0:d], c_ref[G + 2:G + 3, 0:d])
    xs = jnp.concatenate(
        [x[b * n_tot + n_z:(b + 1) * n_tot, :] for b in range(batch)],
        axis=0).astype(bf16)                                   # (batch*n_x, d)

    # ---- MlpAnchorFreeHead (cls|reg fused), lane-dense 128-wide output ------
    # TODO(synk): exact MlpAnchorFreeHead internals/output activations are not in
    #             the provided source; a 2-layer-MLP cls(1)/reg(4) head with raw
    #             outputs is implemented.
    h1 = (jnp.dot(xs, w_ref[hb + k_pad:hb + k_pad + d, 0:2 * d],
                  preferred_element_type=f32)
          + c_ref[G + 5:G + 6, 0:2 * d])
    h1 = jax.nn.gelu(h1, approximate=True).astype(bf16)
    out_ref[...] = (jnp.dot(h1, w_ref[hb + k_pad + d:hb + k_pad + 3 * d, :],
                            preferred_element_type=f32)
                    + c_ref[G + 6:G + 7, :])


# ------------------------------- JAX glue -----------------------------------
def patchify(img, patch):
    # img: NCHW -> [B, Np, C*P*P] with (C, kh, kw) inner order (Conv2d order).
    B, C, H, W = img.shape
    gh, gw = H // patch, W // patch
    p = img.reshape(B, C, gh, patch, gw, patch)
    p = p.transpose(0, 2, 4, 1, 3, 5)          # B, gh, gw, C, ph, pw
    return p.reshape(B, gh * gw, C * patch * patch)


def pack_params(params):
    """One-time restructuring of PyTorch-layout params into two packed slabs."""
    D, H = EMBED_DIM, NUM_HEADS
    scale = (D // H) ** -0.5
    head = params["head"]

    def pad(a, rows, cols=LANES):
        return jnp.pad(a, ((0, rows - a.shape[0]), (0, cols - a.shape[1])))

    def row(v):
        v = v.reshape(1, -1)
        return jnp.pad(v, ((0, 0), (0, LANES - v.shape[1])))

    # ---- bf16 weight slab (W_ROWS, 128) ----
    w_rows = []
    for blk in params["blocks"]:
        wq = blk["w_qkv"][:, :D] * scale        # fold attention scale into Wq
        wk = blk["w_qkv"][:, D:2 * D]
        wv = blk["w_qkv"][:, 2 * D:]
        w_rows += [pad(wq, D), pad(wk, D), pad(wv, D), pad(blk["w_proj"], D),
                   pad(blk["w_fc1"], D), pad(blk["w_fc2"], MLP_DIM)]
    w_rows.append(pad(params["pe_w"], K_PAD))                        # patch embed
    w1 = jnp.concatenate([head["wc1"], head["wr1"]], axis=1)         # (D, 2D)
    w_rows.append(pad(w1, D))
    w2 = jnp.zeros((2 * D, LANES), jnp.float32)
    w2 = w2.at[:D, 0:1].set(head["wc2"]).at[D:, 1:5].set(head["wr2"])
    w_rows.append(w2)
    weights = jnp.concatenate(w_rows, axis=0).astype(jnp.bfloat16)
    assert weights.shape == (W_ROWS, LANES)

    # ---- f32 consts slab (C_ROWS, 128) ----
    xW, xH = X_SIZE
    zW, zH = Z_SIZE
    tte = params["token_type_embed"]
    pos = params["pos_embed"][0]                                     # (Nx, D)
    pos_z = pos.reshape(xH, xW, D)[:zH, :zW, :].reshape(N_Z, D)
    pos_x = pos + tte[2:3, :]                                        # tte[2] folded in
    pos_tt = jnp.concatenate([pos_z, pos_x], axis=0)                 # (N_TOT, D)

    b_head = jnp.zeros((1, LANES), jnp.float32)
    b_head = b_head.at[0, 0:1].set(head["bc2"][0]).at[0, 1:5].set(head["br2"][0])

    c_rows = [jnp.pad(pos_tt, ((0, 0), (0, LANES - D))),
              row(params["pe_b"]), row(params["norm_g"]), row(params["norm_b"]),
              row(tte[0]), row(tte[1] - tte[0]),
              row(jnp.concatenate([head["bc1"], head["br1"]], axis=1)),
              b_head, jnp.zeros((1, LANES), jnp.float32)]
    for blk in params["blocks"]:
        bq = blk["b_qkv"][:, :D] * scale
        bk = blk["b_qkv"][:, D:2 * D]
        bv = blk["b_qkv"][:, 2 * D:]
        c_rows += [row(blk["ln1_g"]), row(blk["ln1_b"]),
                   row(bq), row(bk), row(bv),
                   row(blk["b_proj"]), row(blk["ls1"]),
                   row(blk["ln2_g"]), row(blk["ln2_b"]),
                   row(blk["b_fc1"]), row(blk["b_fc2"]), row(blk["ls2"])]
    consts = jnp.concatenate(c_rows, axis=0)
    consts = jnp.pad(consts, ((0, C_ROWS - consts.shape[0]), (0, 0)))
    return weights, consts


def forward(packed, z, x, z_feat_mask):
    weights, consts = packed
    B = z.shape[0]

    patches = jnp.concatenate([patchify(z, PATCH), patchify(x, PATCH)], axis=1)
    patches = patches.reshape(B * N_TOT, K_RAW)
    patches = jnp.pad(patches, ((0, 0), (0, K_PAD - K_RAW))).astype(jnp.bfloat16)
    zmask = z_feat_mask.reshape(B * N_Z, 1).astype(jnp.float32)

    kernel = functools.partial(
        fused_forward_kernel, batch=B, depth=DEPTH, num_heads=NUM_HEADS,
        n_z=N_Z, n_x=N_X, d=EMBED_DIM, mlp_dim=MLP_DIM, k_pad=K_PAD)

    out = pl.pallas_call(
        kernel,
        out_shape=jax.ShapeDtypeStruct((B * N_X, LANES), jnp.float32),
        grid=(1,),
        in_specs=[
            pl.BlockSpec((B * N_TOT, K_PAD), lambda i: (0, 0)),
            pl.BlockSpec((B * N_Z, 1), lambda i: (0, 0)),
            pl.BlockSpec(weights.shape, lambda i: (0, 0)),
            pl.BlockSpec(consts.shape, lambda i: (0, 0)),
        ],
        out_specs=pl.BlockSpec((B * N_X, LANES), lambda i: (0, 0)),
        compiler_params=pltpu.CompilerParams(
            dimension_semantics=("arbitrary",)),
    )(patches, zmask, weights, consts)

    xW, xH = X_SIZE
    out = out.reshape(B, xH, xW, LANES)
    score_map = out[..., 0]
    bbox = out[..., 1:5]
    return score_map, bbox


# --------------------------- deterministic init -----------------------------
def init_params(key):
    D = EMBED_DIM
    Hd = MLP_RATIO * D
    K = K_RAW

    def nrm(k, shape, std=0.02):
        return std * jax.random.normal(k, shape, dtype=jnp.float32)

    keys = iter(jax.random.split(key, 64))
    # TODO(synk): pretrained DINOv2 weights / pos-embed interpolation are replaced by
    #             deterministic random init (no checkpoint available in-script).
    params = {
        "pe_w": nrm(next(keys), (K, D)),
        "pe_b": jnp.zeros((1, D), jnp.float32),
        "pos_embed": nrm(next(keys), (1, N_X, D)),
        "token_type_embed": nrm(next(keys), (3, D)),
        "norm_g": jnp.ones((1, D), jnp.float32),
        "norm_b": jnp.zeros((1, D), jnp.float32),
        "blocks": [],
        "head": {
            "wc1": nrm(next(keys), (D, D)), "bc1": jnp.zeros((1, D), jnp.float32),
            "wc2": nrm(next(keys), (D, 1)), "bc2": jnp.zeros((1, 1), jnp.float32),
            "wr1": nrm(next(keys), (D, D)), "br1": jnp.zeros((1, D), jnp.float32),
            "wr2": nrm(next(keys), (D, 4)), "br2": jnp.zeros((1, 4), jnp.float32),
        },
    }
    for _ in range(DEPTH):
        params["blocks"].append({
            "ln1_g": jnp.ones((1, D), jnp.float32),
            "ln1_b": jnp.zeros((1, D), jnp.float32),
            "w_qkv": nrm(next(keys), (D, 3 * D)),
            "b_qkv": jnp.zeros((1, 3 * D), jnp.float32),
            "w_proj": nrm(next(keys), (D, D)),
            "b_proj": jnp.zeros((1, D), jnp.float32),
            "ls1": jnp.ones((1, D), jnp.float32),     # LayerScale gamma
            "ln2_g": jnp.ones((1, D), jnp.float32),
            "ln2_b": jnp.zeros((1, D), jnp.float32),
            "w_fc1": nrm(next(keys), (D, Hd)),
            "b_fc1": jnp.zeros((1, Hd), jnp.float32),
            "w_fc2": nrm(next(keys), (Hd, D)),
            "b_fc2": jnp.zeros((1, D), jnp.float32),
            "ls2": jnp.ones((1, D), jnp.float32),
        })
    return params


# ---------------------------------- main ------------------------------------
if __name__ == "__main__":
    root = jax.random.PRNGKey(0)
    k_p, k_z, k_x, k_m = jax.random.split(root, 4)

    params = init_params(k_p)
    packed = pack_params(params)          # one-time packing, outside jit

    zW, zH = Z_SIZE
    xW, xH = X_SIZE
    z_img = jax.random.normal(k_z, (BATCH, IN_CH, zH * PATCH, zW * PATCH), jnp.float32)
    x_img = jax.random.normal(k_x, (BATCH, IN_CH, xH * PATCH, xW * PATCH), jnp.float32)
    z_feat_mask = jax.random.randint(k_m, (BATCH, zH, zW), 0, 2, dtype=jnp.int32)

    fwd = jax.jit(forward)
    score_map, bbox = fwd(packed, z_img, x_img, z_feat_mask)
    jax.block_until_ready((score_map, bbox))

    assert score_map.shape == (BATCH, xH, xW)
    assert bbox.shape == (BATCH, xH, xW, 4)
    print("KERNEL_OK")
</pallas_src>

<mosaic_0001>
module attributes {stable_mosaic.version = 11 : i64} {
  func.func @fused_forward_kernel(%arg0: i32, %arg1: memref<160x16xbf16, #tpu.memory_space<vmem>>, %arg2: memref<32x1xf32, #tpu.memory_space<vmem>>, %arg3: memref<688x128xbf16, #tpu.memory_space<vmem>>, %arg4: memref<112x128xf32, #tpu.memory_space<vmem>>, %arg5: memref<128x128xf32, #tpu.memory_space<vmem>>) attributes {dimension_semantics = [#tpu.dimension_semantics<arbitrary>], iteration_bounds = array<i64: 1>, scalar_prefetch = 0 : i64, scratch_operands = 0 : i64, tpu.core_type = #tpu.core_type<tc>, window_params = [{pipeline_mode = #tpu.pipeline_mode<synchronous>, transform_indices = @transform_0, window_bounds = array<i64: 160, 16>}, {pipeline_mode = #tpu.pipeline_mode<synchronous>, transform_indices = @transform_1, window_bounds = array<i64: 32, 1>}, {pipeline_mode = #tpu.pipeline_mode<synchronous>, transform_indices = @transform_2, window_bounds = array<i64: 688, 128>}, {pipeline_mode = #tpu.pipeline_mode<synchronous>, transform_indices = @transform_3, window_bounds = array<i64: 112, 128>}, {pipeline_mode = #tpu.pipeline_mode<synchronous>, transform_indices = @transform_4, window_bounds = array<i64: 128, 128>}]} {
    %0 = tpu.iota {dimensions = array<i32: 1>} : vector<1x32xi32>
    %c0_i32 = arith.constant 0 : i32
    %1 = vector.broadcast %c0_i32 : i32 to vector<1x32xi32>
    %2 = arith.cmpi sge, %0, %1 : vector<1x32xi32>
    %c16_i32 = arith.constant 16 : i32
    %3 = vector.broadcast %c16_i32 : i32 to vector<1x32xi32>
    %4 = arith.cmpi slt, %0, %3 : vector<1x32xi32>
    %5 = arith.andi %2, %4 : vector<1x32xi1>
    %c16_i32_0 = arith.constant 16 : i32
    %6 = vector.broadcast %c16_i32_0 : i32 to vector<1x32xi32>
    %7 = arith.cmpi sge, %0, %6 : vector<1x32xi32>
    %c32_i32 = arith.constant 32 : i32
    %8 = vector.broadcast %c32_i32 : i32 to vector<1x32xi32>
    %9 = arith.cmpi slt, %0, %8 : vector<1x32xi32>
    %10 = arith.andi %7, %9 : vector<1x32xi1>
    %c0 = arith.constant 0 : index
    %c0_1 = arith.constant 0 : index
    %11 = vector.load %arg1[%c0, %c0_1] : memref<160x16xbf16, #tpu.memory_space<vmem>>, vector<160x16xbf16>
    %c576 = arith.constant 576 : index
    %c0_2 = arith.constant 0 : index
    %12 = vector.load %arg3[%c576, %c0_2] : memref<688x128xbf16, #tpu.memory_space<vmem>>, vector<16x32xbf16>
    %cst = arith.constant dense<0.000000e+00> : vector<160x32xf32>
    %13 = tpu.matmul %11, %12, %cst {dimension_numbers = #tpu.dot_dimension_numbers<[1], [0], [0], [1], [0, 0, 1, 1], [], []>} : vector<160x16xbf16>, vector<16x32xbf16>, vector<160x32xf32> -> vector<160x32xf32>
    %c80 = arith.constant 80 : index
    %c0_3 = arith.constant 0 : index
    %14 = vector.load %arg4[%c80, %c0_3] : memref<112x128xf32, #tpu.memory_space<vmem>>, vector<1x32xf32>
    %15 = vector.broadcast %14 : vector<1x32xf32> to vector<160x32xf32>
    %16 = arith.addf %13, %15 : vector<160x32xf32>
    %c0_4 = arith.constant 0 : index
    %c0_5 = arith.constant 0 : index
    %17 = vector.load %arg4[%c0_4, %c0_5] : memref<112x128xf32, #tpu.memory_space<vmem>>, vector<80x32xf32>
    %c83 = arith.constant 83 : index
    %c0_6 = arith.constant 0 : index
    %18 = vector.load %arg4[%c83, %c0_6] : memref<112x128xf32, #tpu.memory_space<vmem>>, vector<1x32xf32>
    %c84 = arith.constant 84 : index
    %c0_7 = arith.constant 0 : index
    %19 = vector.load %arg4[%c84, %c0_7] : memref<112x128xf32, #tpu.memory_space<vmem>>, vector<1x32xf32>
    %20 = vector.extract_strided_slice %16 {offsets = [0, 0], sizes = [80, 32], strides = [1, 1]} : vector<160x32xf32> to vector<80x32xf32>
    %21 = arith.addf %20, %17 : vector<80x32xf32>
    %c0_8 = arith.constant 0 : index
    %c0_9 = arith.constant 0 : index
    %22 = vector.load %arg2[%c0_8, %c0_9] : memref<32x1xf32, #tpu.memory_space<vmem>>, vector<16x1xf32>
    %23 = vector.broadcast %22 : vector<16x1xf32> to vector<16x32xf32>
    %24 = vector.broadcast %19 : vector<1x32xf32> to vector<16x32xf32>
    %25 = arith.mulf %23, %24 : vector<16x32xf32>
    %26 = vector.broadcast %18 : vector<1x32xf32> to vector<16x32xf32>
    %27 = arith.addf %26, %25 : vector<16x32xf32>
    %28 = vector.extract_strided_slice %21 {offsets = [0, 0], sizes = [16, 32], strides = [1, 1]} : vector<80x32xf32> to vector<16x32xf32>
    %29 = arith.addf %28, %27 : vector<16x32xf32>
    %30 = vector.extract_strided_slice %21 {offsets = [16, 0], sizes = [64, 32], strides = [1, 1]} : vector<80x32xf32> to vector<64x32xf32>
    %31 = vector.extract_strided_slice %16 {offsets = [80, 0], sizes = [80, 32], strides = [1, 1]} : vector<160x32xf32> to vector<80x32xf32>
    %32 = arith.addf %31, %17 : vector<80x32xf32>
    %c16 = arith.constant 16 : index
    %c0_10 = arith.constant 0 : index
    %33 = vector.load %arg2[%c16, %c0_10] : memref<32x1xf32, #tpu.memory_space<vmem>>, vector<16x1xf32>
    %34 = vector.broadcast %33 : vector<16x1xf32> to vector<16x32xf32>
    %35 = vector.broadcast %19 : vector<1x32xf32> to vector<16x32xf32>
    %36 = arith.mulf %34, %35 : vector<16x32xf32>
    %37 = vector.broadcast %18 : vector<1x32xf32> to vector<16x32xf32>
    %38 = arith.addf %37, %36 : vector<16x32xf32>
    %39 = vector.extract_strided_slice %32 {offsets = [0, 0], sizes = [16, 32], strides = [1, 1]} : vector<80x32xf32> to vector<16x32xf32>
    %40 = arith.addf %39, %38 : vector<16x32xf32>
    %41 = vector.extract_strided_slice %32 {offsets = [16, 0], sizes = [64, 32], strides = [1, 1]} : vector<80x32xf32> to vector<64x32xf32>
    %42 = tpu.concatenate %29, %30, %40, %41 in 0 : vector<16x32xf32>, vector<64x32xf32>, vector<16x32xf32>, vector<64x32xf32> -> vector<160x32xf32>
    %c88 = arith.constant 88 : index
    %c0_11 = arith.constant 0 : index
    %43 = vector.load %arg4[%c88, %c0_11] : memref<112x128xf32, #tpu.memory_space<vmem>>, vector<1x32xf32>
    %c89 = arith.constant 89 : index
    %c0_12 = arith.constant 0 : index
    %44 = vector.load %arg4[%c89, %c0_12] : memref<112x128xf32, #tpu.memory_space<vmem>>, vector<1x32xf32>
    %cst_13 = arith.constant dense<0.000000e+00> : vector<160xf32>
    %45 = vector.multi_reduction <add>, %42, %cst_13 [1] : vector<160x32xf32> to vector<160xf32>
    %46 = vector.shape_cast %45 : vector<160xf32> to vector<160x1xf32>
    %cst_14 = arith.constant 3.200000e+01 : f32
    %47 = vector.broadcast %cst_14 : f32 to vector<160x1xf32>
    %48 = arith.divf %46, %47 : vector<160x1xf32>
    %49 = vector.broadcast %48 : vector<160x1xf32> to vector<160x32xf32>
    %50 = arith.subf %42, %49 : vector<160x32xf32>
    %51 = arith.mulf %50, %50 : vector<160x32xf32>
    %cst_15 = arith.constant dense<0.000000e+00> : vector<160xf32>
    %52 = vector.multi_reduction <add>, %51, %cst_15 [1] : vector<160x32xf32> to vector<160xf32>
    %53 = vector.shape_cast %52 : vector<160xf32> to vector<160x1xf32>
    %cst_16 = arith.constant 3.200000e+01 : f32
    %54 = vector.broadcast %cst_16 : f32 to vector<160x1xf32>
    %55 = arith.divf %53, %54 : vector<160x1xf32>
    %cst_17 = arith.constant 9.99999997E-7 : f32
    %56 = vector.broadcast %cst_17 : f32 to vector<160x1xf32>
    %57 = arith.addf %55, %56 : vector<160x1xf32>
    %58 = math.rsqrt %57 : vector<160x1xf32>
    %59 = vector.broadcast %58 : vector<160x1xf32> to vector<160x32xf32>
    %60 = arith.mulf %50, %59 : vector<160x32xf32>
    %61 = vector.broadcast %43 : vector<1x32xf32> to vector<160x32xf32>
    %62 = arith.mulf %60, %61 : vector<160x32xf32>
    %63 = vector.broadcast %44 : vector<1x32xf32> to vector<160x32xf32>
    %64 = arith.addf %62, %63 : vector<160x32xf32>
    %65 = arith.truncf %64 : vector<160x32xf32> to vector<160x32xbf16>
    %c0_18 = arith.constant 0 : index
    %c0_19 = arith.constant 0 : index
    %66 = vector.load %arg3[%c0_18, %c0_19] : memref<688x128xbf16, #tpu.memory_space<vmem>>, vector<32x32xbf16>
    %cst_20 = arith.constant dense<0.000000e+00> : vector<160x32xf32>
    %67 = tpu.matmul %65, %66, %cst_20 {dimension_numbers = #tpu.dot_dimension_numbers<[1], [0], [0], [1], [0, 0, 1, 1], [], []>} : vector<160x32xbf16>, vector<32x32xbf16>, vector<160x32xf32> -> vector<160x32xf32>
    %c90 = arith.constant 90 : index
    %c0_21 = arith.constant 0 : index
    %68 = vector.load %arg4[%c90, %c0_21] : memref<112x128xf32, #tpu.memory_space<vmem>>, vector<1x32xf32>
    %69 = vector.broadcast %68 : vector<1x32xf32> to vector<160x32xf32>
    %70 = arith.addf %67, %69 : vector<160x32xf32>
    %71 = arith.truncf %70 : vector<160x32xf32> to vector<160x32xbf16>
    %c32 = arith.constant 32 : index
    %c0_22 = arith.constant 0 : index
    %72 = vector.load %arg3[%c32, %c0_22] : memref<688x128xbf16, #tpu.memory_space<vmem>>, vector<32x32xbf16>
    %cst_23 = arith.constant dense<0.000000e+00> : vector<160x32xf32>
    %73 = tpu.matmul %65, %72, %cst_23 {dimension_numbers = #tpu.dot_dimension_numbers<[1], [0], [0], [1], [0, 0, 1, 1], [], []>} : vector<160x32xbf16>, vector<32x32xbf16>, vector<160x32xf32> -> vector<160x32xf32>
    %c91 = arith.constant 91 : index
    %c0_24 = arith.constant 0 : index
    %74 = vector.load %arg4[%c91, %c0_24] : memref<112x128xf32, #tpu.memory_space<vmem>>, vector<1x32xf32>
    %75 = vector.broadcast %74 : vector<1x32xf32> to vector<160x32xf32>
    %76 = arith.addf %73, %75 : vector<160x32xf32>
    %77 = arith.truncf %76 : vector<160x32xf32> to vector<160x32xbf16>
    %c64 = arith.constant 64 : index
    %c0_25 = arith.constant 0 : index
    %78 = vector.load %arg3[%c64, %c0_25] : memref<688x128xbf16, #tpu.memory_space<vmem>>, vector<32x32xbf16>
    %cst_26 = arith.constant dense<0.000000e+00> : vector<160x32xf32>
    %79 = tpu.matmul %65, %78, %cst_26 {dimension_numbers = #tpu.dot_dimension_numbers<[1], [0], [0], [1], [0, 0, 1, 1], [], []>} : vector<160x32xbf16>, vector<32x32xbf16>, vector<160x32xf32> -> vector<160x32xf32>
    %c92 = arith.constant 92 : index
    %c0_27 = arith.constant 0 : index
    %80 = vector.load %arg4[%c92, %c0_27] : memref<112x128xf32, #tpu.memory_space<vmem>>, vector<1x32xf32>
    %81 = vector.broadcast %80 : vector<1x32xf32> to vector<160x32xf32>
    %82 = arith.addf %79, %81 : vector<160x32xf32>
    %83 = arith.truncf %82 : vector<160x32xf32> to vector<160x32xbf16>
    %84 = vector.extract_strided_slice %71 {offsets = [0, 0], sizes = [80, 32], strides = [1, 1]} : vector<160x32xbf16> to vector<80x32xbf16>
    %85 = vector.extract_strided_slice %77 {offsets = [0, 0], sizes = [80, 32], strides = [1, 1]} : vector<160x32xbf16> to vector<80x32xbf16>
    %86 = vector.extract_strided_slice %83 {offsets = [0, 0], sizes = [80, 32], strides = [1, 1]} : vector<160x32xbf16> to vector<80x32xbf16>
    %c0_i32_28 = arith.constant 0 : i32
    %87 = arith.sitofp %c0_i32_28 : i32 to bf16
    %88 = vector.shape_cast %5 : vector<1x32xi1> to vector<1x32xi1>
    %89 = vector.broadcast %88 : vector<1x32xi1> to vector<80x32xi1>
    %90 = vector.broadcast %87 : bf16 to vector<80x32xbf16>
    %91 = arith.select %89, %84, %90 : vector<80x32xi1>, vector<80x32xbf16>
    %cst_29 = arith.constant dense<0.000000e+00> : vector<80x80xf32>
    %92 = tpu.matmul %91, %85, %cst_29 {dimension_numbers = #tpu.dot_dimension_numbers<[1], [1], [0], [0], [0, 0, 1, 0], [], []>} : vector<80x32xbf16>, vector<80x32xbf16>, vector<80x80xf32> -> vector<80x80xf32>
    %cst_30 = arith.constant dense<0xFF800000> : vector<80xf32>
    %93 = vector.multi_reduction <maximumf>, %92, %cst_30 [1] : vector<80x80xf32> to vector<80xf32>
    %94 = vector.shape_cast %93 : vector<80xf32> to vector<80x1xf32>
    %95 = vector.broadcast %94 : vector<80x1xf32> to vector<80x80xf32>
    %96 = arith.subf %92, %95 : vector<80x80xf32>
    %97 = math.exp %96 : vector<80x80xf32>
    %cst_31 = arith.constant dense<0.000000e+00> : vector<80xf32>
    %98 = vector.multi_reduction <add>, %97, %cst_31 [1] : vector<80x80xf32> to vector<80xf32>
    %99 = vector.shape_cast %98 : vector<80xf32> to vector<80x1xf32>
    %100 = tpu.reciprocal %99 {approx = true} : vector<80x1xf32> -> vector<80x1xf32>
    %101 = vector.broadcast %100 : vector<80x1xf32> to vector<80x80xf32>
    %102 = arith.mulf %97, %101 : vector<80x80xf32>
    %c0_i32_32 = arith.constant 0 : i32
    %103 = arith.sitofp %c0_i32_32 : i32 to bf16
    %104 = vector.shape_cast %5 : vector<1x32xi1> to vector<1x32xi1>
    %105 = vector.broadcast %104 : vector<1x32xi1> to vector<80x32xi1>
    %106 = vector.broadcast %103 : bf16 to vector<80x32xbf16>
    %107 = arith.select %105, %86, %106 : vector<80x32xi1>, vector<80x32xbf16>
    %108 = arith.truncf %102 : vector<80x80xf32> to vector<80x80xbf16>
    %cst_33 = arith.constant dense<0.000000e+00> : vector<80x32xf32>
    %109 = tpu.matmul %108, %107, %cst_33 {dimension_numbers = #tpu.dot_dimension_numbers<[1], [0], [0], [1], [0, 0, 1, 1], [], []>} : vector<80x80xbf16>, vector<80x32xbf16>, vector<80x32xf32> -> vector<80x32xf32>
    %c0_i32_34 = arith.constant 0 : i32
    %110 = arith.sitofp %c0_i32_34 : i32 to bf16
    %111 = vector.shape_cast %10 : vector<1x32xi1> to vector<1x32xi1>
    %112 = vector.broadcast %111 : vector<1x32xi1> to vector<80x32xi1>
    %113 = vector.broadcast %110 : bf16 to vector<80x32xbf16>
    %114 = arith.select %112, %84, %113 : vector<80x32xi1>, vector<80x32xbf16>
    %cst_35 = arith.constant dense<0.000000e+00> : vector<80x80xf32>
    %115 = tpu.matmul %114, %85, %cst_35 {dimension_numbers = #tpu.dot_dimension_numbers<[1], [1], [0], [0], [0, 0, 1, 0], [], []>} : vector<80x32xbf16>, vector<80x32xbf16>, vector<80x80xf32> -> vector<80x80xf32>
    %cst_36 = arith.constant dense<0xFF800000> : vector<80xf32>
    %116 = vector.multi_reduction <maximumf>, %115, %cst_36 [1] : vector<80x80xf32> to vector<80xf32>
    %117 = vector.shape_cast %116 : vector<80xf32> to vector<80x1xf32>
    %118 = vector.broadcast %117 : vector<80x1xf32> to vector<80x80xf32>
    %119 = arith.subf %115, %118 : vector<80x80xf32>
    %120 = math.exp %119 : vector<80x80xf32>
    %cst_37 = arith.constant dense<0.000000e+00> : vector<80xf32>
    %121 = vector.multi_reduction <add>, %120, %cst_37 [1] : vector<80x80xf32> to vector<80xf32>
    %122 = vector.shape_cast %121 : vector<80xf32> to vector<80x1xf32>
    %123 = tpu.reciprocal %122 {approx = true} : vector<80x1xf32> -> vector<80x1xf32>
    %124 = vector.broadcast %123 : vector<80x1xf32> to vector<80x80xf32>
    %125 = arith.mulf %120, %124 : vector<80x80xf32>
    %c0_i32_38 = arith.constant 0 : i32
    %126 = arith.sitofp %c0_i32_38 : i32 to bf16
    %127 = vector.shape_cast %10 : vector<1x32xi1> to vector<1x32xi1>
    %128 = vector.broadcast %127 : vector<1x32xi1> to vector<80x32xi1>
    %129 = vector.broadcast %126 : bf16 to vector<80x32xbf16>
    %130 = arith.select %128, %86, %129 : vector<80x32xi1>, vector<80x32xbf16>
    %131 = arith.truncf %125 : vector<80x80xf32> to vector<80x80xbf16>
    %cst_39 = arith.constant dense<0.000000e+00> : vector<80x32xf32>
    %132 = tpu.matmul %131, %130, %cst_39 {dimension_numbers = #tpu.dot_dimension_numbers<[1], [0], [0], [1], [0, 0, 1, 1], [], []>} : vector<80x80xbf16>, vector<80x32xbf16>, vector<80x32xf32> -> vector<80x32xf32>
    %133 = arith.addf %109, %132 : vector<80x32xf32>
    %134 = vector.extract_strided_slice %71 {offsets = [80, 0], sizes = [80, 32], strides = [1, 1]} : vector<160x32xbf16> to vector<80x32xbf16>
    %135 = vector.extract_strided_slice %77 {offsets = [80, 0], sizes = [80, 32], strides = [1, 1]} : vector<160x32xbf16> to vector<80x32xbf16>
    %136 = vector.extract_strided_slice %83 {offsets = [80, 0], sizes = [80, 32], strides = [1, 1]} : vector<160x32xbf16> to vector<80x32xbf16>
    %c0_i32_40 = arith.constant 0 : i32
    %137 = arith.sitofp %c0_i32_40 : i32 to bf16
    %138 = vector.shape_cast %5 : vector<1x32xi1> to vector<1x32xi1>
    %139 = vector.broadcast %138 : vector<1x32xi1> to vector<80x32xi1>
    %140 = vector.broadcast %137 : bf16 to vector<80x32xbf16>
    %141 = arith.select %139, %134, %140 : vector<80x32xi1>, vector<80x32xbf16>
    %cst_41 = arith.constant dense<0.000000e+00> : vector<80x80xf32>
    %142 = tpu.matmul %141, %135, %cst_41 {dimension_numbers = #tpu.dot_dimension_numbers<[1], [1], [0], [0], [0, 0, 1, 0], [], []>} : vector<80x32xbf16>, vector<80x32xbf16>, vector<80x80xf32> -> vector<80x80xf32>
    %cst_42 = arith.constant dense<0xFF800000> : vector<80xf32>
    %143 = vector.multi_reduction <maximumf>, %142, %cst_42 [1] : vector<80x80xf32> to vector<80xf32>
    %144 = vector.shape_cast %143 : vector<80xf32> to vector<80x1xf32>
    %145 = vector.broadcast %144 : vector<80x1xf32> to vector<80x80xf32>
    %146 = arith.subf %142, %145 : vector<80x80xf32>
    %147 = math.exp %146 : vector<80x80xf32>
    %cst_43 = arith.constant dense<0.000000e+00> : vector<80xf32>
    %148 = vector.multi_reduction <add>, %147, %cst_43 [1] : vector<80x80xf32> to vector<80xf32>
    %149 = vector.shape_cast %148 : vector<80xf32> to vector<80x1xf32>
    %150 = tpu.reciprocal %149 {approx = true} : vector<80x1xf32> -> vector<80x1xf32>
    %151 = vector.broadcast %150 : vector<80x1xf32> to vector<80x80xf32>
    %152 = arith.mulf %147, %151 : vector<80x80xf32>
    %c0_i32_44 = arith.constant 0 : i32
    %153 = arith.sitofp %c0_i32_44 : i32 to bf16
    %154 = vector.shape_cast %5 : vector<1x32xi1> to vector<1x32xi1>
    %155 = vector.broadcast %154 : vector<1x32xi1> to vector<80x32xi1>
    %156 = vector.broadcast %153 : bf16 to vector<80x32xbf16>
    %157 = arith.select %155, %136, %156 : vector<80x32xi1>, vector<80x32xbf16>
    %158 = arith.truncf %152 : vector<80x80xf32> to vector<80x80xbf16>
    %cst_45 = arith.constant dense<0.000000e+00> : vector<80x32xf32>
    %159 = tpu.matmul %158, %157, %cst_45 {dimension_numbers = #tpu.dot_dimension_numbers<[1], [0], [0], [1], [0, 0, 1, 1], [], []>} : vector<80x80xbf16>, vector<80x32xbf16>, vector<80x32xf32> -> vector<80x32xf32>
    %c0_i32_46 = arith.constant 0 : i32
    %160 = arith.sitofp %c0_i32_46 : i32 to bf16
    %161 = vector.shape_cast %10 : vector<1x32xi1> to vector<1x32xi1>
    %162 = vector.broadcast %161 : vector<1x32xi1> to vector<80x32xi1>
    %163 = vector.broadcast %160 : bf16 to vector<80x32xbf16>
    %164 = arith.select %162, %134, %163 : vector<80x32xi1>, vector<80x32xbf16>
    %cst_47 = arith.constant dense<0.000000e+00> : vector<80x80xf32>
    %165 = tpu.matmul %164, %135, %cst_47 {dimension_numbers = #tpu.dot_dimension_numbers<[1], [1], [0], [0], [0, 0, 1, 0], [], []>} : vector<80x32xbf16>, vector<80x32xbf16>, vector<80x80xf32> -> vector<80x80xf32>
    %cst_48 = arith.constant dense<0xFF800000> : vector<80xf32>
    %166 = vector.multi_reduction <maximumf>, %165, %cst_48 [1] : vector<80x80xf32> to vector<80xf32>
    %167 = vector.shape_cast %166 : vector<80xf32> to vector<80x1xf32>
    %168 = vector.broadcast %167 : vector<80x1xf32> to vector<80x80xf32>
    %169 = arith.subf %165, %168 : vector<80x80xf32>
    %170 = math.exp %169 : vector<80x80xf32>
    %cst_49 = arith.constant dense<0.000000e+00> : vector<80xf32>
    %171 = vector.multi_reduction <add>, %170, %cst_49 [1] : vector<80x80xf32> to vector<80xf32>
    %172 = vector.shape_cast %171 : vector<80xf32> to vector<80x1xf32>
    %173 = tpu.reciprocal %172 {approx = true} : vector<80x1xf32> -> vector<80x1xf32>
    %174 = vector.broadcast %173 : vector<80x1xf32> to vector<80x80xf32>
    %175 = arith.mulf %170, %174 : vector<80x80xf32>
    %c0_i32_50 = arith.constant 0 : i32
    %176 = arith.sitofp %c0_i32_50 : i32 to bf16
    %177 = vector.shape_cast %10 : vector<1x32xi1> to vector<1x32xi1>
    %178 = vector.broadcast %177 : vector<1x32xi1> to vector<80x32xi1>
    %179 = vector.broadcast %176 : bf16 to vector<80x32xbf16>
    %180 = arith.select %178, %136, %179 : vector<80x32xi1>, vector<80x32xbf16>
    %181 = arith.truncf %175 : vector<80x80xf32> to vector<80x80xbf16>
    %cst_51 = arith.constant dense<0.000000e+00> : vector<80x32xf32>
    %182 = tpu.matmul %181, %180, %cst_51 {dimension_numbers = #tpu.dot_dimension_numbers<[1], [0], [0], [1], [0, 0, 1, 1], [], []>} : vector<80x80xbf16>, vector<80x32xbf16>, vector<80x32xf32> -> vector<80x32xf32>
    %183 = arith.addf %159, %182 : vector<80x32xf32>
    %184 = tpu.concatenate %133, %183 in 0 : vector<80x32xf32>, vector<80x32xf32> -> vector<160x32xf32>
    %185 = arith.truncf %184 : vector<160x32xf32> to vector<160x32xbf16>
    %c96 = arith.constant 96 : index
    %c0_52 = arith.constant 0 : index
    %186 = vector.load %arg3[%c96, %c0_52] : memref<688x128xbf16, #tpu.memory_space<vmem>>, vector<32x32xbf16>
    %cst_53 = arith.constant dense<0.000000e+00> : vector<160x32xf32>
    %187 = tpu.matmul %185, %186, %cst_53 {dimension_numbers = #tpu.dot_dimension_numbers<[1], [0], [0], [1], [0, 0, 1, 1], [], []>} : vector<160x32xbf16>, vector<32x32xbf16>, vector<160x32xf32> -> vector<160x32xf32>
    %c93 = arith.constant 93 : index
    %c0_54 = arith.constant 0 : index
    %188 = vector.load %arg4[%c93, %c0_54] : memref<112x128xf32, #tpu.memory_space<vmem>>, vector<1x32xf32>
    %189 = vector.broadcast %188 : vector<1x32xf32> to vector<160x32xf32>
    %190 = arith.addf %187, %189 : vector<160x32xf32>
    %c94 = arith.constant 94 : index
    %c0_55 = arith.constant 0 : index
    %191 = vector.load %arg4[%c94, %c0_55] : memref<112x128xf32, #tpu.memory_space<vmem>>, vector<1x32xf32>
    %192 = vector.broadcast %191 : vector<1x32xf32> to vector<160x32xf32>
    %193 = arith.mulf %192, %190 : vector<160x32xf32>
    %194 = arith.addf %42, %193 : vector<160x32xf32>
    %c95 = arith.constant 95 : index
    %c0_56 = arith.constant 0 : index
    %195 = vector.load %arg4[%c95, %c0_56] : memref<112x128xf32, #tpu.memory_space<vmem>>, vector<1x32xf32>
    %c96_57 = arith.constant 96 : index
    %c0_58 = arith.constant 0 : index
    %196 = vector.load %arg4[%c96_57, %c0_58] : memref<112x128xf32, #tpu.memory_space<vmem>>, vector<1x32xf32>
    %cst_59 = arith.constant dense<0.000000e+00> : vector<160xf32>
    %197 = vector.multi_reduction <add>, %194, %cst_59 [1] : vector<160x32xf32> to vector<160xf32>
    %198 = vector.shape_cast %197 : vector<160xf32> to vector<160x1xf32>
    %cst_60 = arith.constant 3.200000e+01 : f32
    %199 = vector.broadcast %cst_60 : f32 to vector<160x1xf32>
    %200 = arith.divf %198, %199 : vector<160x1xf32>
    %201 = vector.broadcast %200 : vector<160x1xf32> to vector<160x32xf32>
    %202 = arith.subf %194, %201 : vector<160x32xf32>
    %203 = arith.mulf %202, %202 : vector<160x32xf32>
    %cst_61 = arith.constant dense<0.000000e+00> : vector<160xf32>
    %204 = vector.multi_reduction <add>, %203, %cst_61 [1] : vector<160x32xf32> to vector<160xf32>
    %205 = vector.shape_cast %204 : vector<160xf32> to vector<160x1xf32>
    %cst_62 = arith.constant 3.200000e+01 : f32
    %206 = vector.broadcast %cst_62 : f32 to vector<160x1xf32>
    %207 = arith.divf %205, %206 : vector<160x1xf32>
    %cst_63 = arith.constant 9.99999997E-7 : f32
    %208 = vector.broadcast %cst_63 : f32 to vector<160x1xf32>
    %209 = arith.addf %207, %208 : vector<160x1xf32>
    %210 = math.rsqrt %209 : vector<160x1xf32>
    %211 = vector.broadcast %210 : vector<160x1xf32> to vector<160x32xf32>
    %212 = arith.mulf %202, %211 : vector<160x32xf32>
    %213 = vector.broadcast %195 : vector<1x32xf32> to vector<160x32xf32>
    %214 = arith.mulf %212, %213 : vector<160x32xf32>
    %215 = vector.broadcast %196 : vector<1x32xf32> to vector<160x32xf32>
    %216 = arith.addf %214, %215 : vector<160x32xf32>
    %217 = arith.truncf %216 : vector<160x32xf32> to vector<160x32xbf16>
    %c128 = arith.constant 128 : index
    %c0_64 = arith.constant 0 : index
    %218 = vector.load %arg3[%c128, %c0_64] : memref<688x128xbf16, #tpu.memory_space<vmem>>, vector<32x128xbf16>
    %cst_65 = arith.constant dense<0.000000e+00> : vector<160x128xf32>
    %219 = tpu.matmul %217, %218, %cst_65 {dimension_numbers = #tpu.dot_dimension_numbers<[1], [0], [0], [1], [0, 0, 1, 1], [], []>} : vector<160x32xbf16>, vector<32x128xbf16>, vector<160x128xf32> -> vector<160x128xf32>
    %c97 = arith.constant 97 : index
    %c0_66 = arith.constant 0 : index
    %220 = vector.load %arg4[%c97, %c0_66] : memref<112x128xf32, #tpu.memory_space<vmem>>, vector<1x128xf32>
    %221 = vector.broadcast %220 : vector<1x128xf32> to vector<160x128xf32>
    %222 = arith.addf %219, %221 : vector<160x128xf32>
    %223 = arith.mulf %222, %222 : vector<160x128xf32>
    %224 = arith.mulf %222, %223 : vector<160x128xf32>
    %cst_67 = arith.constant 4.471500e-02 : f32
    %225 = vector.broadcast %cst_67 : f32 to vector<160x128xf32>
    %226 = arith.mulf %225, %224 : vector<160x128xf32>
    %227 = arith.addf %222, %226 : vector<160x128xf32>
    %cst_68 = arith.constant 0.797884583 : f32
    %228 = vector.broadcast %cst_68 : f32 to vector<160x128xf32>
    %229 = arith.mulf %228, %227 : vector<160x128xf32>
    %230 = math.tanh %229 : vector<160x128xf32>
    %cst_69 = arith.constant 1.000000e+00 : f32
    %231 = vector.broadcast %cst_69 : f32 to vector<160x128xf32>
    %232 = arith.addf %231, %230 : vector<160x128xf32>
    %cst_70 = arith.constant 5.000000e-01 : f32
    %233 = vector.broadcast %cst_70 : f32 to vector<160x128xf32>
    %234 = arith.mulf %233, %232 : vector<160x128xf32>
    %235 = arith.mulf %222, %234 : vector<160x128xf32>
    %236 = arith.truncf %235 : vector<160x128xf32> to vector<160x128xbf16>
    %c160 = arith.constant 160 : index
    %c0_71 = arith.constant 0 : index
    %237 = vector.load %arg3[%c160, %c0_71] : memref<688x128xbf16, #tpu.memory_space<vmem>>, vector<128x32xbf16>
    %cst_72 = arith.constant dense<0.000000e+00> : vector<160x32xf32>
    %238 = tpu.matmul %236, %237, %cst_72 {dimension_numbers = #tpu.dot_dimension_numbers<[1], [0], [0], [1], [0, 0, 1, 1], [], []>} : vector<160x128xbf16>, vector<128x32xbf16>, vector<160x32xf32> -> vector<160x32xf32>
    %c98 = arith.constant 98 : index
    %c0_73 = arith.constant 0 : index
    %239 = vector.load %arg4[%c98, %c0_73] : memref<112x128xf32, #tpu.memory_space<vmem>>, vector<1x32xf32>
    %240 = vector.broadcast %239 : vector<1x32xf32> to vector<160x32xf32>
    %241 = arith.addf %238, %240 : vector<160x32xf32>
    %c99 = arith.constant 99 : index
    %c0_74 = arith.constant 0 : index
    %242 = vector.load %arg4[%c99, %c0_74] : memref<112x128xf32, #tpu.memory_space<vmem>>, vector<1x32xf32>
    %243 = vector.broadcast %242 : vector<1x32xf32> to vector<160x32xf32>
    %244 = arith.mulf %243, %241 : vector<160x32xf32>
    %245 = arith.addf %194, %244 : vector<160x32xf32>
    %c100 = arith.constant 100 : index
    %c0_75 = arith.constant 0 : index
    %246 = vector.load %arg4[%c100, %c0_75] : memref<112x128xf32, #tpu.memory_space<vmem>>, vector<1x32xf32>
    %c101 = arith.constant 101 : index
    %c0_76 = arith.constant 0 : index
    %247 = vector.load %arg4[%c101, %c0_76] : memref<112x128xf32, #tpu.memory_space<vmem>>, vector<1x32xf32>
    %cst_77 = arith.constant dense<0.000000e+00> : vector<160xf32>
    %248 = vector.multi_reduction <add>, %245, %cst_77 [1] : vector<160x32xf32> to vector<160xf32>
    %249 = vector.shape_cast %248 : vector<160xf32> to vector<160x1xf32>
    %cst_78 = arith.constant 3.200000e+01 : f32
    %250 = vector.broadcast %cst_78 : f32 to vector<160x1xf32>
    %251 = arith.divf %249, %250 : vector<160x1xf32>
    %252 = vector.broadcast %251 : vector<160x1xf32> to vector<160x32xf32>
    %253 = arith.subf %245, %252 : vector<160x32xf32>
    %254 = arith.mulf %253, %253 : vector<160x32xf32>
    %cst_79 = arith.constant dense<0.000000e+00> : vector<160xf32>
    %255 = vector.multi_reduction <add>, %254, %cst_79 [1] : vector<160x32xf32> to vector<160xf32>
    %256 = vector.shape_cast %255 : vector<160xf32> to vector<160x1xf32>
    %cst_80 = arith.constant 3.200000e+01 : f32
    %257 = vector.broadcast %cst_80 : f32 to vector<160x1xf32>
    %258 = arith.divf %256, %257 : vector<160x1xf32>
    %cst_81 = arith.constant 9.99999997E-7 : f32
    %259 = vector.broadcast %cst_81 : f32 to vector<160x1xf32>
    %260 = arith.addf %258, %259 : vector<160x1xf32>
    %261 = math.rsqrt %260 : vector<160x1xf32>
    %262 = vector.broadcast %261 : vector<160x1xf32> to vector<160x32xf32>
    %263 = arith.mulf %253, %262 : vector<160x32xf32>
    %264 = vector.broadcast %246 : vector<1x32xf32> to vector<160x32xf32>
    %265 = arith.mulf %263, %264 : vector<160x32xf32>
    %266 = vector.broadcast %247 : vector<1x32xf32> to vector<160x32xf32>
    %267 = arith.addf %265, %266 : vector<160x32xf32>
    %268 = arith.truncf %267 : vector<160x32xf32> to vector<160x32xbf16>
    %c288 = arith.constant 288 : index
    %c0_82 = arith.constant 0 : index
    %269 = vector.load %arg3[%c288, %c0_82] : memref<688x128xbf16, #tpu.memory_space<vmem>>, vector<32x32xbf16>
    %cst_83 = arith.constant dense<0.000000e+00> : vector<160x32xf32>
    %270 = tpu.matmul %268, %269, %cst_83 {dimension_numbers = #tpu.dot_dimension_numbers<[1], [0], [0], [1], [0, 0, 1, 1], [], []>} : vector<160x32xbf16>, vector<32x32xbf16>, vector<160x32xf32> -> vector<160x32xf32>
    %c102 = arith.constant 102 : index
    %c0_84 = arith.constant 0 : index
    %271 = vector.load %arg4[%c102, %c0_84] : memref<112x128xf32, #tpu.memory_space<vmem>>, vector<1x32xf32>
    %272 = vector.broadcast %271 : vector<1x32xf32> to vector<160x32xf32>
    %273 = arith.addf %270, %272 : vector<160x32xf32>
    %274 = arith.truncf %273 : vector<160x32xf32> to vector<160x32xbf16>
    %c320 = arith.constant 320 : index
    %c0_85 = arith.constant 0 : index
    %275 = vector.load %arg3[%c320, %c0_85] : memref<688x128xbf16, #tpu.memory_space<vmem>>, vector<32x32xbf16>
    %cst_86 = arith.constant dense<0.000000e+00> : vector<160x32xf32>
    %276 = tpu.matmul %268, %275, %cst_86 {dimension_numbers = #tpu.dot_dimension_numbers<[1], [0], [0], [1], [0, 0, 1, 1], [], []>} : vector<160x32xbf16>, vector<32x32xbf16>, vector<160x32xf32> -> vector<160x32xf32>
    %c103 = arith.constant 103 : index
    %c0_87 = arith.constant 0 : index
    %277 = vector.load %arg4[%c103, %c0_87] : memref<112x128xf32, #tpu.memory_space<vmem>>, vector<1x32xf32>
    %278 = vector.broadcast %277 : vector<1x32xf32> to vector<160x32xf32>
    %279 = arith.addf %276, %278 : vector<160x32xf32>
    %280 = arith.truncf %279 : vector<160x32xf32> to vector<160x32xbf16>
    %c352 = arith.constant 352 : index
    %c0_88 = arith.constant 0 : index
    %281 = vector.load %arg3[%c352, %c0_88] : memref<688x128xbf16, #tpu.memory_space<vmem>>, vector<32x32xbf16>
    %cst_89 = arith.constant dense<0.000000e+00> : vector<160x32xf32>
    %282 = tpu.matmul %268, %281, %cst_89 {dimension_numbers = #tpu.dot_dimension_numbers<[1], [0], [0], [1], [0, 0, 1, 1], [], []>} : vector<160x32xbf16>, vector<32x32xbf16>, vector<160x32xf32> -> vector<160x32xf32>
    %c104 = arith.constant 104 : index
    %c0_90 = arith.constant 0 : index
    %283 = vector.load %arg4[%c104, %c0_90] : memref<112x128xf32, #tpu.memory_space<vmem>>, vector<1x32xf32>
    %284 = vector.broadcast %283 : vector<1x32xf32> to vector<160x32xf32>
    %285 = arith.addf %282, %284 : vector<160x32xf32>
    %286 = arith.truncf %285 : vector<160x32xf32> to vector<160x32xbf16>
    %287 = vector.extract_strided_slice %274 {offsets = [0, 0], sizes = [80, 32], strides = [1, 1]} : vector<160x32xbf16> to vector<80x32xbf16>
    %288 = vector.extract_strided_slice %280 {offsets = [0, 0], sizes = [80, 32], strides = [1, 1]} : vector<160x32xbf16> to vector<80x32xbf16>
    %289 = vector.extract_strided_slice %286 {offsets = [0, 0], sizes = [80, 32], strides = [1, 1]} : vector<160x32xbf16> to vector<80x32xbf16>
    %c0_i32_91 = arith.constant 0 : i32
    %290 = arith.sitofp %c0_i32_91 : i32 to bf16
    %291 = vector.shape_cast %5 : vector<1x32xi1> to vector<1x32xi1>
    %292 = vector.broadcast %291 : vector<1x32xi1> to vector<80x32xi1>
    %293 = vector.broadcast %290 : bf16 to vector<80x32xbf16>
    %294 = arith.select %292, %287, %293 : vector<80x32xi1>, vector<80x32xbf16>
    %cst_92 = arith.constant dense<0.000000e+00> : vector<80x80xf32>
    %295 = tpu.matmul %294, %288, %cst_92 {dimension_numbers = #tpu.dot_dimension_numbers<[1], [1], [0], [0], [0, 0, 1, 0], [], []>} : vector<80x32xbf16>, vector<80x32xbf16>, vector<80x80xf32> -> vector<80x80xf32>
    %cst_93 = arith.constant dense<0xFF800000> : vector<80xf32>
    %296 = vector.multi_reduction <maximumf>, %295, %cst_93 [1] : vector<80x80xf32> to vector<80xf32>
    %297 = vector.shape_cast %296 : vector<80xf32> to vector<80x1xf32>
    %298 = vector.broadcast %297 : vector<80x1xf32> to vector<80x80xf32>
    %299 = arith.subf %295, %298 : vector<80x80xf32>
    %300 = math.exp %299 : vector<80x80xf32>
    %cst_94 = arith.constant dense<0.000000e+00> : vector<80xf32>
    %301 = vector.multi_reduction <add>, %300, %cst_94 [1] : vector<80x80xf32> to vector<80xf32>
    %302 = vector.shape_cast %301 : vector<80xf32> to vector<80x1xf32>
    %303 = tpu.reciprocal %302 {approx = true} : vector<80x1xf32> -> vector<80x1xf32>
    %304 = vector.broadcast %303 : vector<80x1xf32> to vector<80x80xf32>
    %305 = arith.mulf %300, %304 : vector<80x80xf32>
    %c0_i32_95 = arith.constant 0 : i32
    %306 = arith.sitofp %c0_i32_95 : i32 to bf16
    %307 = vector.shape_cast %5 : vector<1x32xi1> to vector<1x32xi1>
    %308 = vector.broadcast %307 : vector<1x32xi1> to vector<80x32xi1>
    %309 = vector.broadcast %306 : bf16 to vector<80x32xbf16>
    %310 = arith.select %308, %289, %309 : vector<80x32xi1>, vector<80x32xbf16>
    %311 = arith.truncf %305 : vector<80x80xf32> to vector<80x80xbf16>
    %cst_96 = arith.constant dense<0.000000e+00> : vector<80x32xf32>
    %312 = tpu.matmul %311, %310, %cst_96 {dimension_numbers = #tpu.dot_dimension_numbers<[1], [0], [0], [1], [0, 0, 1, 1], [], []>} : vector<80x80xbf16>, vector<80x32xbf16>, vector<80x32xf32> -> vector<80x32xf32>
    %c0_i32_97 = arith.constant 0 : i32
    %313 = arith.sitofp %c0_i32_97 : i32 to bf16
    %314 = vector.shape_cast %10 : vector<1x32xi1> to vector<1x32xi1>
    %315 = vector.broadcast %314 : vector<1x32xi1> to vector<80x32xi1>
    %316 = vector.broadcast %313 : bf16 to vector<80x32xbf16>
    %317 = arith.select %315, %287, %316 : vector<80x32xi1>, vector<80x32xbf16>
    %cst_98 = arith.constant dense<0.000000e+00> : vector<80x80xf32>
    %318 = tpu.matmul %317, %288, %cst_98 {dimension_numbers = #tpu.dot_dimension_numbers<[1], [1], [0], [0], [0, 0, 1, 0], [], []>} : vector<80x32xbf16>, vector<80x32xbf16>, vector<80x80xf32> -> vector<80x80xf32>
    %cst_99 = arith.constant dense<0xFF800000> : vector<80xf32>
    %319 = vector.multi_reduction <maximumf>, %318, %cst_99 [1] : vector<80x80xf32> to vector<80xf32>
    %320 = vector.shape_cast %319 : vector<80xf32> to vector<80x1xf32>
    %321 = vector.broadcast %320 : vector<80x1xf32> to vector<80x80xf32>
    %322 = arith.subf %318, %321 : vector<80x80xf32>
    %323 = math.exp %322 : vector<80x80xf32>
    %cst_100 = arith.constant dense<0.000000e+00> : vector<80xf32>
    %324 = vector.multi_reduction <add>, %323, %cst_100 [1] : vector<80x80xf32> to vector<80xf32>
    %325 = vector.shape_cast %324 : vector<80xf32> to vector<80x1xf32>
    %326 = tpu.reciprocal %325 {approx = true} : vector<80x1xf32> -> vector<80x1xf32>
    %327 = vector.broadcast %326 : vector<80x1xf32> to vector<80x80xf32>
    %328 = arith.mulf %323, %327 : vector<80x80xf32>
    %c0_i32_101 = arith.constant 0 : i32
    %329 = arith.sitofp %c0_i32_101 : i32 to bf16
    %330 = vector.shape_cast %10 : vector<1x32xi1> to vector<1x32xi1>
    %331 = vector.broadcast %330 : vector<1x32xi1> to vector<80x32xi1>
    %332 = vector.broadcast %329 : bf16 to vector<80x32xbf16>
    %333 = arith.select %331, %289, %332 : vector<80x32xi1>, vector<80x32xbf16>
    %334 = arith.truncf %328 : vector<80x80xf32> to vector<80x80xbf16>
    %cst_102 = arith.constant dense<0.000000e+00> : vector<80x32xf32>
    %335 = tpu.matmul %334, %333, %cst_102 {dimension_numbers = #tpu.dot_dimension_numbers<[1], [0], [0], [1], [0, 0, 1, 1], [], []>} : vector<80x80xbf16>, vector<80x32xbf16>, vector<80x32xf32> -> vector<80x32xf32>
    %336 = arith.addf %312, %335 : vector<80x32xf32>
    %337 = vector.extract_strided_slice %274 {offsets = [80, 0], sizes = [80, 32], strides = [1, 1]} : vector<160x32xbf16> to vector<80x32xbf16>
    %338 = vector.extract_strided_slice %280 {offsets = [80, 0], sizes = [80, 32], strides = [1, 1]} : vector<160x32xbf16> to vector<80x32xbf16>
    %339 = vector.extract_strided_slice %286 {offsets = [80, 0], sizes = [80, 32], strides = [1, 1]} : vector<160x32xbf16> to vector<80x32xbf16>
    %c0_i32_103 = arith.constant 0 : i32
    %340 = arith.sitofp %c0_i32_103 : i32 to bf16
    %341 = vector.shape_cast %5 : vector<1x32xi1> to vector<1x32xi1>
    %342 = vector.broadcast %341 : vector<1x32xi1> to vector<80x32xi1>
    %343 = vector.broadcast %340 : bf16 to vector<80x32xbf16>
    %344 = arith.select %342, %337, %343 : vector<80x32xi1>, vector<80x32xbf16>
    %cst_104 = arith.constant dense<0.000000e+00> : vector<80x80xf32>
    %345 = tpu.matmul %344, %338, %cst_104 {dimension_numbers = #tpu.dot_dimension_numbers<[1], [1], [0], [0], [0, 0, 1, 0], [], []>} : vector<80x32xbf16>, vector<80x32xbf16>, vector<80x80xf32> -> vector<80x80xf32>
    %cst_105 = arith.constant dense<0xFF800000> : vector<80xf32>
    %346 = vector.multi_reduction <maximumf>, %345, %cst_105 [1] : vector<80x80xf32> to vector<80xf32>
    %347 = vector.shape_cast %346 : vector<80xf32> to vector<80x1xf32>
    %348 = vector.broadcast %347 : vector<80x1xf32> to vector<80x80xf32>
    %349 = arith.subf %345, %348 : vector<80x80xf32>
    %350 = math.exp %349 : vector<80x80xf32>
    %cst_106 = arith.constant dense<0.000000e+00> : vector<80xf32>
    %351 = vector.multi_reduction <add>, %350, %cst_106 [1] : vector<80x80xf32> to vector<80xf32>
    %352 = vector.shape_cast %351 : vector<80xf32> to vector<80x1xf32>
    %353 = tpu.reciprocal %352 {approx = true} : vector<80x1xf32> -> vector<80x1xf32>
    %354 = vector.broadcast %353 : vector<80x1xf32> to vector<80x80xf32>
    %355 = arith.mulf %350, %354 : vector<80x80xf32>
    %c0_i32_107 = arith.constant 0 : i32
    %356 = arith.sitofp %c0_i32_107 : i32 to bf16
    %357 = vector.shape_cast %5 : vector<1x32xi1> to vector<1x32xi1>
    %358 = vector.broadcast %357 : vector<1x32xi1> to vector<80x32xi1>
    %359 = vector.broadcast %356 : bf16 to vector<80x32xbf16>
    %360 = arith.select %358, %339, %359 : vector<80x32xi1>, vector<80x32xbf16>
    %361 = arith.truncf %355 : vector<80x80xf32> to vector<80x80xbf16>
    %cst_108 = arith.constant dense<0.000000e+00> : vector<80x32xf32>
    %362 = tpu.matmul %361, %360, %cst_108 {dimension_numbers = #tpu.dot_dimension_numbers<[1], [0], [0], [1], [0, 0, 1, 1], [], []>} : vector<80x80xbf16>, vector<80x32xbf16>, vector<80x32xf32> -> vector<80x32xf32>
    %c0_i32_109 = arith.constant 0 : i32
    %363 = arith.sitofp %c0_i32_109 : i32 to bf16
    %364 = vector.shape_cast %10 : vector<1x32xi1> to vector<1x32xi1>
    %365 = vector.broadcast %364 : vector<1x32xi1> to vector<80x32xi1>
    %366 = vector.broadcast %363 : bf16 to vector<80x32xbf16>
    %367 = arith.select %365, %337, %366 : vector<80x32xi1>, vector<80x32xbf16>
    %cst_110 = arith.constant dense<0.000000e+00> : vector<80x80xf32>
    %368 = tpu.matmul %367, %338, %cst_110 {dimension_numbers = #tpu.dot_dimension_numbers<[1], [1], [0], [0], [0, 0, 1, 0], [], []>} : vector<80x32xbf16>, vector<80x32xbf16>, vector<80x80xf32> -> vector<80x80xf32>
    %cst_111 = arith.constant dense<0xFF800000> : vector<80xf32>
    %369 = vector.multi_reduction <maximumf>, %368, %cst_111 [1] : vector<80x80xf32> to vector<80xf32>
    %370 = vector.shape_cast %369 : vector<80xf32> to vector<80x1xf32>
    %371 = vector.broadcast %370 : vector<80x1xf32> to vector<80x80xf32>
    %372 = arith.subf %368, %371 : vector<80x80xf32>
    %373 = math.exp %372 : vector<80x80xf32>
    %cst_112 = arith.constant dense<0.000000e+00> : vector<80xf32>
    %374 = vector.multi_reduction <add>, %373, %cst_112 [1] : vector<80x80xf32> to vector<80xf32>
    %375 = vector.shape_cast %374 : vector<80xf32> to vector<80x1xf32>
    %376 = tpu.reciprocal %375 {approx = true} : vector<80x1xf32> -> vector<80x1xf32>
    %377 = vector.broadcast %376 : vector<80x1xf32> to vector<80x80xf32>
    %378 = arith.mulf %373, %377 : vector<80x80xf32>
    %c0_i32_113 = arith.constant 0 : i32
    %379 = arith.sitofp %c0_i32_113 : i32 to bf16
    %380 = vector.shape_cast %10 : vector<1x32xi1> to vector<1x32xi1>
    %381 = vector.broadcast %380 : vector<1x32xi1> to vector<80x32xi1>
    %382 = vector.broadcast %379 : bf16 to vector<80x32xbf16>
    %383 = arith.select %381, %339, %382 : vector<80x32xi1>, vector<80x32xbf16>
    %384 = arith.truncf %378 : vector<80x80xf32> to vector<80x80xbf16>
    %cst_114 = arith.constant dense<0.000000e+00> : vector<80x32xf32>
    %385 = tpu.matmul %384, %383, %cst_114 {dimension_numbers = #tpu.dot_dimension_numbers<[1], [0], [0], [1], [0, 0, 1, 1], [], []>} : vector<80x80xbf16>, vector<80x32xbf16>, vector<80x32xf32> -> vector<80x32xf32>
    %386 = arith.addf %362, %385 : vector<80x32xf32>
    %387 = tpu.concatenate %336, %386 in 0 : vector<80x32xf32>, vector<80x32xf32> -> vector<160x32xf32>
    %388 = arith.truncf %387 : vector<160x32xf32> to vector<160x32xbf16>
    %c384 = arith.constant 384 : index
    %c0_115 = arith.constant 0 : index
    %389 = vector.load %arg3[%c384, %c0_115] : memref<688x128xbf16, #tpu.memory_space<vmem>>, vector<32x32xbf16>
    %cst_116 = arith.constant dense<0.000000e+00> : vector<160x32xf32>
    %390 = tpu.matmul %388, %389, %cst_116 {dimension_numbers = #tpu.dot_dimension_numbers<[1], [0], [0], [1], [0, 0, 1, 1], [], []>} : vector<160x32xbf16>, vector<32x32xbf16>, vector<160x32xf32> -> vector<160x32xf32>
    %c105 = arith.constant 105 : index
    %c0_117 = arith.constant 0 : index
    %391 = vector.load %arg4[%c105, %c0_117] : memref<112x128xf32, #tpu.memory_space<vmem>>, vector<1x32xf32>
    %392 = vector.broadcast %391 : vector<1x32xf32> to vector<160x32xf32>
    %393 = arith.addf %390, %392 : vector<160x32xf32>
    %c106 = arith.constant 106 : index
    %c0_118 = arith.constant 0 : index
    %394 = vector.load %arg4[%c106, %c0_118] : memref<112x128xf32, #tpu.memory_space<vmem>>, vector<1x32xf32>
    %395 = vector.broadcast %394 : vector<1x32xf32> to vector<160x32xf32>
    %396 = arith.mulf %395, %393 : vector<160x32xf32>
    %397 = arith.addf %245, %396 : vector<160x32xf32>
    %c107 = arith.constant 107 : index
    %c0_119 = arith.constant 0 : index
    %398 = vector.load %arg4[%c107, %c0_119] : memref<112x128xf32, #tpu.memory_space<vmem>>, vector<1x32xf32>
    %c108 = arith.constant 108 : index
    %c0_120 = arith.constant 0 : index
    %399 = vector.load %arg4[%c108, %c0_120] : memref<112x128xf32, #tpu.memory_space<vmem>>, vector<1x32xf32>
    %cst_121 = arith.constant dense<0.000000e+00> : vector<160xf32>
    %400 = vector.multi_reduction <add>, %397, %cst_121 [1] : vector<160x32xf32> to vector<160xf32>
    %401 = vector.shape_cast %400 : vector<160xf32> to vector<160x1xf32>
    %cst_122 = arith.constant 3.200000e+01 : f32
    %402 = vector.broadcast %cst_122 : f32 to vector<160x1xf32>
    %403 = arith.divf %401, %402 : vector<160x1xf32>
    %404 = vector.broadcast %403 : vector<160x1xf32> to vector<160x32xf32>
    %405 = arith.subf %397, %404 : vector<160x32xf32>
    %406 = arith.mulf %405, %405 : vector<160x32xf32>
    %cst_123 = arith.constant dense<0.000000e+00> : vector<160xf32>
    %407 = vector.multi_reduction <add>, %406, %cst_123 [1] : vector<160x32xf32> to vector<160xf32>
    %408 = vector.shape_cast %407 : vector<160xf32> to vector<160x1xf32>
    %cst_124 = arith.constant 3.200000e+01 : f32
    %409 = vector.broadcast %cst_124 : f32 to vector<160x1xf32>
    %410 = arith.divf %408, %409 : vector<160x1xf32>
    %cst_125 = arith.constant 9.99999997E-7 : f32
    %411 = vector.broadcast %cst_125 : f32 to vector<160x1xf32>
    %412 = arith.addf %410, %411 : vector<160x1xf32>
    %413 = math.rsqrt %412 : vector<160x1xf32>
    %414 = vector.broadcast %413 : vector<160x1xf32> to vector<160x32xf32>
    %415 = arith.mulf %405, %414 : vector<160x32xf32>
    %416 = vector.broadcast %398 : vector<1x32xf32> to vector<160x32xf32>
    %417 = arith.mulf %415, %416 : vector<160x32xf32>
    %418 = vector.broadcast %399 : vector<1x32xf32> to vector<160x32xf32>
    %419 = arith.addf %417, %418 : vector<160x32xf32>
    %420 = arith.truncf %419 : vector<160x32xf32> to vector<160x32xbf16>
    %c416 = arith.constant 416 : index
    %c0_126 = arith.constant 0 : index
    %421 = vector.load %arg3[%c416, %c0_126] : memref<688x128xbf16, #tpu.memory_space<vmem>>, vector<32x128xbf16>
    %cst_127 = arith.constant dense<0.000000e+00> : vector<160x128xf32>
    %422 = tpu.matmul %420, %421, %cst_127 {dimension_numbers = #tpu.dot_dimension_numbers<[1], [0], [0], [1], [0, 0, 1, 1], [], []>} : vector<160x32xbf16>, vector<32x128xbf16>, vector<160x128xf32> -> vector<160x128xf32>
    %c109 = arith.constant 109 : index
    %c0_128 = arith.constant 0 : index
    %423 = vector.load %arg4[%c109, %c0_128] : memref<112x128xf32, #tpu.memory_space<vmem>>, vector<1x128xf32>
    %424 = vector.broadcast %423 : vector<1x128xf32> to vector<160x128xf32>
    %425 = arith.addf %422, %424 : vector<160x128xf32>
    %426 = arith.mulf %425, %425 : vector<160x128xf32>
    %427 = arith.mulf %425, %426 : vector<160x128xf32>
    %cst_129 = arith.constant 4.471500e-02 : f32
    %428 = vector.broadcast %cst_129 : f32 to vector<160x128xf32>
    %429 = arith.mulf %428, %427 : vector<160x128xf32>
    %430 = arith.addf %425, %429 : vector<160x128xf32>
    %cst_130 = arith.constant 0.797884583 : f32
    %431 = vector.broadcast %cst_130 : f32 to vector<160x128xf32>
    %432 = arith.mulf %431, %430 : vector<160x128xf32>
    %433 = math.tanh %432 : vector<160x128xf32>
    %cst_131 = arith.constant 1.000000e+00 : f32
    %434 = vector.broadcast %cst_131 : f32 to vector<160x128xf32>
    %435 = arith.addf %434, %433 : vector<160x128xf32>
    %cst_132 = arith.constant 5.000000e-01 : f32
    %436 = vector.broadcast %cst_132 : f32 to vector<160x128xf32>
    %437 = arith.mulf %436, %435 : vector<160x128xf32>
    %438 = arith.mulf %425, %437 : vector<160x128xf32>
    %439 = arith.truncf %438 : vector<160x128xf32> to vector<160x128xbf16>
    %c448 = arith.constant 448 : index
    %c0_133 = arith.constant 0 : index
    %440 = vector.load %arg3[%c448, %c0_133] : memref<688x128xbf16, #tpu.memory_space<vmem>>, vector<128x32xbf16>
    %cst_134 = arith.constant dense<0.000000e+00> : vector<160x32xf32>
    %441 = tpu.matmul %439, %440, %cst_134 {dimension_numbers = #tpu.dot_dimension_numbers<[1], [0], [0], [1], [0, 0, 1, 1], [], []>} : vector<160x128xbf16>, vector<128x32xbf16>, vector<160x32xf32> -> vector<160x32xf32>
    %c110 = arith.constant 110 : index
    %c0_135 = arith.constant 0 : index
    %442 = vector.load %arg4[%c110, %c0_135] : memref<112x128xf32, #tpu.memory_space<vmem>>, vector<1x32xf32>
    %443 = vector.broadcast %442 : vector<1x32xf32> to vector<160x32xf32>
    %444 = arith.addf %441, %443 : vector<160x32xf32>
    %c111 = arith.constant 111 : index
    %c0_136 = arith.constant 0 : index
    %445 = vector.load %arg4[%c111, %c0_136] : memref<112x128xf32, #tpu.memory_space<vmem>>, vector<1x32xf32>
    %446 = vector.broadcast %445 : vector<1x32xf32> to vector<160x32xf32>
    %447 = arith.mulf %446, %444 : vector<160x32xf32>
    %448 = arith.addf %397, %447 : vector<160x32xf32>
    %c81 = arith.constant 81 : index
    %c0_137 = arith.constant 0 : index
    %449 = vector.load %arg4[%c81, %c0_137] : memref<112x128xf32, #tpu.memory_space<vmem>>, vector<1x32xf32>
    %c82 = arith.constant 82 : index
    %c0_138 = arith.constant 0 : index
    %450 = vector.load %arg4[%c82, %c0_138] : memref<112x128xf32, #tpu.memory_space<vmem>>, vector<1x32xf32>
    %cst_139 = arith.constant dense<0.000000e+00> : vector<160xf32>
    %451 = vector.multi_reduction <add>, %448, %cst_139 [1] : vector<160x32xf32> to vector<160xf32>
    %452 = vector.shape_cast %451 : vector<160xf32> to vector<160x1xf32>
    %cst_140 = arith.constant 3.200000e+01 : f32
    %453 = vector.broadcast %cst_140 : f32 to vector<160x1xf32>
    %454 = arith.divf %452, %453 : vector<160x1xf32>
    %455 = vector.broadcast %454 : vector<160x1xf32> to vector<160x32xf32>
    %456 = arith.subf %448, %455 : vector<160x32xf32>
    %457 = arith.mulf %456, %456 : vector<160x32xf32>
    %cst_141 = arith.constant dense<0.000000e+00> : vector<160xf32>
    %458 = vector.multi_reduction <add>, %457, %cst_141 [1] : vector<160x32xf32> to vector<160xf32>
    %459 = vector.shape_cast %458 : vector<160xf32> to vector<160x1xf32>
    %cst_142 = arith.constant 3.200000e+01 : f32
    %460 = vector.broadcast %cst_142 : f32 to vector<160x1xf32>
    %461 = arith.divf %459, %460 : vector<160x1xf32>
    %cst_143 = arith.constant 9.99999997E-7 : f32
    %462 = vector.broadcast %cst_143 : f32 to vector<160x1xf32>
    %463 = arith.addf %461, %462 : vector<160x1xf32>
    %464 = math.rsqrt %463 : vector<160x1xf32>
    %465 = vector.broadcast %464 : vector<160x1xf32> to vector<160x32xf32>
    %466 = arith.mulf %456, %465 : vector<160x32xf32>
    %467 = vector.broadcast %449 : vector<1x32xf32> to vector<160x32xf32>
    %468 = arith.mulf %466, %467 : vector<160x32xf32>
    %469 = vector.broadcast %450 : vector<1x32xf32> to vector<160x32xf32>
    %470 = arith.addf %468, %469 : vector<160x32xf32>
    %471 = vector.extract_strided_slice %470 {offsets = [16, 0], sizes = [64, 32], strides = [1, 1]} : vector<160x32xf32> to vector<64x32xf32>
    %472 = vector.extract_strided_slice %470 {offsets = [96, 0], sizes = [64, 32], strides = [1, 1]} : vector<160x32xf32> to vector<64x32xf32>
    %473 = tpu.concatenate %471, %472 in 0 : vector<64x32xf32>, vector<64x32xf32> -> vector<128x32xf32>
    %474 = arith.truncf %473 : vector<128x32xf32> to vector<128x32xbf16>
    %c592 = arith.constant 592 : index
    %c0_144 = arith.constant 0 : index
    %475 = vector.load %arg3[%c592, %c0_144] : memref<688x128xbf16, #tpu.memory_space<vmem>>, vector<32x64xbf16>
    %cst_145 = arith.constant dense<0.000000e+00> : vector<128x64xf32>
    %476 = tpu.matmul %474, %475, %cst_145 {dimension_numbers = #tpu.dot_dimension_numbers<[1], [0], [0], [1], [0, 0, 1, 1], [], []>} : vector<128x32xbf16>, vector<32x64xbf16>, vector<128x64xf32> -> vector<128x64xf32>
    %c85 = arith.constant 85 : index
    %c0_146 = arith.constant 0 : index
    %477 = vector.load %arg4[%c85, %c0_146] : memref<112x128xf32, #tpu.memory_space<vmem>>, vector<1x64xf32>
    %478 = vector.broadcast %477 : vector<1x64xf32> to vector<128x64xf32>
    %479 = arith.addf %476, %478 : vector<128x64xf32>
    %480 = arith.mulf %479, %479 : vector<128x64xf32>
    %481 = arith.mulf %479, %480 : vector<128x64xf32>
    %cst_147 = arith.constant 4.471500e-02 : f32
    %482 = vector.broadcast %cst_147 : f32 to vector<128x64xf32>
    %483 = arith.mulf %482, %481 : vector<128x64xf32>
    %484 = arith.addf %479, %483 : vector<128x64xf32>
    %cst_148 = arith.constant 0.797884583 : f32
    %485 = vector.broadcast %cst_148 : f32 to vector<128x64xf32>
    %486 = arith.mulf %485, %484 : vector<128x64xf32>
    %487 = math.tanh %486 : vector<128x64xf32>
    %cst_149 = arith.constant 1.000000e+00 : f32
    %488 = vector.broadcast %cst_149 : f32 to vector<128x64xf32>
    %489 = arith.addf %488, %487 : vector<128x64xf32>
    %cst_150 = arith.constant 5.000000e-01 : f32
    %490 = vector.broadcast %cst_150 : f32 to vector<128x64xf32>
    %491 = arith.mulf %490, %489 : vector<128x64xf32>
    %492 = arith.mulf %479, %491 : vector<128x64xf32>
    %493 = arith.truncf %492 : vector<128x64xf32> to vector<128x64xbf16>
    %c624 = arith.constant 624 : index
    %c0_151 = arith.constant 0 : index
    %494 = vector.load %arg3[%c624, %c0_151] : memref<688x128xbf16, #tpu.memory_space<vmem>>, vector<64x128xbf16>
    %cst_152 = arith.constant dense<0.000000e+00> : vector<128x128xf32>
    %495 = tpu.matmul %493, %494, %cst_152 {dimension_numbers = #tpu.dot_dimension_numbers<[1], [0], [0], [1], [0, 0, 1, 1], [], []>} : vector<128x64xbf16>, vector<64x128xbf16>, vector<128x128xf32> -> vector<128x128xf32>
    %c86 = arith.constant 86 : index
    %c0_153 = arith.constant 0 : index
    %496 = vector.load %arg4[%c86, %c0_153] : memref<112x128xf32, #tpu.memory_space<vmem>>, vector<1x128xf32>
    %497 = vector.broadcast %496 : vector<1x128xf32> to vector<128x128xf32>
    %498 = arith.addf %495, %497 : vector<128x128xf32>
    %c0_154 = arith.constant 0 : index
    %c0_155 = arith.constant 0 : index
    %499 = vector.load %arg5[%c0_154, %c0_155] : memref<128x128xf32, #tpu.memory_space<vmem>>, vector<128x128xf32>
    tpu.vector_store %arg5[%c0_154, %c0_155], %498 {strides = array<i32>} : memref<128x128xf32, #tpu.memory_space<vmem>>, vector<128x128xf32>,
    return
  }
  func.func @transform_0(%arg0: i32) -> (i32, i32) {
    %c0_i32 = arith.constant 0 : i32
    %c0_i32_0 = arith.constant 0 : i32
    %c0_i32_1 = arith.constant 0 : i32
    return %c0_i32, %c0_i32_0 : i32, i32
  }
  func.func @transform_1(%arg0: i32) -> (i32, i32) {
    %c0_i32 = arith.constant 0 : i32
    %c0_i32_0 = arith.constant 0 : i32
    %c0_i32_1 = arith.constant 0 : i32
    return %c0_i32, %c0_i32_0 : i32, i32
  }
  func.func @transform_2(%arg0: i32) -> (i32, i32) {
    %c0_i32 = arith.constant 0 : i32
    %c0_i32_0 = arith.constant 0 : i32
    %c0_i32_1 = arith.constant 0 : i32
    return %c0_i32, %c0_i32_0 : i32, i32
  }
  func.func @transform_3(%arg0: i32) -> (i32, i32) {
    %c0_i32 = arith.constant 0 : i32
    %c0_i32_0 = arith.constant 0 : i32
    %c0_i32_1 = arith.constant 0 : i32
    return %c0_i32, %c0_i32_0 : i32, i32
  }
  func.func @transform_4(%arg0: i32) -> (i32, i32) {
    %c0_i32 = arith.constant 0 : i32
    %c0_i32_0 = arith.constant 0 : i32
    %c0_i32_1 = arith.constant 0 : i32
    return %c0_i32, %c0_i32_0 : i32, i32
  }
}

</mosaic_0001>

<bundles_post_ra>
// kernel: forward.1
= control target key start
LH: loop header
LB: loop body
LE: loop exit
PB: predicated region body
PF: predicated region fallthrough
CT: control target
= control target key end

     0   :  { %vm111_vm0 = vcmask 130048   ;;  %v9606_v1 = vmov 0   ;;  %vm333_vm1 = vcmask 261120   ;;  %vm9608_vm2 = vmmov 0   ;;  %s13756_s2 = inlined_call_operand.vmem [shape: bf16[688,128], index: 2, kind: input, shape index: {}]   ;;  %s13757_s0 = inlined_call_operand.vmem [shape: bf16[160,16], index: 0, kind: input, shape index: {}]   ;;  %s13758_s1 = inlined_call_operand.vmem [shape: f32[32,1], index: 1, kind: input, shape index: {}]   ;;  %s13759_s3 = inlined_call_operand.vmem [shape: f32[112,128], index: 3, kind: input, shape index: {}]   ;;  %s13760_s4 = inlined_call_operand.vmem [shape: f32[128,128], index: 4, kind: output, shape index: {}]  }
   0x1   :  { %v8929_v0 = vld [vmem:[%s13756_s2 + $0x120] sm:$0xff]   ;;  %8927 = vset.pattern.permute.xlu0 %v9606_v1  ;;  %8928 = vset.pattern.permute.xlu1 %v9606_v1  ;;  %v8931_v3 = vld [vmem:[%s13757_s0 + $0x8] sm:$0xff]   ;;  %v8932_v4 = vld [vmem:[%s13757_s0 + $0x10] sm:$0xff]   ;;  %vm1232_vm11 = vcmask 654336   ;;  %vm7201_vm12 = vcmask 523264  }
   0x2   :  { %v8930_v2 = vld [vmem:[%s13757_s0] sm:$0xff]   ;;  %7982 = vmatprep.subr.bf16.mxu0 %v8929_v0  ;;  %v8933_v5 = vld [vmem:[%s13757_s0 + $0x18] sm:$0xff]   ;;  %v313_v8 = vld [vmem:[%s13758_s1 + $0x10] sm:$0xff] }
   0x3   :  { %7983 = vmatpush3.bf16.msra.mxu0 %v8929_v0  ;;  %7984 = vmatprep.mubr.msk.bf16.mxu0 %vm111_vm0, %v8930_v2  ;;  %v8934_v6 = vld [vmem:[%s13757_s0 + $0x20] sm:$0xff]   ;;  %v278_v9 = vld [vmem:[%s13758_s1 + $0x8] sm:$0xff]  ;;  %v314_v10 = vld [vmem:[%s13758_s1 + $0x18] sm:$0xff] }
   0x4   :  { %v277_v7 = vld [vmem:[%s13758_s1] sm:$0xff]  ;;  %317 = vperm.xlu1 %8928, %v313_v8   ;;  %v8935_v11 = vld [vmem:[%s13757_s0 + $0x28] sm:$0xff]   ;;  %v8936_v12 = vld [vmem:[%s13757_s0 + $0x30] sm:$0xff]  }
   0x5   :  { %281 = vperm.xlu0 %8927, %v277_v7   ;;  %v8937_v13 = vld [vmem:[%s13757_s0 + $0x38] sm:$0xff]   ;;  %v8938_v14 = vld [vmem:[%s13757_s0 + $0x40] sm:$0xff]   ;;  %v8939_v15 = vld [vmem:[%s13757_s0 + $0x48] sm:$0xff]  }
   0x6   :  { %7985 = vmatmul.mubr.msk.bf16.vlgmr.msra.gmra.mrb[0].mxu0 %vm111_vm0, %v8931_v3  ;;  %v7365_v17 = vld [vmem:[%s13759_s3 + $0x54] ss:$0 sm:$0xff]  ;;  %v9697_v19 = vld [vmem:[%s13759_s3 + $0x53] ss:$0 sm:$0xff]  ;;  %v9702_v20 = vld [vmem:[%s13759_s3 + $0x50] ss:$0 sm:$0xff] }
   0x7   :  { %7988 = vmatprep.mubr.msk.bf16.mxu0 %vm111_vm0, %v8932_v4  ;;  %v255_v24 = vld [vmem:[%s13759_s3] sm:$0xff]  ;;  %v9712_v30 = vld [vmem:[%s13759_s3 + $0x8] sm:$0xff]  ;;  %v9719_v34 = vld [vmem:[%s13759_s3 + $0x10] sm:$0xff] }
   0x8   :  { %322 = vperm.xlu1 %8928, %v314_v10   ;;  %v9732_v40 = vld [vmem:[%s13759_s3 + $0x18] sm:$0xff]  ;;  %v9742_v45 = vld [vmem:[%s13759_s3 + $0x30] sm:$0xff]  ;;  %v259_v47 = vld [vmem:[%s13759_s3 + $0x20] sm:$0xff] }
   0x9   :  { %286 = vperm.xlu0 %8927, %v278_v9   ;;  %v9756_v54 = vld [vmem:[%s13759_s3 + $0x28] sm:$0xff]  ;;  %v9775_v0 = vld [vmem:[%s13759_s3 + $0x38] sm:$0xff]  ;;  %v263_v7 = vld [vmem:[%s13759_s3 + $0x40] sm:$0xff] }
   0xe   :  { %7989 = vmatmul.mubr.msk.bf16.gmra.mrb[4].mxu0 %vm111_vm0, %v8933_v5 }
   0xf   :  { %7992 = vmatprep.mubr.msk.bf16.mxu0 %vm111_vm0, %v8934_v6 }
  0x16   :  { %7993 = vmatmul.mubr.msk.bf16.gmra.mrb[8].mxu0 %vm111_vm0, %v8935_v11 }
  0x17   :  { %7996 = vmatprep.mubr.msk.bf16.mxu0 %vm111_vm0, %v8936_v12 }
  0x1e   :  { %7997 = vmatmul.mubr.msk.bf16.gmra.mrb[12].mxu0 %vm111_vm0, %v8937_v13 }
  0x1f   :  { %8000 = vmatprep.mubr.msk.bf16.mxu0 %vm111_vm0, %v8938_v14 }
  0x26   :  { %8001 = vmatmul.mubr.msk.bf16.gmra.mrb[16].mxu0 %vm111_vm0, %v8939_v15 }
  0x83   :  { %v318_v51 = vpop.permute.xlu1 %317 }
  0x84   :  { %v282_v16 = vpop.permute.xlu0 %281  ;;  %v325_v59 = vmul.f32 %v7365_v17, %v318_v51 }
  0x85   :  { %v293_v18 = vmul.f32 %v7365_v17, %v282_v16 }
  0x86   :  { %v327_v8 = vadd.f32 %v9697_v19, %v325_v59 }
  0x87   :  { %v299_v25 = vadd.f32 %v9697_v19, %v293_v18  ;;  %v323_v63 = vpop.permute.xlu1 %322  ;;  %v264_v18 = vld [vmem:[%s13759_s3 + $0x48] sm:$0xff] }
  0x88   :  { %v287_v21 = vpop.permute.xlu0 %286  ;;  %v326_v9 = vmul.f32 %v7365_v17, %v323_v63 }
  0x89   :  { %v294_v26 = vmul.f32 %v7365_v17, %v287_v21 }
  0x8b   :  { %v300_v35 = vadd.f32 %v9697_v19, %v294_v26 }
  0xd9   :  { %v7986_v22 = vpop.f32.mrb[0].mxu0 }
  0xda   :  { %v176_v23 = vpop.f32.mrb[1].mxu0  ;;  %v185_v31 = vadd.f32 %v7986_v22, %v9702_v20  ;;  %v328_v22 = vadd.f32 %v9697_v19, %v326_v9 }
  0xdb   :  { %v177_v27 = vadd.f32 %v9702_v20, %v176_v23  ;;  %v7987_v28 = vpop.f32.mrb[2].mxu0 }
  0xdc   :  { %v179_v29 = vpop.f32.mrb[3].mxu0  ;;  %v188_v38 = vadd.f32 %v7987_v28, %v9702_v20  ;;  %v9727_v39 = vadd.f32 %v9719_v34, %v185_v31 }
  0xdd   :  { %v267_v32 = vadd.f32 %v255_v24, %v177_v27  ;;  %v180_v33 = vadd.f32 %v9702_v20, %v179_v29 }
  0xde   :  { %13807 = vst [vmem:[#allocation3_spill] sm:$0xff] %v9727_v39  ;;  %v9751_v52 = vadd.f32 %v9732_v40, %v188_v38  ;;  %v340_v57 = vsel %vm333_vm1, %v9727_v39, 0.0 }
  0xdf   :  { %v9722_v36 = vadd.f32 %v299_v25, %v267_v32  ;;  %v268_v37 = vadd.f32 %v9712_v30, %v180_v33 }
  0xe0   :  { %13809 = vst [vmem:[#allocation5_spill] sm:$0xff] %v9751_v52  ;;  %v343_v3 = vsel %vm333_vm1, %v9751_v52, 0.0 }
  0xe1   :  { %13806 = vst [vmem:[#allocation2_spill] sm:$0xff] %v9722_v36  ;;  %v9734_v41 = vadd.f32 %v300_v35, %v268_v37  ;;  %v7990_v42 = vpop.f32.mrb[4].mxu0  ;;  %v334_v43 = vsel %vm333_vm1, %v9722_v36, 0.0 }
  0xe2   :  { %v201_v44 = vadd.f32 %v7990_v42, %v9702_v20  ;;  %v192_v46 = vpop.f32.mrb[5].mxu0  ;;  %335 = vadd.xlane.f32.xlu0 %v334_v43 }
  0xe3   :  { %13808 = vst [vmem:[#allocation4_spill] sm:$0xff] %v9734_v41  ;;  %v193_v48 = vadd.f32 %v9702_v20, %v192_v46  ;;  %v337_v49 = vsel %vm333_vm1, %v9734_v41, 0.0  ;;  %v7991_v50 = vpop.f32.mrb[6].mxu0 }
  0xe4   :  { %338 = vadd.xlane.f32.xlu1 %v337_v49  ;;  %v195_v53 = vpop.f32.mrb[7].mxu0  ;;  %v9759_v55 = vadd.f32 %v9742_v45, %v201_v44  ;;  %v204_v60 = vadd.f32 %v7991_v50, %v9702_v20 }
  0xe5   :  { %v9761_v56 = vadd.f32 %v259_v47, %v193_v48  ;;  %v196_v58 = vadd.f32 %v9702_v20, %v195_v53 }
  0xe6   :  { %13810 = vst [vmem:[#allocation6_spill] sm:$0xff] %v9759_v55  ;;  %341 = vadd.xlane.f32.xlu0 %v340_v57  ;;  %v352_v4 = vsel %vm333_vm1, %v9759_v55, 0.0  ;;  %v9787_v10 = vadd.f32 %v9775_v0, %v204_v60 }
  0xe7   :  { %13811 = vst [vmem:[#allocation7_spill] sm:$0xff] %v9761_v56  ;;  %v9768_v61 = vadd.f32 %v9756_v54, %v196_v58  ;;  %v346_v62 = vsel %vm333_vm1, %v9761_v56, 0.0 }
  0xe8   :  { %347 = vadd.xlane.f32.xlu1 %v346_v62  ;;  %13813 = vst [vmem:[#allocation9_spill] sm:$0xff] %v9787_v10  ;;  %v355_v27 = vsel %vm333_vm1, %v9787_v10, 0.0 }
  0xe9   :  { %13812 = vst [vmem:[#allocation8_spill] sm:$0xff] %v9768_v61  ;;  %v7994_v2 = vpop.f32.mrb[8].mxu0  ;;  %v349_v12 = vsel %vm333_vm1, %v9768_v61, 0.0 }
  0xea   :  { %v217_v5 = vadd.f32 %v7994_v2, %v9702_v20  ;;  %v208_v6 = vpop.f32.mrb[9].mxu0  ;;  %344 = vadd.xlane.f32.xlu0 %v343_v3 }
  0xeb   :  { %v209_v11 = vadd.f32 %v9702_v20, %v208_v6  ;;  %v7995_v13 = vpop.f32.mrb[10].mxu0 }
  0xec   :  { %v303_v14 = vadd.f32 %v255_v24, %v217_v5  ;;  %353 = vadd.xlane.f32.xlu1 %v352_v4  ;;  %v220_v15 = vadd.f32 %v7995_v13, %v9702_v20  ;;  %v211_v16 = vpop.f32.mrb[11].mxu0 }
  0xed   :  { %v9796_v21 = vadd.f32 %v263_v7, %v209_v11  ;;  %v212_v17 = vadd.f32 %v9702_v20, %v211_v16 }
  0xee   :  { %350 = vadd.xlane.f32.xlu0 %v349_v12  ;;  %v9800_v23 = vadd.f32 %v327_v8, %v303_v14  ;;  %v304_v25 = vadd.f32 %v9712_v30, %v220_v15 }
  0xef   :  { %13814 = vst [vmem:[#allocation10_spill] sm:$0xff] %v9796_v21  ;;  %v9803_v24 = vadd.f32 %v264_v18, %v212_v17  ;;  %v358_v26 = vsel %vm333_vm1, %v9796_v21, 0.0 }
  0xf0   :  { %13815 = vst [vmem:[#allocation11_spill] sm:$0xff] %v9800_v23  ;;  %359 = vadd.xlane.f32.xlu1 %v358_v26  ;;  %v364_v29 = vsel %vm333_vm1, %v9800_v23, 0.0  ;;  %v9815_v35 = vadd.f32 %v328_v22, %v304_v25 }
  0xf1   :  { %13816 = vst [vmem:[#allocation12_spill] sm:$0xff] %v9803_v24  ;;  %v7998_v28 = vpop.f32.mrb[12].mxu0  ;;  %v361_v30 = vsel %vm333_vm1, %v9803_v24, 0.0 }
  0xf2   :  { %v233_v31 = vadd.f32 %v7998_v28, %v9702_v20  ;;  %v224_v19 = vpop.f32.mrb[13].mxu0  ;;  %356 = vadd.xlane.f32.xlu0 %v355_v27  ;;  %13817 = vst [vmem:[#allocation13_spill] sm:$0xff] %v9815_v35  ;;  %v367_v49 = vsel %vm333_vm1, %v9815_v35, 0.0 }
  0xf3   :  { %v225_v32 = vadd.f32 %v9702_v20, %v224_v19  ;;  %v7999_v33 = vpop.f32.mrb[14].mxu0 }
  0xf4   :  { %365 = vadd.xlane.f32.xlu1 %v364_v29  ;;  %v227_v37 = vpop.f32.mrb[15].mxu0  ;;  %v9817_v38 = vadd.f32 %v259_v47, %v233_v31  ;;  %v236_v44 = vadd.f32 %v7999_v33, %v9702_v20 }
  0xf5   :  { %v9820_v42 = vadd.f32 %v9719_v34, %v225_v32  ;;  %v228_v43 = vadd.f32 %v9702_v20, %v227_v37 }
  0xf6   :  { %13818 = vst [vmem:[#allocation14_spill] sm:$0xff] %v9817_v38  ;;  %362 = vadd.xlane.f32.xlu0 %v361_v30  ;;  %v376_v34 = vsel %vm333_vm1, %v9817_v38, 0.0  ;;  %v9835_v53 = vadd.f32 %v9756_v54, %v236_v44 }
  0xf7   :  { %13819 = vst [vmem:[#allocation15_spill] sm:$0xff] %v9820_v42  ;;  %v9825_v46 = vadd.f32 %v9732_v40, %v228_v43  ;;  %v370_v48 = vsel %vm333_vm1, %v9820_v42, 0.0 }
  0xf8   :  { %371 = vadd.xlane.f32.xlu1 %v370_v48  ;;  %13821 = vst [vmem:[#allocation17_spill] sm:$0xff] %v9835_v53  ;;  %v379_v4 = vsel %vm333_vm1, %v9835_v53, 0.0 }
  0xf9   :  { %13820 = vst [vmem:[#allocation16_spill] sm:$0xff] %v9825_v46  ;;  %v8002_v47 = vpop.f32.mrb[16].mxu0  ;;  %v373_v57 = vsel %vm333_vm1, %v9825_v46, 0.0 }
  0xfa   :  { %v249_v50 = vadd.f32 %v8002_v47, %v9702_v20  ;;  %v240_v51 = vpop.f32.mrb[17].mxu0  ;;  %368 = vadd.xlane.f32.xlu0 %v367_v49 }
  0xfb   :  { %v241_v40 = vadd.f32 %v9702_v20, %v240_v51  ;;  %v8003_v58 = vpop.f32.mrb[18].mxu0 }
  0xfc   :  { %377 = vadd.xlane.f32.xlu1 %v376_v34  ;;  %v243_v59 = vpop.f32.mrb[19].mxu0  ;;  %v9840_v60 = vadd.f32 %v263_v7, %v249_v50  ;;  %v252_v2 = vadd.f32 %v8003_v58, %v9702_v20 }
  0xfd   :  { %v9843_v62 = vadd.f32 %v9742_v45, %v241_v40  ;;  %v244_v63 = vadd.f32 %v9702_v20, %v243_v59 }
  0xfe   :  { %13822 = vst [vmem:[#allocation18_spill] sm:$0xff] %v9840_v60  ;;  %374 = vadd.xlane.f32.xlu0 %v373_v57  ;;  %v388_v5 = vsel %vm333_vm1, %v9840_v60, 0.0  ;;  %v9856_v45 = vadd.f32 %v264_v18, %v252_v2 }
  0xff   :  { %13823 = vst [vmem:[#allocation19_spill] sm:$0xff] %v9843_v62  ;;  %v9848_v54 = vadd.f32 %v9775_v0, %v244_v63  ;;  %v382_v3 = vsel %vm333_vm1, %v9843_v62, 0.0  ;;  %v8940_v0 = vld [vmem:[%s13756_s2 + $0x10] sm:$0xff]  }
 0x100   :  { %383 = vadd.xlane.f32.xlu1 %v382_v3  ;;  %13825 = vst [vmem:[#allocation21_spill] sm:$0xff] %v9856_v45  ;;  %v391_v20 = vsel %vm333_vm1, %v9856_v45, 0.0  ;;  %8028 = vmatprep.subr.bf16.mxu0 %v8940_v0 }
 0x101   :  { %13824 = vst [vmem:[#allocation20_spill] sm:$0xff] %v9848_v54  ;;  %v385_v6 = vsel %vm333_vm1, %v9848_v54, 0.0  ;;  %8029 = vmatpush3.bf16.msra.mxu0 %v8940_v0 }
 0x102   :  { %380 = vadd.xlane.f32.xlu0 %v379_v4 }
 0x104   :  { %389 = vadd.xlane.f32.xlu1 %v388_v5 }
 0x106   :  { %386 = vadd.xlane.f32.xlu0 %v385_v6 }
 0x10a   :  { %392 = vadd.xlane.f32.xlu0 %v391_v20 }
 0x16f   :  { %v336_v7 = vpop.xlane.xlu0 %335 }
 0x170   :  { %v395_v8 = vmul.f32 0.03125, %v336_v7 }
 0x171   :  { %v339_v9 = vpop.xlane.xlu1 %338 }
 0x172   :  { %v9866_v11 = vsub.f32 %v9722_v36, %v395_v8  ;;  %v396_v12 = vmul.f32 0.03125, %v339_v9 }
 0x173   :  { %v342_v13 = vpop.xlane.xlu0 %341 }
 0x174   :  { %v9869_v14 = vsub.f32 %v9734_v41, %v396_v12  ;;  %v397_v15 = vmul.f32 0.03125, %v342_v13  ;;  %v435_v16 = vmul.f32 %v9866_v11, %v9866_v11 }
 0x175   :  { %v348_v18 = vpop.xlane.xlu1 %347 }
 0x176   :  { %v9874_v17 = vsub.f32 %v9727_v39, %v397_v15  ;;  %v399_v22 = vmul.f32 0.03125, %v348_v18  ;;  %v455_v25 = vsel %vm333_vm1, %v435_v16, 0.0  ;;  %v436_v26 = vmul.f32 %v9869_v14, %v9869_v14 }
 0x177   :  { %456 = vadd.xlane.f32.xlu1 %v455_v25  ;;  %v345_v27 = vpop.xlane.xlu0 %344 }
 0x178   :  { %v9880_v28 = vsub.f32 %v9761_v56, %v399_v22  ;;  %v398_v29 = vmul.f32 0.03125, %v345_v27  ;;  %v458_v31 = vsel %vm333_vm1, %v436_v26, 0.0  ;;  %v437_v19 = vmul.f32 %v9874_v17, %v9874_v17 }
 0x179   :  { %v354_v32 = vpop.xlane.xlu1 %353  ;;  %459 = vadd.xlane.f32.xlu0 %v458_v31 }
 0x17a   :  { %v9886_v30 = vsub.f32 %v9751_v52, %v398_v29  ;;  %v401_v33 = vmul.f32 0.03125, %v354_v32  ;;  %v461_v37 = vsel %vm333_vm1, %v437_v19, 0.0  ;;  %v439_v43 = vmul.f32 %v9880_v28, %v9880_v28 }
 0x17b   :  { %462 = vadd.xlane.f32.xlu1 %v461_v37  ;;  %v351_v44 = vpop.xlane.xlu0 %350 }
 0x17c   :  { %v9892_v48 = vsub.f32 %v9759_v55, %v401_v33  ;;  %v400_v49 = vmul.f32 0.03125, %v351_v44  ;;  %v438_v47 = vmul.f32 %v9886_v30, %v9886_v30  ;;  %v467_v50 = vsel %vm333_vm1, %v439_v43, 0.0 }
 0x17d   :  { %v360_v34 = vpop.xlane.xlu1 %359 }
 0x17e   :  { %v9898_v51 = vsub.f32 %v9768_v61, %v400_v49  ;;  %v403_v40 = vmul.f32 0.03125, %v360_v34  ;;  %v464_v57 = vsel %vm333_vm1, %v438_v47, 0.0  ;;  %v441_v58 = vmul.f32 %v9892_v48, %v9892_v48 }
 0x17f   :  { %468 = vadd.xlane.f32.xlu1 %v467_v50  ;;  %465 = vadd.xlane.f32.xlu0 %v464_v57  ;;  %v357_v59 = vpop.xlane.xlu0 %356 }
 0x180   :  { %v9904_v63 = vsub.f32 %v9796_v21, %v403_v40  ;;  %v402_v2 = vmul.f32 0.03125, %v357_v59  ;;  %v440_v3 = vmul.f32 %v9898_v51, %v9898_v51  ;;  %v473_v5 = vsel %vm333_vm1, %v441_v58, 0.0 }
 0x181   :  { %v366_v4 = vpop.xlane.xlu1 %365 }
 0x182   :  { %v9910_v6 = vsub.f32 %v9787_v10, %v402_v2  ;;  %v405_v20 = vmul.f32 0.03125, %v366_v4  ;;  %v470_v0 = vsel %vm333_vm1, %v440_v3, 0.0  ;;  %v443_v7 = vmul.f32 %v9904_v63, %v9904_v63 }
 0x183   :  { %474 = vadd.xlane.f32.xlu1 %v473_v5  ;;  %471 = vadd.xlane.f32.xlu0 %v470_v0  ;;  %v363_v8 = vpop.xlane.xlu0 %362 }
 0x184   :  { %v9916_v9 = vsub.f32 %v9800_v23, %v405_v20  ;;  %v404_v12 = vmul.f32 0.03125, %v363_v8  ;;  %v442_v13 = vmul.f32 %v9910_v6, %v9910_v6  ;;  %v479_v16 = vsel %vm333_vm1, %v443_v7, 0.0 }
 0x185   :  { %v372_v15 = vpop.xlane.xlu1 %371 }
 0x186   :  { %v9922_v18 = vsub.f32 %v9803_v24, %v404_v12  ;;  %v407_v22 = vmul.f32 0.03125, %v372_v15  ;;  %v476_v25 = vsel %vm333_vm1, %v442_v13, 0.0  ;;  %v445_v26 = vmul.f32 %v9916_v9, %v9916_v9 }
 0x187   :  { %480 = vadd.xlane.f32.xlu1 %v479_v16  ;;  %477 = vadd.xlane.f32.xlu0 %v476_v25  ;;  %v369_v27 = vpop.xlane.xlu0 %368  ;;  %v8941_v25 = vld [vmem:[%s13756_s2 + $0x18] sm:$0xff]  }
 0x188   :  { %v9928_v29 = vsub.f32 %v9820_v42, %v407_v22  ;;  %v406_v31 = vmul.f32 0.03125, %v369_v27  ;;  %v444_v19 = vmul.f32 %v9922_v18, %v9922_v18  ;;  %v485_v33 = vsel %vm333_vm1, %v445_v26, 0.0  ;;  %8030 = vmatprep.subr.bf16.mxu0 %v8941_v25 }
 0x189   :  { %v378_v32 = vpop.xlane.xlu1 %377  ;;  %8031 = vmatpush3.bf16.msra.mxu0 %v8941_v25 }
 0x18a   :  { %v9934_v37 = vsub.f32 %v9815_v35, %v406_v31  ;;  %v409_v43 = vmul.f32 0.03125, %v378_v32  ;;  %v482_v44 = vsel %vm333_vm1, %v444_v19, 0.0  ;;  %v447_v49 = vmul.f32 %v9928_v29, %v9928_v29 }
 0x18b   :  { %486 = vadd.xlane.f32.xlu1 %v485_v33  ;;  %483 = vadd.xlane.f32.xlu0 %v482_v44  ;;  %v375_v47 = vpop.xlane.xlu0 %374 }
 0x18c   :  { %v9940_v34 = vsub.f32 %v9817_v38, %v409_v43  ;;  %v408_v50 = vmul.f32 0.03125, %v375_v47  ;;  %v446_v40 = vmul.f32 %v9934_v37, %v9934_v37  ;;  %v491_v58 = vsel %vm333_vm1, %v447_v49, 0.0 }
 0x18d   :  { %v384_v57 = vpop.xlane.xlu1 %383 }
 0x18e   :  { %v9946_v59 = vsub.f32 %v9825_v46, %v408_v50  ;;  %v411_v2 = vmul.f32 0.03125, %v384_v57  ;;  %v488_v3 = vsel %vm333_vm1, %v446_v40, 0.0  ;;  %v449_v4 = vmul.f32 %v9940_v34, %v9940_v34 }
 0x18f   :  { %492 = vadd.xlane.f32.xlu1 %v491_v58  ;;  %489 = vadd.xlane.f32.xlu0 %v488_v3  ;;  %v381_v5 = vpop.xlane.xlu0 %380 }
 0x190   :  { %v9952_v20 = vsub.f32 %v9843_v62, %v411_v2  ;;  %v410_v0 = vmul.f32 0.03125, %v381_v5  ;;  %v448_v7 = vmul.f32 %v9946_v59, %v9946_v59  ;;  %v497_v12 = vsel %vm333_vm1, %v449_v4, 0.0  ;;  %v8942_v2 = vld [vmem:[%s13756_s2] sm:$0xff]   ;;  %v8943_v5 = vld [vmem:[%s13756_s2 + $0x8] sm:$0xff]  }
 0x191   :  { %v390_v8 = vpop.xlane.xlu1 %389  ;;  %8004 = vmatprep.subr.bf16.mxu1 %v8942_v2 }
 0x192   :  { %v9958_v13 = vsub.f32 %v9835_v53, %v410_v0  ;;  %v413_v15 = vmul.f32 0.03125, %v390_v8  ;;  %v494_v16 = vsel %vm333_vm1, %v448_v7, 0.0  ;;  %v451_v22 = vmul.f32 %v9952_v20, %v9952_v20  ;;  %8005 = vmatpush3.bf16.msra.mxu1 %v8942_v2  ;;  %v9997_v0 = vld [vmem:[%s13756_s2 + $0x20] sm:$0xff]  }
 0x193   :  { %498 = vadd.xlane.f32.xlu1 %v497_v12  ;;  %495 = vadd.xlane.f32.xlu0 %v494_v16  ;;  %v387_v26 = vpop.xlane.xlu0 %386 }
 0x194   :  { %v9967_v27 = vsub.f32 %v9840_v60, %v413_v15  ;;  %v412_v31 = vmul.f32 0.03125, %v387_v26  ;;  %v450_v19 = vmul.f32 %v9958_v13, %v9958_v13  ;;  %v503_v33 = vsel %vm333_vm1, %v451_v22, 0.0  ;;  %8006 = vmatprep.subr.bf16.mxu1 %v8943_v5 }
 0x196   :  { %v9972_v32 = vsub.f32 %v9848_v54, %v412_v31  ;;  %v500_v43 = vsel %vm333_vm1, %v450_v19, 0.0  ;;  %v453_v44 = vmul.f32 %v9967_v27, %v9967_v27  ;;  %8007 = vmatpush3.bf16.msra.mxu1 %v8943_v5 }
 0x197   :  { %504 = vadd.xlane.f32.xlu1 %v503_v33  ;;  %501 = vadd.xlane.f32.xlu0 %v500_v43  ;;  %v393_v49 = vpop.xlane.xlu0 %392 }
 0x198   :  { %v414_v47 = vmul.f32 0.03125, %v393_v49  ;;  %v452_v50 = vmul.f32 %v9972_v32, %v9972_v32  ;;  %v509_v57 = vsel %vm333_vm1, %v453_v44, 0.0  ;;  %8052 = vmatprep.subr.bf16.mxu1 %v9997_v0 }
 0x19a   :  { %v9981_v40 = vsub.f32 %v9856_v45, %v414_v47  ;;  %v506_v58 = vsel %vm333_vm1, %v452_v50, 0.0 }
 0x19b   :  { %510 = vadd.xlane.f32.xlu1 %v509_v57  ;;  %507 = vadd.xlane.f32.xlu0 %v506_v58 }
 0x19c   :  { %v454_v3 = vmul.f32 %v9981_v40, %v9981_v40 }
 0x19e   :  { %v512_v4 = vsel %vm333_vm1, %v454_v3, 0.0 }
 0x19f   :  { %513 = vadd.xlane.f32.xlu0 %v512_v4 }
 0x204   :  { %v457_v7 = vpop.xlane.xlu1 %456 }
 0x205   :  { %v515_v8 = vmul.f32 0.03125, %v457_v7  ;;  %v10003_v7 = vld [vmem:[%s13759_s3 + $0x58] ss:$0 sm:$0xff] }
 0x206   :  { %v460_v12 = vpop.xlane.xlu0 %459 }
 0x207   :  { %v535_v15 = vadd.f32 1e-06, %v515_v8  ;;  %v516_v16 = vmul.f32 0.03125, %v460_v12 }
 0x208   :  { %v463_v22 = vpop.xlane.xlu1 %462 }
 0x209   :  { %8982 = vrsqrt.f32 %v535_v15  ;;  %v536_v25 = vadd.f32 1e-06, %v516_v16  ;;  %v517_v26 = vmul.f32 0.03125, %v463_v22 }
 0x20b   :  { %8984 = vrsqrt.f32 %v536_v25  ;;  %v537_v31 = vadd.f32 1e-06, %v517_v26 }
 0x20c   :  { %v469_v19 = vpop.xlane.xlu1 %468  ;;  %v466_v33 = vpop.xlane.xlu0 %465 }
 0x20d   :  { %8986 = vrsqrt.f32 %v537_v31  ;;  %v519_v43 = vmul.f32 0.03125, %v469_v19  ;;  %v518_v44 = vmul.f32 0.03125, %v466_v33 }
 0x20f   :  { %v539_v49 = vadd.f32 1e-06, %v519_v43  ;;  %v538_v47 = vadd.f32 1e-06, %v518_v44  ;;  %v10011_v44 = vld [vmem:[%s13759_s3 + $0x59] ss:$0 sm:$0xff] }
 0x210   :  { %v475_v50 = vpop.xlane.xlu1 %474  ;;  %v472_v57 = vpop.xlane.xlu0 %471 }
 0x211   :  { %8988 = vrsqrt.f32 %v539_v49  ;;  %v521_v58 = vmul.f32 0.03125, %v475_v50  ;;  %v520_v2 = vmul.f32 0.03125, %v472_v57 }
 0x212   :  { %8990 = vrsqrt.f32 %v538_v47 }
 0x213   :  { %v8983_v3 = vpop.eup %8982  ;;  %v541_v4 = vadd.f32 1e-06, %v521_v58  ;;  %v540_v5 = vadd.f32 1e-06, %v520_v2 }
 0x214   :  { %v481_v8 = vpop.xlane.xlu1 %480  ;;  %v478_v12 = vpop.xlane.xlu0 %477  ;;  %v575_v15 = vmul.f32 %v8983_v3, %v9866_v11 }
 0x215   :  { %v8985_v16 = vpop.eup %8984  ;;  %8992 = vrsqrt.f32 %v541_v4  ;;  %v523_v22 = vmul.f32 0.03125, %v481_v8  ;;  %v522_v25 = vmul.f32 0.03125, %v478_v12 }
 0x216   :  { %8994 = vrsqrt.f32 %v540_v5  ;;  %v576_v26 = vmul.f32 %v8985_v16, %v9869_v14  ;;  %v599_v31 = vmul.f32 %v10003_v7, %v575_v15 }
 0x217   :  { %v8987_v19 = vpop.eup %8986  ;;  %v543_v33 = vadd.f32 1e-06, %v523_v22  ;;  %v542_v43 = vadd.f32 1e-06, %v522_v25 }
 0x218   :  { %v487_v49 = vpop.xlane.xlu1 %486  ;;  %v484_v47 = vpop.xlane.xlu0 %483  ;;  %v600_v11 = vmul.f32 %v10003_v7, %v576_v26  ;;  %v577_v50 = vmul.f32 %v8987_v19, %v9874_v17  ;;  %v623_v14 = vadd.f32 %v10011_v44, %v599_v31 }
 0x219   :  { %8996 = vrsqrt.f32 %v543_v33  ;;  %v525_v57 = vmul.f32 0.03125, %v487_v49  ;;  %v524_v58 = vmul.f32 0.03125, %v484_v47 }
 0x21a   :  { %8998 = vrsqrt.f32 %v542_v43  ;;  %v624_v2 = vadd.f32 %v10011_v44, %v600_v11  ;;  %v601_v22 = vmul.f32 %v10003_v7, %v577_v50 }
 0x21b   :  { %v8989_v3 = vpop.eup %8988  ;;  %v545_v4 = vadd.f32 1e-06, %v525_v57  ;;  %v544_v5 = vadd.f32 1e-06, %v524_v58 }
 0x21c   :  { %v8991_v8 = vpop.eup %8990  ;;  %v493_v12 = vpop.xlane.xlu1 %492  ;;  %v10017_v16 = vpack.c.bf16 %v624_v2, %v623_v14  ;;  %v579_v31 = vmul.f32 %v8989_v3, %v9880_v28  ;;  %v625_v57 = vadd.f32 %v10011_v44, %v601_v22 }
 0x21d   :  { %v490_v15 = vpop.xlane.xlu0 %489  ;;  %9000 = vrsqrt.f32 %v545_v4  ;;  %v527_v17 = vmul.f32 0.03125, %v493_v12  ;;  %v578_v26 = vmul.f32 %v8991_v8, %v9886_v30 }
 0x21e   :  { %v526_v25 = vmul.f32 0.03125, %v490_v15  ;;  %9002 = vrsqrt.f32 %v544_v5  ;;  %8008 = vmatprep.mubr.msk.bf16.mxu1 %vm333_vm1, %v10017_v16  ;;  %8032 = vmatprep.mubr.msk.bf16.mxu0 %vm333_vm1, %v10017_v16  ;;  %v603_v3 = vmul.f32 %v10003_v7, %v579_v31  ;;  %v8945_v15 = vld [vmem:[%s13756_s2 + $0x28] sm:$0xff]  }
 0x21f   :  { %v8993_v19 = vpop.eup %8992  ;;  %v547_v33 = vadd.f32 1e-06, %v527_v17  ;;  %v602_v49 = vmul.f32 %v10003_v7, %v578_v26 }
 0x220   :  { %v546_v43 = vadd.f32 1e-06, %v526_v25  ;;  %v8995_v47 = vpop.eup %8994  ;;  %v499_v11 = vpop.xlane.xlu1 %498  ;;  %v581_v30 = vmul.f32 %v8993_v19, %v9892_v48 }
 0x221   :  { %v496_v50 = vpop.xlane.xlu0 %495  ;;  %9004 = vrsqrt.f32 %v547_v33  ;;  %v529_v58 = vmul.f32 0.03125, %v499_v11  ;;  %v626_v2 = vadd.f32 %v10011_v44, %v602_v49  ;;  %v580_v28 = vmul.f32 %v8995_v47, %v9898_v51 }
 0x222   :  { %v528_v14 = vmul.f32 0.03125, %v496_v50  ;;  %9006 = vrsqrt.f32 %v546_v43  ;;  %v605_v26 = vmul.f32 %v10003_v7, %v581_v30  ;;  %v627_v33 = vadd.f32 %v10011_v44, %v603_v3 }
 0x223   :  { %v8997_v4 = vpop.eup %8996  ;;  %v549_v5 = vadd.f32 1e-06, %v529_v58  ;;  %v10032_v12 = vpack.c.bf16 %v626_v2, %v625_v57  ;;  %v604_v25 = vmul.f32 %v10003_v7, %v580_v28 }
 0x224   :  { %v548_v8 = vadd.f32 1e-06, %v528_v14  ;;  %v8999_v48 = vpop.eup %8998  ;;  %v505_v22 = vpop.xlane.xlu1 %504  ;;  %v583_v49 = vmul.f32 %v8997_v4, %v9904_v63  ;;  %v629_v2 = vadd.f32 %v10011_v44, %v605_v26 }
 0x225   :  { %v502_v17 = vpop.xlane.xlu0 %501  ;;  %9008 = vrsqrt.f32 %v549_v5  ;;  %v531_v51 = vmul.f32 0.03125, %v505_v22  ;;  %8009 = vmatmul.mubr.msk.bf16.vlgmr.msra.gmra.mrb[0].mxu1 %vm333_vm1, %v10032_v12  ;;  %8033 = vmatmul.mubr.msk.bf16.vlgmr.msra.gmra.mrb[20].mxu0 %vm333_vm1, %v10032_v12  ;;  %v582_v19 = vmul.f32 %v8999_v48, %v9910_v6  ;;  %v628_v43 = vadd.f32 %v10011_v44, %v604_v25 }
 0x226   :  { %v530_v31 = vmul.f32 0.03125, %v502_v17  ;;  %9010 = vrsqrt.f32 %v548_v8  ;;  %8053 = vmatpush3.bf16.msra.mxu1 %v9997_v0  ;;  %v607_v5 = vmul.f32 %v10003_v7, %v583_v49 }
 0x227   :  { %v9001_v47 = vpop.eup %9000  ;;  %v551_v11 = vadd.f32 1e-06, %v531_v51  ;;  %v606_v57 = vmul.f32 %v10003_v7, %v582_v19  ;;  %8054 = vmatprep.subr.bf16.mxu1 %v8945_v15  ;;  %v10049_v14 = vpack.c.bf16 %v628_v43, %v627_v33 }
 0x228   :  { %v550_v50 = vadd.f32 1e-06, %v530_v31  ;;  %v9003_v30 = vpop.eup %9002  ;;  %v511_v58 = vpop.xlane.xlu1 %510  ;;  %v585_v28 = vmul.f32 %v9001_v47, %v9916_v9 }
 0x229   :  { %v508_v6 = vpop.xlane.xlu0 %507  ;;  %9012 = vrsqrt.f32 %v551_v11  ;;  %v533_v3 = vmul.f32 0.03125, %v511_v58  ;;  %v630_v0 = vadd.f32 %v10011_v44, %v606_v57  ;;  %8012 = vmatprep.mubr.msk.bf16.mxu1 %vm333_vm1, %v10049_v14  ;;  %8036 = vmatprep.mubr.msk.bf16.mxu0 %vm333_vm1, %v10049_v14  ;;  %v584_v4 = vmul.f32 %v9003_v30, %v9922_v18 }
 0x22a   :  { %v532_v63 = vmul.f32 0.03125, %v508_v6  ;;  %9014 = vrsqrt.f32 %v550_v50  ;;  %8055 = vmatpush3.bf16.msra.mxu1 %v8945_v15  ;;  %v609_v19 = vmul.f32 %v10003_v7, %v585_v28  ;;  %v631_v15 = vadd.f32 %v10011_v44, %v607_v5 }
 0x22b   :  { %v9005_v8 = vpop.eup %9004  ;;  %v553_v48 = vadd.f32 1e-06, %v533_v3  ;;  %v10060_v9 = vpack.c.bf16 %v630_v0, %v629_v2  ;;  %v608_v26 = vmul.f32 %v10003_v7, %v584_v4 }
 0x22c   :  { %v552_v22 = vadd.f32 1e-06, %v532_v63  ;;  %v9007_v17 = vpop.eup %9006  ;;  %v587_v51 = vmul.f32 %v9005_v8, %v9928_v29 }
 0x22d   :  { %v514_v25 = vpop.xlane.xlu0 %513  ;;  %9016 = vrsqrt.f32 %v553_v48  ;;  %8013 = vmatmul.mubr.msk.bf16.gmra.mrb[4].mxu1 %vm333_vm1, %v10060_v9  ;;  %8037 = vmatmul.mubr.msk.bf16.gmra.mrb[24].mxu0 %vm333_vm1, %v10060_v9  ;;  %v586_v31 = vmul.f32 %v9007_v17, %v9934_v37  ;;  %v632_v33 = vadd.f32 %v10011_v44, %v608_v26  ;;  %v633_v37 = vadd.f32 %v10011_v44, %v609_v19 }
 0x22e   :  { %v534_v18 = vmul.f32 0.03125, %v514_v25  ;;  %9018 = vrsqrt.f32 %v552_v22  ;;  %v611_v50 = vmul.f32 %v10003_v7, %v587_v51 }
 0x22f   :  { %v9009_v43 = vpop.eup %9008  ;;  %v610_v29 = vmul.f32 %v10003_v7, %v586_v31  ;;  %v647_v11 = vpack.c.bf16 %v632_v33, %v631_v15 }
 0x230   :  { %v554_v49 = vadd.f32 1e-06, %v534_v18  ;;  %v9011_v47 = vpop.eup %9010  ;;  %v589_v57 = vmul.f32 %v9009_v43, %v9940_v34  ;;  %v635_v63 = vadd.f32 %v10011_v44, %v611_v50 }
 0x231   :  { %v634_v30 = vadd.f32 %v10011_v44, %v610_v29  ;;  %v588_v58 = vmul.f32 %v9011_v47, %v9946_v59  ;;  %8016 = vmatprep.mubr.msk.bf16.mxu1 %vm333_vm1, %v647_v11  ;;  %8040 = vmatprep.mubr.msk.bf16.mxu0 %vm333_vm1, %v647_v11 }
 0x232   :  { %9020 = vrsqrt.f32 %v554_v49  ;;  %v613_v34 = vmul.f32 %v10003_v7, %v589_v57 }
 0x233   :  { %v9013_v6 = vpop.eup %9012  ;;  %v648_v2 = vpack.c.bf16 %v634_v30, %v633_v37  ;;  %v612_v28 = vmul.f32 %v10003_v7, %v588_v58 }
 0x234   :  { %v9015_v3 = vpop.eup %9014  ;;  %v591_v4 = vmul.f32 %v9013_v6, %v9952_v20  ;;  %v637_v17 = vadd.f32 %v10011_v44, %v613_v34 }
 0x235   :  { %8017 = vmatmul.mubr.msk.bf16.gmra.mrb[8].mxu1 %vm333_vm1, %v648_v2  ;;  %8041 = vmatmul.mubr.msk.bf16.gmra.mrb[28].mxu0 %vm333_vm1, %v648_v2  ;;  %v636_v0 = vadd.f32 %v10011_v44, %v612_v28  ;;  %v590_v59 = vmul.f32 %v9015_v3, %v9958_v13 }
 0x236   :  { %v615_v13 = vmul.f32 %v10003_v7, %v591_v4 }
 0x237   :  { %v9017_v5 = vpop.eup %9016  ;;  %v649_v8 = vpack.c.bf16 %v636_v0, %v635_v63  ;;  %v614_v48 = vmul.f32 %v10003_v7, %v590_v59 }
 0x238   :  { %v9019_v22 = vpop.eup %9018  ;;  %v593_v25 = vmul.f32 %v9017_v5, %v9967_v27  ;;  %v639_v27 = vadd.f32 %v10011_v44, %v615_v13 }
 0x239   :  { %8020 = vmatprep.mubr.msk.bf16.mxu1 %vm333_vm1, %v649_v8  ;;  %8044 = vmatprep.mubr.msk.bf16.mxu0 %vm333_vm1, %v649_v8  ;;  %v638_v26 = vadd.f32 %v10011_v44, %v614_v48  ;;  %v592_v51 = vmul.f32 %v9019_v22, %v9972_v32 }
 0x23a   :  { %v617_v15 = vmul.f32 %v10003_v7, %v593_v25 }
 0x23b   :  { %v650_v18 = vpack.c.bf16 %v638_v26, %v637_v17  ;;  %v616_v31 = vmul.f32 %v10003_v7, %v592_v51 }
 0x23c   :  { %v9021_v20 = vpop.eup %9020  ;;  %v641_v49 = vadd.f32 %v10011_v44, %v617_v15 }
 0x23d   :  { %v594_v19 = vmul.f32 %v9021_v20, %v9981_v40  ;;  %8021 = vmatmul.mubr.msk.bf16.gmra.mrb[12].mxu1 %vm333_vm1, %v650_v18  ;;  %8045 = vmatmul.mubr.msk.bf16.gmra.mrb[32].mxu0 %vm333_vm1, %v650_v18  ;;  %v640_v33 = vadd.f32 %v10011_v44, %v616_v31 }
 0x23f   :  { %v618_v32 = vmul.f32 %v10003_v7, %v594_v19  ;;  %v651_v43 = vpack.c.bf16 %v640_v33, %v639_v27  ;;  %v13761_v7 = vmov 0.0  }
 0x240   :  { %8076 = vmatprep.subr.bf16.mxu0 %v13761_v7  ;;  %8106 = vmatprep.subr.bf16.mxu1 %v13761_v7 }
 0x241   :  { %v642_v29 = vadd.f32 %v10011_v44, %v618_v32  ;;  %8024 = vmatprep.mubr.msk.bf16.mxu1 %vm333_vm1, %v651_v43  ;;  %8048 = vmatprep.mubr.msk.bf16.mxu0 %vm333_vm1, %v651_v43 }
 0x243   :  { %v652_v40 = vpack.c.bf16 %v642_v29, %v641_v49 }
 0x245   :  { %8025 = vmatmul.mubr.msk.bf16.gmra.mrb[16].mxu1 %vm333_vm1, %v652_v40  ;;  %8049 = vmatmul.mubr.msk.bf16.gmra.mrb[36].mxu0 %vm333_vm1, %v652_v40 }
 0x246   :  { %8056 = vmatprep.mubr.msk.bf16.mxu1 %vm333_vm1, %v10017_v16  ;;  %8086 = vmatprep.mubr.msk.bf16.mxu0 %vm9608_vm2, %v13761_v7  ;;  %v10133_v16 = vld [vmem:[%s13759_s3 + $0x5a] ss:$0 sm:$0xff] }
 0x24d   :  { %8057 = vmatmul.mubr.msk.bf16.vlgmr.msra.gmra.mrb[20].mxu1 %vm333_vm1, %v10032_v12 }
 0x24e   :  { %8060 = vmatprep.mubr.msk.bf16.mxu1 %vm333_vm1, %v10049_v14  ;;  %v10138_v14 = vld [vmem:[%s13759_s3 + $0x5b] ss:$0 sm:$0xff] }
 0x255   :  { %8061 = vmatmul.mubr.msk.bf16.gmra.mrb[24].mxu1 %vm333_vm1, %v10060_v9 }
 0x256   :  { %8064 = vmatprep.mubr.msk.bf16.mxu1 %vm333_vm1, %v647_v11 }
 0x25d   :  { %8065 = vmatmul.mubr.msk.bf16.gmra.mrb[28].mxu1 %vm333_vm1, %v648_v2 }
 0x25e   :  { %8068 = vmatprep.mubr.msk.bf16.mxu1 %vm333_vm1, %v649_v8 }
 0x265   :  { %8069 = vmatmul.mubr.msk.bf16.gmra.mrb[32].mxu1 %vm333_vm1, %v650_v18 }
 0x266   :  { %8072 = vmatprep.mubr.msk.bf16.mxu1 %vm333_vm1, %v651_v43 }
 0x26d   :  { %8073 = vmatmul.mubr.msk.bf16.gmra.mrb[36].mxu1 %vm333_vm1, %v652_v40 }
 0x26e   :  { %8116 = vmatprep.mubr.msk.bf16.mxu1 %vm9608_vm2, %v13761_v7 }
 0x2f8   :  { %v8010_v44 = vpop.f32.mrb[0].mxu1  ;;  %v8034_v12 = vpop.f32.mrb[20].mxu0 }
 0x2f9   :  { %v738_v9 = vpop.f32.mrb[1].mxu1  ;;  %v882_v47 = vpop.f32.mrb[21].mxu0  ;;  %v747_v57 = vadd.f32 %v8010_v44, %v10133_v16  ;;  %v891_v37 = vadd.f32 %v8034_v12, %v10138_v14 }
 0x2fa   :  { %v8011_v11 = vpop.f32.mrb[2].mxu1  ;;  %v8035_v50 = vpop.f32.mrb[22].mxu0  ;;  %v739_v28 = vadd.f32 %v10133_v16, %v738_v9  ;;  %v883_v3 = vadd.f32 %v10138_v14, %v882_v47 }
 0x2fb   :  { %v750_v30 = vadd.f32 %v8011_v11, %v10133_v16  ;;  %v894_v58 = vadd.f32 %v8035_v50, %v10138_v14  ;;  %v741_v6 = vpop.f32.mrb[3].mxu1  ;;  %v885_v2 = vpop.f32.mrb[23].mxu0 }
 0x2fc   :  { %v742_v63 = vadd.f32 %v10133_v16, %v741_v6  ;;  %v886_v34 = vadd.f32 %v10138_v14, %v885_v2 }
 0x2fd   :  { %v962_v0 = vpack.c.bf16 %v894_v58, %v891_v37  ;;  %v10148_v59 = vpack.c.bf16 %v750_v30, %v747_v57  ;;  %v20_v57 = vlaneseq }
 0x2fe   :  { %v10150_v4 = vpack.c.bf16 %v742_v63, %v739_v28  ;;  %v961_v5 = vpack.c.bf16 %v886_v34, %v883_v3 }
 0x2ff   :  { %v1148_v47 = vsel %vm333_vm1, %v962_v0, 0 }
 0x300   :  { %v8014_v8 = vpop.f32.mrb[4].mxu1  ;;  %v8038_v48 = vpop.f32.mrb[24].mxu0  ;;  %v1145_v22 = vsel %vm333_vm1, %v961_v5, 0 }
 0x301   :  { %v754_v17 = vpop.f32.mrb[5].mxu1  ;;  %v898_v25 = vpop.f32.mrb[25].mxu0  ;;  %8077 = vmatpush3.bf16.xpose.msra.mxu0 %v1145_v22  ;;  %8107 = vmatpush3.bf16.xpose.msra.mxu1 %v1145_v22  ;;  %v763_v13 = vadd.f32 %v8014_v8, %v10133_v16  ;;  %v10157_v20 = vadd.f32 %v8038_v48, %v10138_v14 }
 0x302   :  { %v8015_v26 = vpop.f32.mrb[6].mxu1  ;;  %v8039_v51 = vpop.f32.mrb[26].mxu0  ;;  %8078 = vmatprep.subr.bf16.mxu0 %v13761_v7  ;;  %8108 = vmatprep.subr.bf16.mxu1 %v13761_v7  ;;  %v755_v27 = vadd.f32 %v10133_v16, %v754_v17  ;;  %v899_v33 = vadd.f32 %v10138_v14, %v898_v25  ;;  %v21_v17 = vand.u32 127, %v20_v57 }
 0x303   :  { %v766_v18 = vadd.f32 %v8015_v26, %v10133_v16  ;;  %v10161_v31 = vadd.f32 %v8039_v51, %v10138_v14  ;;  %v757_v19 = vpop.f32.mrb[7].mxu1  ;;  %v901_v15 = vpop.f32.mrb[27].mxu0 }
 0x304   :  { %v758_v32 = vadd.f32 %v10133_v16, %v757_v19  ;;  %v902_v43 = vadd.f32 %v10138_v14, %v901_v15  ;;  %vm25_vm3 = vcmp.ge.s32.totalorder %v21_v17, 16  ;;  %vm26_vm4 = vcmp.lt.s32.totalorder %v21_v17, 32 }
 0x305   :  { %v964_v49 = vpack.c.bf16 %v10161_v31, %v10157_v20  ;;  %v10169_v29 = vpack.c.bf16 %v766_v18, %v763_v13  ;;  %vm23_vm5 = vcmp.lt.s32.totalorder %v21_v17, 16  ;;  %vm10229_vm6 = vmand %vm25_vm3, %vm26_vm4 }
 0x306   :  { %v963_v40 = vpack.c.bf16 %v902_v43, %v899_v33  ;;  %v10171_v44 = vpack.c.bf16 %v758_v32, %v755_v27  ;;  %vm10237_vm7 = vmpackc.low %vm23_vm5, %vm23_vm5 }
 0x307   :  { %vm1355_vm8 = vmpackc.low %vm10229_vm6, %vm10229_vm6 }
 0x308   :  { %v8018_v12 = vpop.f32.mrb[8].mxu1  ;;  %v8042_v9 = vpop.f32.mrb[28].mxu0  ;;  %v1151_v18 = vsel %vm333_vm1, %v963_v40, 0 }
 0x309   :  { %v770_v11 = vpop.f32.mrb[9].mxu1  ;;  %v914_v50 = vpop.f32.mrb[29].mxu0  ;;  %8079 = vmatpush3.bf16.xpose.msra.mxu0 %v1148_v47  ;;  %8109 = vmatpush3.bf16.xpose.msra.mxu1 %v1148_v47  ;;  %v779_v58 = vadd.f32 %v8018_v12, %v10133_v16  ;;  %v10178_v6 = vadd.f32 %v8042_v9, %v10138_v14 }
 0x30a   :  { %v8019_v37 = vpop.f32.mrb[10].mxu1  ;;  %v8043_v30 = vpop.f32.mrb[30].mxu0  ;;  %8080 = vmatprep.subr.bf16.mxu0 %v13761_v7  ;;  %8110 = vmatprep.subr.bf16.mxu1 %v13761_v7  ;;  %v771_v34 = vadd.f32 %v10133_v16, %v770_v11  ;;  %v10186_v0 = vadd.f32 %v10138_v14, %v914_v50 }
 0x30b   :  { %v782_v2 = vadd.f32 %v8019_v37, %v10133_v16  ;;  %v10182_v28 = vadd.f32 %v8043_v30, %v10138_v14  ;;  %v773_v3 = vpop.f32.mrb[11].mxu1  ;;  %v917_v63 = vpop.f32.mrb[31].mxu0 }
 0x30c   :  { %v774_v5 = vadd.f32 %v10133_v16, %v773_v3  ;;  %v10190_v8 = vadd.f32 %v10138_v14, %v917_v63 }
 0x30d   :  { %v10192_v48 = vpack.c.bf16 %v782_v2, %v779_v58  ;;  %v966_v22 = vpack.c.bf16 %v10182_v28, %v10178_v6 }
 0x30e   :  { %v965_v25 = vpack.c.bf16 %v10190_v8, %v10186_v0  ;;  %v10198_v26 = vpack.c.bf16 %v774_v5, %v771_v34  ;;  %v1120_v5 = vshrl.u32 %v20_v57, 7 }
 0x310   :  { %v8022_v51 = vpop.f32.mrb[12].mxu1  ;;  %v8046_v13 = vpop.f32.mrb[32].mxu0 }
 0x311   :  { %v786_v19 = vpop.f32.mrb[13].mxu1  ;;  %v930_v15 = vpop.f32.mrb[33].mxu0  ;;  %8081 = vmatpush3.bf16.xpose.msra.mxu0 %v1151_v18  ;;  %8111 = vmatpush3.bf16.xpose.msra.mxu1 %v1151_v18  ;;  %v795_v32 = vadd.f32 %v8022_v51, %v10133_v16  ;;  %v10205_v43 = vadd.f32 %v8046_v13, %v10138_v14  ;;  %v1154_v18 = vsel %vm333_vm1, %v964_v49, 0 }
 0x312   :  { %v8023_v27 = vpop.f32.mrb[14].mxu1  ;;  %v8047_v33 = vpop.f32.mrb[34].mxu0  ;;  %8082 = vmatprep.subr.bf16.mxu0 %v13761_v7  ;;  %8112 = vmatprep.subr.bf16.mxu1 %v13761_v7  ;;  %v787_v11 = vadd.f32 %v10133_v16, %v786_v19  ;;  %v10213_v50 = vadd.f32 %v10138_v14, %v930_v15  ;;  %v10281_v19 = vld [vmem:[%s13759_s3 + $0x5c] ss:$0 sm:$0xff] }
 0x313   :  { %v798_v12 = vadd.f32 %v8023_v27, %v10133_v16  ;;  %v10209_v40 = vadd.f32 %v8047_v33, %v10138_v14  ;;  %v789_v9 = vpop.f32.mrb[15].mxu1  ;;  %v933_v47 = vpop.f32.mrb[35].mxu0 }
 0x314   :  { %v790_v37 = vadd.f32 %v10133_v16, %v789_v9  ;;  %v10217_v30 = vadd.f32 %v10138_v14, %v933_v47 }
 0x315   :  { %v968_v58 = vpack.c.bf16 %v10209_v40, %v10205_v43  ;;  %v10221_v2 = vpack.c.bf16 %v798_v12, %v795_v32 }
 0x316   :  { %v967_v3 = vpack.c.bf16 %v10217_v30, %v10213_v50  ;;  %v10225_v63 = vpack.c.bf16 %v790_v37, %v787_v11  ;;  %v1121_v11 = vsub.s32 0, %v1120_v5 }
 0x318   :  { %v8026_v51 = vpop.f32.mrb[16].mxu1  ;;  %v8050_v13 = vpop.f32.mrb[36].mxu0 }
 0x319   :  { %v811_v15 = vadd.f32 %v8026_v51, %v10133_v16  ;;  %v10243_v17 = vadd.f32 %v8050_v13, %v10138_v14  ;;  %v802_v27 = vpop.f32.mrb[17].mxu1  ;;  %v946_v33 = vpop.f32.mrb[37].mxu0  ;;  %8083 = vmatpush3.bf16.xpose.msra.mxu0 %v1154_v18  ;;  %8113 = vmatpush3.bf16.xpose.msra.mxu1 %v1154_v18  ;;  %v1118_v51 = vsel %vm10237_vm7, 65537, %v9606_v1  ;;  %v1356_v13 = vsel %vm1355_vm8, 65537, %v9606_v1 }
 0x31a   :  { %v803_v20 = vadd.f32 %v10133_v16, %v802_v27  ;;  %v10250_v31 = vadd.f32 %v10138_v14, %v946_v33  ;;  %v8027_v49 = vpop.f32.mrb[18].mxu1  ;;  %v8051_v57 = vpop.f32.mrb[38].mxu0  ;;  %8084 = vmatprep.subr.bf16.mxu0 %v13761_v7  ;;  %8114 = vmatprep.subr.bf16.mxu1 %v13761_v7  ;;  %v1157_v1 = vsel %vm333_vm1, %v965_v25, 0 }
 0x31b   :  { %v814_v32 = vadd.f32 %v8027_v49, %v10133_v16  ;;  %v10256_v12 = vadd.f32 %v8051_v57, %v10138_v14  ;;  %v805_v9 = vpop.f32.mrb[19].mxu1  ;;  %v949_v47 = vpop.f32.mrb[39].mxu0 }
 0x31c   :  { %v806_v37 = vadd.f32 %v10133_v16, %v805_v9  ;;  %v10260_v34 = vadd.f32 %v10138_v14, %v949_v47  ;;  %v10274_v16 = vrot.slane %v1118_v51, %v1121_v11  ;;  %v10276_v14 = vrot.slane %v1356_v13, %v1121_v11 }
 0x31d   :  { %v970_v18 = vpack.c.bf16 %v10256_v12, %v10243_v17  ;;  %v10268_v27 = vpack.c.bf16 %v814_v32, %v811_v15 }
 0x31e   :  { %v969_v33 = vpack.c.bf16 %v10260_v34, %v10250_v31  ;;  %v10272_v5 = vpack.c.bf16 %v806_v37, %v803_v20  ;;  %vm1123_vm9 = vcmp.ne.s16.totalorder %v10274_v16, 0  ;;  %vm1361_vm10 = vcmp.ne.s16.totalorder %v10276_v14, 0 }
 0x31f   :  { %v1124_v11 = vsel %vm1123_vm9, %v10150_v4, 0  ;;  %v1362_v37 = vsel %vm1361_vm10, %v10150_v4, 0  ;;  %v1752_v17 = vsel %vm1123_vm9, %v10225_v63, 0  ;;  %v1753_v12 = vsel %vm1123_vm9, %v10221_v2, 0 }
 0x320   :  { %v8058_v49 = vpop.f32.mrb[20].mxu1 }
 0x321   :  { %v1026_v15 = vpop.f32.mrb[21].mxu1  ;;  %8085 = vmatpush3.bf16.xpose.msra.mxu0 %v1157_v1  ;;  %8115 = vmatpush3.bf16.xpose.msra.mxu1 %v1157_v1  ;;  %v1035_v57 = vadd.f32 %v8058_v49, %v10281_v19  ;;  %v10314_v49 = vsel %vm333_vm1, %v966_v22, 0 }
 0x322   :  { %v8059_v20 = vpop.f32.mrb[22].mxu1  ;;  %8136 = vmatprep.subr.bf16.mxu0 %v13761_v7  ;;  %8196 = vmatprep.subr.bf16.mxu1 %v13761_v7  ;;  %v1027_v0 = vadd.f32 %v10281_v19, %v1026_v15 }
 0x323   :  { %v1038_v32 = vadd.f32 %v8059_v20, %v10281_v19  ;;  %v1029_v9 = vpop.f32.mrb[23].mxu1 }
 0x324   :  { %v1030_v8 = vadd.f32 %v10281_v19, %v1029_v9 }
 0x325   :  { %v10295_v25 = vpack.c.bf16 %v1038_v32, %v1035_v57 }
 0x326   :  { %v10297_v47 = vpack.c.bf16 %v1030_v8, %v1027_v0  ;;  %v1125_v0 = vsel %vm1123_vm9, %v10148_v59, 0  ;;  %v1363_v8 = vsel %vm1361_vm10, %v10148_v59, 0 }
 0x327   :  { %v1566_v22 = vsel %vm1361_vm10, %v10295_v25, 0 }
 0x328   :  { %v8062_v51 = vpop.f32.mrb[24].mxu1  ;;  %8087 = vmatmul.mubr.msk.bf16.vlgmr.msra.gmra.mrb[40].mxu0 %vm333_vm1, %v1124_v11  ;;  %8117 = vmatmul.mubr.msk.bf16.vlgmr.msra.gmra.mrb[40].mxu1 %vm333_vm1, %v1362_v37  ;;  %v1565_v13 = vsel %vm1361_vm10, %v10297_v47, 0 }
 0x329   :  { %v1042_v1 = vpop.f32.mrb[25].mxu1  ;;  %8137 = vmatpush3.bf16.msra.mxu0 %v1565_v13  ;;  %8197 = vmatpush3.bf16.xpose.msra.mxu1 %v10314_v49  ;;  %v1051_v15 = vadd.f32 %v8062_v51, %v10281_v19  ;;  %v10350_v51 = vsel %vm333_vm1, %v967_v3, 0 }
 0x32a   :  { %v8063_v4 = vpop.f32.mrb[26].mxu1  ;;  %8138 = vmatprep.subr.bf16.mxu0 %v13761_v7  ;;  %8090 = vmatprep.mubr.msk.bf16.mxu0 %vm9608_vm2, %v13761_v7  ;;  %v1043_v6 = vadd.f32 %v10281_v19, %v1042_v1 }
 0x32b   :  { %v1054_v20 = vadd.f32 %v8063_v4, %v10281_v19  ;;  %v1045_v57 = vpop.f32.mrb[27].mxu1  ;;  %8120 = vmatprep.mubr.msk.bf16.mxu1 %vm9608_vm2, %v13761_v7  ;;  %8198 = vmatprep.subr.bf16.mxu1 %v13761_v7 }
 0x32c   :  { %v1046_v28 = vadd.f32 %v10281_v19, %v1045_v57 }
 0x32d   :  { %8139 = vmatpush3.bf16.msra.mxu0 %v1566_v22  ;;  %v10330_v32 = vpack.c.bf16 %v1054_v20, %v1051_v15 }
 0x32e   :  { %8140 = vmatprep.subr.bf16.mxu0 %v13761_v7  ;;  %v10333_v9 = vpack.c.bf16 %v1046_v28, %v1043_v6  ;;  %v1126_v6 = vsel %vm1123_vm9, %v10171_v44, 0  ;;  %v1364_v28 = vsel %vm1361_vm10, %v10171_v44, 0 }
 0x32f   :  { %v1568_v3 = vsel %vm1361_vm10, %v10330_v32, 0 }
 0x330   :  { %v8066_v11 = vpop.f32.mrb[28].mxu1  ;;  %8091 = vmatmul.mubr.msk.bf16.gmra.mrb[44].mxu0 %vm333_vm1, %v1125_v0  ;;  %8121 = vmatmul.mubr.msk.bf16.gmra.mrb[44].mxu1 %vm333_vm1, %v1363_v8  ;;  %v1567_v37 = vsel %vm1361_vm10, %v10333_v9, 0  ;;  %v1778_v8 = vsel %vm333_vm1, %v968_v58, 0 }
 0x331   :  { %v1067_v13 = vadd.f32 %v8066_v11, %v10281_v19  ;;  %v1058_v1 = vpop.f32.mrb[29].mxu1  ;;  %8141 = vmatpush3.bf16.msra.mxu0 %v1567_v37  ;;  %8199 = vmatpush3.bf16.xpose.msra.mxu1 %v10350_v51 }
 0x332   :  { %v8067_v59 = vpop.f32.mrb[30].mxu1  ;;  %8142 = vmatprep.subr.bf16.mxu0 %v13761_v7  ;;  %8094 = vmatprep.mubr.msk.bf16.mxu0 %vm9608_vm2, %v13761_v7  ;;  %v1059_v50 = vadd.f32 %v10281_v19, %v1058_v1 }
 0x333   :  { %v1070_v4 = vadd.f32 %v8067_v59, %v10281_v19  ;;  %v1061_v15 = vpop.f32.mrb[31].mxu1  ;;  %8124 = vmatprep.mubr.msk.bf16.mxu1 %vm9608_vm2, %v13761_v7  ;;  %8200 = vmatprep.subr.bf16.mxu1 %v13761_v7 }
 0x334   :  { %v1062_v30 = vadd.f32 %v10281_v19, %v1061_v15  ;;  %v1365_v15 = vsel %vm1361_vm10, %v10169_v29, 0 }
 0x335   :  { %8143 = vmatpush3.bf16.msra.mxu0 %v1568_v3  ;;  %v10366_v20 = vpack.c.bf16 %v1070_v4, %v1067_v13  ;;  %v1127_v4 = vsel %vm1123_vm9, %v10169_v29, 0 }
 0x336   :  { %8144 = vmatprep.subr.bf16.mxu0 %v13761_v7  ;;  %v10369_v57 = vpack.c.bf16 %v1062_v30, %v1059_v50  ;;  %v1781_v30 = vsel %vm333_vm1, %v969_v33, 0 }
 0x338   :  { %v8070_v22 = vpop.f32.mrb[32].mxu1  ;;  %8095 = vmatmul.mubr.msk.bf16.gmra.mrb[48].mxu0 %vm333_vm1, %v1126_v6  ;;  %8125 = vmatmul.mubr.msk.bf16.gmra.mrb[48].mxu1 %vm333_vm1, %v1364_v28  ;;  %v1569_v0 = vsel %vm1361_vm10, %v10369_v57, 0 }
 0x339   :  { %v1083_v11 = vadd.f32 %v8070_v22, %v10281_v19  ;;  %v1074_v37 = vpop.f32.mrb[33].mxu1  ;;  %8145 = vmatpush3.bf16.msra.mxu0 %v1569_v0  ;;  %8201 = vmatpush3.bf16.xpose.msra.mxu1 %v1778_v8 }
 0x33a   :  { %v1075_v44 = vadd.f32 %v10281_v19, %v1074_v37  ;;  %v8071_v13 = vpop.f32.mrb[34].mxu1  ;;  %8098 = vmatprep.mubr.msk.bf16.mxu0 %vm9608_vm2, %v13761_v7  ;;  %8128 = vmatprep.mubr.msk.bf16.mxu1 %vm9608_vm2, %v13761_v7  ;;  %v1366_v37 = vsel %vm1361_vm10, %v10198_v26, 0 }
 0x33b   :  { %v1086_v1 = vadd.f32 %v8071_v13, %v10281_v19  ;;  %v1077_v59 = vpop.f32.mrb[35].mxu1  ;;  %8202 = vmatprep.subr.bf16.mxu1 %v13761_v7  ;;  %8166 = vmatprep.subr.bf16.mxu0 %v13761_v7 }
 0x33c   :  { %v1078_v43 = vadd.f32 %v10281_v19, %v1077_v59 }
 0x33d   :  { %v10396_v40 = vpack.c.bf16 %v1086_v1, %v1083_v11  ;;  %v1128_v11 = vsel %vm1123_vm9, %v10198_v26, 0  ;;  %v1751_v26 = vsel %vm1123_vm9, %v10192_v48, 0 }
 0x33e   :  { %v10398_v58 = vpack.c.bf16 %v1078_v43, %v1075_v44  ;;  %v1981_v44 = vsel %vm1361_vm10, %v10221_v2, 0 }
 0x340   :  { %v8074_v50 = vpop.f32.mrb[36].mxu1  ;;  %8099 = vmatmul.mubr.msk.bf16.gmra.mrb[52].mxu0 %vm333_vm1, %v1127_v4  ;;  %8129 = vmatmul.mubr.msk.bf16.gmra.mrb[52].mxu1 %vm333_vm1, %v1365_v15 }
 0x341   :  { %v1099_v3 = vadd.f32 %v8074_v50, %v10281_v19  ;;  %v1090_v6 = vpop.f32.mrb[37].mxu1  ;;  %8203 = vmatpush3.bf16.xpose.msra.mxu1 %v1781_v30  ;;  %8102 = vmatprep.mubr.msk.bf16.mxu0 %vm9608_vm2, %v13761_v7 }
 0x342   :  { %v1091_v28 = vadd.f32 %v10281_v19, %v1090_v6  ;;  %v8075_v29 = vpop.f32.mrb[38].mxu1  ;;  %8132 = vmatprep.mubr.msk.bf16.mxu1 %vm9608_vm2, %v13761_v7  ;;  %8204 = vmatprep.subr.bf16.mxu1 %v13761_v7 }
 0x343   :  { %v1102_v22 = vadd.f32 %v8075_v29, %v10281_v19  ;;  %v1093_v31 = vpop.f32.mrb[39].mxu1 }
 0x344   :  { %v1094_v34 = vadd.f32 %v10281_v19, %v1093_v31  ;;  %v1784_v19 = vsel %vm333_vm1, %v970_v18, 0  ;;  %v1754_v18 = vsel %vm1123_vm9, %v10272_v5, 0 }
 0x345   :  { %v10421_v33 = vpack.c.bf16 %v1102_v22, %v1099_v3 }
 0x346   :  { %v10423_v0 = vpack.c.bf16 %v1094_v34, %v1091_v28 }
 0x347   :  { %13830 = vst [vmem:[#allocation22_spill] sm:$0xff] %v10421_v33 }
 0x348   :  { %8103 = vmatmul.mubr.msk.bf16.gmra.mrb[56].mxu0 %vm333_vm1, %v1128_v11  ;;  %8133 = vmatmul.mubr.msk.bf16.gmra.mrb[56].mxu1 %vm333_vm1, %v1366_v37 }
 0x349   :  { %8205 = vmatpush3.bf16.xpose.msra.mxu1 %v1784_v19  ;;  %8206 = vmatprep.mubr.msk.bf16.mxu1 %vm9608_vm2, %v13761_v7 }
 0x34a   :  { %8226 = vmatprep.subr.bf16.mxu1 %v13761_v7  ;;  %8146 = vmatprep.mubr.msk.bf16.mxu0 %vm9608_vm2, %v13761_v7 }
 0x350   :  { %8207 = vmatmul.mubr.msk.bf16.vlgmr.msra.gmra.mrb[60].mxu1 %vm333_vm1, %v1751_v26 }
 0x351   :  { %8227 = vmatpush3.bf16.xpose.msra.mxu1 %v10314_v49  ;;  %8210 = vmatprep.mubr.msk.bf16.mxu1 %vm9608_vm2, %v13761_v7  ;;  %v1755_v49 = vsel %vm1123_vm9, %v10268_v27, 0 }
 0x352   :  { %8228 = vmatprep.subr.bf16.mxu1 %v13761_v7 }
 0x358   :  { %8211 = vmatmul.mubr.msk.bf16.gmra.mrb[64].mxu1 %vm333_vm1, %v1752_v17 }
 0x359   :  { %8229 = vmatpush3.bf16.xpose.msra.mxu1 %v10350_v51  ;;  %8214 = vmatprep.mubr.msk.bf16.mxu1 %vm9608_vm2, %v13761_v7  ;;  %v1979_v51 = vsel %vm1361_vm10, %v10192_v48, 0  ;;  %v1982_v48 = vsel %vm1361_vm10, %v10272_v5, 0 }
 0x35a   :  { %8230 = vmatprep.subr.bf16.mxu1 %v13761_v7 }
 0x360   :  { %8215 = vmatmul.mubr.msk.bf16.gmra.mrb[68].mxu1 %vm333_vm1, %v1753_v12 }
 0x361   :  { %8231 = vmatpush3.bf16.xpose.msra.mxu1 %v1778_v8  ;;  %8218 = vmatprep.mubr.msk.bf16.mxu1 %vm9608_vm2, %v13761_v7  ;;  %v1980_v8 = vsel %vm1361_vm10, %v10225_v63, 0  ;;  %v1983_v63 = vsel %vm1361_vm10, %v10268_v27, 0 }
 0x362   :  { %8232 = vmatprep.subr.bf16.mxu1 %v13761_v7 }
 0x368   :  { %8219 = vmatmul.mubr.msk.bf16.gmra.mrb[72].mxu1 %vm333_vm1, %v1754_v18 }
 0x369   :  { %8233 = vmatpush3.bf16.xpose.msra.mxu1 %v1781_v30  ;;  %8222 = vmatprep.mubr.msk.bf16.mxu1 %vm9608_vm2, %v13761_v7 }
 0x36a   :  { %8234 = vmatprep.subr.bf16.mxu1 %v13761_v7 }
 0x370   :  { %8223 = vmatmul.mubr.msk.bf16.gmra.mrb[76].mxu1 %vm333_vm1, %v1755_v49 }
 0x371   :  { %8235 = vmatpush3.bf16.xpose.msra.mxu1 %v1784_v19  ;;  %8236 = vmatprep.mubr.msk.bf16.mxu1 %vm9608_vm2, %v13761_v7 }
 0x378   :  { %8237 = vmatmul.mubr.msk.bf16.vlgmr.msra.gmra.mrb[80].mxu1 %vm333_vm1, %v1979_v51 }
 0x379   :  { %8240 = vmatprep.mubr.msk.bf16.mxu1 %vm9608_vm2, %v13761_v7 }
 0x380   :  { %8241 = vmatmul.mubr.msk.bf16.gmra.mrb[84].mxu1 %vm333_vm1, %v1980_v8 }
 0x381   :  { %8244 = vmatprep.mubr.msk.bf16.mxu1 %vm9608_vm2, %v13761_v7 }
 0x388   :  { %8245 = vmatmul.mubr.msk.bf16.gmra.mrb[88].mxu1 %vm333_vm1, %v1981_v44 }
 0x389   :  { %8248 = vmatprep.mubr.msk.bf16.mxu1 %vm9608_vm2, %v13761_v7 }
 0x390   :  { %8249 = vmatmul.mubr.msk.bf16.gmra.mrb[92].mxu1 %vm333_vm1, %v1982_v48 }
 0x391   :  { %8252 = vmatprep.mubr.msk.bf16.mxu1 %vm9608_vm2, %v13761_v7 }
 0x398   :  { %8253 = vmatmul.mubr.msk.bf16.gmra.mrb[96].mxu1 %vm333_vm1, %v1983_v63 }
 0x3fb   :  { %v10506_v2 = vpop.f32.mrb[40].mxu0  ;;  %v10508_v13 = vpop.f32.mrb[40].mxu1 }
 0x3fc   :  { %v8088_v1 = vpop.f32.mrb[41].mxu0  ;;  %v8118_v59 = vpop.f32.mrb[41].mxu1  ;;  %v1455_v5 = vsel %vm1232_vm11, %v10508_v13, -inf }
 0x3fd   :  { %v10512_v43 = vpop.f32.mrb[42].mxu0  ;;  %1456 = vmax.xlane.f32.xlu1 %v1455_v5  ;;  %v10514_v4 = vpop.f32.mrb[42].mxu1 }
 0x3fe   :  { %v8089_v15 = vpop.f32.mrb[43].mxu0  ;;  %v8119_v50 = vpop.f32.mrb[43].mxu1  ;;  %v1458_v27 = vsel %vm1232_vm11, %v10514_v4, -inf }
 0x3ff   :  { %1459 = vmax.xlane.f32.xlu0 %v1458_v27 }
 0x403   :  { %v10518_v30 = vpop.f32.mrb[44].mxu0  ;;  %v10520_v3 = vpop.f32.mrb[44].mxu1 }
 0x404   :  { %v8092_v6 = vpop.f32.mrb[45].mxu0  ;;  %v8122_v28 = vpop.f32.mrb[45].mxu1  ;;  %v1461_v29 = vsel %vm1232_vm11, %v10520_v3, -inf }
 0x405   :  { %v10524_v22 = vpop.f32.mrb[46].mxu0  ;;  %1462 = vmax.xlane.f32.xlu1 %v1461_v29  ;;  %v10526_v31 = vpop.f32.mrb[46].mxu1 }
 0x406   :  { %v8093_v34 = vpop.f32.mrb[47].mxu0  ;;  %v8123_v11 = vpop.f32.mrb[47].mxu1  ;;  %v1464_v37 = vsel %vm1232_vm11, %v10526_v31, -inf }
 0x407   :  { %1465 = vmax.xlane.f32.xlu0 %v1464_v37 }
 0x40b   :  { %v10530_v19 = vpop.f32.mrb[48].mxu0  ;;  %v10532_v26 = vpop.f32.mrb[48].mxu1 }
 0x40c   :  { %v8096_v17 = vpop.f32.mrb[49].mxu0  ;;  %v8126_v12 = vpop.f32.mrb[49].mxu1  ;;  %v1467_v18 = vsel %vm1232_vm11, %v10532_v26, -inf }
 0x40d   :  { %v10536_v49 = vpop.f32.mrb[50].mxu0  ;;  %1468 = vmax.xlane.f32.xlu1 %v1467_v18  ;;  %v10538_v51 = vpop.f32.mrb[50].mxu1 }
 0x40e   :  { %v8097_v8 = vpop.f32.mrb[51].mxu0  ;;  %v8127_v44 = vpop.f32.mrb[51].mxu1  ;;  %v1470_v48 = vsel %vm1232_vm11, %v10538_v51, -inf }
 0x40f   :  { %1471 = vmax.xlane.f32.xlu0 %v1470_v48 }
 0x413   :  { %v10542_v63 = vpop.f32.mrb[52].mxu0  ;;  %v10544_v1 = vpop.f32.mrb[52].mxu1 }
 0x414   :  { %v8100_v59 = vpop.f32.mrb[53].mxu0  ;;  %v8130_v5 = vpop.f32.mrb[53].mxu1  ;;  %v1473_v15 = vsel %vm1232_vm11, %v10544_v1, -inf }
 0x415   :  { %v10548_v50 = vpop.f32.mrb[54].mxu0  ;;  %1474 = vmax.xlane.f32.xlu1 %v1473_v15  ;;  %v10550_v27 = vpop.f32.mrb[54].mxu1  ;;  %v1233_v5 = vsel %vm1232_vm11, %v10506_v2, -inf  ;;  %v1236_v15 = vsel %vm1232_vm11, %v10512_v43, -inf }
 0x416   :  { %v8101_v6 = vpop.f32.mrb[55].mxu0  ;;  %v8131_v28 = vpop.f32.mrb[55].mxu1  ;;  %v1476_v29 = vsel %vm1232_vm11, %v10550_v27, -inf }
 0x417   :  { %1477 = vmax.xlane.f32.xlu0 %v1476_v29  ;;  %v1239_v29 = vsel %vm1232_vm11, %v10518_v30, -inf }
 0x41b   :  { %v10554_v34 = vpop.f32.mrb[56].mxu0  ;;  %v10556_v11 = vpop.f32.mrb[56].mxu1 }
 0x41c   :  { %v8104_v37 = vpop.f32.mrb[57].mxu0  ;;  %v8134_v17 = vpop.f32.mrb[57].mxu1  ;;  %v1479_v12 = vsel %vm1232_vm11, %v10556_v11, -inf }
 0x41d   :  { %v10560_v18 = vpop.f32.mrb[58].mxu0  ;;  %1480 = vmax.xlane.f32.xlu1 %v1479_v12  ;;  %v10562_v8 = vpop.f32.mrb[58].mxu1  ;;  %v1242_v12 = vsel %vm1232_vm11, %v10524_v22, -inf }
 0x41e   :  { %v8105_v44 = vpop.f32.mrb[59].mxu0  ;;  %v8135_v48 = vpop.f32.mrb[59].mxu1  ;;  %v1482_v59 = vsel %vm1232_vm11, %v10562_v8, -inf }
 0x41f   :  { %1483 = vmax.xlane.f32.xlu0 %v1482_v59  ;;  %v1245_v44 = vsel %vm1232_vm11, %v10530_v19, -inf  ;;  %v1248_v48 = vsel %vm1232_vm11, %v10536_v49, -inf }
 0x421   :  { %1234 = vmax.xlane.f32.xlu1 %v1233_v5 }
 0x423   :  { %1237 = vmax.xlane.f32.xlu0 %v1236_v15  ;;  %v10570_v6 = vpop.f32.mrb[60].mxu1  ;;  %v1251_v15 = vsel %vm1232_vm11, %v10542_v63, -inf }
 0x424   :  { %v8208_v28 = vpop.f32.mrb[61].mxu1 }
 0x425   :  { %1240 = vmax.xlane.f32.xlu1 %v1239_v29  ;;  %v10574_v37 = vpop.f32.mrb[62].mxu1 }
 0x426   :  { %v8209_v17 = vpop.f32.mrb[63].mxu1 }
 0x427   :  { %1243 = vmax.xlane.f32.xlu0 %v1242_v12  ;;  %v1254_v17 = vsel %vm1232_vm11, %v10548_v50, -inf  ;;  %v1257_v12 = vsel %vm1232_vm11, %v10554_v34, -inf }
 0x429   :  { %1246 = vmax.xlane.f32.xlu1 %v1245_v44  ;;  %v1260_v44 = vsel %vm1232_vm11, %v10560_v18, -inf }
 0x42b   :  { %1249 = vmax.xlane.f32.xlu0 %v1248_v48  ;;  %v10582_v59 = vpop.f32.mrb[64].mxu1 }
 0x42c   :  { %v8212_v5 = vpop.f32.mrb[65].mxu1 }
 0x42d   :  { %1252 = vmax.xlane.f32.xlu1 %v1251_v15  ;;  %v10586_v28 = vpop.f32.mrb[66].mxu1 }
 0x42e   :  { %v8213_v29 = vpop.f32.mrb[67].mxu1 }
 0x42f   :  { %1255 = vmax.xlane.f32.xlu0 %v1254_v17 }
 0x431   :  { %1258 = vmax.xlane.f32.xlu1 %v1257_v12 }
 0x433   :  { %1261 = vmax.xlane.f32.xlu0 %v1260_v44  ;;  %v10594_v48 = vpop.f32.mrb[68].mxu1 }
 0x434   :  { %v8216_v5 = vpop.f32.mrb[69].mxu1 }
 0x435   :  { %v10596_v7 = vpop.f32.mrb[70].mxu1 }
 0x436   :  { %v8217_v15 = vpop.f32.mrb[71].mxu1 }
 0x43b   :  { %v10598_v45 = vpop.f32.mrb[72].mxu1 }
 0x43c   :  { %v8220_v29 = vpop.f32.mrb[73].mxu1 }
 0x43d   :  { %v10600_v54 = vpop.f32.mrb[74].mxu1 }
 0x43e   :  { %v8221_v17 = vpop.f32.mrb[75].mxu1 }
 0x443   :  { %v10602_v60 = vpop.f32.mrb[76].mxu1 }
 0x444   :  { %v8224_v62 = vpop.f32.mrb[77].mxu1 }
 0x445   :  { %v10604_v12 = vpop.f32.mrb[78].mxu1 }
 0x446   :  { %v8225_v53 = vpop.f32.mrb[79].mxu1 }
 0x44b   :  { %v10606_v46 = vpop.f32.mrb[80].mxu1 }
 0x44c   :  { %v8238_v44 = vpop.f32.mrb[81].mxu1  ;;  %v2072_v5 = vsel %vm1232_vm11, %v10606_v46, -inf }
 0x44d   :  { %2073 = vmax.xlane.f32.xlu1 %v2072_v5  ;;  %v10610_v15 = vpop.f32.mrb[82].mxu1 }
 0x44e   :  { %v8239_v38 = vpop.f32.mrb[83].mxu1  ;;  %v2075_v29 = vsel %vm1232_vm11, %v10610_v15, -inf }
 0x44f   :  { %2076 = vmax.xlane.f32.xlu0 %v2075_v29 }
 0x453   :  { %v10614_v17 = vpop.f32.mrb[84].mxu1 }
 0x454   :  { %v8242_v62 = vpop.f32.mrb[85].mxu1  ;;  %v2078_v53 = vsel %vm1232_vm11, %v10614_v17, -inf }
 0x455   :  { %2079 = vmax.xlane.f32.xlu1 %v2078_v53  ;;  %v10618_v42 = vpop.f32.mrb[86].mxu1 }
 0x456   :  { %v8243_v44 = vpop.f32.mrb[87].mxu1  ;;  %v2081_v5 = vsel %vm1232_vm11, %v10618_v42, -inf }
 0x457   :  { %2082 = vmax.xlane.f32.xlu0 %v2081_v5 }
 0x45b   :  { %v10622_v35 = vpop.f32.mrb[88].mxu1 }
 0x45c   :  { %v8246_v38 = vpop.f32.mrb[89].mxu1 }
 0x45d   :  { %v10624_v24 = vpop.f32.mrb[90].mxu1 }
 0x45e   :  { %v8247_v29 = vpop.f32.mrb[91].mxu1 }
 0x463   :  { %v10626_v23 = vpop.f32.mrb[92].mxu1 }
 0x464   :  { %v8250_v62 = vpop.f32.mrb[93].mxu1 }
 0x465   :  { %v10628_v21 = vpop.f32.mrb[94].mxu1 }
 0x466   :  { %v8251_v10 = vpop.f32.mrb[95].mxu1 }
 0x46b   :  { %v10630_v53 = vpop.f32.mrb[96].mxu1 }
 0x46c   :  { %v8254_v61 = vpop.f32.mrb[97].mxu1 }
 0x46d   :  { %v10632_v44 = vpop.f32.mrb[98].mxu1 }
 0x46e   :  { %v8255_v55 = vpop.f32.mrb[99].mxu1 }
 0x48a   :  { %v1457_v56 = vpop.xlane.xlu1 %1456 }
 0x48b   :  { %v1485_v5 = vsub.f32 %v10508_v13, %v1457_v56 }
 0x48c   :  { %v1460_v52 = vpop.xlane.xlu0 %1459 }
 0x48d   :  { %v1495_v38 = vmul.f32 1.442695, %v1485_v5  ;;  %v1486_v41 = vsub.f32 %v10514_v4, %v1460_v52  ;;  %v2087_v5 = vsel %vm1232_vm11, %v10624_v24, -inf }
 0x48f   :  { %9022 = vpow2.f32 %v1495_v38  ;;  %v1497_v29 = vmul.f32 1.442695, %v1486_v41 }
 0x491   :  { %9024 = vpow2.f32 %v1497_v29 }
 0x492   :  { %v1463_v62 = vpop.xlane.xlu1 %1462 }
 0x493   :  { %v1487_v39 = vsub.f32 %v10520_v3, %v1463_v62 }
 0x494   :  { %v1466_v10 = vpop.xlane.xlu0 %1465 }
 0x495   :  { %v1499_v36 = vmul.f32 1.442695, %v1487_v39  ;;  %v1488_v61 = vsub.f32 %v10526_v31, %v1466_v10 }
 0x497   :  { %9026 = vpow2.f32 %v1499_v36  ;;  %v1501_v33 = vmul.f32 1.442695, %v1488_v61 }
 0x499   :  { %v10638_v55 = vpop.eup %9022  ;;  %9028 = vpow2.f32 %v1501_v33  ;;  %v2084_v33 = vsel %vm1232_vm11, %v10622_v35, -inf }
 0x49a   :  { %v1469_v56 = vpop.xlane.xlu1 %1468  ;;  %v1515_v13 = vsel %vm1232_vm11, %v10638_v55, 0.0 }
 0x49b   :  { %v10642_v52 = vpop.eup %9024  ;;  %v1489_v41 = vsub.f32 %v10532_v26, %v1469_v56  ;;  %1516 = vadd.xlane.f32.xlu1 %v1515_v13 }
 0x49c   :  { %v1472_v4 = vpop.xlane.xlu0 %1471  ;;  %v1518_v39 = vsel %vm1232_vm11, %v10642_v52, 0.0 }
 0x49d   :  { %v1503_v3 = vmul.f32 1.442695, %v1489_v41  ;;  %v1490_v36 = vsub.f32 %v10538_v51, %v1472_v4  ;;  %1519 = vadd.xlane.f32.xlu0 %v1518_v39  ;;  %v2090_v41 = vsel %vm1232_vm11, %v10626_v23, -inf  ;;  %v2093_v39 = vsel %vm1232_vm11, %v10628_v21, -inf }
 0x49f   :  { %9030 = vpow2.f32 %v1503_v3  ;;  %v1505_v31 = vmul.f32 1.442695, %v1490_v36  ;;  %2085 = vmax.xlane.f32.xlu1 %v2084_v33 }
 0x4a1   :  { %v10652_v38 = vpop.eup %9026  ;;  %9032 = vpow2.f32 %v1505_v31  ;;  %2088 = vmax.xlane.f32.xlu0 %v2087_v5 }
 0x4a2   :  { %v1475_v26 = vpop.xlane.xlu1 %1474  ;;  %v1521_v29 = vsel %vm1232_vm11, %v10652_v38, 0.0 }
 0x4a3   :  { %v10656_v62 = vpop.eup %9028  ;;  %v1491_v51 = vsub.f32 %v10544_v1, %v1475_v26  ;;  %1522 = vadd.xlane.f32.xlu1 %v1521_v29 }
 0x4a4   :  { %v1478_v10 = vpop.xlane.xlu0 %1477  ;;  %v1524_v61 = vsel %vm1232_vm11, %v10656_v62, 0.0 }
 0x4a5   :  { %v1507_v56 = vmul.f32 1.442695, %v1491_v51  ;;  %v1492_v13 = vsub.f32 %v10550_v27, %v1478_v10  ;;  %1525 = vadd.xlane.f32.xlu0 %v1524_v61  ;;  %v2096_v10 = vsel %vm1232_vm11, %v10630_v53, -inf }
 0x4a7   :  { %9034 = vpow2.f32 %v1507_v56  ;;  %v1509_v4 = vmul.f32 1.442695, %v1492_v13  ;;  %2091 = vmax.xlane.f32.xlu1 %v2090_v41 }
 0x4a9   :  { %v10666_v3 = vpop.eup %9030  ;;  %9036 = vpow2.f32 %v1509_v4  ;;  %2094 = vmax.xlane.f32.xlu0 %v2093_v39 }
 0x4aa   :  { %v1481_v1 = vpop.xlane.xlu1 %1480  ;;  %v1527_v36 = vsel %vm1232_vm11, %v10666_v3, 0.0 }
 0x4ab   :  { %v10670_v33 = vpop.eup %9032  ;;  %v1493_v27 = vsub.f32 %v10556_v11, %v1481_v1  ;;  %1528 = vadd.xlane.f32.xlu1 %v1527_v36  ;;  %v2099_v11 = vsel %vm1232_vm11, %v10632_v44, -inf }
 0x4ac   :  { %v1484_v31 = vpop.xlane.xlu0 %1483  ;;  %v1530_v5 = vsel %vm1232_vm11, %v10670_v33, 0.0 }
 0x4ad   :  { %v1511_v26 = vmul.f32 1.442695, %v1493_v27  ;;  %v1494_v29 = vsub.f32 %v10562_v8, %v1484_v31  ;;  %1531 = vadd.xlane.f32.xlu0 %v1530_v5 }
 0x4ae   :  { %v1235_v51 = vpop.xlane.xlu1 %1234 }
 0x4af   :  { %9038 = vpow2.f32 %v1511_v26  ;;  %v1513_v61 = vmul.f32 1.442695, %v1494_v29  ;;  %v1263_v56 = vsub.f32 %v10506_v2, %v1235_v51  ;;  %2097 = vmax.xlane.f32.xlu1 %v2096_v10  ;;  %v1859_v51 = vsel %vm1232_vm11, %v10570_v6, -inf }
 0x4b0   :  { %v1238_v13 = vpop.xlane.xlu0 %1237 }
 0x4b1   :  { %v10681_v41 = vpop.eup %9034  ;;  %9040 = vpow2.f32 %v1513_v61  ;;  %v1273_v4 = vmul.f32 1.442695, %v1263_v56  ;;  %v1264_v8 = vsub.f32 %v10512_v43, %v1238_v13  ;;  %2100 = vmax.xlane.f32.xlu0 %v2099_v11 }
 0x4b2   :  { %v1241_v39 = vpop.xlane.xlu1 %1240  ;;  %v1533_v1 = vsel %vm1232_vm11, %v10681_v41, 0.0 }
 0x4b3   :  { %v10686_v36 = vpop.eup %9036  ;;  %9042 = vpow2.f32 %v1273_v4  ;;  %v1275_v2 = vmul.f32 1.442695, %v1264_v8  ;;  %v1265_v27 = vsub.f32 %v10518_v30, %v1241_v39  ;;  %1534 = vadd.xlane.f32.xlu1 %v1533_v1  ;;  %v1862_v30 = vsel %vm1232_vm11, %v10574_v37, -inf }
 0x4b4   :  { %v1244_v31 = vpop.xlane.xlu0 %1243  ;;  %v1536_v5 = vsel %vm1232_vm11, %v10686_v36, 0.0 }
 0x4b5   :  { %9044 = vpow2.f32 %v1275_v2  ;;  %v1277_v26 = vmul.f32 1.442695, %v1265_v27  ;;  %v1266_v43 = vsub.f32 %v10524_v22, %v1244_v31  ;;  %1537 = vadd.xlane.f32.xlu0 %v1536_v5 }
 0x4b6   :  { %v1247_v29 = vpop.xlane.xlu1 %1246 }
 0x4b7   :  { %v1279_v10 = vmul.f32 1.442695, %v1266_v43  ;;  %1860 = vmax.xlane.f32.xlu1 %v1859_v51  ;;  %9046 = vpow2.f32 %v1277_v26  ;;  %v1267_v13 = vsub.f32 %v10530_v19, %v1247_v29  ;;  %v1865_v43 = vsel %vm1232_vm11, %v10582_v59, -inf }
 0x4b8   :  { %v1250_v61 = vpop.xlane.xlu0 %1249 }
 0x4b9   :  { %v10696_v56 = vpop.eup %9038  ;;  %1863 = vmax.xlane.f32.xlu0 %v1862_v30  ;;  %9048 = vpow2.f32 %v1279_v10  ;;  %v1268_v4 = vsub.f32 %v10536_v49, %v1250_v61  ;;  %v1281_v1 = vmul.f32 1.442695, %v1267_v13  ;;  %v1868_v10 = vsel %vm1232_vm11, %v10586_v28, -inf }
 0x4ba   :  { %v1539_v22 = vsel %vm1232_vm11, %v10696_v56, 0.0  ;;  %v1253_v2 = vpop.xlane.xlu1 %1252 }
 0x4bb   :  { %v10701_v11 = vpop.eup %9040  ;;  %1540 = vadd.xlane.f32.xlu1 %v1539_v22  ;;  %v1283_v31 = vmul.f32 1.442695, %v1268_v4  ;;  %9050 = vpow2.f32 %v1281_v1  ;;  %v1269_v26 = vsub.f32 %v10542_v63, %v1253_v2  ;;  %v1871_v1 = vsel %vm1232_vm11, %v10594_v48, -inf }
 0x4bc   :  { %v1542_v8 = vsel %vm1232_vm11, %v10701_v11, 0.0  ;;  %v1256_v5 = vpop.xlane.xlu0 %1255 }
 0x4bd   :  { %v10706_v39 = vpop.eup %9042  ;;  %1543 = vadd.xlane.f32.xlu0 %v1542_v8  ;;  %9052 = vpow2.f32 %v1283_v31  ;;  %v1270_v51 = vsub.f32 %v10548_v50, %v1256_v5  ;;  %v1285_v30 = vmul.f32 1.442695, %v1269_v26  ;;  %v1874_v31 = vsel %vm1232_vm11, %v10596_v7, -inf }
 0x4be   :  { %v1293_v19 = vsel %vm1232_vm11, %v10706_v39, 0.0  ;;  %v1259_v13 = vpop.xlane.xlu1 %1258 }
 0x4bf   :  { %v10710_v27 = vpop.eup %9044  ;;  %1294 = vadd.xlane.f32.xlu1 %v1293_v19  ;;  %v1287_v22 = vmul.f32 1.442695, %v1270_v51  ;;  %9054 = vpow2.f32 %v1285_v30  ;;  %v1271_v50 = vsub.f32 %v10554_v34, %v1259_v13 }
 0x4c0   :  { %v1296_v49 = vsel %vm1232_vm11, %v10710_v27, 0.0  ;;  %v1262_v4 = vpop.xlane.xlu0 %1261 }
 0x4c1   :  { %1297 = vadd.xlane.f32.xlu0 %v1296_v49  ;;  %v10717_v29 = vpop.eup %9046  ;;  %9056 = vpow2.f32 %v1287_v22  ;;  %v1272_v19 = vsub.f32 %v10560_v18, %v1262_v4  ;;  %v1289_v49 = vmul.f32 1.442695, %v1271_v50  ;;  %v1877_v18 = vsel %vm1232_vm11, %v10598_v45, -inf }
 0x4c2   :  { %v1299_v63 = vsel %vm1232_vm11, %v10717_v29, 0.0  ;;  %v1883_v4 = vsel %vm1232_vm11, %v10602_v60, -inf }
 0x4c3   :  { %1866 = vmax.xlane.f32.xlu1 %v1865_v43  ;;  %v10722_v61 = vpop.eup %9048  ;;  %v1291_v26 = vmul.f32 1.442695, %v1272_v19  ;;  %9058 = vpow2.f32 %v1289_v49  ;;  %v1886_v19 = vsel %vm1232_vm11, %v10604_v12, -inf }
 0x4c4   :  { %v1302_v8 = vsel %vm1232_vm11, %v10722_v61, 0.0 }
 0x4c5   :  { %1869 = vmax.xlane.f32.xlu0 %v1868_v10  ;;  %v10731_v2 = vpop.eup %9050  ;;  %9060 = vpow2.f32 %v1291_v26  ;;  %v1880_v10 = vsel %vm1232_vm11, %v10600_v54, -inf }
 0x4c6   :  { %v1305_v34 = vsel %vm1232_vm11, %v10731_v2, 0.0 }
 0x4c7   :  { %1300 = vadd.xlane.f32.xlu1 %v1299_v63  ;;  %v10736_v5 = vpop.eup %9052 }
 0x4c8   :  { %v1308_v43 = vsel %vm1232_vm11, %v10736_v5, 0.0 }
 0x4c9   :  { %1303 = vadd.xlane.f32.xlu0 %v1302_v8  ;;  %v10744_v51 = vpop.eup %9054 }
 0x4ca   :  { %v1311_v13 = vsel %vm1232_vm11, %v10744_v51, 0.0 }
 0x4cb   :  { %1872 = vmax.xlane.f32.xlu1 %v1871_v1  ;;  %v10748_v30 = vpop.eup %9056 }
 0x4cc   :  { %v1314_v63 = vsel %vm1232_vm11, %v10748_v30, 0.0 }
 0x4cd   :  { %1875 = vmax.xlane.f32.xlu0 %v1874_v31  ;;  %v10756_v8 = vpop.eup %9058 }
 0x4ce   :  { %v1317_v26 = vsel %vm1232_vm11, %v10756_v8, 0.0 }
 0x4cf   :  { %1306 = vadd.xlane.f32.xlu1 %v1305_v34  ;;  %v10761_v31 = vpop.eup %9060 }
 0x4d1   :  { %1309 = vadd.xlane.f32.xlu0 %v1308_v43 }
 0x4d3   :  { %1878 = vmax.xlane.f32.xlu1 %v1877_v18 }
 0x4d5   :  { %1881 = vmax.xlane.f32.xlu0 %v1880_v10 }
 0x4d7   :  { %1312 = vadd.xlane.f32.xlu1 %v1311_v13 }
 0x4d9   :  { %1315 = vadd.xlane.f32.xlu0 %v1314_v63 }
 0x4da   :  { %v2074_v22 = vpop.xlane.xlu1 %2073 }
 0x4db   :  { %v2102_v50 = vsub.f32 %v10606_v46, %v2074_v22  ;;  %1884 = vmax.xlane.f32.xlu1 %v1883_v4  ;;  %v1320_v46 = vsel %vm1232_vm11, %v10761_v31, 0.0 }
 0x4dc   :  { %v2077_v1 = vpop.xlane.xlu0 %2076 }
 0x4dd   :  { %v2112_v49 = vmul.f32 1.442695, %v2102_v50  ;;  %v2103_v34 = vsub.f32 %v10610_v15, %v2077_v1  ;;  %1887 = vmax.xlane.f32.xlu0 %v1886_v19 }
 0x4df   :  { %9062 = vpow2.f32 %v2112_v49  ;;  %v2114_v43 = vmul.f32 1.442695, %v2103_v34  ;;  %1318 = vadd.xlane.f32.xlu1 %v1317_v26 }
 0x4e1   :  { %9064 = vpow2.f32 %v2114_v43  ;;  %1321 = vadd.xlane.f32.xlu0 %v1320_v46 }
 0x4e2   :  { %v2080_v18 = vpop.xlane.xlu1 %2079 }
 0x4e3   :  { %v2104_v10 = vsub.f32 %v10614_v17, %v2080_v18 }
 0x4e4   :  { %v2083_v13 = vpop.xlane.xlu0 %2082 }
 0x4e5   :  { %v2116_v63 = vmul.f32 1.442695, %v2104_v10  ;;  %v2105_v22 = vsub.f32 %v10618_v42, %v2083_v13 }
 0x4e7   :  { %9066 = vpow2.f32 %v2116_v63  ;;  %v2118_v15 = vmul.f32 1.442695, %v2105_v22 }
 0x4e9   :  { %v10770_v4 = vpop.eup %9062  ;;  %9068 = vpow2.f32 %v2118_v15 }
 0x4ea   :  { %v2132_v50 = vsel %vm1232_vm11, %v10770_v4, 0.0 }
 0x4eb   :  { %v10774_v1 = vpop.eup %9064  ;;  %2133 = vadd.xlane.f32.xlu1 %v2132_v50 }
 0x4ec   :  { %v2135_v19 = vsel %vm1232_vm11, %v10774_v1, 0.0 }
 0x4ed   :  { %2136 = vadd.xlane.f32.xlu0 %v2135_v19 }
 0x4f1   :  { %v10778_v17 = vpop.eup %9066 }
 0x4f2   :  { %v2138_v42 = vsel %vm1232_vm11, %v10778_v17, 0.0 }
 0x4f3   :  { %v10782_v49 = vpop.eup %9068  ;;  %2139 = vadd.xlane.f32.xlu1 %v2138_v42 }
 0x4f4   :  { %v2141_v34 = vsel %vm1232_vm11, %v10782_v49, 0.0 }
 0x4f5   :  { %2142 = vadd.xlane.f32.xlu0 %v2141_v34 }
 0x528   :  { %v1517_v26 = vpop.xlane.xlu1 %1516 }
 0x529   :  { %9070 = vrcp.f32 %v1517_v26 }
 0x52a   :  { %v1520_v43 = vpop.xlane.xlu0 %1519 }
 0x52b   :  { %9072 = vrcp.f32 %v1520_v43 }
 0x52c   :  { %v2086_v46 = vpop.xlane.xlu1 %2085 }
 0x52d   :  { %v2106_v18 = vsub.f32 %v10622_v35, %v2086_v46 }
 0x52e   :  { %v2089_v10 = vpop.xlane.xlu0 %2088 }
 0x52f   :  { %v2120_v13 = vmul.f32 1.442695, %v2106_v18  ;;  %v2107_v63 = vsub.f32 %v10624_v24, %v2089_v10 }
 0x530   :  { %v1523_v22 = vpop.xlane.xlu1 %1522 }
 0x531   :  { %9074 = vpow2.f32 %v2120_v13  ;;  %v2122_v15 = vmul.f32 1.442695, %v2107_v63 }
 0x532   :  { %9076 = vrcp.f32 %v1523_v22  ;;  %v1526_v50 = vpop.xlane.xlu0 %1525  ;;  %v1343_v22 = vsel %vm1123_vm9, %v10297_v47, 0 }
 0x533   :  { %v9071_v19 = vpop.eup %9070  ;;  %9078 = vpow2.f32 %v2122_v15 }
 0x534   :  { %9080 = vrcp.f32 %v1526_v50  ;;  %v2092_v42 = vpop.xlane.xlu1 %2091  ;;  %v1555_v43 = vmul.f32 %v9071_v19, %v10638_v55  ;;  %v13831_v55 = vmov 0.0  }
 0x535   :  { %v9073_v34 = vpop.eup %9072  ;;  %v2108_v26 = vsub.f32 %v10626_v23, %v2092_v42 }
 0x536   :  { %v1556_v35 = vmul.f32 %v9073_v34, %v10642_v52  ;;  %v2095_v46 = vpop.xlane.xlu0 %2094  ;;  %v1344_v34 = vsel %vm1123_vm9, %v10295_v25, 0 }
 0x537   :  { %v2124_v18 = vmul.f32 1.442695, %v2108_v26  ;;  %v2109_v24 = vsub.f32 %v10628_v21, %v2095_v46 }
 0x538   :  { %v1570_v10 = vpack.c.bf16 %v1556_v35, %v1555_v43  ;;  %v1529_v13 = vpop.xlane.xlu1 %1528 }
 0x539   :  { %9082 = vpow2.f32 %v2124_v18  ;;  %v2126_v63 = vmul.f32 1.442695, %v2109_v24 }
 0x53a   :  { %9084 = vrcp.f32 %v1529_v13  ;;  %8147 = vmatmul.mubr.msk.bf16.vlgmr.msra.gmra.mrb[60].mxu0 %vm1232_vm11, %v1570_v10  ;;  %v1532_v23 = vpop.xlane.xlu0 %1531 }
 0x53b   :  { %v10796_v15 = vpop.eup %9074  ;;  %9086 = vpow2.f32 %v2126_v63  ;;  %8167 = vmatpush3.bf16.msra.mxu0 %v1343_v22  ;;  %8150 = vmatprep.mubr.msk.bf16.mxu0 %vm9608_vm2, %v13831_v55 }
 0x53c   :  { %v9077_v21 = vpop.eup %9076  ;;  %9088 = vrcp.f32 %v1532_v23  ;;  %v2098_v52 = vpop.xlane.xlu1 %2097  ;;  %8168 = vmatprep.subr.bf16.mxu0 %v13831_v55  ;;  %v2144_v50 = vsel %vm1232_vm11, %v10796_v15, 0.0 }
 0x53d   :  { %v10803_v19 = vpop.eup %9078  ;;  %v2110_v47 = vsub.f32 %v10630_v53, %v2098_v52  ;;  %2145 = vadd.xlane.f32.xlu1 %v2144_v50  ;;  %v1557_v18 = vmul.f32 %v9077_v21, %v10652_v38 }
 0x53e   :  { %v9081_v42 = vpop.eup %9080  ;;  %v2101_v26 = vpop.xlane.xlu0 %2100  ;;  %v2147_v43 = vsel %vm1232_vm11, %v10803_v19, 0.0 }
 0x53f   :  { %v2128_v35 = vmul.f32 1.442695, %v2110_v47  ;;  %8169 = vmatpush3.bf16.msra.mxu0 %v1344_v34  ;;  %v2111_v46 = vsub.f32 %v10632_v44, %v2101_v26  ;;  %2148 = vadd.xlane.f32.xlu0 %v2147_v43  ;;  %v1558_v24 = vmul.f32 %v9081_v42, %v10656_v62  ;;  %v1345_v44 = vsel %vm1123_vm9, %v10333_v9, 0 }
 0x540   :  { %v1535_v53 = vpop.xlane.xlu1 %1534  ;;  %8170 = vmatprep.subr.bf16.mxu0 %v13831_v55  ;;  %v1346_v9 = vsel %vm1123_vm9, %v10330_v32, 0 }
 0x541   :  { %9090 = vpow2.f32 %v2128_v35  ;;  %v2130_v10 = vmul.f32 1.442695, %v2111_v46  ;;  %v1571_v13 = vpack.c.bf16 %v1558_v24, %v1557_v18 }
 0x542   :  { %9092 = vrcp.f32 %v1535_v53  ;;  %v1538_v25 = vpop.xlane.xlu0 %1537 }
 0x543   :  { %v10815_v63 = vpop.eup %9082  ;;  %9094 = vpow2.f32 %v2130_v10  ;;  %8151 = vmatmul.mubr.msk.bf16.gmra.mrb[64].mxu0 %vm1232_vm11, %v1571_v13 }
 0x544   :  { %v9085_v38 = vpop.eup %9084  ;;  %8171 = vmatpush3.bf16.msra.mxu0 %v1345_v44  ;;  %9096 = vrcp.f32 %v1538_v25  ;;  %v1861_v62 = vpop.xlane.xlu1 %1860  ;;  %v2150_v22 = vsel %vm1232_vm11, %v10815_v63, 0.0  ;;  %8154 = vmatprep.mubr.msk.bf16.mxu0 %vm9608_vm2, %v13831_v55 }
 0x545   :  { %v10825_v23 = vpop.eup %9086  ;;  %v1889_v21 = vsub.f32 %v10570_v6, %v1861_v62  ;;  %8172 = vmatprep.subr.bf16.mxu0 %v13831_v55  ;;  %2151 = vadd.xlane.f32.xlu1 %v2150_v22  ;;  %v1559_v26 = vmul.f32 %v9085_v38, %v10666_v3 }
 0x546   :  { %v9089_v52 = vpop.eup %9088  ;;  %v1864_v50 = vpop.xlane.xlu0 %1863  ;;  %v2153_v47 = vsel %vm1232_vm11, %v10825_v23, 0.0 }
 0x547   :  { %v1899_v42 = vmul.f32 1.442695, %v1889_v21  ;;  %v1890_v34 = vsub.f32 %v10574_v37, %v1864_v50  ;;  %2154 = vadd.xlane.f32.xlu0 %v2153_v47  ;;  %v1560_v6 = vmul.f32 %v9089_v52, %v10670_v33  ;;  %v1347_v37 = vsel %vm1123_vm9, %v10369_v57, 0 }
 0x548   :  { %8173 = vmatpush3.bf16.msra.mxu0 %v1346_v9  ;;  %v1541_v43 = vpop.xlane.xlu1 %1540 }
 0x549   :  { %9098 = vpow2.f32 %v1899_v42  ;;  %v1901_v35 = vmul.f32 1.442695, %v1890_v34  ;;  %8174 = vmatprep.subr.bf16.mxu0 %v13831_v55  ;;  %v1572_v46 = vpack.c.bf16 %v1560_v6, %v1559_v26 }
 0x54a   :  { %9100 = vrcp.f32 %v1541_v43  ;;  %v1544_v32 = vpop.xlane.xlu0 %1543 }
 0x54b   :  { %v10838_v18 = vpop.eup %9090  ;;  %9102 = vpow2.f32 %v1901_v35  ;;  %8155 = vmatmul.mubr.msk.bf16.gmra.mrb[68].mxu0 %vm1232_vm11, %v1572_v46 }
 0x54c   :  { %v9093_v3 = vpop.eup %9092  ;;  %8175 = vmatpush3.bf16.msra.mxu0 %v1347_v37  ;;  %9104 = vrcp.f32 %v1544_v32  ;;  %v1295_v33 = vpop.xlane.xlu1 %1294  ;;  %v2156_v24 = vsel %vm1232_vm11, %v10838_v18, 0.0  ;;  %8158 = vmatprep.mubr.msk.bf16.mxu0 %vm9608_vm2, %v13831_v55 }
 0x54d   :  { %v10848_v53 = vpop.eup %9094  ;;  %2157 = vadd.xlane.f32.xlu1 %v2156_v24  ;;  %8256 = vmatprep.subr.bf16.mxu0 %v13831_v55  ;;  %v1561_v25 = vmul.f32 %v9093_v3, %v10681_v41 }
 0x54e   :  { %v9097_v10 = vpop.eup %9096  ;;  %v1298_v13 = vpop.xlane.xlu0 %1297  ;;  %v2159_v57 = vsel %vm1232_vm11, %v10848_v53, 0.0 }
 0x54f   :  { %2160 = vadd.xlane.f32.xlu0 %v2159_v57  ;;  %v1562_v44 = vmul.f32 %v9097_v10, %v10686_v36  ;;  %9106 = vrcp.f32 %v1298_v13 }
 0x550   :  { %v1867_v38 = vpop.xlane.xlu1 %1866  ;;  %9108 = vrcp.f32 %v1295_v33 }
 0x551   :  { %v1891_v62 = vsub.f32 %v10582_v59, %v1867_v38  ;;  %v1573_v22 = vpack.c.bf16 %v1562_v44, %v1561_v25 }
 0x552   :  { %v1870_v21 = vpop.xlane.xlu0 %1869 }
 0x553   :  { %v10856_v52 = vpop.eup %9098  ;;  %v1903_v9 = vmul.f32 1.442695, %v1891_v62  ;;  %8159 = vmatmul.mubr.msk.bf16.gmra.mrb[72].mxu0 %vm1232_vm11, %v1573_v22  ;;  %v1892_v50 = vsub.f32 %v10586_v28, %v1870_v21 }
 0x554   :  { %v9101_v47 = vpop.eup %9100  ;;  %v1301_v42 = vpop.xlane.xlu1 %1300  ;;  %v1919_v41 = vsel %vm1232_vm11, %v10856_v52, 0.0  ;;  %8162 = vmatprep.mubr.msk.bf16.mxu0 %vm9608_vm2, %v13831_v55 }
 0x555   :  { %v10864_v36 = vpop.eup %9102  ;;  %9110 = vpow2.f32 %v1903_v9  ;;  %v1905_v59 = vmul.f32 1.442695, %v1892_v50  ;;  %1920 = vadd.xlane.f32.xlu1 %v1919_v41  ;;  %v1563_v28 = vmul.f32 %v9101_v47, %v10696_v56 }
 0x556   :  { %v9105_v34 = vpop.eup %9104  ;;  %v1304_v26 = vpop.xlane.xlu0 %1303  ;;  %v1922_v6 = vsel %vm1232_vm11, %v10864_v36, 0.0 }
 0x557   :  { %9112 = vpow2.f32 %v1905_v59  ;;  %1923 = vadd.xlane.f32.xlu0 %v1922_v6  ;;  %v1564_v43 = vmul.f32 %v9105_v34, %v10701_v11 }
 0x558   :  { %9114 = vrcp.f32 %v1304_v26  ;;  %v1873_v35 = vpop.xlane.xlu1 %1872 }
 0x559   :  { %v1893_v46 = vsub.f32 %v10594_v48, %v1873_v35  ;;  %v1574_v32 = vpack.c.bf16 %v1564_v43, %v1563_v28  ;;  %v9107_v37 = vpop.eup %9106  ;;  %9116 = vrcp.f32 %v1301_v42 }
 0x55a   :  { %v1876_v3 = vpop.xlane.xlu0 %1875  ;;  %v9109_v10 = vpop.eup %9108  ;;  %v1334_v56 = vmul.f32 %v9107_v37, %v10710_v27 }
 0x55b   :  { %v1907_v33 = vmul.f32 1.442695, %v1893_v46  ;;  %8163 = vmatmul.mubr.msk.bf16.gmra.mrb[76].mxu0 %vm1232_vm11, %v1574_v32  ;;  %v1894_v24 = vsub.f32 %v10596_v7, %v1876_v3  ;;  %v1333_v25 = vmul.f32 %v9109_v10, %v10706_v39  ;;  %v2182_v39 = vsel %vm1361_vm10, %v10366_v20, 0 }
 0x55c   :  { %v1307_v13 = vpop.xlane.xlu1 %1306  ;;  %8176 = vmatprep.mubr.msk.bf16.mxu0 %vm9608_vm2, %v13831_v55 }
 0x55d   :  { %9118 = vpow2.f32 %v1907_v33  ;;  %v1909_v11 = vmul.f32 1.442695, %v1894_v24  ;;  %v1348_v62 = vpack.c.bf16 %v1334_v56, %v1333_v25  ;;  %v2184_v33 = vsel %vm1361_vm10, %v10396_v40, 0 }
 0x55e   :  { %v1310_v57 = vpop.xlane.xlu0 %1309 }
 0x55f   :  { %v10876_v48 = vpop.eup %9110  ;;  %9120 = vpow2.f32 %v1909_v11 }
 0x560   :  { %9122 = vrcp.f32 %v1310_v57  ;;  %v1879_v44 = vpop.xlane.xlu1 %1878  ;;  %v1925_v7 = vsel %vm1232_vm11, %v10876_v48, 0.0 }
 0x561   :  { %v10881_v38 = vpop.eup %9112  ;;  %v1895_v22 = vsub.f32 %v10598_v45, %v1879_v44  ;;  %1926 = vadd.xlane.f32.xlu1 %v1925_v7  ;;  %9124 = vrcp.f32 %v1307_v13 }
 0x562   :  { %v9115_v27 = vpop.eup %9114  ;;  %v1882_v21 = vpop.xlane.xlu0 %1881  ;;  %v1928_v9 = vsel %vm1232_vm11, %v10881_v38, 0.0 }
 0x563   :  { %v1911_v50 = vmul.f32 1.442695, %v1895_v22  ;;  %8177 = vmatmul.mubr.msk.bf16.vlgmr.msra.gmra.mrb[60].mxu0 %vm1232_vm11, %v1348_v62  ;;  %v1896_v47 = vsub.f32 %v10600_v54, %v1882_v21  ;;  %1929 = vadd.xlane.f32.xlu0 %v1928_v9  ;;  %v9117_v42 = vpop.eup %9116  ;;  %v1336_v59 = vmul.f32 %v9115_v27, %v10722_v61  ;;  %v2183_v54 = vsel %vm1361_vm10, %v10398_v58, 0  ;;  %v13832_v27 = vld [vmem:[#allocation22_spill] sm:$0xff] }
 0x564   :  { %8257 = vmatpush3.bf16.msra.mxu0 %v2182_v39  ;;  %v1313_v45 = vpop.xlane.xlu1 %1312  ;;  %8180 = vmatprep.mubr.msk.bf16.mxu0 %vm9608_vm2, %v13831_v55  ;;  %v1335_v6 = vmul.f32 %v9117_v42, %v10717_v29 }
 0x565   :  { %9126 = vpow2.f32 %v1911_v50  ;;  %v1913_v41 = vmul.f32 1.442695, %v1896_v47  ;;  %8258 = vmatprep.subr.bf16.mxu0 %v13831_v55 }
 0x566   :  { %v1316_v34 = vpop.xlane.xlu0 %1315  ;;  %v1349_v46 = vpack.c.bf16 %v1336_v59, %v1335_v6 }
 0x567   :  { %v10895_v26 = vpop.eup %9118  ;;  %9128 = vpow2.f32 %v1913_v41 }
 0x568   :  { %8259 = vmatpush3.bf16.msra.mxu0 %v2183_v54  ;;  %9130 = vrcp.f32 %v1316_v34  ;;  %v1885_v28 = vpop.xlane.xlu1 %1884  ;;  %v1931_v43 = vsel %vm1232_vm11, %v10895_v26, 0.0 }
 0x569   :  { %v10903_v35 = vpop.eup %9120  ;;  %v1897_v61 = vsub.f32 %v10602_v60, %v1885_v28  ;;  %1932 = vadd.xlane.f32.xlu1 %v1931_v43  ;;  %8260 = vmatprep.subr.bf16.mxu0 %v13831_v55  ;;  %9132 = vrcp.f32 %v1313_v45 }
 0x56a   :  { %v9123_v32 = vpop.eup %9122  ;;  %v1888_v37 = vpop.xlane.xlu0 %1887  ;;  %v1934_v29 = vsel %vm1232_vm11, %v10903_v35, 0.0 }
 0x56b   :  { %v1915_v3 = vmul.f32 1.442695, %v1897_v61  ;;  %8181 = vmatmul.mubr.msk.bf16.gmra.mrb[64].mxu0 %vm1232_vm11, %v1349_v46  ;;  %v1898_v24 = vsub.f32 %v10604_v12, %v1888_v37  ;;  %1935 = vadd.xlane.f32.xlu0 %v1934_v29  ;;  %v9125_v60 = vpop.eup %9124  ;;  %v1338_v13 = vmul.f32 %v9123_v32, %v10736_v5  ;;  %v2185_v12 = vsel %vm1361_vm10, %v10423_v0, 0 }
 0x56c   :  { %8261 = vmatpush3.bf16.msra.mxu0 %v2184_v33  ;;  %8184 = vmatprep.mubr.msk.bf16.mxu0 %vm9608_vm2, %v13831_v55  ;;  %v1319_v57 = vpop.xlane.xlu1 %1318  ;;  %v1337_v25 = vmul.f32 %v9125_v60, %v10731_v2  ;;  %v2186_v2 = vsel %vm1361_vm10, %v13832_v27, 0 }
 0x56d   :  { %9134 = vpow2.f32 %v1915_v3  ;;  %v1917_v10 = vmul.f32 1.442695, %v1898_v24  ;;  %8262 = vmatprep.subr.bf16.mxu0 %v13831_v55 }
 0x56e   :  { %v1322_v56 = vpop.xlane.xlu0 %1321  ;;  %v1350_v5 = vpack.c.bf16 %v1338_v13, %v1337_v25 }
 0x56f   :  { %v10918_v11 = vpop.eup %9126  ;;  %9136 = vpow2.f32 %v1917_v10 }
 0x570   :  { %8263 = vmatpush3.bf16.msra.mxu0 %v2185_v12  ;;  %9138 = vrcp.f32 %v1322_v56  ;;  %v1937_v44 = vsel %vm1232_vm11, %v10918_v11, 0.0 }
 0x571   :  { %v10926_v7 = vpop.eup %9128  ;;  %1938 = vadd.xlane.f32.xlu1 %v1937_v44  ;;  %8264 = vmatprep.subr.bf16.mxu0 %v13831_v55  ;;  %9140 = vrcp.f32 %v1319_v57 }
 0x572   :  { %v9131_v62 = vpop.eup %9130  ;;  %v1940_v22 = vsel %vm1232_vm11, %v10926_v7, 0.0 }
 0x573   :  { %8185 = vmatmul.mubr.msk.bf16.gmra.mrb[68].mxu0 %vm1232_vm11, %v1350_v5  ;;  %1941 = vadd.xlane.f32.xlu0 %v1940_v22  ;;  %v9133_v21 = vpop.eup %9132  ;;  %v1340_v9 = vmul.f32 %v9131_v62, %v10748_v30 }
 0x574   :  { %8265 = vmatpush3.bf16.msra.mxu0 %v2186_v2  ;;  %8188 = vmatprep.mubr.msk.bf16.mxu0 %vm9608_vm2, %v13831_v55  ;;  %v1339_v39 = vmul.f32 %v9133_v21, %v10744_v51 }
 0x575   :  { %8286 = vmatprep.subr.bf16.mxu0 %v13831_v55 }
 0x576   :  { %v1351_v41 = vpack.c.bf16 %v1340_v9, %v1339_v39 }
 0x577   :  { %v10939_v50 = vpop.eup %9134 }
 0x578   :  { %v2134_v47 = vpop.xlane.xlu1 %2133  ;;  %v1943_v42 = vsel %vm1232_vm11, %v10939_v50, 0.0 }
 0x579   :  { %v10944_v45 = vpop.eup %9136  ;;  %9142 = vrcp.f32 %v2134_v47  ;;  %1944 = vadd.xlane.f32.xlu1 %v1943_v42 }
 0x57a   :  { %v9139_v59 = vpop.eup %9138  ;;  %v2137_v34 = vpop.xlane.xlu0 %2136  ;;  %v1946_v30 = vsel %vm1232_vm11, %v10944_v45, 0.0 }
 0x57b   :  { %8189 = vmatmul.mubr.msk.bf16.gmra.mrb[72].mxu0 %vm1232_vm11, %v1351_v41  ;;  %9144 = vrcp.f32 %v2137_v34  ;;  %1947 = vadd.xlane.f32.xlu0 %v1946_v30  ;;  %v9141_v54 = vpop.eup %9140  ;;  %v1342_v51 = vmul.f32 %v9139_v59, %v10761_v31 }
 0x57c   :  { %8192 = vmatprep.mubr.msk.bf16.mxu0 %vm9608_vm2, %v13831_v55  ;;  %v1341_v6 = vmul.f32 %v9141_v54, %v10756_v8  ;;  %v1969_v8 = vsel %vm1123_vm9, %v10366_v20, 0  ;;  %v1971_v20 = vsel %vm1123_vm9, %v10396_v40, 0  ;;  %v8946_v40 = vld [vmem:[%s13756_s2 + $0x30] sm:$0xff]  }
 0x57d   :  { %8316 = vmatprep.subr.bf16.mxu1 %v8946_v40 }
 0x57e   :  { %v1352_v43 = vpack.c.bf16 %v1342_v51, %v1341_v6  ;;  %8317 = vmatpush3.bf16.msra.mxu1 %v8946_v40 }
 0x580   :  { %v2140_v28 = vpop.xlane.xlu1 %2139 }
 0x581   :  { %9146 = vrcp.f32 %v2140_v28 }
 0x582   :  { %v2143_v61 = vpop.xlane.xlu0 %2142 }
 0x583   :  { %v9143_v46 = vpop.eup %9142  ;;  %8193 = vmatmul.mubr.msk.bf16.gmra.mrb[76].mxu0 %vm1232_vm11, %v1352_v43  ;;  %9148 = vrcp.f32 %v2143_v61 }
 0x584   :  { %8266 = vmatprep.mubr.msk.bf16.mxu0 %vm9608_vm2, %v13831_v55  ;;  %v2172_v37 = vmul.f32 %v9143_v46, %v10770_v4 }
 0x585   :  { %v9145_v32 = vpop.eup %9144 }
 0x586   :  { %v2173_v29 = vmul.f32 %v9145_v32, %v10774_v1  ;;  %v1970_v1 = vsel %vm1123_vm9, %v10398_v58, 0  ;;  %v1972_v58 = vsel %vm1123_vm9, %v10423_v0, 0 }
 0x588   :  { %v2187_v3 = vpack.c.bf16 %v2173_v29, %v2172_v37 }
 0x58b   :  { %v9147_v31 = vpop.eup %9146  ;;  %8267 = vmatmul.mubr.msk.bf16.vlgmr.msra.gmra.mrb[80].mxu0 %vm1232_vm11, %v2187_v3 }
 0x58c   :  { %8287 = vmatpush3.bf16.msra.mxu0 %v1969_v8  ;;  %8270 = vmatprep.mubr.msk.bf16.mxu0 %vm9608_vm2, %v13831_v55  ;;  %v2174_v24 = vmul.f32 %v9147_v31, %v10778_v17  ;;  %v1973_v17 = vsel %vm1123_vm9, %v13832_v27, 0 }
 0x58d   :  { %v9149_v33 = vpop.eup %9148  ;;  %8288 = vmatprep.subr.bf16.mxu0 %v13831_v55 }
 0x58e   :  { %v2175_v4 = vmul.f32 %v9149_v33, %v10782_v49  ;;  %v8947_v49 = vld [vmem:[%s13756_s2 + $0x38] sm:$0xff]  }
 0x58f   :  { %8318 = vmatprep.subr.bf16.mxu1 %v8947_v49 }
 0x590   :  { %8289 = vmatpush3.bf16.msra.mxu0 %v1970_v1  ;;  %v2188_v60 = vpack.c.bf16 %v2175_v4, %v2174_v24  ;;  %8319 = vmatpush3.bf16.msra.mxu1 %v8947_v49 }
 0x591   :  { %8290 = vmatprep.subr.bf16.mxu0 %v13831_v55 }
 0x593   :  { %8271 = vmatmul.mubr.msk.bf16.gmra.mrb[84].mxu0 %vm1232_vm11, %v2188_v60 }
 0x594   :  { %8291 = vmatpush3.bf16.msra.mxu0 %v1971_v20  ;;  %8274 = vmatprep.mubr.msk.bf16.mxu0 %vm9608_vm2, %v13831_v55 }
 0x595   :  { %8292 = vmatprep.subr.bf16.mxu0 %v13831_v55 }
 0x598   :  { %8293 = vmatpush3.bf16.msra.mxu0 %v1972_v58 }
 0x599   :  { %8294 = vmatprep.subr.bf16.mxu0 %v13831_v55 }
 0x59c   :  { %8295 = vmatpush3.bf16.msra.mxu0 %v1973_v17 }
 0x5ca   :  { %v2146_v0 = vpop.xlane.xlu1 %2145 }
 0x5cb   :  { %9150 = vrcp.f32 %v2146_v0 }
 0x5cc   :  { %v2149_v10 = vpop.xlane.xlu0 %2148 }
 0x5cd   :  { %9152 = vrcp.f32 %v2149_v10 }
 0x5d2   :  { %v2152_v13 = vpop.xlane.xlu1 %2151 }
 0x5d3   :  { %9154 = vrcp.f32 %v2152_v13 }
 0x5d4   :  { %v2155_v56 = vpop.xlane.xlu0 %2154 }
 0x5d5   :  { %v9151_v57 = vpop.eup %9150  ;;  %9156 = vrcp.f32 %v2155_v56 }
 0x5d6   :  { %v2176_v25 = vmul.f32 %v9151_v57, %v10796_v15 }
 0x5d7   :  { %v9153_v12 = vpop.eup %9152 }
 0x5d8   :  { %v2177_v44 = vmul.f32 %v9153_v12, %v10803_v19 }
 0x5da   :  { %v2158_v5 = vpop.xlane.xlu1 %2157  ;;  %v2189_v62 = vpack.c.bf16 %v2177_v44, %v2176_v25 }
 0x5db   :  { %9158 = vrcp.f32 %v2158_v5 }
 0x5dc   :  { %8275 = vmatmul.mubr.msk.bf16.gmra.mrb[88].mxu0 %vm1232_vm11, %v2189_v62  ;;  %v2161_v22 = vpop.xlane.xlu0 %2160 }
 0x5dd   :  { %v9155_v27 = vpop.eup %9154  ;;  %9160 = vrcp.f32 %v2161_v22  ;;  %8278 = vmatprep.mubr.msk.bf16.mxu0 %vm9608_vm2, %v13831_v55 }
 0x5de   :  { %v2178_v21 = vmul.f32 %v9155_v27, %v10815_v63 }
 0x5df   :  { %v9157_v2 = vpop.eup %9156 }
 0x5e0   :  { %v2179_v9 = vmul.f32 %v9157_v2, %v10825_v23 }
 0x5e2   :  { %v1921_v39 = vpop.xlane.xlu1 %1920  ;;  %v2190_v15 = vpack.c.bf16 %v2179_v9, %v2178_v21 }
 0x5e3   :  { %9162 = vrcp.f32 %v1921_v39 }
 0x5e4   :  { %8279 = vmatmul.mubr.msk.bf16.gmra.mrb[92].mxu0 %vm1232_vm11, %v2190_v15  ;;  %v1924_v19 = vpop.xlane.xlu0 %1923 }
 0x5e5   :  { %v9159_v47 = vpop.eup %9158  ;;  %9164 = vrcp.f32 %v1924_v19  ;;  %8282 = vmatprep.mubr.msk.bf16.mxu0 %vm9608_vm2, %v13831_v55 }
 0x5e6   :  { %v2180_v41 = vmul.f32 %v9159_v47, %v10838_v18 }
 0x5e7   :  { %v9161_v42 = vpop.eup %9160 }
 0x5e8   :  { %v2181_v59 = vmul.f32 %v9161_v42, %v10848_v53 }
 0x5ea   :  { %v2191_v34 = vpack.c.bf16 %v2181_v59, %v2180_v41 }
 0x5ec   :  { %8283 = vmatmul.mubr.msk.bf16.gmra.mrb[96].mxu0 %vm1232_vm11, %v2191_v34 }
 0x5ed   :  { %v9163_v63 = vpop.eup %9162  ;;  %8296 = vmatprep.mubr.msk.bf16.mxu0 %vm9608_vm2, %v13831_v55 }
 0x5ee   :  { %v1927_v23 = vpop.xlane.xlu1 %1926  ;;  %v1959_v54 = vmul.f32 %v9163_v63, %v10856_v52 }
 0x5ef   :  { %v9165_v30 = vpop.eup %9164  ;;  %9166 = vrcp.f32 %v1927_v23 }
 0x5f0   :  { %v1960_v51 = vmul.f32 %v9165_v30, %v10864_v36  ;;  %v1930_v6 = vpop.xlane.xlu0 %1929 }
 0x5f1   :  { %9168 = vrcp.f32 %v1930_v6 }
 0x5f2   :  { %v1974_v28 = vpack.c.bf16 %v1960_v51, %v1959_v54 }
 0x5f4   :  { %8297 = vmatmul.mubr.msk.bf16.vlgmr.msra.gmra.mrb[80].mxu0 %vm1232_vm11, %v1974_v28 }
 0x5f5   :  { %8300 = vmatprep.mubr.msk.bf16.mxu0 %vm9608_vm2, %v13831_v55 }
 0x5f6   :  { %v1933_v18 = vpop.xlane.xlu1 %1932 }
 0x5f7   :  { %9170 = vrcp.f32 %v1933_v18 }
 0x5f8   :  { %v1936_v53 = vpop.xlane.xlu0 %1935 }
 0x5f9   :  { %v9167_v43 = vpop.eup %9166  ;;  %9172 = vrcp.f32 %v1936_v53 }
 0x5fa   :  { %v1961_v46 = vmul.f32 %v9167_v43, %v10876_v48 }
 0x5fb   :  { %v9169_v61 = vpop.eup %9168 }
 0x5fc   :  { %v1962_v52 = vmul.f32 %v9169_v61, %v10881_v38 }
 0x5fe   :  { %v1939_v32 = vpop.xlane.xlu1 %1938  ;;  %v1975_v36 = vpack.c.bf16 %v1962_v52, %v1961_v46 }
 0x5ff   :  { %9174 = vrcp.f32 %v1939_v32 }
 0x600   :  { %8301 = vmatmul.mubr.msk.bf16.gmra.mrb[84].mxu0 %vm1232_vm11, %v1975_v36  ;;  %v1942_v37 = vpop.xlane.xlu0 %1941 }
 0x601   :  { %v9171_v29 = vpop.eup %9170  ;;  %9176 = vrcp.f32 %v1942_v37  ;;  %8304 = vmatprep.mubr.msk.bf16.mxu0 %vm9608_vm2, %v13831_v55 }
 0x602   :  { %v1963_v31 = vmul.f32 %v9171_v29, %v10895_v26 }
 0x603   :  { %v9173_v3 = vpop.eup %9172 }
 0x604   :  { %v1964_v8 = vmul.f32 %v9173_v3, %v10903_v35 }
 0x606   :  { %v1945_v33 = vpop.xlane.xlu1 %1944  ;;  %v1976_v48 = vpack.c.bf16 %v1964_v8, %v1963_v31 }
 0x607   :  { %9178 = vrcp.f32 %v1945_v33 }
 0x608   :  { %8305 = vmatmul.mubr.msk.bf16.gmra.mrb[88].mxu0 %vm1232_vm11, %v1976_v48  ;;  %v1948_v38 = vpop.xlane.xlu0 %1947 }
 0x609   :  { %v9175_v24 = vpop.eup %9174  ;;  %9180 = vrcp.f32 %v1948_v38  ;;  %8308 = vmatprep.mubr.msk.bf16.mxu0 %vm9608_vm2, %v13831_v55  ;;  %v11042_v38 = vld [vmem:[%s13759_s3 + $0x5d] ss:$0 sm:$0xff] }
 0x60a   :  { %v1965_v1 = vmul.f32 %v9175_v24, %v10918_v11 }
 0x60b   :  { %v9177_v4 = vpop.eup %9176 }
 0x60c   :  { %v1966_v60 = vmul.f32 %v9177_v4, %v10926_v7 }
 0x60e   :  { %v1977_v20 = vpack.c.bf16 %v1966_v60, %v1965_v1  ;;  %v11048_v1 = vld [vmem:[%s13759_s3 + $0x5e] ss:$0 sm:$0xff] }
 0x610   :  { %8309 = vmatmul.mubr.msk.bf16.gmra.mrb[92].mxu0 %vm1232_vm11, %v1977_v20 }
 0x611   :  { %v9179_v26 = vpop.eup %9178  ;;  %8312 = vmatprep.mubr.msk.bf16.mxu0 %vm9608_vm2, %v13831_v55 }
 0x612   :  { %v1967_v58 = vmul.f32 %v9179_v26, %v10939_v50 }
 0x613   :  { %v9181_v35 = vpop.eup %9180 }
 0x614   :  { %v1968_v17 = vmul.f32 %v9181_v35, %v10944_v45 }
 0x616   :  { %v1978_v40 = vpack.c.bf16 %v1968_v17, %v1967_v58 }
 0x618   :  { %8313 = vmatmul.mubr.msk.bf16.gmra.mrb[96].mxu0 %vm1232_vm11, %v1978_v40 }
 0x636   :  { %v1712_v49 = vpop.f32.mrb[60].mxu0 }
 0x637   :  { %v8178_v0 = vpop.f32.mrb[61].mxu0 }
 0x638   :  { %v1715_v11 = vpop.f32.mrb[62].mxu0  ;;  %v13833_v0 = vld [vmem:[#allocation2_spill] sm:$0xff] }
 0x639   :  { %v2368_v10 = vpack.c.bf16 %v1715_v11, %v1712_v49  ;;  %v8179_v7 = vpop.f32.mrb[63].mxu0 }
 0x63b   :  { %8320 = vmatprep.mubr.msk.bf16.mxu1 %vm333_vm1, %v2368_v10 }
 0x63e   :  { %v1720_v13 = vpop.f32.mrb[64].mxu0 }
 0x63f   :  { %v8182_v56 = vpop.f32.mrb[65].mxu0 }
 0x640   :  { %v1723_v57 = vpop.f32.mrb[66].mxu0 }
 0x641   :  { %v2369_v12 = vpack.c.bf16 %v1723_v57, %v1720_v13  ;;  %v8183_v25 = vpop.f32.mrb[67].mxu0  ;;  %v13834_v13 = vld [vmem:[#allocation3_spill] sm:$0xff]  ;;  %v13835_v57 = vld [vmem:[#allocation4_spill] sm:$0xff] }
 0x643   :  { %8321 = vmatmul.mubr.msk.bf16.vlgmr.msra.gmra.mrb[100].mxu1 %vm333_vm1, %v2369_v12 }
 0x646   :  { %v1728_v50 = vpop.f32.mrb[68].mxu0 }
 0x647   :  { %v8186_v44 = vpop.f32.mrb[69].mxu0 }
 0x648   :  { %v1731_v45 = vpop.f32.mrb[70].mxu0 }
 0x649   :  { %v2370_v5 = vpack.c.bf16 %v1731_v45, %v1728_v50  ;;  %v8187_v62 = vpop.f32.mrb[71].mxu0  ;;  %v13836_v50 = vld [vmem:[#allocation5_spill] sm:$0xff] }
 0x64b   :  { %8324 = vmatprep.mubr.msk.bf16.mxu1 %vm333_vm1, %v2370_v5 }
 0x64e   :  { %v1736_v22 = vpop.f32.mrb[72].mxu0 }
 0x64f   :  { %v8190_v27 = vpop.f32.mrb[73].mxu0 }
 0x650   :  { %v1739_v2 = vpop.f32.mrb[74].mxu0 }
 0x651   :  { %v2371_v21 = vpack.c.bf16 %v1739_v2, %v1736_v22  ;;  %v8191_v9 = vpop.f32.mrb[75].mxu0 }
 0x653   :  { %8325 = vmatmul.mubr.msk.bf16.gmra.mrb[104].mxu1 %vm333_vm1, %v2371_v21 }
 0x656   :  { %v1744_v39 = vpop.f32.mrb[76].mxu0 }
 0x657   :  { %v8194_v15 = vpop.f32.mrb[77].mxu0 }
 0x658   :  { %v1747_v19 = vpop.f32.mrb[78].mxu0 }
 0x659   :  { %v2372_v47 = vpack.c.bf16 %v1747_v19, %v1744_v39  ;;  %v8195_v42 = vpop.f32.mrb[79].mxu0 }
 0x65b   :  { %8328 = vmatprep.mubr.msk.bf16.mxu1 %vm333_vm1, %v2372_v47 }
 0x6c7   :  { %v2329_v41 = vpop.f32.mrb[80].mxu0 }
 0x6c8   :  { %v8298_v59 = vpop.f32.mrb[81].mxu0 }
 0x6c9   :  { %v2332_v34 = vpop.f32.mrb[82].mxu0 }
 0x6ca   :  { %v2373_v63 = vpack.c.bf16 %v2332_v34, %v2329_v41  ;;  %v8299_v23 = vpop.f32.mrb[83].mxu0  ;;  %v13837_v41 = vld [vmem:[#allocation7_spill] sm:$0xff] }
 0x6cb   :  { %v13838_v23 = vld [vmem:[#allocation6_spill] sm:$0xff] }
 0x6cc   :  { %8329 = vmatmul.mubr.msk.bf16.gmra.mrb[108].mxu1 %vm333_vm1, %v2373_v63 }
 0x6d3   :  { %v2337_v30 = vpop.f32.mrb[84].mxu0 }
 0x6d4   :  { %v8302_v54 = vpop.f32.mrb[85].mxu0 }
 0x6d5   :  { %v2340_v51 = vpop.f32.mrb[86].mxu0  ;;  %v13839_v54 = vld [vmem:[#allocation8_spill] sm:$0xff] }
 0x6d6   :  { %v2374_v6 = vpack.c.bf16 %v2340_v51, %v2337_v30  ;;  %v8303_v28 = vpop.f32.mrb[87].mxu0 }
 0x6d7   :  { %v13840_v28 = vld [vmem:[#allocation9_spill] sm:$0xff] }
 0x6d8   :  { %8332 = vmatprep.mubr.msk.bf16.mxu1 %vm333_vm1, %v2374_v6 }
 0x6db   :  { %v2345_v18 = vpop.f32.mrb[88].mxu0 }
 0x6dc   :  { %v8306_v53 = vpop.f32.mrb[89].mxu0 }
 0x6dd   :  { %v2348_v43 = vpop.f32.mrb[90].mxu0 }
 0x6de   :  { %v2375_v61 = vpack.c.bf16 %v2348_v43, %v2345_v18  ;;  %v8307_v46 = vpop.f32.mrb[91].mxu0 }
 0x6e0   :  { %8333 = vmatmul.mubr.msk.bf16.gmra.mrb[112].mxu1 %vm333_vm1, %v2375_v61 }
 0x6e3   :  { %v2353_v52 = vpop.f32.mrb[92].mxu0 }
 0x6e4   :  { %v8310_v32 = vpop.f32.mrb[93].mxu0 }
 0x6e5   :  { %v2356_v36 = vpop.f32.mrb[94].mxu0 }
 0x6e6   :  { %v2376_v37 = vpack.c.bf16 %v2356_v36, %v2353_v52  ;;  %v8311_v29 = vpop.f32.mrb[95].mxu0 }
 0x6e8   :  { %8336 = vmatprep.mubr.msk.bf16.mxu1 %vm333_vm1, %v2376_v37 }
 0x6eb   :  { %v2361_v3 = vpop.f32.mrb[96].mxu0 }
 0x6ec   :  { %v8314_v31 = vpop.f32.mrb[97].mxu0 }
 0x6ed   :  { %v2364_v8 = vpop.f32.mrb[98].mxu0 }
 0x6ee   :  { %v2377_v33 = vpack.c.bf16 %v2364_v8, %v2361_v3  ;;  %v8315_v48 = vpop.f32.mrb[99].mxu0 }
 0x6ef   :  { %v13841_v48 = vld [vmem:[#allocation10_spill] sm:$0xff] }
 0x6f0   :  { %8337 = vmatmul.mubr.msk.bf16.gmra.mrb[116].mxu1 %vm333_vm1, %v2377_v33 }
 0x716   :  { %v8322_v24 = vpop.f32.mrb[100].mxu1 }
 0x717   :  { %v2472_v4 = vadd.f32 %v8322_v24, %v11042_v38  ;;  %v2463_v60 = vpop.f32.mrb[101].mxu1 }
 0x718   :  { %v2464_v20 = vadd.f32 %v11042_v38, %v2463_v60  ;;  %v8323_v26 = vpop.f32.mrb[102].mxu1 }
 0x719   :  { %v2475_v35 = vadd.f32 %v8323_v26, %v11042_v38  ;;  %v2466_v58 = vpop.f32.mrb[103].mxu1  ;;  %v2549_v17 = vmul.f32 %v11048_v1, %v2472_v4 }
 0x71a   :  { %v2547_v40 = vmul.f32 %v11048_v1, %v2464_v20  ;;  %v2467_v49 = vadd.f32 %v11042_v38, %v2466_v58  ;;  %v13842_v20 = vld [vmem:[#allocation11_spill] sm:$0xff] }
 0x71b   :  { %v2550_v10 = vmul.f32 %v11048_v1, %v2475_v35  ;;  %v11061_v56 = vadd.f32 %v2549_v17, %v13834_v13  ;;  %v13843_v35 = vld [vmem:[#allocation12_spill] sm:$0xff] }
 0x71c   :  { %v11056_v11 = vadd.f32 %v2547_v40, %v13833_v0  ;;  %v2548_v7 = vmul.f32 %v11048_v1, %v2467_v49  ;;  %v13844_v40 = vld [vmem:[#allocation13_spill] sm:$0xff] }
 0x71d   :  { %v11069_v44 = vadd.f32 %v2550_v10, %v13836_v50  ;;  %v2595_v5 = vsel %vm333_vm1, %v11061_v56, 0.0 }
 0x71e   :  { %v11064_v12 = vadd.f32 %v2548_v7, %v13835_v57  ;;  %v2589_v25 = vsel %vm333_vm1, %v11056_v11, 0.0 }
 0x71f   :  { %2590 = vadd.xlane.f32.xlu1 %v2589_v25  ;;  %v2598_v62 = vsel %vm333_vm1, %v11069_v44, 0.0 }
 0x720   :  { %v2592_v45 = vsel %vm333_vm1, %v11064_v12, 0.0 }
 0x721   :  { %2593 = vadd.xlane.f32.xlu0 %v2592_v45 }
 0x723   :  { %2596 = vadd.xlane.f32.xlu1 %v2595_v5 }
 0x725   :  { %2599 = vadd.xlane.f32.xlu0 %v2598_v62 }
 0x726   :  { %v8326_v22 = vpop.f32.mrb[104].mxu1 }
 0x727   :  { %v2488_v27 = vadd.f32 %v8326_v22, %v11042_v38  ;;  %v2479_v2 = vpop.f32.mrb[105].mxu1 }
 0x728   :  { %v2480_v21 = vadd.f32 %v11042_v38, %v2479_v2  ;;  %v8327_v9 = vpop.f32.mrb[106].mxu1 }
 0x729   :  { %v2491_v39 = vadd.f32 %v8327_v9, %v11042_v38  ;;  %v2482_v15 = vpop.f32.mrb[107].mxu1  ;;  %v2553_v19 = vmul.f32 %v11048_v1, %v2488_v27 }
 0x72a   :  { %v2551_v47 = vmul.f32 %v11048_v1, %v2480_v21  ;;  %v2483_v42 = vadd.f32 %v11042_v38, %v2482_v15  ;;  %v13845_v21 = vld [vmem:[#allocation15_spill] sm:$0xff] }
 0x72b   :  { %v2554_v34 = vmul.f32 %v11048_v1, %v2491_v39  ;;  %v11089_v30 = vadd.f32 %v2553_v19, %v13838_v23  ;;  %v13846_v19 = vld [vmem:[#allocation14_spill] sm:$0xff] }
 0x72c   :  { %v11084_v59 = vadd.f32 %v2551_v47, %v13837_v41  ;;  %v2552_v63 = vmul.f32 %v11048_v1, %v2483_v42  ;;  %v13847_v42 = vld [vmem:[#allocation16_spill] sm:$0xff] }
 0x72d   :  { %v11097_v18 = vadd.f32 %v2554_v34, %v13840_v28  ;;  %v2607_v43 = vsel %vm333_vm1, %v11089_v30, 0.0 }
 0x72e   :  { %v11092_v51 = vadd.f32 %v2552_v63, %v13839_v54  ;;  %v2601_v6 = vsel %vm333_vm1, %v11084_v59, 0.0  ;;  %v13848_v63 = vld [vmem:[#allocation17_spill] sm:$0xff] }
 0x72f   :  { %2602 = vadd.xlane.f32.xlu1 %v2601_v6  ;;  %v2610_v61 = vsel %vm333_vm1, %v11097_v18, 0.0 }
 0x730   :  { %v2604_v53 = vsel %vm333_vm1, %v11092_v51, 0.0 }
 0x731   :  { %2605 = vadd.xlane.f32.xlu0 %v2604_v53 }
 0x733   :  { %2608 = vadd.xlane.f32.xlu1 %v2607_v43 }
 0x735   :  { %2611 = vadd.xlane.f32.xlu0 %v2610_v61 }
 0x79f   :  { %v8330_v46 = vpop.f32.mrb[108].mxu1 }
 0x7a0   :  { %v2504_v52 = vadd.f32 %v8330_v46, %v11042_v38  ;;  %v2495_v32 = vpop.f32.mrb[109].mxu1 }
 0x7a1   :  { %v2496_v36 = vadd.f32 %v11042_v38, %v2495_v32  ;;  %v8331_v37 = vpop.f32.mrb[110].mxu1 }
 0x7a2   :  { %v2507_v29 = vadd.f32 %v8331_v37, %v11042_v38  ;;  %v2498_v3 = vpop.f32.mrb[111].mxu1  ;;  %v2557_v31 = vmul.f32 %v11048_v1, %v2504_v52 }
 0x7a3   :  { %v2555_v8 = vmul.f32 %v11048_v1, %v2496_v36  ;;  %v2499_v33 = vadd.f32 %v11042_v38, %v2498_v3 }
 0x7a4   :  { %v2558_v4 = vmul.f32 %v11048_v1, %v2507_v29  ;;  %v11117_v26 = vadd.f32 %v2557_v31, %v13842_v20  ;;  %v13849_v20 = vld [vmem:[#allocation19_spill] sm:$0xff] }
 0x7a5   :  { %v11112_v24 = vadd.f32 %v2555_v8, %v13841_v48  ;;  %v2556_v60 = vmul.f32 %v11048_v1, %v2499_v33 }
 0x7a6   :  { %v11125_v49 = vadd.f32 %v2558_v4, %v13844_v40  ;;  %v2619_v10 = vsel %vm333_vm1, %v11117_v26, 0.0 }
 0x7a7   :  { %v11120_v58 = vadd.f32 %v2556_v60, %v13843_v35  ;;  %v2613_v17 = vsel %vm333_vm1, %v11112_v24, 0.0 }
 0x7a8   :  { %2614 = vadd.xlane.f32.xlu1 %v2613_v17  ;;  %v2622_v7 = vsel %vm333_vm1, %v11125_v49, 0.0 }
 0x7a9   :  { %v2616_v0 = vsel %vm333_vm1, %v11120_v58, 0.0 }
 0x7aa   :  { %2617 = vadd.xlane.f32.xlu0 %v2616_v0 }
 0x7ac   :  { %2620 = vadd.xlane.f32.xlu1 %v2619_v10  ;;  %v2591_v28 = vpop.xlane.xlu1 %2590 }
 0x7ad   :  { %v2649_v37 = vmul.f32 0.03125, %v2591_v28 }
 0x7ae   :  { %2623 = vadd.xlane.f32.xlu0 %v2622_v7  ;;  %v2594_v43 = vpop.xlane.xlu0 %2593 }
 0x7af   :  { %v2650_v60 = vmul.f32 0.03125, %v2594_v43  ;;  %v11173_v0 = vsub.f32 %v11056_v11, %v2649_v37 }
 0x7b0   :  { %v2597_v29 = vpop.xlane.xlu1 %2596 }
 0x7b1   :  { %v2651_v7 = vmul.f32 0.03125, %v2597_v29 }
 0x7b2   :  { %v2600_v4 = vpop.xlane.xlu0 %2599 }
 0x7b3   :  { %v8334_v13 = vpop.f32.mrb[112].mxu1 }
 0x7b4   :  { %v2520_v57 = vadd.f32 %v8334_v13, %v11042_v38  ;;  %v2511_v25 = vpop.f32.mrb[113].mxu1  ;;  %v13850_v13 = vld [vmem:[#allocation18_spill] sm:$0xff] }
 0x7b5   :  { %v2512_v50 = vadd.f32 %v11042_v38, %v2511_v25  ;;  %v8335_v45 = vpop.f32.mrb[114].mxu1  ;;  %v13851_v25 = vld [vmem:[#allocation20_spill] sm:$0xff] }
 0x7b6   :  { %v2523_v5 = vadd.f32 %v8335_v45, %v11042_v38  ;;  %v2514_v62 = vpop.f32.mrb[115].mxu1  ;;  %v2561_v22 = vmul.f32 %v11048_v1, %v2520_v57 }
 0x7b7   :  { %v2559_v27 = vmul.f32 %v11048_v1, %v2512_v50  ;;  %v2515_v2 = vadd.f32 %v11042_v38, %v2514_v62  ;;  %v13852_v62 = vld [vmem:[#allocation21_spill] sm:$0xff] }
 0x7b8   :  { %v2562_v39 = vmul.f32 %v11048_v1, %v2523_v5  ;;  %v11145_v47 = vadd.f32 %v2561_v22, %v13846_v19  ;;  %v11184_v5 = vsub.f32 %v11064_v12, %v2650_v60 }
 0x7b9   :  { %v11140_v9 = vadd.f32 %v2559_v27, %v13845_v21  ;;  %v2560_v15 = vmul.f32 %v11048_v1, %v2515_v2  ;;  %v11192_v2 = vsub.f32 %v11061_v56, %v2651_v7  ;;  %v8949_v7 = vld [vmem:[%s13756_s2 + $0x48] sm:$0xff]  }
 0x7ba   :  { %v11153_v23 = vadd.f32 %v2562_v39, %v13848_v63  ;;  %v2631_v6 = vsel %vm333_vm1, %v11145_v47, 0.0 }
 0x7bb   :  { %v11148_v41 = vadd.f32 %v2560_v15, %v13847_v42  ;;  %v2625_v34 = vsel %vm333_vm1, %v11140_v9, 0.0  ;;  %v2689_v15 = vmul.f32 %v11173_v0, %v11173_v0 }
 0x7bc   :  { %2626 = vadd.xlane.f32.xlu1 %v2625_v34  ;;  %v2634_v53 = vsel %vm333_vm1, %v11153_v23, 0.0  ;;  %v2603_v10 = vpop.xlane.xlu1 %2602 }
 0x7bd   :  { %v2628_v54 = vsel %vm333_vm1, %v11148_v41, 0.0  ;;  %v2653_v21 = vmul.f32 0.03125, %v2603_v10  ;;  %v2709_v43 = vsel %vm333_vm1, %v2689_v15, 0.0  ;;  %v8948_v10 = vld [vmem:[%s13756_s2 + $0x40] sm:$0xff]  }
 0x7be   :  { %2629 = vadd.xlane.f32.xlu0 %v2628_v54  ;;  %v2606_v45 = vpop.xlane.xlu0 %2605  ;;  %v2690_v54 = vmul.f32 %v11184_v5, %v11184_v5  ;;  %8340 = vmatprep.subr.bf16.mxu1 %v8948_v10 }
 0x7bf   :  { %v2654_v34 = vmul.f32 0.03125, %v2606_v45  ;;  %v11206_v28 = vsub.f32 %v11084_v59, %v2653_v21  ;;  %8341 = vmatpush3.bf16.msra.mxu1 %v8948_v10 }
 0x7c0   :  { %2632 = vadd.xlane.f32.xlu1 %v2631_v6  ;;  %v2609_v19 = vpop.xlane.xlu1 %2608  ;;  %8342 = vmatprep.subr.bf16.mxu1 %v8949_v7 }
 0x7c2   :  { %2635 = vadd.xlane.f32.xlu0 %v2634_v53  ;;  %v2612_v6 = vpop.xlane.xlu0 %2611  ;;  %v2655_v53 = vmul.f32 0.03125, %v2609_v19 }
 0x7c3   :  { %v8338_v61 = vpop.f32.mrb[116].mxu1  ;;  %8343 = vmatpush3.bf16.msra.mxu1 %v8949_v7 }
 0x7c4   :  { %v2536_v46 = vadd.f32 %v8338_v61, %v11042_v38  ;;  %v2527_v52 = vpop.f32.mrb[117].mxu1  ;;  %v2691_v61 = vmul.f32 %v11192_v2, %v11192_v2  ;;  %v11218_v37 = vsub.f32 %v11089_v30, %v2655_v53 }
 0x7c5   :  { %v2528_v32 = vadd.f32 %v11042_v38, %v2527_v52  ;;  %v8339_v36 = vpop.f32.mrb[118].mxu1  ;;  %v2656_v52 = vmul.f32 0.03125, %v2612_v6 }
 0x7c6   :  { %v2539_v3 = vadd.f32 %v8339_v36, %v11042_v38  ;;  %v2530_v31 = vpop.f32.mrb[119].mxu1  ;;  %v2565_v8 = vmul.f32 %v11048_v1, %v2536_v46  ;;  %v11212_v46 = vsub.f32 %v11092_v51, %v2654_v34  ;;  %v2715_v29 = vsel %vm333_vm1, %v2691_v61, 0.0 }
 0x7c7   :  { %v2563_v33 = vmul.f32 %v11048_v1, %v2528_v32  ;;  %v2531_v48 = vadd.f32 %v11042_v38, %v2530_v31  ;;  %v2712_v32 = vsel %vm333_vm1, %v2690_v54, 0.0  ;;  %v11224_v31 = vsub.f32 %v11097_v18, %v2656_v52 }
 0x7c8   :  { %v2566_v17 = vmul.f32 %v11048_v1, %v2539_v3  ;;  %v11176_v57 = vadd.f32 %v2565_v8, %v13850_v13  ;;  %v2693_v3 = vmul.f32 %v11206_v28, %v11206_v28 }
 0x7c9   :  { %v11168_v35 = vadd.f32 %v2563_v33, %v13849_v20  ;;  %v2564_v40 = vmul.f32 %v11048_v1, %v2531_v48  ;;  %v2652_v1 = vmul.f32 0.03125, %v2600_v4  ;;  %v2694_v33 = vmul.f32 %v11212_v46, %v11212_v46 }
 0x7ca   :  { %v11187_v22 = vadd.f32 %v2566_v17, %v13852_v62  ;;  %v2643_v39 = vsel %vm333_vm1, %v11176_v57, 0.0  ;;  %v2721_v48 = vsel %vm333_vm1, %v2693_v3, 0.0  ;;  %v2695_v4 = vmul.f32 %v11218_v37, %v11218_v37 }
 0x7cb   :  { %v11179_v50 = vadd.f32 %v2564_v40, %v13851_v25  ;;  %v2637_v38 = vsel %vm333_vm1, %v11168_v35, 0.0  ;;  %v11199_v42 = vsub.f32 %v11069_v44, %v2652_v1  ;;  %v2724_v60 = vsel %vm333_vm1, %v2694_v33, 0.0 }
 0x7cc   :  { %2638 = vadd.xlane.f32.xlu1 %v2637_v38  ;;  %v2646_v63 = vsel %vm333_vm1, %v11187_v22, 0.0  ;;  %v2696_v20 = vmul.f32 %v11224_v31, %v11224_v31  ;;  %v2727_v17 = vsel %vm333_vm1, %v2695_v4, 0.0 }
 0x7cd   :  { %v2640_v27 = vsel %vm333_vm1, %v11179_v50, 0.0  ;;  %v2692_v36 = vmul.f32 %v11199_v42, %v11199_v42 }
 0x7ce   :  { %2641 = vadd.xlane.f32.xlu0 %v2640_v27  ;;  %v2730_v40 = vsel %vm333_vm1, %v2696_v20, 0.0 }
 0x7cf   :  { %v2718_v8 = vsel %vm333_vm1, %v2692_v36, 0.0 }
 0x7d0   :  { %2644 = vadd.xlane.f32.xlu1 %v2643_v39 }
 0x7d2   :  { %2647 = vadd.xlane.f32.xlu0 %v2646_v63 }
 0x7d4   :  { %2710 = vadd.xlane.f32.xlu1 %v2709_v43 }
 0x7d6   :  { %2713 = vadd.xlane.f32.xlu0 %v2712_v32 }
 0x7d8   :  { %2716 = vadd.xlane.f32.xlu1 %v2715_v29 }
 0x7da   :  { %2719 = vadd.xlane.f32.xlu0 %v2718_v8 }
 0x7dc   :  { %2722 = vadd.xlane.f32.xlu1 %v2721_v48 }
 0x7de   :  { %2725 = vadd.xlane.f32.xlu0 %v2724_v60 }
 0x7e0   :  { %2728 = vadd.xlane.f32.xlu1 %v2727_v17 }
 0x7e2   :  { %2731 = vadd.xlane.f32.xlu0 %v2730_v40 }
 0x835   :  { %v2615_v13 = vpop.xlane.xlu1 %2614 }
 0x836   :  { %v2657_v25 = vmul.f32 0.03125, %v2615_v13 }
 0x837   :  { %v2618_v38 = vpop.xlane.xlu0 %2617 }
 0x838   :  { %v11244_v45 = vsub.f32 %v11112_v24, %v2657_v25  ;;  %v2658_v1 = vmul.f32 0.03125, %v2618_v38 }
 0x839   :  { %v2621_v62 = vpop.xlane.xlu1 %2620 }
 0x83a   :  { %v11247_v27 = vsub.f32 %v11120_v58, %v2658_v1  ;;  %v2659_v21 = vmul.f32 0.03125, %v2621_v62  ;;  %v2697_v39 = vmul.f32 %v11244_v45, %v11244_v45 }
 0x83b   :  { %v2624_v15 = vpop.xlane.xlu0 %2623 }
 0x83c   :  { %v11252_v19 = vsub.f32 %v11117_v26, %v2659_v21  ;;  %v2660_v34 = vmul.f32 0.03125, %v2624_v15  ;;  %v2733_v63 = vsel %vm333_vm1, %v2697_v39, 0.0  ;;  %v2698_v54 = vmul.f32 %v11247_v27, %v11247_v27 }
 0x83d   :  { %2734 = vadd.xlane.f32.xlu1 %v2733_v63 }
 0x83e   :  { %v11258_v6 = vsub.f32 %v11125_v49, %v2660_v34  ;;  %v2736_v53 = vsel %vm333_vm1, %v2698_v54, 0.0  ;;  %v2699_v43 = vmul.f32 %v11252_v19, %v11252_v19 }
 0x83f   :  { %2737 = vadd.xlane.f32.xlu0 %v2736_v53 }
 0x840   :  { %v2739_v61 = vsel %vm333_vm1, %v2699_v43, 0.0  ;;  %v2700_v52 = vmul.f32 %v11258_v6, %v11258_v6 }
 0x841   :  { %2740 = vadd.xlane.f32.xlu1 %v2739_v61 }
 0x842   :  { %v2742_v32 = vsel %vm333_vm1, %v2700_v52, 0.0 }
 0x843   :  { %2743 = vadd.xlane.f32.xlu0 %v2742_v32 }
 0x849   :  { %v2627_v36 = vpop.xlane.xlu1 %2626 }
 0x84a   :  { %v2661_v29 = vmul.f32 0.03125, %v2627_v36 }
 0x84b   :  { %v2630_v3 = vpop.xlane.xlu0 %2629 }
 0x84c   :  { %v11268_v8 = vsub.f32 %v11140_v9, %v2661_v29  ;;  %v2662_v33 = vmul.f32 0.03125, %v2630_v3 }
 0x84d   :  { %v2633_v48 = vpop.xlane.xlu1 %2632 }
 0x84e   :  { %v11271_v4 = vsub.f32 %v11148_v41, %v2662_v33  ;;  %v2663_v60 = vmul.f32 0.03125, %v2633_v48  ;;  %v2701_v20 = vmul.f32 %v11268_v8, %v11268_v8 }
 0x84f   :  { %v2636_v17 = vpop.xlane.xlu0 %2635 }
 0x850   :  { %v11276_v40 = vsub.f32 %v11145_v47, %v2663_v60  ;;  %v2664_v10 = vmul.f32 0.03125, %v2636_v17  ;;  %v2745_v7 = vsel %vm333_vm1, %v2701_v20, 0.0  ;;  %v2702_v13 = vmul.f32 %v11271_v4, %v11271_v4 }
 0x851   :  { %2746 = vadd.xlane.f32.xlu1 %v2745_v7 }
 0x852   :  { %v11282_v25 = vsub.f32 %v11153_v23, %v2664_v10  ;;  %v2748_v38 = vsel %vm333_vm1, %v2702_v13, 0.0  ;;  %v2703_v1 = vmul.f32 %v11276_v40, %v11276_v40 }
 0x853   :  { %2749 = vadd.xlane.f32.xlu0 %v2748_v38 }
 0x854   :  { %v2751_v62 = vsel %vm333_vm1, %v2703_v1, 0.0  ;;  %v2704_v21 = vmul.f32 %v11282_v25, %v11282_v25 }
 0x855   :  { %2752 = vadd.xlane.f32.xlu1 %v2751_v62 }
 0x856   :  { %v2754_v39 = vsel %vm333_vm1, %v2704_v21, 0.0 }
 0x857   :  { %2755 = vadd.xlane.f32.xlu0 %v2754_v39 }
 0x859   :  { %v2639_v15 = vpop.xlane.xlu1 %2638 }
 0x85a   :  { %v2665_v34 = vmul.f32 0.03125, %v2639_v15 }
 0x85b   :  { %v2642_v63 = vpop.xlane.xlu0 %2641 }
 0x85c   :  { %v11292_v54 = vsub.f32 %v11168_v35, %v2665_v34  ;;  %v2666_v53 = vmul.f32 0.03125, %v2642_v63 }
 0x85d   :  { %v2645_v43 = vpop.xlane.xlu1 %2644 }
 0x85e   :  { %v11295_v61 = vsub.f32 %v11179_v50, %v2666_v53  ;;  %v2667_v52 = vmul.f32 0.03125, %v2645_v43  ;;  %v2705_v32 = vmul.f32 %v11292_v54, %v11292_v54 }
 0x85f   :  { %v2648_v36 = vpop.xlane.xlu0 %2647 }
 0x860   :  { %v11300_v29 = vsub.f32 %v11176_v57, %v2667_v52  ;;  %v2668_v3 = vmul.f32 0.03125, %v2648_v36  ;;  %v2757_v33 = vsel %vm333_vm1, %v2705_v32, 0.0  ;;  %v2706_v48 = vmul.f32 %v11295_v61, %v11295_v61 }
 0x861   :  { %2758 = vadd.xlane.f32.xlu1 %v2757_v33  ;;  %v2711_v60 = vpop.xlane.xlu1 %2710 }
 0x862   :  { %v11306_v20 = vsub.f32 %v11187_v22, %v2668_v3  ;;  %v2769_v17 = vmul.f32 0.03125, %v2711_v60  ;;  %v2760_v10 = vsel %vm333_vm1, %v2706_v48, 0.0  ;;  %v2707_v7 = vmul.f32 %v11300_v29, %v11300_v29 }
 0x863   :  { %2761 = vadd.xlane.f32.xlu0 %v2760_v10  ;;  %v2714_v13 = vpop.xlane.xlu0 %2713 }
 0x864   :  { %v2789_v38 = vadd.f32 1e-06, %v2769_v17  ;;  %v2770_v1 = vmul.f32 0.03125, %v2714_v13  ;;  %v2763_v62 = vsel %vm333_vm1, %v2707_v7, 0.0  ;;  %v2708_v21 = vmul.f32 %v11306_v20, %v11306_v20 }
 0x865   :  { %2764 = vadd.xlane.f32.xlu1 %v2763_v62  ;;  %v2717_v39 = vpop.xlane.xlu1 %2716 }
 0x866   :  { %9182 = vrsqrt.f32 %v2789_v38  ;;  %v2790_v15 = vadd.f32 1e-06, %v2770_v1  ;;  %v2771_v34 = vmul.f32 0.03125, %v2717_v39  ;;  %v2766_v63 = vsel %vm333_vm1, %v2708_v21, 0.0  ;;  %v11318_v1 = vld [vmem:[%s13759_s3 + $0x5f] ss:$0 sm:$0xff] }
 0x867   :  { %2767 = vadd.xlane.f32.xlu0 %v2766_v63  ;;  %v2720_v53 = vpop.xlane.xlu0 %2719 }
 0x868   :  { %9184 = vrsqrt.f32 %v2790_v15  ;;  %v2791_v43 = vadd.f32 1e-06, %v2771_v34  ;;  %v2772_v52 = vmul.f32 0.03125, %v2720_v53 }
 0x869   :  { %v2723_v32 = vpop.xlane.xlu1 %2722 }
 0x86a   :  { %9186 = vrsqrt.f32 %v2791_v43  ;;  %v2792_v36 = vadd.f32 1e-06, %v2772_v52  ;;  %v2773_v3 = vmul.f32 0.03125, %v2723_v32  ;;  %v11326_v52 = vld [vmem:[%s13759_s3 + $0x60] ss:$0 sm:$0xff] }
 0x86b   :  { %v2726_v33 = vpop.xlane.xlu0 %2725 }
 0x86c   :  { %9188 = vrsqrt.f32 %v2792_v36  ;;  %v2793_v48 = vadd.f32 1e-06, %v2773_v3  ;;  %v2774_v60 = vmul.f32 0.03125, %v2726_v33 }
 0x86d   :  { %v2729_v17 = vpop.xlane.xlu1 %2728 }
 0x86e   :  { %9190 = vrsqrt.f32 %v2793_v48  ;;  %v2794_v10 = vadd.f32 1e-06, %v2774_v60  ;;  %v2775_v7 = vmul.f32 0.03125, %v2729_v17 }
 0x86f   :  { %v2732_v13 = vpop.xlane.xlu0 %2731 }
 0x870   :  { %v9183_v38 = vpop.eup %9182  ;;  %9192 = vrsqrt.f32 %v2794_v10  ;;  %v2795_v62 = vadd.f32 1e-06, %v2775_v7  ;;  %v2776_v21 = vmul.f32 0.03125, %v2732_v13 }
 0x871   :  { %v2829_v39 = vmul.f32 %v9183_v38, %v11173_v0 }
 0x872   :  { %v9185_v15 = vpop.eup %9184  ;;  %9194 = vrsqrt.f32 %v2795_v62  ;;  %v2796_v34 = vadd.f32 1e-06, %v2776_v21 }
 0x873   :  { %v2830_v63 = vmul.f32 %v9185_v15, %v11184_v5  ;;  %v2853_v53 = vmul.f32 %v11318_v1, %v2829_v39 }
 0x874   :  { %v9187_v43 = vpop.eup %9186  ;;  %9196 = vrsqrt.f32 %v2796_v34 }
 0x875   :  { %v2831_v32 = vmul.f32 %v9187_v43, %v11192_v2  ;;  %v2854_v36 = vmul.f32 %v11318_v1, %v2830_v63  ;;  %v2877_v5 = vadd.f32 %v11326_v52, %v2853_v53 }
 0x876   :  { %v9189_v3 = vpop.eup %9188 }
 0x877   :  { %v2855_v0 = vmul.f32 %v11318_v1, %v2831_v32  ;;  %v2832_v33 = vmul.f32 %v9189_v3, %v11199_v42  ;;  %v2878_v48 = vadd.f32 %v11326_v52, %v2854_v36 }
 0x878   :  { %v9191_v60 = vpop.eup %9190 }
 0x879   :  { %v2856_v17 = vmul.f32 %v11318_v1, %v2832_v33  ;;  %v2897_v10 = vpack.c.bf16 %v2878_v48, %v2877_v5  ;;  %v2833_v7 = vmul.f32 %v9191_v60, %v11206_v28  ;;  %v2879_v2 = vadd.f32 %v11326_v52, %v2855_v0 }
 0x87a   :  { %v9193_v13 = vpop.eup %9192 }
 0x87b   :  { %v2880_v38 = vadd.f32 %v11326_v52, %v2856_v17  ;;  %8344 = vmatprep.mubr.msk.bf16.mxu1 %vm333_vm1, %v2897_v10  ;;  %v2834_v62 = vmul.f32 %v9193_v13, %v11212_v46  ;;  %v2857_v42 = vmul.f32 %v11318_v1, %v2833_v7 }
 0x87c   :  { %v9195_v21 = vpop.eup %9194 }
 0x87d   :  { %v2898_v39 = vpack.c.bf16 %v2880_v38, %v2879_v2  ;;  %v2858_v15 = vmul.f32 %v11318_v1, %v2834_v62  ;;  %v2835_v34 = vmul.f32 %v9195_v21, %v11218_v37  ;;  %v2881_v28 = vadd.f32 %v11326_v52, %v2857_v42  ;;  %v8950_v42 = vld [vmem:[%s13756_s2 + $0x50] sm:$0xff]  }
 0x87e   :  { %v9197_v63 = vpop.eup %9196  ;;  %8364 = vmatprep.subr.bf16.mxu0 %v8950_v42 }
 0x87f   :  { %8345 = vmatmul.mubr.msk.bf16.vlgmr.msra.gmra.mrb[120].mxu1 %vm333_vm1, %v2898_v39  ;;  %v2882_v53 = vadd.f32 %v11326_v52, %v2858_v15  ;;  %v2836_v43 = vmul.f32 %v9197_v63, %v11224_v31  ;;  %v2859_v32 = vmul.f32 %v11318_v1, %v2835_v34  ;;  %8365 = vmatpush3.bf16.msra.mxu0 %v8950_v42  ;;  %v8951_v15 = vld [vmem:[%s13756_s2 + $0x58] sm:$0xff]  }
 0x880   :  { %8366 = vmatprep.subr.bf16.mxu0 %v8951_v15 }
 0x881   :  { %v2899_v46 = vpack.c.bf16 %v2882_v53, %v2881_v28  ;;  %v2860_v36 = vmul.f32 %v11318_v1, %v2836_v43  ;;  %v2883_v3 = vadd.f32 %v11326_v52, %v2859_v32 }
 0x883   :  { %8348 = vmatprep.mubr.msk.bf16.mxu1 %vm333_vm1, %v2899_v46  ;;  %v2884_v37 = vadd.f32 %v11326_v52, %v2860_v36  ;;  %8367 = vmatpush3.bf16.msra.mxu0 %v8951_v15 }
 0x885   :  { %v2900_v0 = vpack.c.bf16 %v2884_v37, %v2883_v3 }
 0x887   :  { %8349 = vmatmul.mubr.msk.bf16.gmra.mrb[124].mxu1 %vm333_vm1, %v2900_v0 }
 0x8ca   :  { %v2735_v33 = vpop.xlane.xlu1 %2734 }
 0x8cb   :  { %v2777_v5 = vmul.f32 0.03125, %v2735_v33 }
 0x8cc   :  { %v2738_v48 = vpop.xlane.xlu0 %2737 }
 0x8cd   :  { %v2797_v60 = vadd.f32 1e-06, %v2777_v5  ;;  %v2778_v17 = vmul.f32 0.03125, %v2738_v48 }
 0x8ce   :  { %v2741_v31 = vpop.xlane.xlu1 %2740 }
 0x8cf   :  { %9198 = vrsqrt.f32 %v2797_v60  ;;  %v2798_v10 = vadd.f32 1e-06, %v2778_v17  ;;  %v2779_v7 = vmul.f32 0.03125, %v2741_v31 }
 0x8d0   :  { %v2744_v13 = vpop.xlane.xlu0 %2743 }
 0x8d1   :  { %9200 = vrsqrt.f32 %v2798_v10  ;;  %v2799_v2 = vadd.f32 1e-06, %v2779_v7  ;;  %v2780_v38 = vmul.f32 0.03125, %v2744_v13  ;;  %v8953_v10 = vld [vmem:[%s13756_s2 + $0x68] sm:$0xff]  }
 0x8d3   :  { %9202 = vrsqrt.f32 %v2799_v2  ;;  %v2800_v62 = vadd.f32 1e-06, %v2780_v38 }
 0x8d5   :  { %9204 = vrsqrt.f32 %v2800_v62 }
 0x8d9   :  { %v9199_v21 = vpop.eup %9198 }
 0x8da   :  { %v2837_v39 = vmul.f32 %v9199_v21, %v11244_v45  ;;  %v8952_v45 = vld [vmem:[%s13756_s2 + $0x60] sm:$0xff]  }
 0x8db   :  { %v9201_v34 = vpop.eup %9200  ;;  %8368 = vmatprep.subr.bf16.mxu0 %v8952_v45 }
 0x8dc   :  { %v2838_v63 = vmul.f32 %v9201_v34, %v11247_v27  ;;  %v2861_v28 = vmul.f32 %v11318_v1, %v2837_v39  ;;  %8369 = vmatpush3.bf16.msra.mxu0 %v8952_v45  ;;  %v8954_v39 = vld [vmem:[%s13756_s2 + $0x70] sm:$0xff]   ;;  %v8955_v34 = vld [vmem:[%s13756_s2 + $0x78] sm:$0xff]  }
 0x8dd   :  { %v9203_v53 = vpop.eup %9202  ;;  %8370 = vmatprep.subr.bf16.mxu0 %v8953_v10 }
 0x8de   :  { %v2747_v43 = vpop.xlane.xlu1 %2746  ;;  %v2862_v32 = vmul.f32 %v11318_v1, %v2838_v63  ;;  %v2839_v46 = vmul.f32 %v9203_v53, %v11252_v19  ;;  %v2885_v0 = vadd.f32 %v11326_v52, %v2861_v28 }
 0x8df   :  { %v9205_v36 = vpop.eup %9204  ;;  %v2781_v3 = vmul.f32 0.03125, %v2747_v43  ;;  %v8956_v43 = vld [vmem:[%s13756_s2 + $0x80] sm:$0xff]  }
 0x8e0   :  { %v2750_v37 = vpop.xlane.xlu0 %2749  ;;  %v2886_v27 = vadd.f32 %v11326_v52, %v2862_v32  ;;  %v2840_v33 = vmul.f32 %v9205_v36, %v11258_v6  ;;  %v2863_v5 = vmul.f32 %v11318_v1, %v2839_v46  ;;  %8371 = vmatpush3.bf16.msra.mxu0 %v8953_v10 }
 0x8e1   :  { %v2801_v48 = vadd.f32 1e-06, %v2781_v3  ;;  %v2782_v60 = vmul.f32 0.03125, %v2750_v37  ;;  %8372 = vmatprep.subr.bf16.mxu0 %v8954_v39 }
 0x8e2   :  { %v2753_v19 = vpop.xlane.xlu1 %2752  ;;  %v2901_v17 = vpack.c.bf16 %v2886_v27, %v2885_v0  ;;  %v2864_v31 = vmul.f32 %v11318_v1, %v2840_v33  ;;  %v2887_v6 = vadd.f32 %v11326_v52, %v2863_v5 }
 0x8e3   :  { %9206 = vrsqrt.f32 %v2801_v48  ;;  %v2802_v7 = vadd.f32 1e-06, %v2782_v60  ;;  %v2783_v13 = vmul.f32 0.03125, %v2753_v19  ;;  %v8957_v48 = vld [vmem:[%s13756_s2 + $0x88] sm:$0xff]  }
 0x8e4   :  { %v2756_v2 = vpop.xlane.xlu0 %2755  ;;  %8352 = vmatprep.mubr.msk.bf16.mxu1 %vm333_vm1, %v2901_v17  ;;  %v2888_v38 = vadd.f32 %v11326_v52, %v2864_v31  ;;  %8373 = vmatpush3.bf16.msra.mxu0 %v8954_v39 }
 0x8e5   :  { %9208 = vrsqrt.f32 %v2802_v7  ;;  %v2803_v62 = vadd.f32 1e-06, %v2783_v13  ;;  %v2784_v42 = vmul.f32 0.03125, %v2756_v2  ;;  %8374 = vmatprep.subr.bf16.mxu0 %v8955_v34 }
 0x8e6   :  { %v2902_v21 = vpack.c.bf16 %v2888_v38, %v2887_v6 }
 0x8e7   :  { %9210 = vrsqrt.f32 %v2803_v62  ;;  %v2804_v15 = vadd.f32 1e-06, %v2784_v42 }
 0x8e8   :  { %8353 = vmatmul.mubr.msk.bf16.gmra.mrb[128].mxu1 %vm333_vm1, %v2902_v21  ;;  %8375 = vmatpush3.bf16.msra.mxu0 %v8955_v34 }
 0x8e9   :  { %9212 = vrsqrt.f32 %v2804_v15  ;;  %8376 = vmatprep.subr.bf16.mxu0 %v8956_v43 }
 0x8ec   :  { %8377 = vmatpush3.bf16.msra.mxu0 %v8956_v43 }
 0x8ed   :  { %v9207_v63 = vpop.eup %9206  ;;  %8378 = vmatprep.subr.bf16.mxu0 %v8957_v48 }
 0x8ee   :  { %v2759_v28 = vpop.xlane.xlu1 %2758  ;;  %v2841_v53 = vmul.f32 %v9207_v63, %v11268_v8 }
 0x8ef   :  { %v9209_v32 = vpop.eup %9208  ;;  %v2785_v46 = vmul.f32 0.03125, %v2759_v28 }
 0x8f0   :  { %v2762_v45 = vpop.xlane.xlu0 %2761  ;;  %v2842_v36 = vmul.f32 %v9209_v32, %v11271_v4  ;;  %v2865_v3 = vmul.f32 %v11318_v1, %v2841_v53  ;;  %8379 = vmatpush3.bf16.msra.mxu0 %v8957_v48 }
 0x8f1   :  { %v9211_v37 = vpop.eup %9210  ;;  %v2805_v0 = vadd.f32 1e-06, %v2785_v46  ;;  %v2786_v27 = vmul.f32 0.03125, %v2762_v45 }
 0x8f2   :  { %v2765_v33 = vpop.xlane.xlu1 %2764  ;;  %v2866_v5 = vmul.f32 %v11318_v1, %v2842_v36  ;;  %v2843_v8 = vmul.f32 %v9211_v37, %v11276_v40  ;;  %v2889_v31 = vadd.f32 %v11326_v52, %v2865_v3 }
 0x8f3   :  { %v9213_v60 = vpop.eup %9212  ;;  %9214 = vrsqrt.f32 %v2805_v0  ;;  %v2806_v19 = vadd.f32 1e-06, %v2786_v27  ;;  %v2787_v4 = vmul.f32 0.03125, %v2765_v33 }
 0x8f4   :  { %v2768_v17 = vpop.xlane.xlu0 %2767  ;;  %v2890_v10 = vadd.f32 %v11326_v52, %v2866_v5  ;;  %v2844_v7 = vmul.f32 %v9213_v60, %v11282_v25  ;;  %v2867_v13 = vmul.f32 %v11318_v1, %v2843_v8 }
 0x8f5   :  { %9216 = vrsqrt.f32 %v2806_v19  ;;  %v2807_v40 = vadd.f32 1e-06, %v2787_v4  ;;  %v2788_v2 = vmul.f32 0.03125, %v2768_v17 }
 0x8f6   :  { %v2903_v6 = vpack.c.bf16 %v2890_v10, %v2889_v31  ;;  %v2868_v38 = vmul.f32 %v11318_v1, %v2844_v7  ;;  %v2891_v42 = vadd.f32 %v11326_v52, %v2867_v13 }
 0x8f7   :  { %9218 = vrsqrt.f32 %v2807_v40  ;;  %v2808_v62 = vadd.f32 1e-06, %v2788_v2 }
 0x8f8   :  { %8356 = vmatprep.mubr.msk.bf16.mxu1 %vm333_vm1, %v2903_v6  ;;  %v2892_v21 = vadd.f32 %v11326_v52, %v2868_v38 }
 0x8f9   :  { %9220 = vrsqrt.f32 %v2808_v62 }
 0x8fa   :  { %v2904_v25 = vpack.c.bf16 %v2892_v21, %v2891_v42 }
 0x8fc   :  { %8357 = vmatmul.mubr.msk.bf16.gmra.mrb[132].mxu1 %vm333_vm1, %v2904_v25 }
 0x8fd   :  { %v9215_v39 = vpop.eup %9214 }
 0x8fe   :  { %v2845_v15 = vmul.f32 %v9215_v39, %v11292_v54 }
 0x8ff   :  { %v9217_v34 = vpop.eup %9216 }
 0x900   :  { %v2846_v63 = vmul.f32 %v9217_v34, %v11295_v61  ;;  %v2869_v28 = vmul.f32 %v11318_v1, %v2845_v15 }
 0x901   :  { %v9219_v53 = vpop.eup %9218 }
 0x902   :  { %v2870_v43 = vmul.f32 %v11318_v1, %v2846_v63  ;;  %v2847_v32 = vmul.f32 %v9219_v53, %v11300_v29  ;;  %v2893_v45 = vadd.f32 %v11326_v52, %v2869_v28  ;;  %v11422_v29 = vld [vmem:[%s13759_s3 + $0x61] ss:$0 sm:$0xff] }
 0x903   :  { %v9221_v46 = vpop.eup %9220 }
 0x904   :  { %v2894_v36 = vadd.f32 %v11326_v52, %v2870_v43  ;;  %v2848_v3 = vmul.f32 %v9221_v46, %v11306_v20  ;;  %v2871_v37 = vmul.f32 %v11318_v1, %v2847_v32 }
 0x906   :  { %v2905_v54 = vpack.c.bf16 %v2894_v36, %v2893_v45  ;;  %v2872_v0 = vmul.f32 %v11318_v1, %v2848_v3  ;;  %v2895_v61 = vadd.f32 %v11326_v52, %v2871_v37 }
 0x908   :  { %8360 = vmatprep.mubr.msk.bf16.mxu1 %vm333_vm1, %v2905_v54  ;;  %v2896_v27 = vadd.f32 %v11326_v52, %v2872_v0 }
 0x90a   :  { %v2906_v33 = vpack.c.bf16 %v2896_v27, %v2895_v61 }
 0x90c   :  { %8361 = vmatmul.mubr.msk.bf16.gmra.mrb[136].mxu1 %vm333_vm1, %v2906_v33 }
 0x952   :  { %v8346_v20 = vpop.f32.mrb[120].mxu1 }
 0x953   :  { %v11425_v5 = vadd.f32 %v8346_v20, %v11422_v29  ;;  %v2992_v8 = vpop.f32.mrb[121].mxu1 }
 0x954   :  { %v11428_v1 = vadd.f32 %v11422_v29, %v2992_v8  ;;  %v8347_v48 = vpop.f32.mrb[122].mxu1 }
 0x955   :  { %v3073_v52 = vmul.f32 %v11425_v5, %v11425_v5  ;;  %v11433_v60 = vadd.f32 %v8347_v48, %v11422_v29  ;;  %v2995_v19 = vpop.f32.mrb[123].mxu1 }
 0x956   :  { %v3071_v4 = vmul.f32 %v11428_v1, %v11428_v1  ;;  %v11438_v17 = vadd.f32 %v11422_v29, %v2995_v19 }
 0x957   :  { %v3093_v31 = vmul.f32 %v3073_v52, %v11425_v5  ;;  %v3074_v10 = vmul.f32 %v11433_v60, %v11433_v60 }
 0x958   :  { %v3091_v7 = vmul.f32 %v3071_v4, %v11428_v1  ;;  %v3072_v13 = vmul.f32 %v11438_v17, %v11438_v17 }
 0x959   :  { %v3113_v40 = vmul.f32 0.044715, %v3093_v31  ;;  %v3094_v2 = vmul.f32 %v3074_v10, %v11433_v60 }
 0x95a   :  { %v3111_v6 = vmul.f32 0.044715, %v3091_v7  ;;  %v3092_v38 = vmul.f32 %v3072_v13, %v11438_v17  ;;  %v8350_v62 = vpop.f32.mrb[124].mxu1 }
 0x95b   :  { %v3133_v42 = vadd.f32 %v3113_v40, %v11425_v5  ;;  %v3114_v21 = vmul.f32 0.044715, %v3094_v2  ;;  %v11450_v25 = vadd.f32 %v8350_v62, %v11422_v29  ;;  %v3008_v39 = vpop.f32.mrb[125].mxu1 }
 0x95c   :  { %v3131_v15 = vadd.f32 %v3111_v6, %v11428_v1  ;;  %v3112_v34 = vmul.f32 0.044715, %v3092_v38  ;;  %v11454_v63 = vadd.f32 %v11422_v29, %v3008_v39  ;;  %v8351_v28 = vpop.f32.mrb[126].mxu1 }
 0x95d   :  { %v3153_v53 = vmul.f32 0.7978846, %v3133_v42  ;;  %v3134_v43 = vadd.f32 %v3114_v21, %v11433_v60  ;;  %v3077_v32 = vmul.f32 %v11450_v25, %v11450_v25  ;;  %v11460_v46 = vadd.f32 %v8351_v28, %v11422_v29  ;;  %v3011_v45 = vpop.f32.mrb[127].mxu1 }
 0x95e   :  { %v3151_v36 = vmul.f32 0.7978846, %v3131_v15  ;;  %v3132_v3 = vadd.f32 %v3112_v34, %v11438_v17  ;;  %v3075_v37 = vmul.f32 %v11454_v63, %v11454_v63  ;;  %v11466_v54 = vadd.f32 %v11422_v29, %v3011_v45 }
 0x95f   :  { %9222 = vtanh.f32 %v3153_v53  ;;  %v3154_v0 = vmul.f32 0.7978846, %v3134_v43  ;;  %v3097_v61 = vmul.f32 %v3077_v32, %v11450_v25  ;;  %v3078_v27 = vmul.f32 %v11460_v46, %v11460_v46 }
 0x960   :  { %9224 = vtanh.f32 %v3151_v36  ;;  %v3152_v33 = vmul.f32 0.7978846, %v3132_v3  ;;  %v3095_v20 = vmul.f32 %v3075_v37, %v11454_v63  ;;  %v3076_v8 = vmul.f32 %v11466_v54, %v11466_v54 }
 0x961   :  { %9226 = vtanh.f32 %v3154_v0  ;;  %v3117_v48 = vmul.f32 0.044715, %v3097_v61  ;;  %v3098_v52 = vmul.f32 %v3078_v27, %v11460_v46 }
 0x962   :  { %9228 = vtanh.f32 %v3152_v33  ;;  %v3115_v19 = vmul.f32 0.044715, %v3095_v20  ;;  %v3096_v4 = vmul.f32 %v3076_v8, %v11466_v54 }
 0x963   :  { %v3137_v31 = vadd.f32 %v3117_v48, %v11450_v25  ;;  %v3118_v10 = vmul.f32 0.044715, %v3098_v52 }
 0x964   :  { %v3135_v7 = vadd.f32 %v3115_v19, %v11454_v63  ;;  %v3116_v13 = vmul.f32 0.044715, %v3096_v4 }
 0x965   :  { %v3157_v40 = vmul.f32 0.7978846, %v3137_v31  ;;  %v3138_v2 = vadd.f32 %v3118_v10, %v11460_v46 }
 0x966   :  { %v3155_v6 = vmul.f32 0.7978846, %v3135_v7  ;;  %v3136_v38 = vadd.f32 %v3116_v13, %v11466_v54 }
 0x967   :  { %9230 = vtanh.f32 %v3157_v40  ;;  %v3158_v62 = vmul.f32 0.7978846, %v3138_v2 }
 0x968   :  { %9232 = vtanh.f32 %v3155_v6  ;;  %v3156_v42 = vmul.f32 0.7978846, %v3136_v38 }
 0x969   :  { %v9223_v21 = vpop.eup %9222  ;;  %9234 = vtanh.f32 %v3158_v62 }
 0x96a   :  { %v9225_v39 = vpop.eup %9224  ;;  %v3193_v15 = vadd.f32 1.0, %v9223_v21  ;;  %9236 = vtanh.f32 %v3156_v42 }
 0x96b   :  { %v9227_v34 = vpop.eup %9226  ;;  %v3191_v28 = vadd.f32 1.0, %v9225_v39 }
 0x96c   :  { %v9229_v53 = vpop.eup %9228  ;;  %v3213_v43 = vmul.f32 0.5, %v3193_v15  ;;  %v3194_v32 = vadd.f32 1.0, %v9227_v34 }
 0x96d   :  { %v3192_v45 = vadd.f32 1.0, %v9229_v53  ;;  %v3211_v36 = vmul.f32 0.5, %v3191_v28 }
 0x96e   :  { %v3214_v3 = vmul.f32 0.5, %v3194_v32  ;;  %v3233_v0 = vmul.f32 %v3213_v43, %v11425_v5 }
 0x96f   :  { %v3212_v37 = vmul.f32 0.5, %v3192_v45  ;;  %v3231_v33 = vmul.f32 %v3211_v36, %v11428_v1 }
 0x970   :  { %v3234_v61 = vmul.f32 %v3214_v3, %v11433_v60 }
 0x971   :  { %v9231_v27 = vpop.eup %9230  ;;  %v3232_v20 = vmul.f32 %v3212_v37, %v11438_v17 }
 0x972   :  { %v9233_v8 = vpop.eup %9232  ;;  %v3252_v48 = vpack.c.bf16 %v3234_v61, %v3233_v0  ;;  %v3197_v52 = vadd.f32 1.0, %v9231_v27 }
 0x973   :  { %v9235_v19 = vpop.eup %9234  ;;  %v3251_v4 = vpack.c.bf16 %v3232_v20, %v3231_v33  ;;  %v3195_v31 = vadd.f32 1.0, %v9233_v8 }
 0x974   :  { %v9237_v10 = vpop.eup %9236  ;;  %v3198_v7 = vadd.f32 1.0, %v9235_v19  ;;  %v3217_v13 = vmul.f32 0.5, %v3197_v52 }
 0x975   :  { %8380 = vmatprep.mubr.bf16.mxu0 %v3251_v4  ;;  %v3196_v40 = vadd.f32 1.0, %v9237_v10  ;;  %v3215_v2 = vmul.f32 0.5, %v3195_v31 }
 0x976   :  { %8381 = vmatmul.mubr.bf16.vlgmr.msra.gmra.mrb[100].mxu0 %v3252_v48  ;;  %v3218_v5 = vmul.f32 0.5, %v3198_v7  ;;  %v3237_v6 = vmul.f32 %v3217_v13, %v11450_v25 }
 0x977   :  { %v3216_v60 = vmul.f32 0.5, %v3196_v40  ;;  %v3235_v17 = vmul.f32 %v3215_v2, %v11454_v63 }
 0x978   :  { %v3238_v1 = vmul.f32 %v3218_v5, %v11460_v46 }
 0x979   :  { %v3236_v38 = vmul.f32 %v3216_v60, %v11466_v54 }
 0x97a   :  { %v3254_v62 = vpack.c.bf16 %v3238_v1, %v3237_v6 }
 0x97b   :  { %v3253_v42 = vpack.c.bf16 %v3236_v38, %v3235_v17 }
 0x97d   :  { %8384 = vmatprep.mubr.bf16.mxu0 %v3253_v42 }
 0x97e   :  { %8385 = vmatmul.mubr.bf16.gmra.mrb[104].mxu0 %v3254_v62 }
 0x9bb   :  { %v8354_v21 = vpop.f32.mrb[128].mxu1 }
 0x9bc   :  { %v11489_v39 = vadd.f32 %v8354_v21, %v11422_v29  ;;  %v3024_v15 = vpop.f32.mrb[129].mxu1 }
 0x9bd   :  { %v11492_v34 = vadd.f32 %v11422_v29, %v3024_v15  ;;  %v8355_v28 = vpop.f32.mrb[130].mxu1 }
 0x9be   :  { %v3081_v25 = vmul.f32 %v11489_v39, %v11489_v39  ;;  %v3036_v63 = vadd.f32 %v8355_v28, %v11422_v29  ;;  %v3027_v46 = vpop.f32.mrb[131].mxu1 }
 0x9bf   :  { %v3079_v54 = vmul.f32 %v11492_v34, %v11492_v34  ;;  %v3028_v53 = vadd.f32 %v11422_v29, %v3027_v46 }
 0x9c0   :  { %v3101_v43 = vmul.f32 %v3081_v25, %v11489_v39  ;;  %v3082_v32 = vmul.f32 %v3036_v63, %v3036_v63 }
 0x9c1   :  { %v3099_v45 = vmul.f32 %v3079_v54, %v11492_v34  ;;  %v3080_v36 = vmul.f32 %v3028_v53, %v3028_v53 }
 0x9c2   :  { %v3121_v3 = vmul.f32 0.044715, %v3101_v43  ;;  %v3102_v37 = vmul.f32 %v3082_v32, %v3036_v63 }
 0x9c3   :  { %v3119_v0 = vmul.f32 0.044715, %v3099_v45  ;;  %v3100_v61 = vmul.f32 %v3080_v36, %v3028_v53 }
 0x9c4   :  { %v3141_v27 = vadd.f32 %v3121_v3, %v11489_v39  ;;  %v3122_v33 = vmul.f32 0.044715, %v3102_v37 }
 0x9c5   :  { %v3139_v20 = vadd.f32 %v3119_v0, %v11492_v34  ;;  %v3120_v8 = vmul.f32 0.044715, %v3100_v61 }
 0x9c6   :  { %v3161_v48 = vmul.f32 0.7978846, %v3141_v27  ;;  %v3142_v52 = vadd.f32 %v3122_v33, %v3036_v63 }
 0x9c7   :  { %v3159_v19 = vmul.f32 0.7978846, %v3139_v20  ;;  %v3140_v4 = vadd.f32 %v3120_v8, %v3028_v53 }
 0x9c8   :  { %9238 = vtanh.f32 %v3161_v48  ;;  %v3162_v31 = vmul.f32 0.7978846, %v3142_v52 }
 0x9c9   :  { %9240 = vtanh.f32 %v3159_v19  ;;  %v3160_v10 = vmul.f32 0.7978846, %v3140_v4 }
 0x9ca   :  { %9242 = vtanh.f32 %v3162_v31 }
 0x9cb   :  { %9244 = vtanh.f32 %v3160_v10 }
 0x9cf   :  { %v8358_v7 = vpop.f32.mrb[132].mxu1 }
 0x9d0   :  { %v11505_v13 = vadd.f32 %v8358_v7, %v11422_v29  ;;  %v3040_v40 = vpop.f32.mrb[133].mxu1 }
 0x9d1   :  { %v11508_v2 = vadd.f32 %v11422_v29, %v3040_v40  ;;  %v8359_v5 = vpop.f32.mrb[134].mxu1 }
 0x9d2   :  { %v9239_v60 = vpop.eup %9238  ;;  %v3085_v6 = vmul.f32 %v11505_v13, %v11505_v13  ;;  %v11513_v1 = vadd.f32 %v8359_v5, %v11422_v29  ;;  %v3043_v17 = vpop.f32.mrb[135].mxu1 }
 0x9d3   :  { %v9241_v38 = vpop.eup %9240  ;;  %v3083_v62 = vmul.f32 %v11508_v2, %v11508_v2  ;;  %v11518_v42 = vadd.f32 %v11422_v29, %v3043_v17  ;;  %v3201_v21 = vadd.f32 1.0, %v9239_v60 }
 0x9d4   :  { %v9243_v15 = vpop.eup %9242  ;;  %v3105_v28 = vmul.f32 %v3085_v6, %v11505_v13  ;;  %v3086_v25 = vmul.f32 %v11513_v1, %v11513_v1  ;;  %v3199_v46 = vadd.f32 1.0, %v9241_v38 }
 0x9d5   :  { %v9245_v54 = vpop.eup %9244  ;;  %v3103_v43 = vmul.f32 %v3083_v62, %v11508_v2  ;;  %v3084_v32 = vmul.f32 %v11518_v42, %v11518_v42  ;;  %v3202_v45 = vadd.f32 1.0, %v9243_v15  ;;  %v3221_v36 = vmul.f32 0.5, %v3201_v21 }
 0x9d6   :  { %v3125_v3 = vmul.f32 0.044715, %v3105_v28  ;;  %v3106_v37 = vmul.f32 %v3086_v25, %v11513_v1  ;;  %v3200_v0 = vadd.f32 1.0, %v9245_v54  ;;  %v3219_v61 = vmul.f32 0.5, %v3199_v46 }
 0x9d7   :  { %v3123_v27 = vmul.f32 0.044715, %v3103_v43  ;;  %v3104_v33 = vmul.f32 %v3084_v32, %v11518_v42  ;;  %v3222_v20 = vmul.f32 0.5, %v3202_v45  ;;  %v3241_v31 = vmul.f32 %v3221_v36, %v11489_v39 }
 0x9d8   :  { %v3145_v8 = vadd.f32 %v3125_v3, %v11505_v13  ;;  %v3126_v48 = vmul.f32 0.044715, %v3106_v37  ;;  %v3220_v52 = vmul.f32 0.5, %v3200_v0  ;;  %v3239_v5 = vmul.f32 %v3219_v61, %v11492_v34 }
 0x9d9   :  { %v3143_v19 = vadd.f32 %v3123_v27, %v11508_v2  ;;  %v3124_v4 = vmul.f32 0.044715, %v3104_v33  ;;  %v3242_v10 = vmul.f32 %v3222_v20, %v3036_v63 }
 0x9da   :  { %v3165_v7 = vmul.f32 0.7978846, %v3145_v8  ;;  %v3146_v40 = vadd.f32 %v3126_v48, %v11513_v1  ;;  %v3240_v60 = vmul.f32 %v3220_v52, %v3028_v53 }
 0x9db   :  { %v3163_v6 = vmul.f32 0.7978846, %v3143_v19  ;;  %v3144_v17 = vadd.f32 %v3124_v4, %v11518_v42  ;;  %v3256_v38 = vpack.c.bf16 %v3242_v10, %v3241_v31 }
 0x9dc   :  { %9246 = vtanh.f32 %v3165_v7  ;;  %v3166_v62 = vmul.f32 0.7978846, %v3146_v40  ;;  %v3255_v21 = vpack.c.bf16 %v3240_v60, %v3239_v5 }
 0x9dd   :  { %9248 = vtanh.f32 %v3163_v6  ;;  %v3164_v15 = vmul.f32 0.7978846, %v3144_v17 }
 0x9de   :  { %9250 = vtanh.f32 %v3166_v62  ;;  %8388 = vmatprep.mubr.bf16.mxu0 %v3255_v21 }
 0x9df   :  { %9252 = vtanh.f32 %v3164_v15  ;;  %v8362_v39 = vpop.f32.mrb[136].mxu1  ;;  %8389 = vmatmul.mubr.bf16.gmra.mrb[108].mxu0 %v3256_v38 }
 0x9e0   :  { %v11535_v63 = vadd.f32 %v8362_v39, %v11422_v29  ;;  %v3056_v28 = vpop.f32.mrb[137].mxu1 }
 0x9e1   :  { %v11538_v34 = vadd.f32 %v11422_v29, %v3056_v28  ;;  %v8363_v53 = vpop.f32.mrb[138].mxu1 }
 0x9e2   :  { %v3089_v25 = vmul.f32 %v11535_v63, %v11535_v63  ;;  %v3068_v46 = vadd.f32 %v8363_v53, %v11422_v29  ;;  %v3059_v54 = vpop.f32.mrb[139].mxu1 }
 0x9e3   :  { %v3087_v43 = vmul.f32 %v11538_v34, %v11538_v34  ;;  %v3060_v32 = vadd.f32 %v11422_v29, %v3059_v54 }
 0x9e4   :  { %v3109_v45 = vmul.f32 %v3089_v25, %v11535_v63  ;;  %v3090_v36 = vmul.f32 %v3068_v46, %v3068_v46 }
 0x9e5   :  { %v3107_v3 = vmul.f32 %v3087_v43, %v11538_v34  ;;  %v3088_v37 = vmul.f32 %v3060_v32, %v3060_v32 }
 0x9e6   :  { %v9247_v0 = vpop.eup %9246  ;;  %v3129_v61 = vmul.f32 0.044715, %v3109_v45  ;;  %v3110_v27 = vmul.f32 %v3090_v36, %v3068_v46 }
 0x9e7   :  { %v9249_v33 = vpop.eup %9248  ;;  %v3127_v20 = vmul.f32 0.044715, %v3107_v3  ;;  %v3108_v8 = vmul.f32 %v3088_v37, %v3060_v32  ;;  %v3205_v48 = vadd.f32 1.0, %v9247_v0 }
 0x9e8   :  { %v9251_v52 = vpop.eup %9250  ;;  %v3149_v19 = vadd.f32 %v3129_v61, %v11535_v63  ;;  %v3130_v4 = vmul.f32 0.044715, %v3110_v27  ;;  %v3203_v31 = vadd.f32 1.0, %v9249_v33 }
 0x9e9   :  { %v9253_v10 = vpop.eup %9252  ;;  %v3147_v29 = vadd.f32 %v3127_v20, %v11538_v34  ;;  %v3128_v7 = vmul.f32 0.044715, %v3108_v8  ;;  %v3206_v40 = vadd.f32 1.0, %v9251_v52  ;;  %v3225_v5 = vmul.f32 0.5, %v3205_v48 }
 0x9ea   :  { %v3169_v60 = vmul.f32 0.7978846, %v3149_v19  ;;  %v3150_v6 = vadd.f32 %v3130_v4, %v3068_v46  ;;  %v3204_v17 = vadd.f32 1.0, %v9253_v10  ;;  %v3223_v38 = vmul.f32 0.5, %v3203_v31 }
 0x9eb   :  { %v3167_v62 = vmul.f32 0.7978846, %v3147_v29  ;;  %v3148_v21 = vadd.f32 %v3128_v7, %v3060_v32  ;;  %v3226_v15 = vmul.f32 0.5, %v3206_v40  ;;  %v3245_v25 = vmul.f32 %v3225_v5, %v11505_v13  ;;  %v11559_v7 = vld [vmem:[%s13759_s3 + $0x62] ss:$0 sm:$0xff] }
 0x9ec   :  { %9254 = vtanh.f32 %v3169_v60  ;;  %v3170_v39 = vmul.f32 0.7978846, %v3150_v6  ;;  %v3224_v28 = vmul.f32 0.5, %v3204_v17  ;;  %v3243_v43 = vmul.f32 %v3223_v38, %v11508_v2 }
 0x9ed   :  { %9256 = vtanh.f32 %v3167_v62  ;;  %v3168_v53 = vmul.f32 0.7978846, %v3148_v21  ;;  %v3246_v54 = vmul.f32 %v3226_v15, %v11513_v1 }
 0x9ee   :  { %9258 = vtanh.f32 %v3170_v39  ;;  %v3244_v45 = vmul.f32 %v3224_v28, %v11518_v42 }
 0x9ef   :  { %9260 = vtanh.f32 %v3168_v53  ;;  %v3258_v36 = vpack.c.bf16 %v3246_v54, %v3245_v25 }
 0x9f0   :  { %v3257_v3 = vpack.c.bf16 %v3244_v45, %v3243_v43 }
 0x9f2   :  { %8392 = vmatprep.mubr.bf16.mxu0 %v3257_v3 }
 0x9f3   :  { %8393 = vmatmul.mubr.bf16.gmra.mrb[112].mxu0 %v3258_v36 }
 0x9f6   :  { %v9255_v37 = vpop.eup %9254 }
 0x9f7   :  { %v9257_v0 = vpop.eup %9256  ;;  %v3209_v61 = vadd.f32 1.0, %v9255_v37 }
 0x9f8   :  { %v9259_v27 = vpop.eup %9258  ;;  %v3207_v33 = vadd.f32 1.0, %v9257_v0 }
 0x9f9   :  { %v9261_v20 = vpop.eup %9260  ;;  %v3210_v8 = vadd.f32 1.0, %v9259_v27  ;;  %v3229_v13 = vmul.f32 0.5, %v3209_v61 }
 0x9fa   :  { %v3208_v48 = vadd.f32 1.0, %v9261_v20  ;;  %v3227_v1 = vmul.f32 0.5, %v3207_v33 }
 0x9fb   :  { %v3230_v52 = vmul.f32 0.5, %v3210_v8  ;;  %v3249_v2 = vmul.f32 %v3229_v13, %v11535_v63  ;;  %v11565_v63 = vld [vmem:[%s13759_s3 + $0x63] ss:$0 sm:$0xff] }
 0x9fc   :  { %v3228_v19 = vmul.f32 0.5, %v3208_v48  ;;  %v3247_v4 = vmul.f32 %v3227_v1, %v11538_v34 }
 0x9fd   :  { %v3250_v42 = vmul.f32 %v3230_v52, %v3068_v46 }
 0x9fe   :  { %v3248_v31 = vmul.f32 %v3228_v19, %v3060_v32 }
 0x9ff   :  { %v3260_v10 = vpack.c.bf16 %v3250_v42, %v3249_v2 }
 0xa00   :  { %v3259_v29 = vpack.c.bf16 %v3248_v31, %v3247_v4 }
 0xa02   :  { %8396 = vmatprep.mubr.bf16.mxu0 %v3259_v29 }
 0xa03   :  { %8397 = vmatmul.mubr.bf16.gmra.mrb[116].mxu0 %v3260_v10 }
 0xa49   :  { %v8382_v40 = vpop.f32.mrb[100].mxu0 }
 0xa4a   :  { %v3373_v5 = vadd.f32 %v8382_v40, %v11559_v7  ;;  %v3364_v46 = vpop.f32.mrb[101].mxu0 }
 0xa4b   :  { %v3365_v34 = vadd.f32 %v11559_v7, %v3364_v46  ;;  %v8383_v32 = vpop.f32.mrb[102].mxu0 }
 0xa4c   :  { %v3376_v60 = vadd.f32 %v8383_v32, %v11559_v7  ;;  %v3367_v6 = vpop.f32.mrb[103].mxu0  ;;  %v3450_v17 = vmul.f32 %v11565_v63, %v3373_v5 }
 0xa4d   :  { %v3448_v38 = vmul.f32 %v11565_v63, %v3365_v34  ;;  %v3368_v62 = vadd.f32 %v11559_v7, %v3367_v6 }
 0xa4e   :  { %v3451_v15 = vmul.f32 %v11565_v63, %v3376_v60  ;;  %v11578_v28 = vadd.f32 %v3450_v17, %v11061_v56 }
 0xa4f   :  { %v11573_v21 = vadd.f32 %v3448_v38, %v11056_v11  ;;  %v3449_v39 = vmul.f32 %v11565_v63, %v3368_v62 }
 0xa50   :  { %13854 = vst [vmem:[#allocation2_spill] sm:$0xff] %v11578_v28  ;;  %v11587_v11 = vadd.f32 %v3451_v15, %v11069_v44  ;;  %v3496_v44 = vsel %vm333_vm1, %v11578_v28, 0.0 }
 0xa51   :  { %13853 = vst [vmem:[#allocation22_spill] sm:$0xff] %v11573_v21  ;;  %v11581_v53 = vadd.f32 %v3449_v39, %v11064_v12  ;;  %v8386_v25 = vpop.f32.mrb[104].mxu0  ;;  %v3490_v54 = vsel %vm333_vm1, %v11573_v21, 0.0 }
 0xa52   :  { %v3389_v43 = vadd.f32 %v8386_v25, %v11559_v7  ;;  %3491 = vadd.xlane.f32.xlu1 %v3490_v54  ;;  %v3380_v45 = vpop.f32.mrb[105].mxu0  ;;  %13856 = vst [vmem:[#allocation4_spill] sm:$0xff] %v11587_v11  ;;  %v3499_v13 = vsel %vm333_vm1, %v11587_v11, 0.0 }
 0xa53   :  { %13855 = vst [vmem:[#allocation3_spill] sm:$0xff] %v11581_v53  ;;  %v3381_v36 = vadd.f32 %v11559_v7, %v3380_v45  ;;  %v8387_v3 = vpop.f32.mrb[106].mxu0  ;;  %v3493_v56 = vsel %vm333_vm1, %v11581_v53, 0.0 }
 0xa54   :  { %v3392_v12 = vadd.f32 %v8387_v3, %v11559_v7  ;;  %3494 = vadd.xlane.f32.xlu0 %v3493_v56  ;;  %v3383_v37 = vpop.f32.mrb[107].mxu0  ;;  %v3454_v0 = vmul.f32 %v11565_v63, %v3389_v43 }
 0xa55   :  { %v3452_v61 = vmul.f32 %v11565_v63, %v3381_v36  ;;  %v3384_v27 = vadd.f32 %v11559_v7, %v3383_v37 }
 0xa56   :  { %3497 = vadd.xlane.f32.xlu1 %v3496_v44  ;;  %v3455_v20 = vmul.f32 %v11565_v63, %v3392_v12  ;;  %v11606_v48 = vadd.f32 %v3454_v0, %v11089_v30 }
 0xa57   :  { %v11599_v33 = vadd.f32 %v3452_v61, %v11084_v59  ;;  %v3453_v8 = vmul.f32 %v11565_v63, %v3384_v27 }
 0xa58   :  { %3500 = vadd.xlane.f32.xlu0 %v3499_v13  ;;  %13858 = vst [vmem:[#allocation7_spill] sm:$0xff] %v11606_v48  ;;  %v11614_v59 = vadd.f32 %v3455_v20, %v11097_v18  ;;  %v3508_v2 = vsel %vm333_vm1, %v11606_v48, 0.0 }
 0xa59   :  { %13857 = vst [vmem:[#allocation5_spill] sm:$0xff] %v11599_v33  ;;  %v11609_v1 = vadd.f32 %v3453_v8, %v11092_v51  ;;  %v3502_v52 = vsel %vm333_vm1, %v11599_v33, 0.0 }
 0xa5a   :  { %3503 = vadd.xlane.f32.xlu1 %v3502_v52  ;;  %13860 = vst [vmem:[#allocation8_spill] sm:$0xff] %v11614_v59  ;;  %v3511_v30 = vsel %vm333_vm1, %v11614_v59, 0.0 }
 0xa5b   :  { %13859 = vst [vmem:[#allocation6_spill] sm:$0xff] %v11609_v1  ;;  %v3505_v19 = vsel %vm333_vm1, %v11609_v1, 0.0 }
 0xa5c   :  { %3506 = vadd.xlane.f32.xlu0 %v3505_v19 }
 0xa5e   :  { %3509 = vadd.xlane.f32.xlu1 %v3508_v2 }
 0xa60   :  { %3512 = vadd.xlane.f32.xlu0 %v3511_v30 }
 0xab2   :  { %v8390_v51 = vpop.f32.mrb[108].mxu0 }
 0xab3   :  { %v3405_v42 = vadd.f32 %v8390_v51, %v11559_v7  ;;  %v3396_v4 = vpop.f32.mrb[109].mxu0 }
 0xab4   :  { %v3397_v31 = vadd.f32 %v11559_v7, %v3396_v4  ;;  %v8391_v18 = vpop.f32.mrb[110].mxu0 }
 0xab5   :  { %v3408_v10 = vadd.f32 %v8391_v18, %v11559_v7  ;;  %v3399_v29 = vpop.f32.mrb[111].mxu0  ;;  %v3458_v40 = vmul.f32 %v11565_v63, %v3405_v42 }
 0xab6   :  { %v3456_v5 = vmul.f32 %v11565_v63, %v3397_v31  ;;  %v3400_v46 = vadd.f32 %v11559_v7, %v3399_v29 }
 0xab7   :  { %v3459_v32 = vmul.f32 %v11565_v63, %v3408_v10  ;;  %v11634_v6 = vadd.f32 %v3458_v40, %v11117_v26 }
 0xab8   :  { %v11629_v34 = vadd.f32 %v3456_v5, %v11112_v24  ;;  %v3457_v60 = vmul.f32 %v11565_v63, %v3400_v46 }
 0xab9   :  { %13862 = vst [vmem:[#allocation10_spill] sm:$0xff] %v11634_v6  ;;  %v11642_v62 = vadd.f32 %v3459_v32, %v11125_v49  ;;  %v3520_v15 = vsel %vm333_vm1, %v11634_v6, 0.0 }
 0xaba   :  { %13861 = vst [vmem:[#allocation9_spill] sm:$0xff] %v11629_v34  ;;  %v11637_v17 = vadd.f32 %v3457_v60, %v11120_v58  ;;  %v3514_v38 = vsel %vm333_vm1, %v11629_v34, 0.0 }
 0xabb   :  { %3515 = vadd.xlane.f32.xlu1 %v3514_v38  ;;  %13864 = vst [vmem:[#allocation12_spill] sm:$0xff] %v11642_v62  ;;  %v3523_v26 = vsel %vm333_vm1, %v11642_v62, 0.0 }
 0xabc   :  { %13863 = vst [vmem:[#allocation11_spill] sm:$0xff] %v11637_v17  ;;  %v3517_v24 = vsel %vm333_vm1, %v11637_v17, 0.0 }
 0xabd   :  { %3518 = vadd.xlane.f32.xlu0 %v3517_v24 }
 0xabf   :  { %3521 = vadd.xlane.f32.xlu1 %v3520_v15 }
 0xac1   :  { %3524 = vadd.xlane.f32.xlu0 %v3523_v26 }
 0xac6   :  { %v8394_v58 = vpop.f32.mrb[112].mxu0 }
 0xac7   :  { %v3421_v39 = vadd.f32 %v8394_v58, %v11559_v7  ;;  %v3412_v25 = vpop.f32.mrb[113].mxu0 }
 0xac8   :  { %v3413_v54 = vadd.f32 %v11559_v7, %v3412_v25  ;;  %v8395_v49 = vpop.f32.mrb[114].mxu0 }
 0xac9   :  { %v3424_v43 = vadd.f32 %v8395_v49, %v11559_v7  ;;  %v3415_v45 = vpop.f32.mrb[115].mxu0  ;;  %v3462_v36 = vmul.f32 %v11565_v63, %v3421_v39 }
 0xaca   :  { %v3460_v3 = vmul.f32 %v11565_v63, %v3413_v54  ;;  %v3416_v56 = vadd.f32 %v11559_v7, %v3415_v45 }
 0xacb   :  { %v3463_v37 = vmul.f32 %v11565_v63, %v3424_v43  ;;  %v11662_v61 = vadd.f32 %v3462_v36, %v11145_v47 }
 0xacc   :  { %v11657_v12 = vadd.f32 %v3460_v3, %v11140_v9  ;;  %v3461_v0 = vmul.f32 %v11565_v63, %v3416_v56 }
 0xacd   :  { %13866 = vst [vmem:[#allocation15_spill] sm:$0xff] %v11662_v61  ;;  %v11670_v20 = vadd.f32 %v3463_v37, %v11153_v23  ;;  %v3532_v8 = vsel %vm333_vm1, %v11662_v61, 0.0 }
 0xace   :  { %13865 = vst [vmem:[#allocation13_spill] sm:$0xff] %v11657_v12  ;;  %v11665_v27 = vadd.f32 %v3461_v0, %v11148_v41  ;;  %v3526_v44 = vsel %vm333_vm1, %v11657_v12, 0.0 }
 0xacf   :  { %3527 = vadd.xlane.f32.xlu1 %v3526_v44  ;;  %13868 = vst [vmem:[#allocation16_spill] sm:$0xff] %v11670_v20  ;;  %v3535_v47 = vsel %vm333_vm1, %v11670_v20, 0.0 }
 0xad0   :  { %13867 = vst [vmem:[#allocation14_spill] sm:$0xff] %v11665_v27  ;;  %v3529_v9 = vsel %vm333_vm1, %v11665_v27, 0.0 }
 0xad1   :  { %3530 = vadd.xlane.f32.xlu0 %v3529_v9 }
 0xad3   :  { %3533 = vadd.xlane.f32.xlu1 %v3532_v8 }
 0xad5   :  { %3536 = vadd.xlane.f32.xlu0 %v3535_v47 }
 0xad6   :  { %v8398_v41 = vpop.f32.mrb[116].mxu0 }
 0xad7   :  { %v3437_v13 = vadd.f32 %v8398_v41, %v11559_v7  ;;  %v3428_v52 = vpop.f32.mrb[117].mxu0 }
 0xad8   :  { %v3429_v19 = vadd.f32 %v11559_v7, %v3428_v52  ;;  %v8399_v23 = vpop.f32.mrb[118].mxu0 }
 0xad9   :  { %v3440_v2 = vadd.f32 %v8399_v23, %v11559_v7  ;;  %v3431_v30 = vpop.f32.mrb[119].mxu0  ;;  %v3466_v51 = vmul.f32 %v11565_v63, %v3437_v13 }
 0xada   :  { %v3464_v42 = vmul.f32 %v11565_v63, %v3429_v19  ;;  %v3432_v4 = vadd.f32 %v11559_v7, %v3431_v30 }
 0xadb   :  { %v3467_v18 = vmul.f32 %v11565_v63, %v3440_v2  ;;  %v11690_v29 = vadd.f32 %v3466_v51, %v11176_v57 }
 0xadc   :  { %v11685_v31 = vadd.f32 %v3464_v42, %v11168_v35  ;;  %v3465_v10 = vmul.f32 %v11565_v63, %v3432_v4 }
 0xadd   :  { %13870 = vst [vmem:[#allocation19_spill] sm:$0xff] %v11690_v29  ;;  %v11698_v7 = vadd.f32 %v3467_v18, %v11187_v22 }
 0xade   :  { %13869 = vst [vmem:[#allocation17_spill] sm:$0xff] %v11685_v31  ;;  %v11693_v40 = vadd.f32 %v3465_v10, %v11179_v50  ;;  %v3538_v5 = vsel %vm333_vm1, %v11685_v31, 0.0  ;;  %v3544_v50 = vsel %vm333_vm1, %v11690_v29, 0.0 }
 0xadf   :  { %3539 = vadd.xlane.f32.xlu1 %v3538_v5  ;;  %v3492_v46 = vpop.xlane.xlu1 %3491  ;;  %13872 = vst [vmem:[#allocation20_spill] sm:$0xff] %v11698_v7  ;;  %v3547_v15 = vsel %vm333_vm1, %v11698_v7, 0.0 }
 0xae0   :  { %13871 = vst [vmem:[#allocation18_spill] sm:$0xff] %v11693_v40  ;;  %v3550_v35 = vmul.f32 0.03125, %v3492_v46  ;;  %v3541_v32 = vsel %vm333_vm1, %v11693_v40, 0.0 }
 0xae1   :  { %v3495_v60 = vpop.xlane.xlu0 %3494  ;;  %3542 = vadd.xlane.f32.xlu0 %v3541_v32  ;;  %v8958_v32 = vld [vmem:[%s13756_s2 + $0x90] sm:$0xff]  }
 0xae2   :  { %v11703_v57 = vsub.f32 %v11573_v21, %v3550_v35  ;;  %v3551_v63 = vmul.f32 0.03125, %v3495_v60  ;;  %v8959_v60 = vld [vmem:[%s13756_s2 + $0xa0] sm:$0xff]   ;;  %8400 = vmatprep.subr.bf16.mxu1 %v8958_v32 }
 0xae3   :  { %3545 = vadd.xlane.f32.xlu1 %v3544_v50  ;;  %v3498_v38 = vpop.xlane.xlu1 %3497  ;;  %8424 = vmatprep.subr.bf16.mxu0 %v8959_v60  ;;  %v8961_v50 = vld [vmem:[%s13756_s2 + $0xa8] sm:$0xff]  }
 0xae4   :  { %v11708_v24 = vsub.f32 %v11581_v53, %v3551_v63  ;;  %v3552_v22 = vmul.f32 0.03125, %v3498_v38  ;;  %v3590_v26 = vmul.f32 %v11703_v57, %v11703_v57  ;;  %8401 = vmatpush3.bf16.msra.mxu1 %v8958_v32  ;;  %8425 = vmatpush3.bf16.msra.mxu0 %v8959_v60  ;;  %v8960_v63 = vld [vmem:[%s13756_s2 + $0x98] sm:$0xff]  }
 0xae5   :  { %v3501_v58 = vpop.xlane.xlu0 %3500  ;;  %3548 = vadd.xlane.f32.xlu0 %v3547_v15  ;;  %8402 = vmatprep.subr.bf16.mxu1 %v8960_v63 }
 0xae6   :  { %v11715_v39 = vsub.f32 %v11578_v28, %v3552_v22  ;;  %v3553_v25 = vmul.f32 0.03125, %v3501_v58  ;;  %v3610_v54 = vsel %vm333_vm1, %v3590_v26, 0.0  ;;  %v3591_v49 = vmul.f32 %v11708_v24, %v11708_v24  ;;  %8426 = vmatprep.subr.bf16.mxu0 %v8961_v50 }
 0xae7   :  { %3611 = vadd.xlane.f32.xlu1 %v3610_v54  ;;  %v3504_v43 = vpop.xlane.xlu1 %3503 }
 0xae8   :  { %v11721_v45 = vsub.f32 %v11587_v11, %v3553_v25  ;;  %v3554_v36 = vmul.f32 0.03125, %v3504_v43  ;;  %v3613_v3 = vsel %vm333_vm1, %v3591_v49, 0.0  ;;  %v3592_v56 = vmul.f32 %v11715_v39, %v11715_v39  ;;  %8403 = vmatpush3.bf16.msra.mxu1 %v8960_v63  ;;  %8427 = vmatpush3.bf16.msra.mxu0 %v8961_v50 }
 0xae9   :  { %v3507_v37 = vpop.xlane.xlu0 %3506  ;;  %3614 = vadd.xlane.f32.xlu0 %v3613_v3  ;;  %8472 = vmatprep.subr.bf16.mxu0 %v13831_v55 }
 0xaea   :  { %v11727_v0 = vsub.f32 %v11599_v33, %v3554_v36  ;;  %v3555_v44 = vmul.f32 0.03125, %v3507_v37  ;;  %v3616_v9 = vsel %vm333_vm1, %v3592_v56, 0.0  ;;  %v3593_v8 = vmul.f32 %v11721_v45, %v11721_v45 }
 0xaeb   :  { %3617 = vadd.xlane.f32.xlu1 %v3616_v9  ;;  %v3510_v47 = vpop.xlane.xlu1 %3509 }
 0xaec   :  { %v11733_v41 = vsub.f32 %v11609_v1, %v3555_v44  ;;  %v3556_v13 = vmul.f32 0.03125, %v3510_v47  ;;  %v3619_v52 = vsel %vm333_vm1, %v3593_v8, 0.0  ;;  %v3594_v19 = vmul.f32 %v11727_v0, %v11727_v0 }
 0xaed   :  { %v3513_v23 = vpop.xlane.xlu0 %3512  ;;  %3620 = vadd.xlane.f32.xlu0 %v3619_v52 }
 0xaee   :  { %v11739_v2 = vsub.f32 %v11606_v48, %v3556_v13  ;;  %v3557_v30 = vmul.f32 0.03125, %v3513_v23  ;;  %v3622_v51 = vsel %vm333_vm1, %v3594_v19, 0.0  ;;  %v3595_v42 = vmul.f32 %v11733_v41, %v11733_v41 }
 0xaef   :  { %3623 = vadd.xlane.f32.xlu1 %v3622_v51 }
 0xaf0   :  { %v11745_v4 = vsub.f32 %v11614_v59, %v3557_v30  ;;  %v3625_v18 = vsel %vm333_vm1, %v3595_v42, 0.0  ;;  %v3596_v10 = vmul.f32 %v11739_v2, %v11739_v2 }
 0xaf1   :  { %3626 = vadd.xlane.f32.xlu0 %v3625_v18 }
 0xaf2   :  { %v3628_v5 = vsel %vm333_vm1, %v3596_v10, 0.0  ;;  %v3597_v46 = vmul.f32 %v11745_v4, %v11745_v4 }
 0xaf3   :  { %3629 = vadd.xlane.f32.xlu1 %v3628_v5 }
 0xaf4   :  { %v3631_v35 = vsel %vm333_vm1, %v3597_v46, 0.0 }
 0xaf5   :  { %3632 = vadd.xlane.f32.xlu0 %v3631_v35 }
 0xb48   :  { %v3516_v38 = vpop.xlane.xlu1 %3515 }
 0xb49   :  { %v3558_v22 = vmul.f32 0.03125, %v3516_v38 }
 0xb4a   :  { %v3519_v15 = vpop.xlane.xlu0 %3518 }
 0xb4b   :  { %v11768_v26 = vsub.f32 %v11629_v34, %v3558_v22  ;;  %v3559_v58 = vmul.f32 0.03125, %v3519_v15 }
 0xb4c   :  { %v3522_v25 = vpop.xlane.xlu1 %3521 }
 0xb4d   :  { %v11771_v54 = vsub.f32 %v11637_v17, %v3559_v58  ;;  %v3560_v49 = vmul.f32 0.03125, %v3522_v25  ;;  %v3598_v43 = vmul.f32 %v11768_v26, %v11768_v26 }
 0xb4e   :  { %v3525_v36 = vpop.xlane.xlu0 %3524 }
 0xb4f   :  { %v11776_v3 = vsub.f32 %v11634_v6, %v3560_v49  ;;  %v3561_v56 = vmul.f32 0.03125, %v3525_v36  ;;  %v3634_v37 = vsel %vm333_vm1, %v3598_v43, 0.0  ;;  %v3599_v44 = vmul.f32 %v11771_v54, %v11771_v54 }
 0xb50   :  { %3635 = vadd.xlane.f32.xlu1 %v3634_v37 }
 0xb51   :  { %v11782_v9 = vsub.f32 %v11642_v62, %v3561_v56  ;;  %v3637_v8 = vsel %vm333_vm1, %v3599_v44, 0.0  ;;  %v3600_v47 = vmul.f32 %v11776_v3, %v11776_v3 }
 0xb52   :  { %3638 = vadd.xlane.f32.xlu0 %v3637_v8 }
 0xb53   :  { %v3640_v13 = vsel %vm333_vm1, %v3600_v47, 0.0  ;;  %v3601_v52 = vmul.f32 %v11782_v9, %v11782_v9 }
 0xb54   :  { %3641 = vadd.xlane.f32.xlu1 %v3640_v13 }
 0xb55   :  { %v3643_v19 = vsel %vm333_vm1, %v3601_v52, 0.0 }
 0xb56   :  { %3644 = vadd.xlane.f32.xlu0 %v3643_v19 }
 0xb5c   :  { %v3528_v23 = vpop.xlane.xlu1 %3527 }
 0xb5d   :  { %v3562_v30 = vmul.f32 0.03125, %v3528_v23 }
 0xb5e   :  { %v3531_v51 = vpop.xlane.xlu0 %3530 }
 0xb5f   :  { %v11792_v42 = vsub.f32 %v11657_v12, %v3562_v30  ;;  %v3563_v18 = vmul.f32 0.03125, %v3531_v51 }
 0xb60   :  { %v3534_v10 = vpop.xlane.xlu1 %3533 }
 0xb61   :  { %v11795_v5 = vsub.f32 %v11665_v27, %v3563_v18  ;;  %v3564_v46 = vmul.f32 0.03125, %v3534_v10  ;;  %v3602_v35 = vmul.f32 %v11792_v42, %v11792_v42 }
 0xb62   :  { %v3537_v32 = vpop.xlane.xlu0 %3536 }
 0xb63   :  { %v11800_v60 = vsub.f32 %v11662_v61, %v3564_v46  ;;  %v3565_v63 = vmul.f32 0.03125, %v3537_v32  ;;  %v3646_v50 = vsel %vm333_vm1, %v3602_v35, 0.0  ;;  %v3603_v38 = vmul.f32 %v11795_v5, %v11795_v5 }
 0xb64   :  { %3647 = vadd.xlane.f32.xlu1 %v3646_v50 }
 0xb65   :  { %v11806_v22 = vsub.f32 %v11670_v20, %v3565_v63  ;;  %v3649_v15 = vsel %vm333_vm1, %v3603_v38, 0.0  ;;  %v3604_v58 = vmul.f32 %v11800_v60, %v11800_v60 }
 0xb66   :  { %3650 = vadd.xlane.f32.xlu0 %v3649_v15 }
 0xb67   :  { %v3652_v25 = vsel %vm333_vm1, %v3604_v58, 0.0  ;;  %v3605_v49 = vmul.f32 %v11806_v22, %v11806_v22 }
 0xb68   :  { %3653 = vadd.xlane.f32.xlu1 %v3652_v25 }
 0xb69   :  { %v3655_v43 = vsel %vm333_vm1, %v3605_v49, 0.0 }
 0xb6a   :  { %3656 = vadd.xlane.f32.xlu0 %v3655_v43 }
 0xb6c   :  { %v3540_v36 = vpop.xlane.xlu1 %3539 }
 0xb6d   :  { %v3566_v56 = vmul.f32 0.03125, %v3540_v36 }
 0xb6e   :  { %v3543_v37 = vpop.xlane.xlu0 %3542 }
 0xb6f   :  { %v11816_v44 = vsub.f32 %v11685_v31, %v3566_v56  ;;  %v3567_v8 = vmul.f32 0.03125, %v3543_v37 }
 0xb70   :  { %v3546_v47 = vpop.xlane.xlu1 %3545 }
 0xb71   :  { %v11819_v13 = vsub.f32 %v11693_v40, %v3567_v8  ;;  %v3568_v52 = vmul.f32 0.03125, %v3546_v47  ;;  %v3606_v19 = vmul.f32 %v11816_v44, %v11816_v44 }
 0xb72   :  { %v3549_v23 = vpop.xlane.xlu0 %3548 }
 0xb73   :  { %v11824_v30 = vsub.f32 %v11690_v29, %v3568_v52  ;;  %v3569_v51 = vmul.f32 0.03125, %v3549_v23  ;;  %v3658_v18 = vsel %vm333_vm1, %v3606_v19, 0.0  ;;  %v3607_v10 = vmul.f32 %v11819_v13, %v11819_v13 }
 0xb74   :  { %3659 = vadd.xlane.f32.xlu1 %v3658_v18  ;;  %v3612_v46 = vpop.xlane.xlu1 %3611 }
 0xb75   :  { %v11830_v35 = vsub.f32 %v11698_v7, %v3569_v51  ;;  %v3670_v32 = vmul.f32 0.03125, %v3612_v46  ;;  %v3661_v63 = vsel %vm333_vm1, %v3607_v10, 0.0  ;;  %v3608_v50 = vmul.f32 %v11824_v30, %v11824_v30 }
 0xb76   :  { %3662 = vadd.xlane.f32.xlu0 %v3661_v63  ;;  %v3615_v38 = vpop.xlane.xlu0 %3614 }
 0xb77   :  { %v3690_v15 = vadd.f32 1e-06, %v3670_v32  ;;  %v3671_v58 = vmul.f32 0.03125, %v3615_v38  ;;  %v3664_v25 = vsel %vm333_vm1, %v3608_v50, 0.0  ;;  %v3609_v49 = vmul.f32 %v11830_v35, %v11830_v35 }
 0xb78   :  { %3665 = vadd.xlane.f32.xlu1 %v3664_v25  ;;  %v3618_v43 = vpop.xlane.xlu1 %3617 }
 0xb79   :  { %9262 = vrsqrt.f32 %v3690_v15  ;;  %v3691_v36 = vadd.f32 1e-06, %v3671_v58  ;;  %v3672_v56 = vmul.f32 0.03125, %v3618_v43  ;;  %v3667_v37 = vsel %vm333_vm1, %v3609_v49, 0.0  ;;  %v11842_v58 = vld [vmem:[%s13759_s3 + $0x64] ss:$0 sm:$0xff] }
 0xb7a   :  { %3668 = vadd.xlane.f32.xlu0 %v3667_v37  ;;  %v3621_v8 = vpop.xlane.xlu0 %3620 }
 0xb7b   :  { %9264 = vrsqrt.f32 %v3691_v36  ;;  %v3692_v47 = vadd.f32 1e-06, %v3672_v56  ;;  %v3673_v52 = vmul.f32 0.03125, %v3621_v8 }
 0xb7c   :  { %v3624_v19 = vpop.xlane.xlu1 %3623 }
 0xb7d   :  { %9266 = vrsqrt.f32 %v3692_v47  ;;  %v3693_v23 = vadd.f32 1e-06, %v3673_v52  ;;  %v3674_v51 = vmul.f32 0.03125, %v3624_v19  ;;  %v11850_v52 = vld [vmem:[%s13759_s3 + $0x65] ss:$0 sm:$0xff] }
 0xb7e   :  { %v3627_v18 = vpop.xlane.xlu0 %3626 }
 0xb7f   :  { %9268 = vrsqrt.f32 %v3693_v23  ;;  %v3694_v10 = vadd.f32 1e-06, %v3674_v51  ;;  %v3675_v46 = vmul.f32 0.03125, %v3627_v18 }
 0xb80   :  { %v3630_v32 = vpop.xlane.xlu1 %3629 }
 0xb81   :  { %9270 = vrsqrt.f32 %v3694_v10  ;;  %v3695_v63 = vadd.f32 1e-06, %v3675_v46  ;;  %v3676_v50 = vmul.f32 0.03125, %v3630_v32 }
 0xb82   :  { %v3633_v38 = vpop.xlane.xlu0 %3632 }
 0xb83   :  { %v9263_v15 = vpop.eup %9262  ;;  %9272 = vrsqrt.f32 %v3695_v63  ;;  %v3696_v25 = vadd.f32 1e-06, %v3676_v50  ;;  %v3677_v49 = vmul.f32 0.03125, %v3633_v38 }
 0xb84   :  { %v3730_v43 = vmul.f32 %v9263_v15, %v11703_v57 }
 0xb85   :  { %v9265_v36 = vpop.eup %9264  ;;  %9274 = vrsqrt.f32 %v3696_v25  ;;  %v3697_v56 = vadd.f32 1e-06, %v3677_v49 }
 0xb86   :  { %v3731_v37 = vmul.f32 %v9265_v36, %v11708_v24  ;;  %v3754_v8 = vmul.f32 %v11842_v58, %v3730_v43 }
 0xb87   :  { %v9267_v47 = vpop.eup %9266  ;;  %9276 = vrsqrt.f32 %v3697_v56 }
 0xb88   :  { %v3732_v19 = vmul.f32 %v9267_v47, %v11715_v39  ;;  %v3755_v23 = vmul.f32 %v11842_v58, %v3731_v37  ;;  %v3778_v24 = vadd.f32 %v11850_v52, %v3754_v8 }
 0xb89   :  { %v9269_v51 = vpop.eup %9268 }
 0xb8a   :  { %v3756_v57 = vmul.f32 %v11842_v58, %v3732_v19  ;;  %v3733_v18 = vmul.f32 %v9269_v51, %v11721_v45  ;;  %v3779_v10 = vadd.f32 %v11850_v52, %v3755_v23 }
 0xb8b   :  { %v9271_v46 = vpop.eup %9270 }
 0xb8c   :  { %v3757_v32 = vmul.f32 %v11842_v58, %v3733_v18  ;;  %v11859_v63 = vpack.c.bf16 %v3779_v10, %v3778_v24  ;;  %v3734_v50 = vmul.f32 %v9271_v46, %v11727_v0  ;;  %v3780_v39 = vadd.f32 %v11850_v52, %v3756_v57  ;;  %v8963_v18 = vld [vmem:[%s13756_s2 + $0xb8] sm:$0xff]  }
 0xb8d   :  { %v9273_v38 = vpop.eup %9272 }
 0xb8e   :  { %v3781_v15 = vadd.f32 %v11850_v52, %v3757_v32  ;;  %8404 = vmatprep.mubr.msk.bf16.mxu1 %vm333_vm1, %v11859_v63  ;;  %8428 = vmatprep.mubr.msk.bf16.mxu0 %vm333_vm1, %v11859_v63  ;;  %v3735_v45 = vmul.f32 %v9273_v38, %v11733_v41  ;;  %v3758_v25 = vmul.f32 %v11842_v58, %v3734_v50 }
 0xb8f   :  { %v9275_v49 = vpop.eup %9274 }
 0xb90   :  { %v11870_v43 = vpack.c.bf16 %v3781_v15, %v3780_v39  ;;  %v3759_v0 = vmul.f32 %v11842_v58, %v3735_v45  ;;  %v3736_v36 = vmul.f32 %v9275_v49, %v11739_v2  ;;  %v3782_v37 = vadd.f32 %v11850_v52, %v3758_v25 }
 0xb91   :  { %v9277_v56 = vpop.eup %9276 }
 0xb92   :  { %8405 = vmatmul.mubr.msk.bf16.vlgmr.msra.gmra.mrb[140].mxu1 %vm333_vm1, %v11870_v43  ;;  %8429 = vmatmul.mubr.msk.bf16.vlgmr.msra.gmra.mrb[120].mxu0 %vm333_vm1, %v11870_v43  ;;  %v3783_v41 = vadd.f32 %v11850_v52, %v3759_v0  ;;  %v3737_v8 = vmul.f32 %v9277_v56, %v11745_v4  ;;  %v3760_v47 = vmul.f32 %v11842_v58, %v3736_v36  ;;  %v8962_v4 = vld [vmem:[%s13756_s2 + $0xb0] sm:$0xff]  }
 0xb93   :  { %8448 = vmatprep.subr.bf16.mxu1 %v8962_v4 }
 0xb94   :  { %v11882_v19 = vpack.c.bf16 %v3783_v41, %v3782_v37  ;;  %v3761_v23 = vmul.f32 %v11842_v58, %v3737_v8  ;;  %v3784_v2 = vadd.f32 %v11850_v52, %v3760_v47  ;;  %8449 = vmatpush3.bf16.msra.mxu1 %v8962_v4 }
 0xb95   :  { %8450 = vmatprep.subr.bf16.mxu1 %v8963_v18 }
 0xb96   :  { %8408 = vmatprep.mubr.msk.bf16.mxu1 %vm333_vm1, %v11882_v19  ;;  %8432 = vmatprep.mubr.msk.bf16.mxu0 %vm333_vm1, %v11882_v19  ;;  %v3785_v51 = vadd.f32 %v11850_v52, %v3761_v23 }
 0xb98   :  { %v11891_v57 = vpack.c.bf16 %v3785_v51, %v3784_v2  ;;  %8451 = vmatpush3.bf16.msra.mxu1 %v8963_v18 }
 0xb99   :  { %8502 = vmatprep.subr.bf16.mxu1 %v13831_v55 }
 0xb9a   :  { %8409 = vmatmul.mubr.msk.bf16.gmra.mrb[144].mxu1 %vm333_vm1, %v11891_v57  ;;  %8433 = vmatmul.mubr.msk.bf16.gmra.mrb[124].mxu0 %vm333_vm1, %v11891_v57 }
 0xbdd   :  { %v3636_v24 = vpop.xlane.xlu1 %3635 }
 0xbde   :  { %v3678_v10 = vmul.f32 0.03125, %v3636_v24 }
 0xbdf   :  { %v3639_v46 = vpop.xlane.xlu0 %3638 }
 0xbe0   :  { %v3698_v32 = vadd.f32 1e-06, %v3678_v10  ;;  %v3679_v50 = vmul.f32 0.03125, %v3639_v46 }
 0xbe1   :  { %v3642_v38 = vpop.xlane.xlu1 %3641 }
 0xbe2   :  { %9278 = vrsqrt.f32 %v3698_v32  ;;  %v3699_v39 = vadd.f32 1e-06, %v3679_v50  ;;  %v3680_v15 = vmul.f32 0.03125, %v3642_v38 }
 0xbe3   :  { %v3645_v45 = vpop.xlane.xlu0 %3644 }
 0xbe4   :  { %9280 = vrsqrt.f32 %v3699_v39  ;;  %v3700_v25 = vadd.f32 1e-06, %v3680_v15  ;;  %v3681_v49 = vmul.f32 0.03125, %v3645_v45 }
 0xbe6   :  { %9282 = vrsqrt.f32 %v3700_v25  ;;  %v3701_v0 = vadd.f32 1e-06, %v3681_v49 }
 0xbe8   :  { %9284 = vrsqrt.f32 %v3701_v0 }
 0xbec   :  { %v9279_v36 = vpop.eup %9278 }
 0xbed   :  { %v3738_v56 = vmul.f32 %v9279_v36, %v11768_v26 }
 0xbee   :  { %v9281_v37 = vpop.eup %9280 }
 0xbef   :  { %v3739_v41 = vmul.f32 %v9281_v37, %v11771_v54  ;;  %v3762_v8 = vmul.f32 %v11842_v58, %v3738_v56 }
 0xbf0   :  { %v9283_v47 = vpop.eup %9282 }
 0xbf1   :  { %v3648_v23 = vpop.xlane.xlu1 %3647  ;;  %v3763_v2 = vmul.f32 %v11842_v58, %v3739_v41  ;;  %v3740_v51 = vmul.f32 %v9283_v47, %v11776_v3  ;;  %v3786_v10 = vadd.f32 %v11850_v52, %v3762_v8 }
 0xbf2   :  { %v9285_v4 = vpop.eup %9284  ;;  %v3682_v18 = vmul.f32 0.03125, %v3648_v23 }
 0xbf3   :  { %v3651_v24 = vpop.xlane.xlu0 %3650  ;;  %v3787_v46 = vadd.f32 %v11850_v52, %v3763_v2  ;;  %v3741_v26 = vmul.f32 %v9285_v4, %v11782_v9  ;;  %v3764_v32 = vmul.f32 %v11842_v58, %v3740_v51 }
 0xbf4   :  { %v3702_v54 = vadd.f32 1e-06, %v3682_v18  ;;  %v3683_v50 = vmul.f32 0.03125, %v3651_v24 }
 0xbf5   :  { %v3654_v38 = vpop.xlane.xlu1 %3653  ;;  %v11913_v39 = vpack.c.bf16 %v3787_v46, %v3786_v10  ;;  %v3765_v15 = vmul.f32 %v11842_v58, %v3741_v26  ;;  %v3788_v9 = vadd.f32 %v11850_v52, %v3764_v32 }
 0xbf6   :  { %9286 = vrsqrt.f32 %v3702_v54  ;;  %v3703_v3 = vadd.f32 1e-06, %v3683_v50  ;;  %v3684_v45 = vmul.f32 0.03125, %v3654_v38 }
 0xbf7   :  { %v3657_v25 = vpop.xlane.xlu0 %3656  ;;  %8412 = vmatprep.mubr.msk.bf16.mxu1 %vm333_vm1, %v11913_v39  ;;  %8436 = vmatprep.mubr.msk.bf16.mxu0 %vm333_vm1, %v11913_v39  ;;  %v3789_v49 = vadd.f32 %v11850_v52, %v3765_v15 }
 0xbf8   :  { %9288 = vrsqrt.f32 %v3703_v3  ;;  %v3704_v0 = vadd.f32 1e-06, %v3684_v45  ;;  %v3685_v36 = vmul.f32 0.03125, %v3657_v25 }
 0xbf9   :  { %v11922_v56 = vpack.c.bf16 %v3789_v49, %v3788_v9 }
 0xbfa   :  { %9290 = vrsqrt.f32 %v3704_v0  ;;  %v3705_v37 = vadd.f32 1e-06, %v3685_v36 }
 0xbfb   :  { %8413 = vmatmul.mubr.msk.bf16.gmra.mrb[148].mxu1 %vm333_vm1, %v11922_v56  ;;  %8437 = vmatmul.mubr.msk.bf16.gmra.mrb[128].mxu0 %vm333_vm1, %v11922_v56 }
 0xbfc   :  { %9292 = vrsqrt.f32 %v3705_v37 }
 0xc00   :  { %v9287_v41 = vpop.eup %9286 }
 0xc01   :  { %v3660_v8 = vpop.xlane.xlu1 %3659  ;;  %v3742_v47 = vmul.f32 %v9287_v41, %v11792_v42 }
 0xc02   :  { %v9289_v23 = vpop.eup %9288  ;;  %v3686_v2 = vmul.f32 0.03125, %v3660_v8 }
 0xc03   :  { %v3663_v51 = vpop.xlane.xlu0 %3662  ;;  %v3743_v4 = vmul.f32 %v9289_v23, %v11795_v5  ;;  %v3766_v18 = vmul.f32 %v11842_v58, %v3742_v47 }
 0xc04   :  { %v9291_v24 = vpop.eup %9290  ;;  %v3706_v10 = vadd.f32 1e-06, %v3686_v2  ;;  %v3687_v46 = vmul.f32 0.03125, %v3663_v51 }
 0xc05   :  { %v3666_v26 = vpop.xlane.xlu1 %3665  ;;  %v3767_v32 = vmul.f32 %v11842_v58, %v3743_v4  ;;  %v3744_v54 = vmul.f32 %v9291_v24, %v11800_v60  ;;  %v3790_v3 = vadd.f32 %v11850_v52, %v3766_v18 }
 0xc06   :  { %v9293_v50 = vpop.eup %9292  ;;  %9294 = vrsqrt.f32 %v3706_v10  ;;  %v3707_v38 = vadd.f32 1e-06, %v3687_v46  ;;  %v3688_v15 = vmul.f32 0.03125, %v3666_v26 }
 0xc07   :  { %v3669_v42 = vpop.xlane.xlu0 %3668  ;;  %v3791_v45 = vadd.f32 %v11850_v52, %v3767_v32  ;;  %v3745_v5 = vmul.f32 %v9293_v50, %v11806_v22  ;;  %v3768_v25 = vmul.f32 %v11842_v58, %v3744_v54 }
 0xc08   :  { %9296 = vrsqrt.f32 %v3707_v38  ;;  %v3708_v9 = vadd.f32 1e-06, %v3688_v15  ;;  %v3689_v49 = vmul.f32 0.03125, %v3669_v42 }
 0xc09   :  { %v3804_v0 = vpack.c.bf16 %v3791_v45, %v3790_v3  ;;  %v3769_v36 = vmul.f32 %v11842_v58, %v3745_v5  ;;  %v3792_v37 = vadd.f32 %v11850_v52, %v3768_v25 }
 0xc0a   :  { %9298 = vrsqrt.f32 %v3708_v9  ;;  %v3709_v60 = vadd.f32 1e-06, %v3689_v49 }
 0xc0b   :  { %8416 = vmatprep.mubr.msk.bf16.mxu1 %vm333_vm1, %v3804_v0  ;;  %8440 = vmatprep.mubr.msk.bf16.mxu0 %vm333_vm1, %v3804_v0  ;;  %v3793_v41 = vadd.f32 %v11850_v52, %v3769_v36 }
 0xc0c   :  { %9300 = vrsqrt.f32 %v3709_v60 }
 0xc0d   :  { %v3805_v22 = vpack.c.bf16 %v3793_v41, %v3792_v37 }
 0xc0f   :  { %8417 = vmatmul.mubr.msk.bf16.gmra.mrb[152].mxu1 %vm333_vm1, %v3805_v22  ;;  %8441 = vmatmul.mubr.msk.bf16.gmra.mrb[132].mxu0 %vm333_vm1, %v3805_v22 }
 0xc10   :  { %v9295_v8 = vpop.eup %9294 }
 0xc11   :  { %v3746_v47 = vmul.f32 %v9295_v8, %v11816_v44 }
 0xc12   :  { %v9297_v23 = vpop.eup %9296 }
 0xc13   :  { %v3747_v2 = vmul.f32 %v9297_v23, %v11819_v13  ;;  %v3770_v51 = vmul.f32 %v11842_v58, %v3746_v47 }
 0xc14   :  { %v9299_v4 = vpop.eup %9298 }
 0xc15   :  { %v3771_v18 = vmul.f32 %v11842_v58, %v3747_v2  ;;  %v3748_v24 = vmul.f32 %v9299_v4, %v11824_v30  ;;  %v3794_v46 = vadd.f32 %v11850_v52, %v3770_v51 }
 0xc16   :  { %v9301_v10 = vpop.eup %9300 }
 0xc17   :  { %v3795_v26 = vadd.f32 %v11850_v52, %v3771_v18  ;;  %v3749_v32 = vmul.f32 %v9301_v10, %v11830_v35  ;;  %v3772_v54 = vmul.f32 %v11842_v58, %v3748_v24 }
 0xc19   :  { %v3806_v44 = vpack.c.bf16 %v3795_v26, %v3794_v46  ;;  %v3773_v50 = vmul.f32 %v11842_v58, %v3749_v32  ;;  %v3796_v13 = vadd.f32 %v11850_v52, %v3772_v54  ;;  %v11983_v58 = vld [vmem:[%s13759_s3 + $0x66] ss:$0 sm:$0xff] }
 0xc1b   :  { %8420 = vmatprep.mubr.msk.bf16.mxu1 %vm333_vm1, %v3806_v44  ;;  %8444 = vmatprep.mubr.msk.bf16.mxu0 %vm333_vm1, %v3806_v44  ;;  %v3797_v30 = vadd.f32 %v11850_v52, %v3773_v50 }
 0xc1d   :  { %v3807_v38 = vpack.c.bf16 %v3797_v30, %v3796_v13 }
 0xc1f   :  { %8421 = vmatmul.mubr.msk.bf16.gmra.mrb[156].mxu1 %vm333_vm1, %v3807_v38  ;;  %8445 = vmatmul.mubr.msk.bf16.gmra.mrb[136].mxu0 %vm333_vm1, %v3807_v38 }
 0xc20   :  { %8452 = vmatprep.mubr.msk.bf16.mxu1 %vm333_vm1, %v11859_v63  ;;  %8482 = vmatprep.mubr.msk.bf16.mxu0 %vm9608_vm2, %v13831_v55  ;;  %v11988_v63 = vld [vmem:[%s13759_s3 + $0x67] ss:$0 sm:$0xff] }
 0xc27   :  { %8453 = vmatmul.mubr.msk.bf16.vlgmr.msra.gmra.mrb[160].mxu1 %vm333_vm1, %v11870_v43 }
 0xc28   :  { %8456 = vmatprep.mubr.msk.bf16.mxu1 %vm333_vm1, %v11882_v19 }
 0xc2f   :  { %8457 = vmatmul.mubr.msk.bf16.gmra.mrb[164].mxu1 %vm333_vm1, %v11891_v57 }
 0xc30   :  { %8460 = vmatprep.mubr.msk.bf16.mxu1 %vm333_vm1, %v11913_v39 }
 0xc37   :  { %8461 = vmatmul.mubr.msk.bf16.gmra.mrb[168].mxu1 %vm333_vm1, %v11922_v56 }
 0xc38   :  { %8464 = vmatprep.mubr.msk.bf16.mxu1 %vm333_vm1, %v3804_v0 }
 0xc3f   :  { %8465 = vmatmul.mubr.msk.bf16.gmra.mrb[172].mxu1 %vm333_vm1, %v3805_v22 }
 0xc40   :  { %8468 = vmatprep.mubr.msk.bf16.mxu1 %vm333_vm1, %v3806_v44 }
 0xc47   :  { %8469 = vmatmul.mubr.msk.bf16.gmra.mrb[176].mxu1 %vm333_vm1, %v3807_v38 }
 0xc48   :  { %8512 = vmatprep.mubr.msk.bf16.mxu1 %vm9608_vm2, %v13831_v55 }
 0xc65   :  { %v8406_v35 = vpop.f32.mrb[140].mxu1  ;;  %v8430_v52 = vpop.f32.mrb[120].mxu0 }
 0xc66   :  { %v3893_v43 = vpop.f32.mrb[141].mxu1  ;;  %v4037_v19 = vpop.f32.mrb[121].mxu0  ;;  %v3902_v56 = vadd.f32 %v8406_v35, %v11983_v58  ;;  %v4046_v15 = vadd.f32 %v8430_v52, %v11988_v63 }
 0xc67   :  { %v8407_v57 = vpop.f32.mrb[142].mxu1  ;;  %v8431_v39 = vpop.f32.mrb[122].mxu0  ;;  %v3894_v25 = vadd.f32 %v11983_v58, %v3893_v43  ;;  %v4038_v9 = vadd.f32 %v11988_v63, %v4037_v19 }
 0xc68   :  { %v3905_v42 = vadd.f32 %v8407_v57, %v11983_v58  ;;  %v4049_v3 = vadd.f32 %v8431_v39, %v11988_v63  ;;  %v3896_v45 = vpop.f32.mrb[143].mxu1  ;;  %v4040_v5 = vpop.f32.mrb[123].mxu0 }
 0xc69   :  { %v3897_v49 = vadd.f32 %v11983_v58, %v3896_v45  ;;  %v4041_v0 = vadd.f32 %v11988_v63, %v4040_v5 }
 0xc6a   :  { %v11998_v36 = vpack.c.bf16 %v3905_v42, %v3902_v56  ;;  %v4117_v60 = vpack.c.bf16 %v4049_v3, %v4046_v15 }
 0xc6b   :  { %v12000_v37 = vpack.c.bf16 %v3897_v49, %v3894_v25  ;;  %v4116_v41 = vpack.c.bf16 %v4041_v0, %v4038_v9 }
 0xc6c   :  { %v4294_v43 = vsel %vm333_vm1, %v4117_v60, 0 }
 0xc6d   :  { %v8410_v22 = vpop.f32.mrb[144].mxu1  ;;  %v8434_v8 = vpop.f32.mrb[124].mxu0  ;;  %v4291_v47 = vsel %vm333_vm1, %v4116_v41, 0 }
 0xc6e   :  { %v3909_v23 = vpop.f32.mrb[145].mxu1  ;;  %v4053_v2 = vpop.f32.mrb[125].mxu0  ;;  %8473 = vmatpush3.bf16.xpose.msra.mxu0 %v4291_v47  ;;  %8503 = vmatpush3.bf16.xpose.msra.mxu1 %v4291_v47  ;;  %v3918_v18 = vadd.f32 %v8410_v22, %v11983_v58  ;;  %v4062_v24 = vadd.f32 %v8434_v8, %v11988_v63 }
 0xc6f   :  { %v8411_v51 = vpop.f32.mrb[146].mxu1  ;;  %v8435_v4 = vpop.f32.mrb[126].mxu0  ;;  %8474 = vmatprep.subr.bf16.mxu0 %v13831_v55  ;;  %8504 = vmatprep.subr.bf16.mxu1 %v13831_v55  ;;  %v3910_v54 = vadd.f32 %v11983_v58, %v3909_v23  ;;  %v4054_v44 = vadd.f32 %v11988_v63, %v4053_v2 }
 0xc70   :  { %v3921_v10 = vadd.f32 %v8411_v51, %v11983_v58  ;;  %v4065_v46 = vadd.f32 %v8435_v4, %v11988_v63  ;;  %v3912_v26 = vpop.f32.mrb[147].mxu1  ;;  %v4056_v32 = vpop.f32.mrb[127].mxu0 }
 0xc71   :  { %v3913_v50 = vadd.f32 %v11983_v58, %v3912_v26  ;;  %v4057_v13 = vadd.f32 %v11988_v63, %v4056_v32 }
 0xc72   :  { %v12013_v30 = vpack.c.bf16 %v3921_v10, %v3918_v18  ;;  %v4119_v38 = vpack.c.bf16 %v4065_v46, %v4062_v24  ;;  %v4270_v24 = vsel %vm1123_vm9, %v12000_v37, 0  ;;  %v4498_v10 = vsel %vm1361_vm10, %v12000_v37, 0 }
 0xc73   :  { %v12015_v35 = vpack.c.bf16 %v3913_v50, %v3910_v54  ;;  %v4118_v52 = vpack.c.bf16 %v4057_v13, %v4054_v44 }
 0xc74   :  { %v4300_v57 = vsel %vm333_vm1, %v4119_v38, 0  ;;  %v4271_v38 = vsel %vm1123_vm9, %v11998_v36, 0 }
 0xc75   :  { %v4297_v19 = vsel %vm333_vm1, %v4118_v52, 0  ;;  %v4499_v52 = vsel %vm1361_vm10, %v11998_v36, 0 }
 0xc76   :  { %8475 = vmatpush3.bf16.xpose.msra.mxu0 %v4294_v43  ;;  %8505 = vmatpush3.bf16.xpose.msra.mxu1 %v4294_v43 }
 0xc77   :  { %8476 = vmatprep.subr.bf16.mxu0 %v13831_v55  ;;  %8506 = vmatprep.subr.bf16.mxu1 %v13831_v55 }
 0xc7e   :  { %8477 = vmatpush3.bf16.xpose.msra.mxu0 %v4297_v19  ;;  %8507 = vmatpush3.bf16.xpose.msra.mxu1 %v4297_v19 }
 0xc7f   :  { %8478 = vmatprep.subr.bf16.mxu0 %v13831_v55  ;;  %8508 = vmatprep.subr.bf16.mxu1 %v13831_v55 }
 0xc86   :  { %8479 = vmatpush3.bf16.xpose.msra.mxu0 %v4300_v57  ;;  %8509 = vmatpush3.bf16.xpose.msra.mxu1 %v4300_v57 }
 0xc87   :  { %8480 = vmatprep.subr.bf16.mxu0 %v13831_v55  ;;  %8510 = vmatprep.subr.bf16.mxu1 %v13831_v55 }
 0xcce   :  { %v8414_v39 = vpop.f32.mrb[148].mxu1  ;;  %v8438_v56 = vpop.f32.mrb[128].mxu0 }
 0xccf   :  { %v3925_v15 = vpop.f32.mrb[149].mxu1  ;;  %v4069_v42 = vpop.f32.mrb[129].mxu0  ;;  %v3934_v5 = vadd.f32 %v8414_v39, %v11983_v58  ;;  %v4078_v25 = vadd.f32 %v8438_v56, %v11988_v63 }
 0xcd0   :  { %v8415_v3 = vpop.f32.mrb[150].mxu1  ;;  %v8439_v45 = vpop.f32.mrb[130].mxu0  ;;  %v3926_v41 = vadd.f32 %v11983_v58, %v3925_v15  ;;  %v4070_v22 = vadd.f32 %v11988_v63, %v4069_v42 }
 0xcd1   :  { %v3937_v9 = vadd.f32 %v8415_v3, %v11983_v58  ;;  %v4081_v49 = vadd.f32 %v8439_v45, %v11988_v63  ;;  %v3928_v0 = vpop.f32.mrb[151].mxu1  ;;  %v4072_v60 = vpop.f32.mrb[131].mxu0 }
 0xcd2   :  { %v3929_v8 = vadd.f32 %v11983_v58, %v3928_v0  ;;  %v4073_v47 = vadd.f32 %v11988_v63, %v4072_v60  ;;  %v4272_v0 = vsel %vm1123_vm9, %v12015_v35, 0  ;;  %v4500_v60 = vsel %vm1361_vm10, %v12015_v35, 0 }
 0xcd3   :  { %v12034_v23 = vpack.c.bf16 %v3937_v9, %v3934_v5  ;;  %v4121_v2 = vpack.c.bf16 %v4081_v49, %v4078_v25 }
 0xcd4   :  { %v12036_v51 = vpack.c.bf16 %v3929_v8, %v3926_v41  ;;  %v4120_v4 = vpack.c.bf16 %v4073_v47, %v4070_v22 }
 0xcd5   :  { %v12050_v46 = vsel %vm333_vm1, %v4121_v2, 0 }
 0xcd6   :  { %v4303_v18 = vsel %vm333_vm1, %v4120_v4, 0 }
 0xcd7   :  { %8481 = vmatpush3.bf16.xpose.msra.mxu0 %v4303_v18  ;;  %8511 = vmatpush3.bf16.xpose.msra.mxu1 %v4303_v18 }
 0xcd8   :  { %8592 = vmatprep.subr.bf16.mxu1 %v13831_v55  ;;  %8532 = vmatprep.subr.bf16.mxu0 %v13831_v55 }
 0xcde   :  { %8483 = vmatmul.mubr.msk.bf16.vlgmr.msra.gmra.mrb[140].mxu0 %vm333_vm1, %v4270_v24  ;;  %8513 = vmatmul.mubr.msk.bf16.vlgmr.msra.gmra.mrb[180].mxu1 %vm333_vm1, %v4498_v10  ;;  %v4273_v24 = vsel %vm1123_vm9, %v12013_v30, 0  ;;  %v4501_v10 = vsel %vm1361_vm10, %v12013_v30, 0 }
 0xcdf   :  { %8593 = vmatpush3.bf16.xpose.msra.mxu1 %v12050_v46  ;;  %8486 = vmatprep.mubr.msk.bf16.mxu0 %vm9608_vm2, %v13831_v55 }
 0xce0   :  { %8516 = vmatprep.mubr.msk.bf16.mxu1 %vm9608_vm2, %v13831_v55  ;;  %8594 = vmatprep.subr.bf16.mxu1 %v13831_v55 }
 0xce2   :  { %v8418_v26 = vpop.f32.mrb[152].mxu1  ;;  %v8442_v32 = vpop.f32.mrb[132].mxu0 }
 0xce3   :  { %v3941_v37 = vpop.f32.mrb[153].mxu1  ;;  %v4085_v54 = vpop.f32.mrb[133].mxu0  ;;  %v3950_v44 = vadd.f32 %v8418_v26, %v11983_v58  ;;  %v4094_v43 = vadd.f32 %v8442_v32, %v11988_v63 }
 0xce4   :  { %v8419_v50 = vpop.f32.mrb[154].mxu1  ;;  %v8443_v13 = vpop.f32.mrb[134].mxu0  ;;  %v3942_v19 = vadd.f32 %v11983_v58, %v3941_v37  ;;  %v4086_v42 = vadd.f32 %v11988_v63, %v4085_v54 }
 0xce5   :  { %v3953_v57 = vadd.f32 %v8419_v50, %v11983_v58  ;;  %v4097_v39 = vadd.f32 %v8443_v13, %v11988_v63  ;;  %v3944_v56 = vpop.f32.mrb[155].mxu1  ;;  %v4088_v15 = vpop.f32.mrb[135].mxu0 }
 0xce6   :  { %v3945_v3 = vadd.f32 %v11983_v58, %v3944_v56  ;;  %v4089_v45 = vadd.f32 %v11988_v63, %v4088_v15  ;;  %8487 = vmatmul.mubr.msk.bf16.gmra.mrb[144].mxu0 %vm333_vm1, %v4271_v38  ;;  %8517 = vmatmul.mubr.msk.bf16.gmra.mrb[184].mxu1 %vm333_vm1, %v4499_v52 }
 0xce7   :  { %v12074_v36 = vpack.c.bf16 %v3953_v57, %v3950_v44  ;;  %v4123_v5 = vpack.c.bf16 %v4097_v39, %v4094_v43  ;;  %8490 = vmatprep.mubr.msk.bf16.mxu0 %vm9608_vm2, %v13831_v55  ;;  %8520 = vmatprep.mubr.msk.bf16.mxu1 %vm9608_vm2, %v13831_v55 }
 0xce8   :  { %v12080_v25 = vpack.c.bf16 %v3945_v3, %v3942_v19  ;;  %v4122_v9 = vpack.c.bf16 %v4089_v45, %v4086_v42 }
 0xce9   :  { %v12100_v8 = vsel %vm333_vm1, %v4123_v5, 0  ;;  %v4274_v5 = vsel %vm1123_vm9, %v12036_v51, 0 }
 0xcea   :  { %v12083_v49 = vsel %vm333_vm1, %v4122_v9, 0  ;;  %v4502_v9 = vsel %vm1361_vm10, %v12036_v51, 0 }
 0xceb   :  { %8595 = vmatpush3.bf16.xpose.msra.mxu1 %v12083_v49 }
 0xcec   :  { %8596 = vmatprep.subr.bf16.mxu1 %v13831_v55 }
 0xcee   :  { %8491 = vmatmul.mubr.msk.bf16.gmra.mrb[148].mxu0 %vm333_vm1, %v4272_v0  ;;  %8521 = vmatmul.mubr.msk.bf16.gmra.mrb[188].mxu1 %vm333_vm1, %v4500_v60 }
 0xcef   :  { %8494 = vmatprep.mubr.msk.bf16.mxu0 %vm9608_vm2, %v13831_v55  ;;  %8524 = vmatprep.mubr.msk.bf16.mxu1 %vm9608_vm2, %v13831_v55 }
 0xcf2   :  { %v8422_v41 = vpop.f32.mrb[156].mxu1  ;;  %v8446_v22 = vpop.f32.mrb[136].mxu0 }
 0xcf3   :  { %v3957_v47 = vpop.f32.mrb[157].mxu1  ;;  %v4101_v2 = vpop.f32.mrb[137].mxu0  ;;  %8597 = vmatpush3.bf16.xpose.msra.mxu1 %v12100_v8  ;;  %v3966_v35 = vadd.f32 %v8422_v41, %v11983_v58  ;;  %v4110_v26 = vadd.f32 %v8446_v22, %v11988_v63 }
 0xcf4   :  { %v8423_v4 = vpop.f32.mrb[158].mxu1  ;;  %v8447_v18 = vpop.f32.mrb[138].mxu0  ;;  %8598 = vmatprep.subr.bf16.mxu1 %v13831_v55  ;;  %v3958_v32 = vadd.f32 %v11983_v58, %v3957_v47  ;;  %v4102_v13 = vadd.f32 %v11988_v63, %v4101_v2 }
 0xcf5   :  { %v3969_v37 = vadd.f32 %v8423_v4, %v11983_v58  ;;  %v4113_v54 = vadd.f32 %v8447_v18, %v11988_v63  ;;  %v3960_v44 = vpop.f32.mrb[159].mxu1  ;;  %v4104_v50 = vpop.f32.mrb[139].mxu0 }
 0xcf6   :  { %v3961_v38 = vadd.f32 %v11983_v58, %v3960_v44  ;;  %v4105_v52 = vadd.f32 %v11988_v63, %v4104_v50  ;;  %8495 = vmatmul.mubr.msk.bf16.gmra.mrb[152].mxu0 %vm333_vm1, %v4273_v24  ;;  %8525 = vmatmul.mubr.msk.bf16.gmra.mrb[192].mxu1 %vm333_vm1, %v4501_v10  ;;  %v12131_v58 = vld [vmem:[%s13759_s3 + $0x68] ss:$0 sm:$0xff]  ;;  %v4887_v50 = vsel %vm1123_vm9, %v12034_v23, 0 }
 0xcf7   :  { %v12120_v30 = vpack.c.bf16 %v3969_v37, %v3966_v35  ;;  %v4125_v43 = vpack.c.bf16 %v4113_v54, %v4110_v26  ;;  %8498 = vmatprep.mubr.msk.bf16.mxu0 %vm9608_vm2, %v13831_v55  ;;  %8528 = vmatprep.mubr.msk.bf16.mxu1 %vm9608_vm2, %v13831_v55 }
 0xcf8   :  { %v12126_v19 = vpack.c.bf16 %v3961_v38, %v3958_v32  ;;  %v4124_v57 = vpack.c.bf16 %v4105_v52, %v4102_v13 }
 0xcf9   :  { %v12162_v2 = vsel %vm333_vm1, %v4125_v43, 0 }
 0xcfa   :  { %v8454_v39 = vpop.f32.mrb[160].mxu1  ;;  %v12134_v63 = vsel %vm333_vm1, %v4124_v57, 0 }
 0xcfb   :  { %v4181_v56 = vpop.f32.mrb[161].mxu1  ;;  %8599 = vmatpush3.bf16.xpose.msra.mxu1 %v12134_v63  ;;  %v4190_v42 = vadd.f32 %v8454_v39, %v12131_v58 }
 0xcfc   :  { %v8455_v15 = vpop.f32.mrb[162].mxu1  ;;  %8600 = vmatprep.subr.bf16.mxu1 %v13831_v55  ;;  %v4182_v0 = vadd.f32 %v12131_v58, %v4181_v56 }
 0xcfd   :  { %v4193_v3 = vadd.f32 %v8455_v15, %v12131_v58  ;;  %v4184_v45 = vpop.f32.mrb[163].mxu1 }
 0xcfe   :  { %v4185_v60 = vadd.f32 %v12131_v58, %v4184_v45  ;;  %8499 = vmatmul.mubr.msk.bf16.gmra.mrb[156].mxu0 %vm333_vm1, %v4274_v5  ;;  %8529 = vmatmul.mubr.msk.bf16.gmra.mrb[196].mxu1 %vm333_vm1, %v4502_v9  ;;  %v4888_v5 = vsel %vm1123_vm9, %v12080_v25, 0 }
 0xcff   :  { %v12150_v41 = vpack.c.bf16 %v4193_v3, %v4190_v42  ;;  %8602 = vmatprep.mubr.msk.bf16.mxu1 %vm9608_vm2, %v13831_v55  ;;  %8542 = vmatprep.mubr.msk.bf16.mxu0 %vm9608_vm2, %v13831_v55 }
 0xd00   :  { %v12156_v22 = vpack.c.bf16 %v4185_v60, %v4182_v0 }
 0xd01   :  { %v4702_v37 = vsel %vm1361_vm10, %v12150_v41, 0 }
 0xd02   :  { %v8458_v47 = vpop.f32.mrb[164].mxu1  ;;  %v4701_v51 = vsel %vm1361_vm10, %v12156_v22, 0 }
 0xd03   :  { %v4197_v35 = vpop.f32.mrb[165].mxu1  ;;  %8533 = vmatpush3.bf16.msra.mxu0 %v4701_v51  ;;  %8601 = vmatpush3.bf16.xpose.msra.mxu1 %v12162_v2  ;;  %v4206_v18 = vadd.f32 %v8458_v47, %v12131_v58 }
 0xd04   :  { %v8459_v4 = vpop.f32.mrb[166].mxu1  ;;  %8534 = vmatprep.subr.bf16.mxu0 %v13831_v55  ;;  %8622 = vmatprep.subr.bf16.mxu1 %v13831_v55  ;;  %v4198_v26 = vadd.f32 %v12131_v58, %v4197_v35 }
 0xd05   :  { %v4209_v24 = vadd.f32 %v8459_v4, %v12131_v58  ;;  %v4200_v10 = vpop.f32.mrb[167].mxu1 }
 0xd06   :  { %v4201_v32 = vadd.f32 %v12131_v58, %v4200_v10 }
 0xd07   :  { %v12174_v54 = vpack.c.bf16 %v4209_v24, %v4206_v18  ;;  %8535 = vmatpush3.bf16.msra.mxu0 %v4702_v37 }
 0xd08   :  { %v12176_v44 = vpack.c.bf16 %v4201_v32, %v4198_v26  ;;  %8536 = vmatprep.subr.bf16.mxu0 %v13831_v55 }
 0xd09   :  { %v4704_v3 = vsel %vm1361_vm10, %v12174_v54, 0 }
 0xd0a   :  { %v8462_v13 = vpop.f32.mrb[168].mxu1  ;;  %8603 = vmatmul.mubr.msk.bf16.vlgmr.msra.gmra.mrb[200].mxu1 %vm333_vm1, %v4887_v50  ;;  %v4703_v38 = vsel %vm1361_vm10, %v12176_v44, 0 }
 0xd0b   :  { %v4222_v52 = vadd.f32 %v8462_v13, %v12131_v58  ;;  %v4213_v43 = vpop.f32.mrb[169].mxu1  ;;  %8537 = vmatpush3.bf16.msra.mxu0 %v4703_v38  ;;  %8623 = vmatpush3.bf16.xpose.msra.mxu1 %v12050_v46 }
 0xd0c   :  { %v8463_v57 = vpop.f32.mrb[170].mxu1  ;;  %8538 = vmatprep.subr.bf16.mxu0 %v13831_v55  ;;  %8606 = vmatprep.mubr.msk.bf16.mxu1 %vm9608_vm2, %v13831_v55  ;;  %v4214_v15 = vadd.f32 %v12131_v58, %v4213_v43 }
 0xd0d   :  { %v4225_v39 = vadd.f32 %v8463_v57, %v12131_v58  ;;  %v4216_v56 = vpop.f32.mrb[171].mxu1  ;;  %8624 = vmatprep.subr.bf16.mxu1 %v13831_v55 }
 0xd0e   :  { %v4217_v42 = vadd.f32 %v12131_v58, %v4216_v56 }
 0xd0f   :  { %v12198_v46 = vpack.c.bf16 %v4225_v39, %v4222_v52  ;;  %8539 = vmatpush3.bf16.msra.mxu0 %v4704_v3 }
 0xd10   :  { %v12200_v45 = vpack.c.bf16 %v4217_v42, %v4214_v15  ;;  %8540 = vmatprep.subr.bf16.mxu0 %v13831_v55  ;;  %v5116_v15 = vsel %vm1361_vm10, %v12080_v25, 0  ;;  %v5119_v25 = vsel %vm1361_vm10, %v12120_v30, 0 }
 0xd12   :  { %v8466_v9 = vpop.f32.mrb[172].mxu1  ;;  %8607 = vmatmul.mubr.msk.bf16.gmra.mrb[204].mxu1 %vm333_vm1, %v4888_v5  ;;  %v4705_v0 = vsel %vm1361_vm10, %v12200_v45, 0 }
 0xd13   :  { %v4238_v60 = vadd.f32 %v8466_v9, %v12131_v58  ;;  %v4229_v47 = vpop.f32.mrb[173].mxu1  ;;  %8541 = vmatpush3.bf16.msra.mxu0 %v4705_v0  ;;  %8625 = vmatpush3.bf16.xpose.msra.mxu1 %v12083_v49  ;;  %v4889_v49 = vsel %vm1123_vm9, %v12074_v36, 0 }
 0xd14   :  { %v4230_v51 = vadd.f32 %v12131_v58, %v4229_v47  ;;  %v8467_v35 = vpop.f32.mrb[174].mxu1  ;;  %8610 = vmatprep.mubr.msk.bf16.mxu1 %vm9608_vm2, %v13831_v55  ;;  %8626 = vmatprep.subr.bf16.mxu1 %v13831_v55 }
 0xd15   :  { %v4241_v4 = vadd.f32 %v8467_v35, %v12131_v58  ;;  %v4232_v18 = vpop.f32.mrb[175].mxu1  ;;  %8562 = vmatprep.subr.bf16.mxu0 %v13831_v55 }
 0xd16   :  { %v4233_v24 = vadd.f32 %v12131_v58, %v4232_v18 }
 0xd17   :  { %v12219_v10 = vpack.c.bf16 %v4241_v4, %v4238_v60 }
 0xd18   :  { %v12221_v26 = vpack.c.bf16 %v4233_v24, %v4230_v51 }
 0xd1a   :  { %v8470_v32 = vpop.f32.mrb[176].mxu1  ;;  %8611 = vmatmul.mubr.msk.bf16.gmra.mrb[208].mxu1 %vm333_vm1, %v4889_v49 }
 0xd1b   :  { %v4254_v37 = vadd.f32 %v8470_v32, %v12131_v58  ;;  %v4245_v50 = vpop.f32.mrb[177].mxu1  ;;  %8627 = vmatpush3.bf16.xpose.msra.mxu1 %v12100_v8  ;;  %8614 = vmatprep.mubr.msk.bf16.mxu1 %vm9608_vm2, %v13831_v55  ;;  %v4890_v8 = vsel %vm1123_vm9, %v12126_v19, 0 }
 0xd1c   :  { %v4246_v13 = vadd.f32 %v12131_v58, %v4245_v50  ;;  %v8471_v38 = vpop.f32.mrb[178].mxu1  ;;  %8628 = vmatprep.subr.bf16.mxu1 %v13831_v55 }
 0xd1d   :  { %v4257_v52 = vadd.f32 %v8471_v38, %v12131_v58  ;;  %v4248_v43 = vpop.f32.mrb[179].mxu1 }
 0xd1e   :  { %v4249_v57 = vadd.f32 %v12131_v58, %v4248_v43  ;;  %v4891_v58 = vsel %vm1123_vm9, %v12120_v30, 0 }
 0xd1f   :  { %v12235_v39 = vpack.c.bf16 %v4257_v52, %v4254_v37 }
 0xd20   :  { %v12237_v56 = vpack.c.bf16 %v4249_v57, %v4246_v13 }
 0xd21   :  { %13873 = vst [vmem:[#allocation21_spill] sm:$0xff] %v12235_v39 }
 0xd22   :  { %13874 = vst [vmem:[#allocation23_spill] sm:$0xff] %v12237_v56  ;;  %8615 = vmatmul.mubr.msk.bf16.gmra.mrb[212].mxu1 %vm333_vm1, %v4890_v8 }
 0xd23   :  { %8629 = vmatpush3.bf16.xpose.msra.mxu1 %v12134_v63  ;;  %8618 = vmatprep.mubr.msk.bf16.mxu1 %vm9608_vm2, %v13831_v55  ;;  %v5115_v63 = vsel %vm1361_vm10, %v12034_v23, 0  ;;  %v5118_v23 = vsel %vm1361_vm10, %v12126_v19, 0 }
 0xd24   :  { %8630 = vmatprep.subr.bf16.mxu1 %v13831_v55 }
 0xd2a   :  { %8619 = vmatmul.mubr.msk.bf16.gmra.mrb[216].mxu1 %vm333_vm1, %v4891_v58 }
 0xd2b   :  { %8631 = vmatpush3.bf16.xpose.msra.mxu1 %v12162_v2  ;;  %8632 = vmatprep.mubr.msk.bf16.mxu1 %vm9608_vm2, %v13831_v55  ;;  %v5117_v2 = vsel %vm1361_vm10, %v12074_v36, 0 }
 0xd32   :  { %8633 = vmatmul.mubr.msk.bf16.vlgmr.msra.gmra.mrb[220].mxu1 %vm333_vm1, %v5115_v63 }
 0xd33   :  { %8636 = vmatprep.mubr.msk.bf16.mxu1 %vm9608_vm2, %v13831_v55 }
 0xd3a   :  { %8637 = vmatmul.mubr.msk.bf16.gmra.mrb[224].mxu1 %vm333_vm1, %v5116_v15 }
 0xd3b   :  { %8640 = vmatprep.mubr.msk.bf16.mxu1 %vm9608_vm2, %v13831_v55 }
 0xd42   :  { %8641 = vmatmul.mubr.msk.bf16.gmra.mrb[228].mxu1 %vm333_vm1, %v5117_v2 }
 0xd43   :  { %8644 = vmatprep.mubr.msk.bf16.mxu1 %vm9608_vm2, %v13831_v55 }
 0xd4a   :  { %8645 = vmatmul.mubr.msk.bf16.gmra.mrb[232].mxu1 %vm333_vm1, %v5118_v23 }
 0xd4b   :  { %8648 = vmatprep.mubr.msk.bf16.mxu1 %vm9608_vm2, %v13831_v55 }
 0xd52   :  { %8649 = vmatmul.mubr.msk.bf16.gmra.mrb[236].mxu1 %vm333_vm1, %v5119_v25 }
 0xdb1   :  { %v12282_v36 = vpop.f32.mrb[140].mxu0  ;;  %v12284_v42 = vpop.f32.mrb[180].mxu1 }
 0xdb2   :  { %v8484_v3 = vpop.f32.mrb[141].mxu0  ;;  %v8514_v5 = vpop.f32.mrb[181].mxu1  ;;  %v4591_v19 = vsel %vm1232_vm11, %v12284_v42, -inf }
 0xdb3   :  { %v12288_v9 = vpop.f32.mrb[142].mxu0  ;;  %4592 = vmax.xlane.f32.xlu1 %v4591_v19  ;;  %v12290_v0 = vpop.f32.mrb[182].mxu1 }
 0xdb4   :  { %v8485_v60 = vpop.f32.mrb[143].mxu0  ;;  %v8515_v47 = vpop.f32.mrb[183].mxu1  ;;  %v4594_v30 = vsel %vm1232_vm11, %v12290_v0, -inf }
 0xdb5   :  { %4595 = vmax.xlane.f32.xlu0 %v4594_v30 }
 0xdb9   :  { %v12294_v51 = vpop.f32.mrb[144].mxu0  ;;  %v12296_v35 = vpop.f32.mrb[184].mxu1 }
 0xdba   :  { %v8488_v4 = vpop.f32.mrb[145].mxu0  ;;  %v8518_v18 = vpop.f32.mrb[185].mxu1  ;;  %v4597_v24 = vsel %vm1232_vm11, %v12296_v35, -inf }
 0xdbb   :  { %v12300_v49 = vpop.f32.mrb[146].mxu0  ;;  %4598 = vmax.xlane.f32.xlu1 %v4597_v24  ;;  %v12302_v32 = vpop.f32.mrb[186].mxu1 }
 0xdbc   :  { %v8489_v37 = vpop.f32.mrb[147].mxu0  ;;  %v8519_v50 = vpop.f32.mrb[187].mxu1  ;;  %v4600_v13 = vsel %vm1232_vm11, %v12302_v32, -inf }
 0xdbd   :  { %4601 = vmax.xlane.f32.xlu0 %v4600_v13 }
 0xdc1   :  { %v12306_v38 = vpop.f32.mrb[148].mxu0  ;;  %v12308_v52 = vpop.f32.mrb[188].mxu1 }
 0xdc2   :  { %v8492_v43 = vpop.f32.mrb[149].mxu0  ;;  %v8522_v57 = vpop.f32.mrb[189].mxu1  ;;  %v4603_v8 = vsel %vm1232_vm11, %v12308_v52, -inf }
 0xdc3   :  { %v12312_v58 = vpop.f32.mrb[150].mxu0  ;;  %4604 = vmax.xlane.f32.xlu1 %v4603_v8  ;;  %v12314_v63 = vpop.f32.mrb[190].mxu1 }
 0xdc4   :  { %v8493_v15 = vpop.f32.mrb[151].mxu0  ;;  %v8523_v2 = vpop.f32.mrb[191].mxu1  ;;  %v4606_v23 = vsel %vm1232_vm11, %v12314_v63, -inf }
 0xdc5   :  { %4607 = vmax.xlane.f32.xlu0 %v4606_v23 }
 0xdc9   :  { %v12318_v25 = vpop.f32.mrb[152].mxu0  ;;  %v12320_v3 = vpop.f32.mrb[192].mxu1 }
 0xdca   :  { %v8496_v5 = vpop.f32.mrb[153].mxu0  ;;  %v8526_v19 = vpop.f32.mrb[193].mxu1  ;;  %v4609_v60 = vsel %vm1232_vm11, %v12320_v3, -inf }
 0xdcb   :  { %v12324_v47 = vpop.f32.mrb[154].mxu0  ;;  %4610 = vmax.xlane.f32.xlu1 %v4609_v60  ;;  %v12326_v30 = vpop.f32.mrb[194].mxu1  ;;  %v4378_v19 = vsel %vm1232_vm11, %v12282_v36, -inf  ;;  %v4381_v60 = vsel %vm1232_vm11, %v12288_v9, -inf }
 0xdcc   :  { %v8497_v4 = vpop.f32.mrb[155].mxu0  ;;  %v8527_v18 = vpop.f32.mrb[195].mxu1  ;;  %v4612_v24 = vsel %vm1232_vm11, %v12326_v30, -inf }
 0xdcd   :  { %4613 = vmax.xlane.f32.xlu0 %v4612_v24  ;;  %v4384_v4 = vsel %vm1232_vm11, %v12294_v51, -inf  ;;  %v4387_v18 = vsel %vm1232_vm11, %v12300_v49, -inf }
 0xdd1   :  { %v12330_v37 = vpop.f32.mrb[156].mxu0  ;;  %v12332_v50 = vpop.f32.mrb[196].mxu1 }
 0xdd2   :  { %v8500_v13 = vpop.f32.mrb[157].mxu0  ;;  %v8530_v43 = vpop.f32.mrb[197].mxu1  ;;  %v4615_v57 = vsel %vm1232_vm11, %v12332_v50, -inf }
 0xdd3   :  { %v12336_v8 = vpop.f32.mrb[158].mxu0  ;;  %4616 = vmax.xlane.f32.xlu1 %v4615_v57  ;;  %v12338_v15 = vpop.f32.mrb[198].mxu1  ;;  %v4390_v43 = vsel %vm1232_vm11, %v12306_v38, -inf }
 0xdd4   :  { %v8501_v2 = vpop.f32.mrb[159].mxu0  ;;  %v8531_v23 = vpop.f32.mrb[199].mxu1  ;;  %v4618_v5 = vsel %vm1232_vm11, %v12338_v15, -inf }
 0xdd5   :  { %4619 = vmax.xlane.f32.xlu0 %v4618_v5  ;;  %v4393_v23 = vsel %vm1232_vm11, %v12312_v58, -inf  ;;  %v4396_v5 = vsel %vm1232_vm11, %v12318_v25, -inf }
 0xdd7   :  { %4379 = vmax.xlane.f32.xlu1 %v4378_v19  ;;  %v4399_v19 = vsel %vm1232_vm11, %v12324_v47, -inf }
 0xdd9   :  { %4382 = vmax.xlane.f32.xlu0 %v4381_v60 }
 0xddb   :  { %4385 = vmax.xlane.f32.xlu1 %v4384_v4 }
 0xddd   :  { %4388 = vmax.xlane.f32.xlu0 %v4387_v18  ;;  %v12350_v24 = vpop.f32.mrb[200].mxu1  ;;  %v4402_v18 = vsel %vm1232_vm11, %v12330_v37, -inf }
 0xdde   :  { %v8604_v13 = vpop.f32.mrb[201].mxu1 }
 0xddf   :  { %4391 = vmax.xlane.f32.xlu1 %v4390_v43  ;;  %v12354_v57 = vpop.f32.mrb[202].mxu1 }
 0xde0   :  { %v8605_v2 = vpop.f32.mrb[203].mxu1 }
 0xde1   :  { %4394 = vmax.xlane.f32.xlu0 %v4393_v23  ;;  %v4405_v2 = vsel %vm1232_vm11, %v12336_v8, -inf }
 0xde3   :  { %4397 = vmax.xlane.f32.xlu1 %v4396_v5 }
 0xde5   :  { %4400 = vmax.xlane.f32.xlu0 %v4399_v19  ;;  %v12362_v60 = vpop.f32.mrb[204].mxu1 }
 0xde6   :  { %v8608_v4 = vpop.f32.mrb[205].mxu1 }
 0xde7   :  { %4403 = vmax.xlane.f32.xlu1 %v4402_v18  ;;  %v12366_v13 = vpop.f32.mrb[206].mxu1 }
 0xde8   :  { %v8609_v43 = vpop.f32.mrb[207].mxu1 }
 0xde9   :  { %4406 = vmax.xlane.f32.xlu0 %v4405_v2 }
 0xded   :  { %v12370_v23 = vpop.f32.mrb[208].mxu1 }
 0xdee   :  { %v8612_v5 = vpop.f32.mrb[209].mxu1 }
 0xdef   :  { %v12372_v7 = vpop.f32.mrb[210].mxu1 }
 0xdf0   :  { %v8613_v19 = vpop.f32.mrb[211].mxu1 }
 0xdf5   :  { %v12374_v40 = vpop.f32.mrb[212].mxu1 }
 0xdf6   :  { %v8616_v4 = vpop.f32.mrb[213].mxu1 }
 0xdf7   :  { %v12376_v29 = vpop.f32.mrb[214].mxu1 }
 0xdf8   :  { %v8617_v31 = vpop.f32.mrb[215].mxu1 }
 0xdfd   :  { %v12378_v18 = vpop.f32.mrb[216].mxu1 }
 0xdfe   :  { %v8620_v20 = vpop.f32.mrb[217].mxu1 }
 0xdff   :  { %v12380_v43 = vpop.f32.mrb[218].mxu1 }
 0xe00   :  { %v8621_v27 = vpop.f32.mrb[219].mxu1 }
 0xe05   :  { %v12382_v61 = vpop.f32.mrb[220].mxu1 }
 0xe06   :  { %v8634_v2 = vpop.f32.mrb[221].mxu1  ;;  %v5208_v5 = vsel %vm1232_vm11, %v12382_v61, -inf }
 0xe07   :  { %5209 = vmax.xlane.f32.xlu1 %v5208_v5  ;;  %v12386_v19 = vpop.f32.mrb[222].mxu1 }
 0xe08   :  { %v8635_v12 = vpop.f32.mrb[223].mxu1  ;;  %v5211_v4 = vsel %vm1232_vm11, %v12386_v19, -inf }
 0xe09   :  { %5212 = vmax.xlane.f32.xlu0 %v5211_v4 }
 0xe0d   :  { %v12390_v31 = vpop.f32.mrb[224].mxu1 }
 0xe0e   :  { %v8638_v20 = vpop.f32.mrb[225].mxu1  ;;  %v5214_v27 = vsel %vm1232_vm11, %v12390_v31, -inf }
 0xe0f   :  { %5215 = vmax.xlane.f32.xlu1 %v5214_v27  ;;  %v12394_v62 = vpop.f32.mrb[226].mxu1 }
 0xe10   :  { %v8639_v2 = vpop.f32.mrb[227].mxu1  ;;  %v5217_v5 = vsel %vm1232_vm11, %v12394_v62, -inf }
 0xe11   :  { %5218 = vmax.xlane.f32.xlu0 %v5217_v5 }
 0xe15   :  { %v12398_v6 = vpop.f32.mrb[228].mxu1 }
 0xe16   :  { %v8642_v12 = vpop.f32.mrb[229].mxu1 }
 0xe17   :  { %v12400_v17 = vpop.f32.mrb[230].mxu1 }
 0xe18   :  { %v8643_v4 = vpop.f32.mrb[231].mxu1 }
 0xe1d   :  { %v12402_v34 = vpop.f32.mrb[232].mxu1 }
 0xe1e   :  { %v8646_v20 = vpop.f32.mrb[233].mxu1 }
 0xe1f   :  { %v12404_v59 = vpop.f32.mrb[234].mxu1 }
 0xe20   :  { %v8647_v1 = vpop.f32.mrb[235].mxu1 }
 0xe25   :  { %v12406_v27 = vpop.f32.mrb[236].mxu1 }
 0xe26   :  { %v8650_v48 = vpop.f32.mrb[237].mxu1 }
 0xe27   :  { %v12408_v2 = vpop.f32.mrb[238].mxu1 }
 0xe28   :  { %v8651_v33 = vpop.f32.mrb[239].mxu1 }
 0xe40   :  { %v4593_v11 = vpop.xlane.xlu1 %4592 }
 0xe41   :  { %v4621_v5 = vsub.f32 %v12284_v42, %v4593_v11 }
 0xe42   :  { %v4596_v53 = vpop.xlane.xlu0 %4595 }
 0xe43   :  { %v4631_v12 = vmul.f32 1.442695, %v4621_v5  ;;  %v4622_v28 = vsub.f32 %v12290_v0, %v4596_v53  ;;  %v5223_v5 = vsel %vm1232_vm11, %v12400_v17, -inf }
 0xe45   :  { %9302 = vpow2.f32 %v4631_v12  ;;  %v4633_v4 = vmul.f32 1.442695, %v4622_v28 }
 0xe47   :  { %9304 = vpow2.f32 %v4633_v4 }
 0xe48   :  { %v4599_v20 = vpop.xlane.xlu1 %4598 }
 0xe49   :  { %v4623_v21 = vsub.f32 %v12296_v35, %v4599_v20 }
 0xe4a   :  { %v4602_v1 = vpop.xlane.xlu0 %4601 }
 0xe4b   :  { %v4635_v39 = vmul.f32 1.442695, %v4623_v21  ;;  %v4624_v48 = vsub.f32 %v12302_v32, %v4602_v1 }
 0xe4d   :  { %9306 = vpow2.f32 %v4635_v39  ;;  %v4637_v56 = vmul.f32 1.442695, %v4624_v48 }
 0xe4f   :  { %v12414_v33 = vpop.eup %9302  ;;  %9308 = vpow2.f32 %v4637_v56  ;;  %v5220_v56 = vsel %vm1232_vm11, %v12398_v6, -inf }
 0xe50   :  { %v4605_v11 = vpop.xlane.xlu1 %4604  ;;  %v4651_v42 = vsel %vm1232_vm11, %v12414_v33, 0.0 }
 0xe51   :  { %v12418_v53 = vpop.eup %9304  ;;  %v4625_v28 = vsub.f32 %v12308_v52, %v4605_v11  ;;  %4652 = vadd.xlane.f32.xlu1 %v4651_v42 }
 0xe52   :  { %v4608_v0 = vpop.xlane.xlu0 %4607  ;;  %v4654_v21 = vsel %vm1232_vm11, %v12418_v53, 0.0 }
 0xe53   :  { %v4639_v35 = vmul.f32 1.442695, %v4625_v28  ;;  %v4626_v39 = vsub.f32 %v12314_v63, %v4608_v0  ;;  %4655 = vadd.xlane.f32.xlu0 %v4654_v21  ;;  %v5226_v28 = vsel %vm1232_vm11, %v12402_v34, -inf  ;;  %v5229_v21 = vsel %vm1232_vm11, %v12404_v59, -inf }
 0xe55   :  { %9310 = vpow2.f32 %v4639_v35  ;;  %v4641_v32 = vmul.f32 1.442695, %v4626_v39  ;;  %5221 = vmax.xlane.f32.xlu1 %v5220_v56 }
 0xe57   :  { %v12428_v12 = vpop.eup %9306  ;;  %9312 = vpow2.f32 %v4641_v32  ;;  %5224 = vmax.xlane.f32.xlu0 %v5223_v5 }
 0xe58   :  { %v4611_v52 = vpop.xlane.xlu1 %4610  ;;  %v4657_v4 = vsel %vm1232_vm11, %v12428_v12, 0.0 }
 0xe59   :  { %v12432_v20 = vpop.eup %9308  ;;  %v4627_v63 = vsub.f32 %v12320_v3, %v4611_v52  ;;  %4658 = vadd.xlane.f32.xlu1 %v4657_v4 }
 0xe5a   :  { %v4614_v1 = vpop.xlane.xlu0 %4613  ;;  %v4660_v48 = vsel %vm1232_vm11, %v12432_v20, 0.0 }
 0xe5b   :  { %v4643_v11 = vmul.f32 1.442695, %v4627_v63  ;;  %v4628_v42 = vsub.f32 %v12326_v30, %v4614_v1  ;;  %4661 = vadd.xlane.f32.xlu0 %v4660_v48  ;;  %v5232_v1 = vsel %vm1232_vm11, %v12406_v27, -inf }
 0xe5d   :  { %9314 = vpow2.f32 %v4643_v11  ;;  %v4645_v0 = vmul.f32 1.442695, %v4628_v42  ;;  %5227 = vmax.xlane.f32.xlu1 %v5226_v28 }
 0xe5f   :  { %v12442_v35 = vpop.eup %9310  ;;  %9316 = vpow2.f32 %v4645_v0  ;;  %5230 = vmax.xlane.f32.xlu0 %v5229_v21 }
 0xe60   :  { %v4617_v3 = vpop.xlane.xlu1 %4616  ;;  %v4663_v39 = vsel %vm1232_vm11, %v12442_v35, 0.0 }
 0xe61   :  { %v12446_v56 = vpop.eup %9312  ;;  %v4629_v30 = vsub.f32 %v12332_v50, %v4617_v3  ;;  %4664 = vadd.xlane.f32.xlu1 %v4663_v39  ;;  %v5235_v50 = vsel %vm1232_vm11, %v12408_v2, -inf }
 0xe62   :  { %v4620_v32 = vpop.xlane.xlu0 %4619  ;;  %v4666_v5 = vsel %vm1232_vm11, %v12446_v56, 0.0 }
 0xe63   :  { %v4647_v52 = vmul.f32 1.442695, %v4629_v30  ;;  %v4630_v4 = vsub.f32 %v12338_v15, %v4620_v32  ;;  %4667 = vadd.xlane.f32.xlu0 %v4666_v5 }
 0xe64   :  { %v4380_v63 = vpop.xlane.xlu1 %4379 }
 0xe65   :  { %9318 = vpow2.f32 %v4647_v52  ;;  %v4649_v48 = vmul.f32 1.442695, %v4630_v4  ;;  %v4408_v11 = vsub.f32 %v12282_v36, %v4380_v63  ;;  %5233 = vmax.xlane.f32.xlu1 %v5232_v1  ;;  %v4995_v63 = vsel %vm1232_vm11, %v12350_v24, -inf }
 0xe66   :  { %v4383_v42 = vpop.xlane.xlu0 %4382 }
 0xe67   :  { %v12457_v28 = vpop.eup %9314  ;;  %9320 = vpow2.f32 %v4649_v48  ;;  %v4418_v0 = vmul.f32 1.442695, %v4408_v11  ;;  %v4409_v15 = vsub.f32 %v12288_v9, %v4383_v42  ;;  %5236 = vmax.xlane.f32.xlu0 %v5235_v50 }
 0xe68   :  { %v4386_v21 = vpop.xlane.xlu1 %4385  ;;  %v4669_v3 = vsel %vm1232_vm11, %v12457_v28, 0.0 }
 0xe69   :  { %v12462_v39 = vpop.eup %9316  ;;  %9322 = vpow2.f32 %v4418_v0  ;;  %v4420_v36 = vmul.f32 1.442695, %v4409_v15  ;;  %v4410_v30 = vsub.f32 %v12294_v51, %v4386_v21  ;;  %4670 = vadd.xlane.f32.xlu1 %v4669_v3  ;;  %v4998_v51 = vsel %vm1232_vm11, %v12354_v57, -inf }
 0xe6a   :  { %v4389_v32 = vpop.xlane.xlu0 %4388  ;;  %v4672_v5 = vsel %vm1232_vm11, %v12462_v39, 0.0 }
 0xe6b   :  { %9324 = vpow2.f32 %v4420_v36  ;;  %v4422_v52 = vmul.f32 1.442695, %v4410_v30  ;;  %v4411_v9 = vsub.f32 %v12300_v49, %v4389_v32  ;;  %4673 = vadd.xlane.f32.xlu0 %v4672_v5 }
 0xe6c   :  { %v4392_v4 = vpop.xlane.xlu1 %4391 }
 0xe6d   :  { %v4424_v1 = vmul.f32 1.442695, %v4411_v9  ;;  %4996 = vmax.xlane.f32.xlu1 %v4995_v63  ;;  %9326 = vpow2.f32 %v4422_v52  ;;  %v4412_v42 = vsub.f32 %v12306_v38, %v4392_v4  ;;  %v5001_v9 = vsel %vm1232_vm11, %v12362_v60, -inf }
 0xe6e   :  { %v4395_v48 = vpop.xlane.xlu0 %4394 }
 0xe6f   :  { %v12472_v11 = vpop.eup %9318  ;;  %4999 = vmax.xlane.f32.xlu0 %v4998_v51  ;;  %9328 = vpow2.f32 %v4424_v1  ;;  %v4413_v0 = vsub.f32 %v12312_v58, %v4395_v48  ;;  %v4426_v3 = vmul.f32 1.442695, %v4412_v42  ;;  %v5004_v1 = vsel %vm1232_vm11, %v12366_v13, -inf }
 0xe70   :  { %v4675_v49 = vsel %vm1232_vm11, %v12472_v11, 0.0  ;;  %v4398_v36 = vpop.xlane.xlu1 %4397 }
 0xe71   :  { %v12477_v50 = vpop.eup %9320  ;;  %4676 = vadd.xlane.f32.xlu1 %v4675_v49  ;;  %v4428_v32 = vmul.f32 1.442695, %v4413_v0  ;;  %9330 = vpow2.f32 %v4426_v3  ;;  %v4414_v52 = vsub.f32 %v12318_v25, %v4398_v36  ;;  %v5007_v3 = vsel %vm1232_vm11, %v12370_v23, -inf }
 0xe72   :  { %v4678_v15 = vsel %vm1232_vm11, %v12477_v50, 0.0  ;;  %v4401_v5 = vpop.xlane.xlu0 %4400 }
 0xe73   :  { %v12482_v21 = vpop.eup %9322  ;;  %4679 = vadd.xlane.f32.xlu0 %v4678_v15  ;;  %9332 = vpow2.f32 %v4428_v32  ;;  %v4415_v63 = vsub.f32 %v12324_v47, %v4401_v5  ;;  %v4430_v51 = vmul.f32 1.442695, %v4414_v52  ;;  %v5010_v32 = vsel %vm1232_vm11, %v12372_v7, -inf }
 0xe74   :  { %v4438_v38 = vsel %vm1232_vm11, %v12482_v21, 0.0  ;;  %v4404_v42 = vpop.xlane.xlu1 %4403 }
 0xe75   :  { %v12486_v30 = vpop.eup %9324  ;;  %4439 = vadd.xlane.f32.xlu1 %v4438_v38  ;;  %v4432_v49 = vmul.f32 1.442695, %v4415_v63  ;;  %9334 = vpow2.f32 %v4430_v51  ;;  %v4416_v47 = vsub.f32 %v12330_v37, %v4404_v42 }
 0xe76   :  { %v4441_v58 = vsel %vm1232_vm11, %v12486_v30, 0.0  ;;  %v4407_v0 = vpop.xlane.xlu0 %4406 }
 0xe77   :  { %4442 = vadd.xlane.f32.xlu0 %v4441_v58  ;;  %v12493_v4 = vpop.eup %9326  ;;  %9336 = vpow2.f32 %v4432_v49  ;;  %v4417_v38 = vsub.f32 %v12336_v8, %v4407_v0  ;;  %v4434_v58 = vmul.f32 1.442695, %v4416_v47  ;;  %v5013_v8 = vsel %vm1232_vm11, %v12374_v40, -inf }
 0xe78   :  { %v4444_v25 = vsel %vm1232_vm11, %v12493_v4, 0.0  ;;  %v5019_v49 = vsel %vm1232_vm11, %v12378_v18, -inf }
 0xe79   :  { %5002 = vmax.xlane.f32.xlu1 %v5001_v9  ;;  %v12498_v48 = vpop.eup %9328  ;;  %v4436_v52 = vmul.f32 1.442695, %v4417_v38  ;;  %9338 = vpow2.f32 %v4434_v58 }
 0xe7a   :  { %v4447_v15 = vsel %vm1232_vm11, %v12498_v48, 0.0 }
 0xe7b   :  { %5005 = vmax.xlane.f32.xlu0 %v5004_v1  ;;  %v12507_v36 = vpop.eup %9330  ;;  %9340 = vpow2.f32 %v4436_v52  ;;  %v5016_v1 = vsel %vm1232_vm11, %v12376_v29, -inf }
 0xe7c   :  { %v4450_v37 = vsel %vm1232_vm11, %v12507_v36, 0.0 }
 0xe7d   :  { %4445 = vadd.xlane.f32.xlu1 %v4444_v25  ;;  %v12512_v5 = vpop.eup %9332 }
 0xe7e   :  { %v4453_v9 = vsel %vm1232_vm11, %v12512_v5, 0.0 }
 0xe7f   :  { %4448 = vadd.xlane.f32.xlu0 %v4447_v15  ;;  %v12520_v63 = vpop.eup %9334  ;;  %v5022_v15 = vsel %vm1232_vm11, %v12380_v43, -inf }
 0xe80   :  { %v4456_v42 = vsel %vm1232_vm11, %v12520_v63, 0.0 }
 0xe81   :  { %5008 = vmax.xlane.f32.xlu1 %v5007_v3  ;;  %v12524_v51 = vpop.eup %9336 }
 0xe82   :  { %v4459_v25 = vsel %vm1232_vm11, %v12524_v51, 0.0 }
 0xe83   :  { %5011 = vmax.xlane.f32.xlu0 %v5010_v32  ;;  %v12532_v0 = vpop.eup %9338 }
 0xe84   :  { %v4462_v38 = vsel %vm1232_vm11, %v12532_v0, 0.0 }
 0xe85   :  { %4451 = vadd.xlane.f32.xlu1 %v4450_v37  ;;  %v12536_v47 = vpop.eup %9340 }
 0xe86   :  { %v4465_v37 = vsel %vm1232_vm11, %v12536_v47, 0.0 }
 0xe87   :  { %4454 = vadd.xlane.f32.xlu0 %v4453_v9 }
 0xe89   :  { %5014 = vmax.xlane.f32.xlu1 %v5013_v8 }
 0xe8b   :  { %5017 = vmax.xlane.f32.xlu0 %v5016_v1 }
 0xe8d   :  { %4457 = vadd.xlane.f32.xlu1 %v4456_v42 }
 0xe8f   :  { %4460 = vadd.xlane.f32.xlu0 %v4459_v25 }
 0xe91   :  { %5020 = vmax.xlane.f32.xlu1 %v5019_v49 }
 0xe93   :  { %5023 = vmax.xlane.f32.xlu0 %v5022_v15 }
 0xe94   :  { %v5210_v3 = vpop.xlane.xlu1 %5209 }
 0xe95   :  { %v5238_v32 = vsub.f32 %v12382_v61, %v5210_v3  ;;  %4463 = vadd.xlane.f32.xlu1 %v4462_v38 }
 0xe96   :  { %v5213_v58 = vpop.xlane.xlu0 %5212 }
 0xe97   :  { %v5248_v52 = vmul.f32 1.442695, %v5238_v32  ;;  %v5239_v9 = vsub.f32 %v12386_v19, %v5213_v58  ;;  %4466 = vadd.xlane.f32.xlu0 %v4465_v37 }
 0xe99   :  { %9342 = vpow2.f32 %v5248_v52  ;;  %v5250_v8 = vmul.f32 1.442695, %v5239_v9 }
 0xe9b   :  { %9344 = vpow2.f32 %v5250_v8 }
 0xe9c   :  { %v5216_v1 = vpop.xlane.xlu1 %5215 }
 0xe9d   :  { %v5240_v42 = vsub.f32 %v12390_v31, %v5216_v1 }
 0xe9e   :  { %v5219_v25 = vpop.xlane.xlu0 %5218 }
 0xe9f   :  { %v5252_v49 = vmul.f32 1.442695, %v5240_v42  ;;  %v5241_v15 = vsub.f32 %v12394_v62, %v5219_v25 }
 0xea1   :  { %9346 = vpow2.f32 %v5252_v49  ;;  %v5254_v61 = vmul.f32 1.442695, %v5241_v15 }
 0xea3   :  { %v12546_v3 = vpop.eup %9342  ;;  %9348 = vpow2.f32 %v5254_v61 }
 0xea4   :  { %v5268_v38 = vsel %vm1232_vm11, %v12546_v3, 0.0 }
 0xea5   :  { %v12550_v19 = vpop.eup %9344  ;;  %5269 = vadd.xlane.f32.xlu1 %v5268_v38 }
 0xea6   :  { %v5271_v32 = vsel %vm1232_vm11, %v12550_v19, 0.0 }
 0xea7   :  { %5272 = vadd.xlane.f32.xlu0 %v5271_v32 }
 0xeab   :  { %v12554_v31 = vpop.eup %9346 }
 0xeac   :  { %v5274_v62 = vsel %vm1232_vm11, %v12554_v31, 0.0 }
 0xead   :  { %v12558_v58 = vpop.eup %9348  ;;  %5275 = vadd.xlane.f32.xlu1 %v5274_v62 }
 0xeae   :  { %v5277_v37 = vsel %vm1232_vm11, %v12558_v58, 0.0 }
 0xeaf   :  { %5278 = vadd.xlane.f32.xlu0 %v5277_v37 }
 0xede   :  { %v4653_v52 = vpop.xlane.xlu1 %4652 }
 0xedf   :  { %9350 = vrcp.f32 %v4653_v52 }
 0xee0   :  { %v4656_v9 = vpop.xlane.xlu0 %4655 }
 0xee1   :  { %9352 = vrcp.f32 %v4656_v9 }
 0xee2   :  { %v5222_v8 = vpop.xlane.xlu1 %5221 }
 0xee3   :  { %v5242_v1 = vsub.f32 %v12398_v6, %v5222_v8 }
 0xee4   :  { %v5225_v42 = vpop.xlane.xlu0 %5224 }
 0xee5   :  { %v5256_v25 = vmul.f32 1.442695, %v5242_v1  ;;  %v5243_v49 = vsub.f32 %v12400_v17, %v5225_v42 }
 0xee6   :  { %v4659_v15 = vpop.xlane.xlu1 %4658 }
 0xee7   :  { %9354 = vpow2.f32 %v5256_v25  ;;  %v5258_v61 = vmul.f32 1.442695, %v5243_v49 }
 0xee8   :  { %9356 = vrcp.f32 %v4659_v15  ;;  %v4662_v38 = vpop.xlane.xlu0 %4661  ;;  %v4488_v15 = vsel %vm1123_vm9, %v12156_v22, 0 }
 0xee9   :  { %v9351_v32 = vpop.eup %9350  ;;  %9358 = vpow2.f32 %v5258_v61 }
 0xeea   :  { %9360 = vrcp.f32 %v4662_v38  ;;  %v5228_v62 = vpop.xlane.xlu1 %5227  ;;  %v4691_v9 = vmul.f32 %v9351_v32, %v12414_v33 }
 0xeeb   :  { %v9353_v37 = vpop.eup %9352  ;;  %v5244_v52 = vsub.f32 %v12402_v34, %v5228_v62  ;;  %v4489_v62 = vsel %vm1123_vm9, %v12150_v41, 0 }
 0xeec   :  { %v4692_v6 = vmul.f32 %v9353_v37, %v12418_v53  ;;  %v5231_v8 = vpop.xlane.xlu0 %5230 }
 0xeed   :  { %v5260_v1 = vmul.f32 1.442695, %v5244_v52  ;;  %v5245_v17 = vsub.f32 %v12404_v59, %v5231_v8 }
 0xeee   :  { %v4706_v42 = vpack.c.bf16 %v4692_v6, %v4691_v9  ;;  %v4665_v25 = vpop.xlane.xlu1 %4664 }
 0xeef   :  { %9362 = vpow2.f32 %v5260_v1  ;;  %v5262_v49 = vmul.f32 1.442695, %v5245_v17 }
 0xef0   :  { %9364 = vrcp.f32 %v4665_v25  ;;  %8543 = vmatmul.mubr.msk.bf16.vlgmr.msra.gmra.mrb[160].mxu0 %vm1232_vm11, %v4706_v42  ;;  %v4668_v34 = vpop.xlane.xlu0 %4667 }
 0xef1   :  { %v12572_v61 = vpop.eup %9354  ;;  %9366 = vpow2.f32 %v5262_v49  ;;  %8563 = vmatpush3.bf16.msra.mxu0 %v4488_v15  ;;  %8546 = vmatprep.mubr.msk.bf16.mxu0 %vm9608_vm2, %v13831_v55 }
 0xef2   :  { %v9357_v59 = vpop.eup %9356  ;;  %9368 = vrcp.f32 %v4668_v34  ;;  %v5234_v33 = vpop.xlane.xlu1 %5233  ;;  %8564 = vmatprep.subr.bf16.mxu0 %v13831_v55  ;;  %v5280_v53 = vsel %vm1232_vm11, %v12572_v61, 0.0 }
 0xef3   :  { %v12579_v38 = vpop.eup %9358  ;;  %v5246_v22 = vsub.f32 %v12406_v27, %v5234_v33  ;;  %5281 = vadd.xlane.f32.xlu1 %v5280_v53  ;;  %v4693_v8 = vmul.f32 %v9357_v59, %v12428_v12 }
 0xef4   :  { %v9361_v32 = vpop.eup %9360  ;;  %v5237_v37 = vpop.xlane.xlu0 %5236  ;;  %v5283_v52 = vsel %vm1232_vm11, %v12579_v38, 0.0 }
 0xef5   :  { %v5264_v9 = vmul.f32 1.442695, %v5246_v22  ;;  %8565 = vmatpush3.bf16.msra.mxu0 %v4489_v62  ;;  %v5247_v6 = vsub.f32 %v12408_v2, %v5237_v37  ;;  %5284 = vadd.xlane.f32.xlu0 %v5283_v52  ;;  %v4694_v1 = vmul.f32 %v9361_v32, %v12432_v20  ;;  %v4490_v2 = vsel %vm1123_vm9, %v12176_v44, 0 }
 0xef6   :  { %v4671_v27 = vpop.xlane.xlu1 %4670  ;;  %8566 = vmatprep.subr.bf16.mxu0 %v13831_v55  ;;  %v4491_v44 = vsel %vm1123_vm9, %v12174_v54, 0 }
 0xef7   :  { %9370 = vpow2.f32 %v5264_v9  ;;  %v5266_v17 = vmul.f32 1.442695, %v5247_v6  ;;  %v4707_v42 = vpack.c.bf16 %v4694_v1, %v4693_v8 }
 0xef8   :  { %9372 = vrcp.f32 %v4671_v27  ;;  %v4674_v41 = vpop.xlane.xlu0 %4673 }
 0xef9   :  { %v12591_v25 = vpop.eup %9362  ;;  %9374 = vpow2.f32 %v5266_v17  ;;  %8547 = vmatmul.mubr.msk.bf16.gmra.mrb[164].mxu0 %vm1232_vm11, %v4707_v42 }
 0xefa   :  { %v9365_v12 = vpop.eup %9364  ;;  %8567 = vmatpush3.bf16.msra.mxu0 %v4490_v2  ;;  %9376 = vrcp.f32 %v4674_v41  ;;  %v4997_v20 = vpop.xlane.xlu1 %4996  ;;  %v5286_v49 = vsel %vm1232_vm11, %v12591_v25, 0.0  ;;  %8550 = vmatprep.mubr.msk.bf16.mxu0 %vm9608_vm2, %v13831_v55 }
 0xefb   :  { %v12601_v15 = vpop.eup %9366  ;;  %v5025_v34 = vsub.f32 %v12350_v24, %v4997_v20  ;;  %8568 = vmatprep.subr.bf16.mxu0 %v13831_v55  ;;  %5287 = vadd.xlane.f32.xlu1 %v5286_v49  ;;  %v4695_v62 = vmul.f32 %v9365_v12, %v12442_v35 }
 0xefc   :  { %v9369_v59 = vpop.eup %9368  ;;  %v5000_v33 = vpop.xlane.xlu0 %4999  ;;  %v5289_v53 = vsel %vm1232_vm11, %v12601_v15, 0.0 }
 0xefd   :  { %v5035_v22 = vmul.f32 1.442695, %v5025_v34  ;;  %v5026_v32 = vsub.f32 %v12354_v57, %v5000_v33  ;;  %5290 = vadd.xlane.f32.xlu0 %v5289_v53  ;;  %v4696_v24 = vmul.f32 %v9369_v59, %v12446_v56  ;;  %v4492_v57 = vsel %vm1123_vm9, %v12200_v45, 0 }
 0xefe   :  { %8569 = vmatpush3.bf16.msra.mxu0 %v4491_v44  ;;  %v4677_v37 = vpop.xlane.xlu1 %4676 }
 0xeff   :  { %9378 = vpow2.f32 %v5035_v22  ;;  %v5037_v52 = vmul.f32 1.442695, %v5026_v32  ;;  %8570 = vmatprep.subr.bf16.mxu0 %v13831_v55  ;;  %v4708_v9 = vpack.c.bf16 %v4696_v24, %v4695_v62 }
 0xf00   :  { %9380 = vrcp.f32 %v4677_v37  ;;  %v4680_v54 = vpop.xlane.xlu0 %4679 }
 0xf01   :  { %v12614_v6 = vpop.eup %9370  ;;  %9382 = vpow2.f32 %v5037_v52  ;;  %8551 = vmatmul.mubr.msk.bf16.gmra.mrb[168].mxu0 %vm1232_vm11, %v4708_v9 }
 0xf02   :  { %v9373_v35 = vpop.eup %9372  ;;  %8571 = vmatpush3.bf16.msra.mxu0 %v4492_v57  ;;  %9384 = vrcp.f32 %v4680_v54  ;;  %v4440_v56 = vpop.xlane.xlu1 %4439  ;;  %v5292_v8 = vsel %vm1232_vm11, %v12614_v6, 0.0  ;;  %8554 = vmatprep.mubr.msk.bf16.mxu0 %vm9608_vm2, %v13831_v55 }
 0xf03   :  { %v12624_v1 = vpop.eup %9374  ;;  %5293 = vadd.xlane.f32.xlu1 %v5292_v8  ;;  %8652 = vmatprep.subr.bf16.mxu0 %v13831_v55  ;;  %v4697_v42 = vmul.f32 %v9373_v35, %v12457_v28 }
 0xf04   :  { %v9377_v27 = vpop.eup %9376  ;;  %v4443_v17 = vpop.xlane.xlu0 %4442  ;;  %v5295_v45 = vsel %vm1232_vm11, %v12624_v1, 0.0 }
 0xf05   :  { %5296 = vadd.xlane.f32.xlu0 %v5295_v45  ;;  %v4698_v41 = vmul.f32 %v9377_v27, %v12462_v39  ;;  %9386 = vrcp.f32 %v4443_v17 }
 0xf06   :  { %v5003_v2 = vpop.xlane.xlu1 %5002  ;;  %9388 = vrcp.f32 %v4440_v56 }
 0xf07   :  { %v5027_v12 = vsub.f32 %v12362_v60, %v5003_v2  ;;  %v4709_v20 = vpack.c.bf16 %v4698_v41, %v4697_v42 }
 0xf08   :  { %v5006_v49 = vpop.xlane.xlu0 %5005 }
 0xf09   :  { %v12632_v34 = vpop.eup %9378  ;;  %v5039_v59 = vmul.f32 1.442695, %v5027_v12  ;;  %8555 = vmatmul.mubr.msk.bf16.gmra.mrb[172].mxu0 %vm1232_vm11, %v4709_v20  ;;  %v5028_v44 = vsub.f32 %v12366_v13, %v5006_v49 }
 0xf0a   :  { %v9381_v33 = vpop.eup %9380  ;;  %v4446_v53 = vpop.xlane.xlu1 %4445  ;;  %v5055_v28 = vsel %vm1232_vm11, %v12632_v34, 0.0  ;;  %8558 = vmatprep.mubr.msk.bf16.mxu0 %vm9608_vm2, %v13831_v55 }
 0xf0b   :  { %v12640_v39 = vpop.eup %9382  ;;  %9390 = vpow2.f32 %v5039_v59  ;;  %v5041_v60 = vmul.f32 1.442695, %v5028_v44  ;;  %5056 = vadd.xlane.f32.xlu1 %v5055_v28  ;;  %v4699_v13 = vmul.f32 %v9381_v33, %v12472_v11 }
 0xf0c   :  { %v9385_v22 = vpop.eup %9384  ;;  %v4449_v32 = vpop.xlane.xlu0 %4448  ;;  %v5058_v62 = vsel %vm1232_vm11, %v12640_v39, 0.0 }
 0xf0d   :  { %9392 = vpow2.f32 %v5041_v60  ;;  %5059 = vadd.xlane.f32.xlu0 %v5058_v62  ;;  %v4700_v24 = vmul.f32 %v9385_v22, %v12477_v50 }
 0xf0e   :  { %9394 = vrcp.f32 %v4449_v32  ;;  %v5009_v37 = vpop.xlane.xlu1 %5008 }
 0xf0f   :  { %v5029_v52 = vsub.f32 %v12370_v23, %v5009_v37  ;;  %v4710_v9 = vpack.c.bf16 %v4700_v24, %v4699_v13  ;;  %v9387_v54 = vpop.eup %9386  ;;  %9396 = vrcp.f32 %v4446_v53 }
 0xf10   :  { %v5012_v57 = vpop.xlane.xlu0 %5011  ;;  %v9389_v8 = vpop.eup %9388  ;;  %v4479_v11 = vmul.f32 %v9387_v54, %v12486_v30 }
 0xf11   :  { %v5043_v35 = vmul.f32 1.442695, %v5029_v52  ;;  %8559 = vmatmul.mubr.msk.bf16.gmra.mrb[176].mxu0 %vm1232_vm11, %v4710_v9  ;;  %v5030_v56 = vsub.f32 %v12372_v7, %v5012_v57  ;;  %v4478_v45 = vmul.f32 %v9389_v8, %v12482_v21  ;;  %v5318_v21 = vsel %vm1361_vm10, %v12198_v46, 0 }
 0xf12   :  { %v4452_v27 = vpop.xlane.xlu1 %4451  ;;  %8572 = vmatprep.mubr.msk.bf16.mxu0 %vm9608_vm2, %v13831_v55  ;;  %v5320_v57 = vsel %vm1361_vm10, %v12219_v10, 0 }
 0xf13   :  { %9398 = vpow2.f32 %v5043_v35  ;;  %v5045_v50 = vmul.f32 1.442695, %v5030_v56  ;;  %v4493_v2 = vpack.c.bf16 %v4479_v11, %v4478_v45 }
 0xf14   :  { %v4455_v17 = vpop.xlane.xlu0 %4454 }
 0xf15   :  { %v12652_v23 = vpop.eup %9390  ;;  %9400 = vpow2.f32 %v5045_v50 }
 0xf16   :  { %9402 = vrcp.f32 %v4455_v17  ;;  %v5015_v42 = vpop.xlane.xlu1 %5014  ;;  %v5061_v7 = vsel %vm1232_vm11, %v12652_v23, 0.0  ;;  %v13875_v17 = vld [vmem:[#allocation23_spill] sm:$0xff] }
 0xf17   :  { %v12657_v41 = vpop.eup %9392  ;;  %v5031_v12 = vsub.f32 %v12374_v40, %v5015_v42  ;;  %5062 = vadd.xlane.f32.xlu1 %v5061_v7  ;;  %9404 = vrcp.f32 %v4452_v27 }
 0xf18   :  { %v9395_v30 = vpop.eup %9394  ;;  %v5018_v20 = vpop.xlane.xlu0 %5017  ;;  %v5064_v49 = vsel %vm1232_vm11, %v12657_v41, 0.0 }
 0xf19   :  { %v5047_v59 = vmul.f32 1.442695, %v5031_v12  ;;  %8573 = vmatmul.mubr.msk.bf16.vlgmr.msra.gmra.mrb[160].mxu0 %vm1232_vm11, %v4493_v2  ;;  %v5032_v44 = vsub.f32 %v12376_v29, %v5018_v20  ;;  %5065 = vadd.xlane.f32.xlu0 %v5064_v49  ;;  %v9397_v33 = vpop.eup %9396  ;;  %v4481_v28 = vmul.f32 %v9395_v30, %v12498_v48  ;;  %v5319_v29 = vsel %vm1361_vm10, %v12221_v26, 0  ;;  %v13876_v30 = vld [vmem:[#allocation21_spill] sm:$0xff] }
 0xf1a   :  { %8653 = vmatpush3.bf16.msra.mxu0 %v5318_v21  ;;  %v4458_v40 = vpop.xlane.xlu1 %4457  ;;  %8576 = vmatprep.mubr.msk.bf16.mxu0 %vm9608_vm2, %v13831_v55  ;;  %v4480_v32 = vmul.f32 %v9397_v33, %v12493_v4 }
 0xf1b   :  { %9406 = vpow2.f32 %v5047_v59  ;;  %v5049_v53 = vmul.f32 1.442695, %v5032_v44  ;;  %8654 = vmatprep.subr.bf16.mxu0 %v13831_v55 }
 0xf1c   :  { %v4461_v60 = vpop.xlane.xlu0 %4460  ;;  %v4494_v37 = vpack.c.bf16 %v4481_v28, %v4480_v32 }
 0xf1d   :  { %v12671_v22 = vpop.eup %9398  ;;  %9408 = vpow2.f32 %v5049_v53 }
 0xf1e   :  { %8655 = vmatpush3.bf16.msra.mxu0 %v5319_v29  ;;  %9410 = vrcp.f32 %v4461_v60  ;;  %v5021_v62 = vpop.xlane.xlu1 %5020  ;;  %v5067_v13 = vsel %vm1232_vm11, %v12671_v22, 0.0 }
 0xf1f   :  { %v12679_v24 = vpop.eup %9400  ;;  %v5033_v48 = vsub.f32 %v12378_v18, %v5021_v62  ;;  %5068 = vadd.xlane.f32.xlu1 %v5067_v13  ;;  %8656 = vmatprep.subr.bf16.mxu0 %v13831_v55  ;;  %9412 = vrcp.f32 %v4458_v40 }
 0xf20   :  { %v9403_v52 = vpop.eup %9402  ;;  %v5024_v9 = vpop.xlane.xlu0 %5023  ;;  %v5070_v4 = vsel %vm1232_vm11, %v12679_v24, 0.0 }
 0xf21   :  { %v5051_v54 = vmul.f32 1.442695, %v5033_v48  ;;  %8577 = vmatmul.mubr.msk.bf16.gmra.mrb[164].mxu0 %vm1232_vm11, %v4494_v37  ;;  %v5034_v35 = vsub.f32 %v12380_v43, %v5024_v9  ;;  %5071 = vadd.xlane.f32.xlu0 %v5070_v4  ;;  %v9405_v18 = vpop.eup %9404  ;;  %v4483_v8 = vmul.f32 %v9403_v52, %v12512_v5  ;;  %v5321_v43 = vsel %vm1361_vm10, %v13875_v17, 0 }
 0xf22   :  { %8657 = vmatpush3.bf16.msra.mxu0 %v5320_v57  ;;  %8580 = vmatprep.mubr.msk.bf16.mxu0 %vm9608_vm2, %v13831_v55  ;;  %v4464_v50 = vpop.xlane.xlu1 %4463  ;;  %v4482_v45 = vmul.f32 %v9405_v18, %v12507_v36  ;;  %v5322_v36 = vsel %vm1361_vm10, %v13876_v30, 0 }
 0xf23   :  { %9414 = vpow2.f32 %v5051_v54  ;;  %v5053_v56 = vmul.f32 1.442695, %v5034_v35  ;;  %8658 = vmatprep.subr.bf16.mxu0 %v13831_v55  ;;  %v5107_v35 = vsel %vm1123_vm9, %v12219_v10, 0  ;;  %v8964_v10 = vld [vmem:[%s13756_s2 + $0xc0] sm:$0xff]  }
 0xf24   :  { %v4467_v27 = vpop.xlane.xlu0 %4466  ;;  %v4495_v5 = vpack.c.bf16 %v4483_v8, %v4482_v45  ;;  %8712 = vmatprep.subr.bf16.mxu1 %v8964_v10 }
 0xf25   :  { %v12694_v11 = vpop.eup %9406  ;;  %9416 = vpow2.f32 %v5053_v56  ;;  %8713 = vmatpush3.bf16.msra.mxu1 %v8964_v10 }
 0xf26   :  { %8659 = vmatpush3.bf16.msra.mxu0 %v5321_v43  ;;  %9418 = vrcp.f32 %v4467_v27  ;;  %v5073_v42 = vsel %vm1232_vm11, %v12694_v11, 0.0 }
 0xf27   :  { %v12702_v7 = vpop.eup %9408  ;;  %5074 = vadd.xlane.f32.xlu1 %v5073_v42  ;;  %8660 = vmatprep.subr.bf16.mxu0 %v13831_v55  ;;  %9420 = vrcp.f32 %v4464_v50 }
 0xf28   :  { %v9411_v2 = vpop.eup %9410  ;;  %v5076_v12 = vsel %vm1232_vm11, %v12702_v7, 0.0 }
 0xf29   :  { %8581 = vmatmul.mubr.msk.bf16.gmra.mrb[168].mxu0 %vm1232_vm11, %v4495_v5  ;;  %5077 = vadd.xlane.f32.xlu0 %v5076_v12  ;;  %v9413_v20 = vpop.eup %9412  ;;  %v4485_v49 = vmul.f32 %v9411_v2, %v12524_v51 }
 0xf2a   :  { %8661 = vmatpush3.bf16.msra.mxu0 %v5322_v36  ;;  %8584 = vmatprep.mubr.msk.bf16.mxu0 %vm9608_vm2, %v13831_v55  ;;  %v4484_v21 = vmul.f32 %v9413_v20, %v12520_v63 }
 0xf2b   :  { %8682 = vmatprep.subr.bf16.mxu0 %v13831_v55 }
 0xf2c   :  { %v4496_v14 = vpack.c.bf16 %v4485_v49, %v4484_v21 }
 0xf2d   :  { %v12715_v59 = vpop.eup %9414 }
 0xf2e   :  { %v5079_v44 = vsel %vm1232_vm11, %v12715_v59, 0.0 }
 0xf2f   :  { %v12720_v33 = vpop.eup %9416  ;;  %5080 = vadd.xlane.f32.xlu1 %v5079_v44 }
 0xf30   :  { %v9419_v40 = vpop.eup %9418  ;;  %v5082_v53 = vsel %vm1232_vm11, %v12720_v33, 0.0 }
 0xf31   :  { %8585 = vmatmul.mubr.msk.bf16.gmra.mrb[172].mxu0 %vm1232_vm11, %v4496_v14  ;;  %5083 = vadd.xlane.f32.xlu0 %v5082_v53  ;;  %v9421_v51 = vpop.eup %9420  ;;  %v4487_v63 = vmul.f32 %v9419_v40, %v12536_v47 }
 0xf32   :  { %v5270_v28 = vpop.xlane.xlu1 %5269  ;;  %8588 = vmatprep.mubr.msk.bf16.mxu0 %vm9608_vm2, %v13831_v55  ;;  %v4486_v29 = vmul.f32 %v9421_v51, %v12532_v0  ;;  %v5105_v0 = vsel %vm1123_vm9, %v12198_v46, 0 }
 0xf33   :  { %9422 = vrcp.f32 %v5270_v28 }
 0xf34   :  { %v5273_v60 = vpop.xlane.xlu0 %5272  ;;  %v4497_v32 = vpack.c.bf16 %v4487_v63, %v4486_v29 }
 0xf35   :  { %9424 = vrcp.f32 %v5273_v60 }
 0xf39   :  { %8589 = vmatmul.mubr.msk.bf16.gmra.mrb[176].mxu0 %vm1232_vm11, %v4497_v32 }
 0xf3a   :  { %v5276_v62 = vpop.xlane.xlu1 %5275  ;;  %8662 = vmatprep.mubr.msk.bf16.mxu0 %vm9608_vm2, %v13831_v55 }
 0xf3b   :  { %9426 = vrcp.f32 %v5276_v62 }
 0xf3c   :  { %v5279_v13 = vpop.xlane.xlu0 %5278 }
 0xf3d   :  { %v9423_v48 = vpop.eup %9422  ;;  %9428 = vrcp.f32 %v5279_v13 }
 0xf3e   :  { %v5308_v52 = vmul.f32 %v9423_v48, %v12546_v3  ;;  %v5106_v3 = vsel %vm1123_vm9, %v12221_v26, 0  ;;  %v5108_v26 = vsel %vm1123_vm9, %v13875_v17, 0 }
 0xf3f   :  { %v9425_v37 = vpop.eup %9424 }
 0xf40   :  { %v5309_v47 = vmul.f32 %v9425_v37, %v12550_v19 }
 0xf42   :  { %v5323_v9 = vpack.c.bf16 %v5309_v47, %v5308_v52 }
 0xf44   :  { %8663 = vmatmul.mubr.msk.bf16.vlgmr.msra.gmra.mrb[180].mxu0 %vm1232_vm11, %v5323_v9 }
 0xf45   :  { %v9427_v4 = vpop.eup %9426  ;;  %8683 = vmatpush3.bf16.msra.mxu0 %v5105_v0  ;;  %8666 = vmatprep.mubr.msk.bf16.mxu0 %vm9608_vm2, %v13831_v55 }
 0xf46   :  { %8684 = vmatprep.subr.bf16.mxu0 %v13831_v55  ;;  %v5310_v19 = vmul.f32 %v9427_v4, %v12554_v31  ;;  %v5109_v31 = vsel %vm1123_vm9, %v13876_v30, 0 }
 0xf47   :  { %v9429_v54 = vpop.eup %9428 }
 0xf48   :  { %v5311_v57 = vmul.f32 %v9429_v54, %v12558_v58  ;;  %v8965_v58 = vld [vmem:[%s13756_s2 + $0xc8] sm:$0xff]  }
 0xf49   :  { %8685 = vmatpush3.bf16.msra.mxu0 %v5106_v3  ;;  %8714 = vmatprep.subr.bf16.mxu1 %v8965_v58 }
 0xf4a   :  { %8686 = vmatprep.subr.bf16.mxu0 %v13831_v55  ;;  %v5324_v46 = vpack.c.bf16 %v5311_v57, %v5310_v19  ;;  %8715 = vmatpush3.bf16.msra.mxu1 %v8965_v58 }
 0xf4c   :  { %8667 = vmatmul.mubr.msk.bf16.gmra.mrb[184].mxu0 %vm1232_vm11, %v5324_v46 }
 0xf4d   :  { %8687 = vmatpush3.bf16.msra.mxu0 %v5107_v35  ;;  %8670 = vmatprep.mubr.msk.bf16.mxu0 %vm9608_vm2, %v13831_v55 }
 0xf4e   :  { %8688 = vmatprep.subr.bf16.mxu0 %v13831_v55 }
 0xf51   :  { %8689 = vmatpush3.bf16.msra.mxu0 %v5108_v26 }
 0xf52   :  { %8690 = vmatprep.subr.bf16.mxu0 %v13831_v55 }
 0xf55   :  { %8691 = vmatpush3.bf16.msra.mxu0 %v5109_v31 }
 0xf80   :  { %v5282_v18 = vpop.xlane.xlu1 %5281 }
 0xf81   :  { %9430 = vrcp.f32 %v5282_v18 }
 0xf82   :  { %v5285_v56 = vpop.xlane.xlu0 %5284 }
 0xf83   :  { %9432 = vrcp.f32 %v5285_v56 }
 0xf88   :  { %v5288_v8 = vpop.xlane.xlu1 %5287 }
 0xf89   :  { %9434 = vrcp.f32 %v5288_v8 }
 0xf8a   :  { %v5291_v16 = vpop.xlane.xlu0 %5290 }
 0xf8b   :  { %v9431_v27 = vpop.eup %9430  ;;  %9436 = vrcp.f32 %v5291_v16 }
 0xf8c   :  { %v5312_v17 = vmul.f32 %v9431_v27, %v12572_v61 }
 0xf8d   :  { %v9433_v50 = vpop.eup %9432 }
 0xf8e   :  { %v5313_v43 = vmul.f32 %v9433_v50, %v12579_v38 }
 0xf90   :  { %v5294_v45 = vpop.xlane.xlu1 %5293  ;;  %v5325_v42 = vpack.c.bf16 %v5313_v43, %v5312_v17 }
 0xf91   :  { %9438 = vrcp.f32 %v5294_v45 }
 0xf92   :  { %8671 = vmatmul.mubr.msk.bf16.gmra.mrb[188].mxu0 %vm1232_vm11, %v5325_v42  ;;  %v5297_v5 = vpop.xlane.xlu0 %5296 }
 0xf93   :  { %v9435_v2 = vpop.eup %9434  ;;  %9440 = vrcp.f32 %v5297_v5  ;;  %8674 = vmatprep.mubr.msk.bf16.mxu0 %vm9608_vm2, %v13831_v55 }
 0xf94   :  { %v5314_v30 = vmul.f32 %v9435_v2, %v12591_v25 }
 0xf95   :  { %v9437_v12 = vpop.eup %9436 }
 0xf96   :  { %v5315_v36 = vmul.f32 %v9437_v12, %v12601_v15 }
 0xf98   :  { %v5057_v20 = vpop.xlane.xlu1 %5056  ;;  %v5326_v61 = vpack.c.bf16 %v5315_v36, %v5314_v30 }
 0xf99   :  { %9442 = vrcp.f32 %v5057_v20 }
 0xf9a   :  { %8675 = vmatmul.mubr.msk.bf16.gmra.mrb[192].mxu0 %vm1232_vm11, %v5326_v61  ;;  %v5060_v38 = vpop.xlane.xlu0 %5059 }
 0xf9b   :  { %v9439_v49 = vpop.eup %9438  ;;  %9444 = vrcp.f32 %v5060_v38  ;;  %8678 = vmatprep.mubr.msk.bf16.mxu0 %vm9608_vm2, %v13831_v55 }
 0xf9c   :  { %v5316_v44 = vmul.f32 %v9439_v49, %v12614_v6 }
 0xf9d   :  { %v9441_v21 = vpop.eup %9440 }
 0xf9e   :  { %v5317_v14 = vmul.f32 %v9441_v21, %v12624_v1 }
 0xfa0   :  { %v5327_v40 = vpack.c.bf16 %v5317_v14, %v5316_v44 }
 0xfa2   :  { %8679 = vmatmul.mubr.msk.bf16.gmra.mrb[196].mxu0 %vm1232_vm11, %v5327_v40 }
 0xfa3   :  { %v9443_v25 = vpop.eup %9442  ;;  %8692 = vmatprep.mubr.msk.bf16.mxu0 %vm9608_vm2, %v13831_v55 }
 0xfa4   :  { %v5063_v15 = vpop.xlane.xlu1 %5062  ;;  %v5095_v51 = vmul.f32 %v9443_v25, %v12632_v34 }
 0xfa5   :  { %v9445_v53 = vpop.eup %9444  ;;  %9446 = vrcp.f32 %v5063_v15 }
 0xfa6   :  { %v5096_v28 = vmul.f32 %v9445_v53, %v12640_v39  ;;  %v5066_v63 = vpop.xlane.xlu0 %5065 }
 0xfa7   :  { %9448 = vrcp.f32 %v5066_v63 }
 0xfa8   :  { %v5110_v60 = vpack.c.bf16 %v5096_v28, %v5095_v51 }
 0xfaa   :  { %8693 = vmatmul.mubr.msk.bf16.vlgmr.msra.gmra.mrb[180].mxu0 %vm1232_vm11, %v5110_v60 }
 0xfab   :  { %8696 = vmatprep.mubr.msk.bf16.mxu0 %vm9608_vm2, %v13831_v55 }
 0xfac   :  { %v5069_v6 = vpop.xlane.xlu1 %5068 }
 0xfad   :  { %9450 = vrcp.f32 %v5069_v6 }
 0xfae   :  { %v5072_v1 = vpop.xlane.xlu0 %5071 }
 0xfaf   :  { %v9447_v29 = vpop.eup %9446  ;;  %9452 = vrcp.f32 %v5072_v1 }
 0xfb0   :  { %v5097_v62 = vmul.f32 %v9447_v29, %v12652_v23 }
 0xfb1   :  { %v9449_v32 = vpop.eup %9448 }
 0xfb2   :  { %v5098_v34 = vmul.f32 %v9449_v32, %v12657_v41 }
 0xfb4   :  { %v5075_v13 = vpop.xlane.xlu1 %5074  ;;  %v5111_v39 = vpack.c.bf16 %v5098_v34, %v5097_v62 }
 0xfb5   :  { %9454 = vrcp.f32 %v5075_v13 }
 0xfb6   :  { %8697 = vmatmul.mubr.msk.bf16.gmra.mrb[184].mxu0 %vm1232_vm11, %v5111_v39  ;;  %v5078_v48 = vpop.xlane.xlu0 %5077 }
 0xfb7   :  { %v9451_v37 = vpop.eup %9450  ;;  %9456 = vrcp.f32 %v5078_v48  ;;  %8700 = vmatprep.mubr.msk.bf16.mxu0 %vm9608_vm2, %v13831_v55 }
 0xfb8   :  { %v5099_v47 = vmul.f32 %v9451_v37, %v12671_v22 }
 0xfb9   :  { %v9453_v52 = vpop.eup %9452 }
 0xfba   :  { %v5100_v9 = vmul.f32 %v9453_v52, %v12679_v24 }
 0xfbc   :  { %v5081_v0 = vpop.xlane.xlu1 %5080  ;;  %v5112_v23 = vpack.c.bf16 %v5100_v9, %v5099_v47  ;;  %v12818_v9 = vld [vmem:[%s13759_s3 + $0x69] ss:$0 sm:$0xff] }
 0xfbd   :  { %9458 = vrcp.f32 %v5081_v0 }
 0xfbe   :  { %8701 = vmatmul.mubr.msk.bf16.gmra.mrb[188].mxu0 %vm1232_vm11, %v5112_v23  ;;  %v5084_v41 = vpop.xlane.xlu0 %5083 }
 0xfbf   :  { %v9455_v4 = vpop.eup %9454  ;;  %9460 = vrcp.f32 %v5084_v41  ;;  %8704 = vmatprep.mubr.msk.bf16.mxu0 %vm9608_vm2, %v13831_v55  ;;  %v12824_v41 = vld [vmem:[%s13759_s3 + $0x6a] ss:$0 sm:$0xff] }
 0xfc0   :  { %v5101_v3 = vmul.f32 %v9455_v4, %v12694_v11 }
 0xfc1   :  { %v9457_v54 = vpop.eup %9456 }
 0xfc2   :  { %v5102_v19 = vmul.f32 %v9457_v54, %v12702_v7 }
 0xfc4   :  { %v5113_v57 = vpack.c.bf16 %v5102_v19, %v5101_v3 }
 0xfc6   :  { %8705 = vmatmul.mubr.msk.bf16.gmra.mrb[192].mxu0 %vm1232_vm11, %v5113_v57 }
 0xfc7   :  { %v9459_v22 = vpop.eup %9458  ;;  %8708 = vmatprep.mubr.msk.bf16.mxu0 %vm9608_vm2, %v13831_v55 }
 0xfc8   :  { %v5103_v46 = vmul.f32 %v9459_v22, %v12715_v59 }
 0xfc9   :  { %v9461_v24 = vpop.eup %9460 }
 0xfca   :  { %v5104_v35 = vmul.f32 %v9461_v24, %v12720_v33 }
 0xfcc   :  { %v5114_v26 = vpack.c.bf16 %v5104_v35, %v5103_v46 }
 0xfce   :  { %8709 = vmatmul.mubr.msk.bf16.gmra.mrb[196].mxu0 %vm1232_vm11, %v5114_v26 }
 0xfec   :  { %v4848_v31 = vpop.f32.mrb[160].mxu0 }
 0xfed   :  { %v8574_v10 = vpop.f32.mrb[161].mxu0 }
 0xfee   :  { %v4851_v11 = vpop.f32.mrb[162].mxu0 }
 0xfef   :  { %v5504_v58 = vpack.c.bf16 %v4851_v11, %v4848_v31  ;;  %v8575_v7 = vpop.f32.mrb[163].mxu0  ;;  %v13877_v31 = vld [vmem:[#allocation22_spill] sm:$0xff] }
 0xff0   :  { %v13878_v11 = vld [vmem:[#allocation2_spill] sm:$0xff] }
 0xff1   :  { %8716 = vmatprep.mubr.msk.bf16.mxu1 %vm333_vm1, %v5504_v58 }
 0xff4   :  { %v4856_v18 = vpop.f32.mrb[164].mxu0 }
 0xff5   :  { %v8578_v56 = vpop.f32.mrb[165].mxu0 }
 0xff6   :  { %v4859_v8 = vpop.f32.mrb[166].mxu0 }
 0xff7   :  { %v5505_v16 = vpack.c.bf16 %v4859_v8, %v4856_v18  ;;  %v8579_v55 = vpop.f32.mrb[167].mxu0  ;;  %v13879_v18 = vld [vmem:[#allocation3_spill] sm:$0xff]  ;;  %v13880_v8 = vld [vmem:[#allocation4_spill] sm:$0xff] }
 0xff9   :  { %8717 = vmatmul.mubr.msk.bf16.vlgmr.msra.gmra.mrb[240].mxu1 %vm333_vm1, %v5505_v16 }
 0xffc   :  { %v4864_v59 = vpop.f32.mrb[168].mxu0 }
 0xffd   :  { %v8582_v27 = vpop.f32.mrb[169].mxu0 }
 0xffe   :  { %v4867_v33 = vpop.f32.mrb[170].mxu0 }
 0xfff   :  { %v5506_v50 = vpack.c.bf16 %v4867_v33, %v4864_v59  ;;  %v8583_v17 = vpop.f32.mrb[171].mxu0 }
0x1001   :  { %8720 = vmatprep.mubr.msk.bf16.mxu1 %vm333_vm1, %v5506_v50 }
0x1004   :  { %v4872_v43 = vpop.f32.mrb[172].mxu0 }
0x1005   :  { %v8586_v45 = vpop.f32.mrb[173].mxu0 }
0x1006   :  { %v4875_v42 = vpop.f32.mrb[174].mxu0 }
0x1007   :  { %v5507_v5 = vpack.c.bf16 %v4875_v42, %v4872_v43  ;;  %v8587_v2 = vpop.f32.mrb[175].mxu0 }
0x1009   :  { %8721 = vmatmul.mubr.msk.bf16.gmra.mrb[244].mxu1 %vm333_vm1, %v5507_v5 }
0x100c   :  { %v4880_v12 = vpop.f32.mrb[176].mxu0 }
0x100d   :  { %v8590_v30 = vpop.f32.mrb[177].mxu0 }
0x100e   :  { %v4883_v36 = vpop.f32.mrb[178].mxu0 }
0x100f   :  { %v5508_v20 = vpack.c.bf16 %v4883_v36, %v4880_v12  ;;  %v8591_v61 = vpop.f32.mrb[179].mxu0  ;;  %v13881_v36 = vld [vmem:[#allocation5_spill] sm:$0xff] }
0x1011   :  { %8724 = vmatprep.mubr.msk.bf16.mxu1 %vm333_vm1, %v5508_v20 }
0x107d   :  { %v5465_v38 = vpop.f32.mrb[180].mxu0 }
0x107e   :  { %v8694_v49 = vpop.f32.mrb[181].mxu0 }
0x107f   :  { %v5468_v21 = vpop.f32.mrb[182].mxu0  ;;  %v13882_v49 = vld [vmem:[#allocation7_spill] sm:$0xff] }
0x1080   :  { %v5509_v44 = vpack.c.bf16 %v5468_v21, %v5465_v38  ;;  %v8695_v14 = vpop.f32.mrb[183].mxu0 }
0x1082   :  { %8725 = vmatmul.mubr.msk.bf16.gmra.mrb[248].mxu1 %vm333_vm1, %v5509_v44  ;;  %v13883_v44 = vld [vmem:[#allocation6_spill] sm:$0xff] }
0x1089   :  { %v5473_v40 = vpop.f32.mrb[184].mxu0 }
0x108a   :  { %v8698_v25 = vpop.f32.mrb[185].mxu0 }
0x108b   :  { %v5476_v15 = vpop.f32.mrb[186].mxu0  ;;  %v13884_v25 = vld [vmem:[#allocation8_spill] sm:$0xff] }
0x108c   :  { %v5510_v53 = vpack.c.bf16 %v5476_v15, %v5473_v40  ;;  %v8699_v51 = vpop.f32.mrb[187].mxu0 }
0x108e   :  { %8728 = vmatprep.mubr.msk.bf16.mxu1 %vm333_vm1, %v5510_v53 }
0x1091   :  { %v5481_v28 = vpop.f32.mrb[188].mxu0 }
0x1092   :  { %v8702_v63 = vpop.f32.mrb[189].mxu0 }
0x1093   :  { %v5484_v60 = vpop.f32.mrb[190].mxu0 }
0x1094   :  { %v5511_v6 = vpack.c.bf16 %v5484_v60, %v5481_v28  ;;  %v8703_v1 = vpop.f32.mrb[191].mxu0 }
0x1096   :  { %8729 = vmatmul.mubr.msk.bf16.gmra.mrb[252].mxu1 %vm333_vm1, %v5511_v6 }
0x1099   :  { %v5489_v29 = vpop.f32.mrb[192].mxu0 }
0x109a   :  { %v8706_v32 = vpop.f32.mrb[193].mxu0 }
0x109b   :  { %v5492_v62 = vpop.f32.mrb[194].mxu0 }
0x109c   :  { %v5512_v34 = vpack.c.bf16 %v5492_v62, %v5489_v29  ;;  %v8707_v13 = vpop.f32.mrb[195].mxu0 }
0x109e   :  { %8732 = vmatprep.mubr.msk.bf16.mxu1 %vm333_vm1, %v5512_v34 }
0x10a1   :  { %v5497_v39 = vpop.f32.mrb[196].mxu0 }
0x10a2   :  { %v8710_v48 = vpop.f32.mrb[197].mxu0 }
0x10a3   :  { %v5500_v37 = vpop.f32.mrb[198].mxu0  ;;  %v13885_v48 = vld [vmem:[#allocation9_spill] sm:$0xff] }
0x10a4   :  { %v5513_v52 = vpack.c.bf16 %v5500_v37, %v5497_v39  ;;  %v8711_v47 = vpop.f32.mrb[199].mxu0 }
0x10a6   :  { %8733 = vmatmul.mubr.msk.bf16.gmra.mrb[0].mxu1 %vm333_vm1, %v5513_v52 }
0x10cc   :  { %v8718_v0 = vpop.f32.mrb[240].mxu1 }
0x10cd   :  { %v5608_v23 = vadd.f32 %v8718_v0, %v12818_v9  ;;  %v5599_v4 = vpop.f32.mrb[241].mxu1  ;;  %v13886_v0 = vld [vmem:[#allocation11_spill] sm:$0xff] }
0x10ce   :  { %v5600_v54 = vadd.f32 %v12818_v9, %v5599_v4  ;;  %v8719_v3 = vpop.f32.mrb[242].mxu1 }
0x10cf   :  { %v5611_v19 = vadd.f32 %v8719_v3, %v12818_v9  ;;  %v5602_v57 = vpop.f32.mrb[243].mxu1  ;;  %v5685_v22 = vmul.f32 %v12824_v41, %v5608_v23 }
0x10d0   :  { %v5683_v24 = vmul.f32 %v12824_v41, %v5600_v54  ;;  %v5603_v46 = vadd.f32 %v12818_v9, %v5602_v57  ;;  %v13887_v54 = vld [vmem:[#allocation10_spill] sm:$0xff]  ;;  %v13888_v57 = vld [vmem:[#allocation12_spill] sm:$0xff] }
0x10d1   :  { %v5686_v35 = vmul.f32 %v12824_v41, %v5611_v19  ;;  %v12837_v58 = vadd.f32 %v5685_v22, %v13878_v11 }
0x10d2   :  { %v5684_v26 = vmul.f32 %v12824_v41, %v5603_v46  ;;  %v12834_v10 = vadd.f32 %v5683_v24, %v13877_v31 }
0x10d3   :  { %v12845_v16 = vadd.f32 %v5686_v35, %v13880_v8  ;;  %v5731_v59 = vsel %vm333_vm1, %v12837_v58, 0.0 }
0x10d4   :  { %v5725_v7 = vsel %vm333_vm1, %v12834_v10, 0.0  ;;  %v12842_v56 = vadd.f32 %v5684_v26, %v13879_v18 }
0x10d5   :  { %5726 = vadd.xlane.f32.xlu1 %v5725_v7  ;;  %v5734_v27 = vsel %vm333_vm1, %v12845_v16, 0.0 }
0x10d6   :  { %v5728_v55 = vsel %vm333_vm1, %v12842_v56, 0.0 }
0x10d7   :  { %5729 = vadd.xlane.f32.xlu0 %v5728_v55 }
0x10d9   :  { %5732 = vadd.xlane.f32.xlu1 %v5731_v59 }
0x10db   :  { %5735 = vadd.xlane.f32.xlu0 %v5734_v27 }
0x10dc   :  { %v8722_v33 = vpop.f32.mrb[244].mxu1 }
0x10dd   :  { %v5624_v50 = vadd.f32 %v8722_v33, %v12818_v9  ;;  %v5615_v17 = vpop.f32.mrb[245].mxu1  ;;  %v13889_v33 = vld [vmem:[#allocation13_spill] sm:$0xff] }
0x10de   :  { %v5616_v43 = vadd.f32 %v12818_v9, %v5615_v17  ;;  %v8723_v45 = vpop.f32.mrb[246].mxu1 }
0x10df   :  { %v5627_v42 = vadd.f32 %v8723_v45, %v12818_v9  ;;  %v5618_v5 = vpop.f32.mrb[247].mxu1  ;;  %v5689_v2 = vmul.f32 %v12824_v41, %v5624_v50  ;;  %v13890_v45 = vld [vmem:[#allocation15_spill] sm:$0xff] }
0x10e0   :  { %v5687_v12 = vmul.f32 %v12824_v41, %v5616_v43  ;;  %v5619_v30 = vadd.f32 %v12818_v9, %v5618_v5  ;;  %v13891_v5 = vld [vmem:[#allocation14_spill] sm:$0xff] }
0x10e1   :  { %v5690_v61 = vmul.f32 %v12824_v41, %v5627_v42  ;;  %v12865_v21 = vadd.f32 %v5689_v2, %v13882_v49 }
0x10e2   :  { %v12860_v20 = vadd.f32 %v5687_v12, %v13881_v36  ;;  %v5688_v38 = vmul.f32 %v12824_v41, %v5619_v30  ;;  %v13892_v30 = vld [vmem:[#allocation16_spill] sm:$0xff] }
0x10e3   :  { %v12873_v15 = vadd.f32 %v5690_v61, %v13884_v25  ;;  %v5743_v51 = vsel %vm333_vm1, %v12865_v21, 0.0 }
0x10e4   :  { %v12868_v14 = vadd.f32 %v5688_v38, %v13883_v44  ;;  %v5737_v40 = vsel %vm333_vm1, %v12860_v20, 0.0 }
0x10e5   :  { %5738 = vadd.xlane.f32.xlu1 %v5737_v40  ;;  %v5746_v28 = vsel %vm333_vm1, %v12873_v15, 0.0 }
0x10e6   :  { %v5740_v53 = vsel %vm333_vm1, %v12868_v14, 0.0 }
0x10e7   :  { %5741 = vadd.xlane.f32.xlu0 %v5740_v53 }
0x10e9   :  { %5744 = vadd.xlane.f32.xlu1 %v5743_v51 }
0x10eb   :  { %5747 = vadd.xlane.f32.xlu0 %v5746_v28 }
0x1155   :  { %v8726_v63 = vpop.f32.mrb[248].mxu1 }
0x1156   :  { %v5640_v60 = vadd.f32 %v8726_v63, %v12818_v9  ;;  %v5631_v6 = vpop.f32.mrb[249].mxu1 }
0x1157   :  { %v5632_v1 = vadd.f32 %v12818_v9, %v5631_v6  ;;  %v8727_v29 = vpop.f32.mrb[250].mxu1 }
0x1158   :  { %v5643_v32 = vadd.f32 %v8727_v29, %v12818_v9  ;;  %v5634_v62 = vpop.f32.mrb[251].mxu1  ;;  %v5693_v34 = vmul.f32 %v12824_v41, %v5640_v60 }
0x1159   :  { %v5691_v13 = vmul.f32 %v12824_v41, %v5632_v1  ;;  %v5635_v39 = vadd.f32 %v12818_v9, %v5634_v62 }
0x115a   :  { %v5694_v52 = vmul.f32 %v12824_v41, %v5643_v32  ;;  %v12898_v3 = vadd.f32 %v5693_v34, %v13887_v54 }
0x115b   :  { %v12888_v37 = vadd.f32 %v5691_v13, %v13885_v48  ;;  %v5692_v47 = vmul.f32 %v12824_v41, %v5635_v39  ;;  %v13893_v48 = vld [vmem:[#allocation17_spill] sm:$0xff] }
0x115c   :  { %v12903_v22 = vadd.f32 %v5694_v52, %v13888_v57  ;;  %v5755_v24 = vsel %vm333_vm1, %v12898_v3, 0.0  ;;  %v13894_v57 = vld [vmem:[#allocation19_spill] sm:$0xff] }
0x115d   :  { %v12893_v23 = vadd.f32 %v5692_v47, %v13886_v0  ;;  %v5749_v4 = vsel %vm333_vm1, %v12888_v37, 0.0 }
0x115e   :  { %5750 = vadd.xlane.f32.xlu1 %v5749_v4  ;;  %v5758_v46 = vsel %vm333_vm1, %v12903_v22, 0.0 }
0x115f   :  { %v5752_v19 = vsel %vm333_vm1, %v12893_v23, 0.0 }
0x1160   :  { %5753 = vadd.xlane.f32.xlu0 %v5752_v19 }
0x1162   :  { %5756 = vadd.xlane.f32.xlu1 %v5755_v24  ;;  %v5727_v49 = vpop.xlane.xlu1 %5726 }
0x1163   :  { %v5785_v60 = vmul.f32 0.03125, %v5727_v49 }
0x1164   :  { %5759 = vadd.xlane.f32.xlu0 %v5758_v46  ;;  %v5730_v40 = vpop.xlane.xlu0 %5729  ;;  %v13895_v46 = vld [vmem:[#allocation18_spill] sm:$0xff] }
0x1165   :  { %v5786_v39 = vmul.f32 0.03125, %v5730_v40  ;;  %v12949_v4 = vsub.f32 %v12834_v10, %v5785_v60 }
0x1166   :  { %v5733_v6 = vpop.xlane.xlu1 %5732 }
0x1167   :  { %v5787_v19 = vmul.f32 0.03125, %v5733_v6 }
0x1168   :  { %v5736_v13 = vpop.xlane.xlu0 %5735 }
0x1169   :  { %v8730_v35 = vpop.f32.mrb[252].mxu1 }
0x116a   :  { %v5656_v26 = vadd.f32 %v8730_v35, %v12818_v9  ;;  %v5647_v31 = vpop.f32.mrb[253].mxu1 }
0x116b   :  { %v5648_v11 = vadd.f32 %v12818_v9, %v5647_v31  ;;  %v8731_v7 = vpop.f32.mrb[254].mxu1  ;;  %v12960_v31 = vsub.f32 %v12842_v56, %v5786_v39  ;;  %v8967_v39 = vld [vmem:[%s13756_s2 + $0xd8] sm:$0xff]  }
0x116c   :  { %v5659_v18 = vadd.f32 %v8731_v7, %v12818_v9  ;;  %v5650_v8 = vpop.f32.mrb[255].mxu1  ;;  %v5697_v55 = vmul.f32 %v12824_v41, %v5656_v26 }
0x116d   :  { %v5695_v59 = vmul.f32 %v12824_v41, %v5648_v11  ;;  %v5651_v27 = vadd.f32 %v12818_v9, %v5650_v8  ;;  %v13896_v11 = vld [vmem:[#allocation20_spill] sm:$0xff] }
0x116e   :  { %v5698_v17 = vmul.f32 %v12824_v41, %v5659_v18  ;;  %v12921_v42 = vadd.f32 %v5697_v55, %v13890_v45  ;;  %v12968_v18 = vsub.f32 %v12837_v58, %v5787_v19 }
0x116f   :  { %v12916_v50 = vadd.f32 %v5695_v59, %v13889_v33  ;;  %v5696_v43 = vmul.f32 %v12824_v41, %v5651_v27  ;;  %v5825_v59 = vmul.f32 %v12949_v4, %v12949_v4 }
0x1170   :  { %v12929_v36 = vadd.f32 %v5698_v17, %v13892_v30  ;;  %v5767_v38 = vsel %vm333_vm1, %v12921_v42, 0.0 }
0x1171   :  { %v12924_v2 = vadd.f32 %v5696_v43, %v13891_v5  ;;  %v5761_v12 = vsel %vm333_vm1, %v12916_v50, 0.0  ;;  %v5826_v43 = vmul.f32 %v12960_v31, %v12960_v31  ;;  %v5845_v30 = vsel %vm333_vm1, %v5825_v59, 0.0 }
0x1172   :  { %5762 = vadd.xlane.f32.xlu1 %v5761_v12  ;;  %v5770_v44 = vsel %vm333_vm1, %v12929_v36, 0.0  ;;  %v5739_v54 = vpop.xlane.xlu1 %5738 }
0x1173   :  { %v5764_v61 = vsel %vm333_vm1, %v12924_v2, 0.0  ;;  %v5789_v8 = vmul.f32 0.03125, %v5739_v54 }
0x1174   :  { %5765 = vadd.xlane.f32.xlu0 %v5764_v61  ;;  %v5742_v26 = vpop.xlane.xlu0 %5741  ;;  %v5827_v61 = vmul.f32 %v12968_v18, %v12968_v18 }
0x1175   :  { %v5790_v33 = vmul.f32 0.03125, %v5742_v26  ;;  %v12982_v5 = vsub.f32 %v12860_v20, %v5789_v8 }
0x1176   :  { %5768 = vadd.xlane.f32.xlu1 %v5767_v38  ;;  %v5745_v56 = vpop.xlane.xlu1 %5744 }
0x1177   :  { %v5791_v12 = vmul.f32 0.03125, %v5745_v56  ;;  %v12988_v38 = vsub.f32 %v12868_v14, %v5790_v33 }
0x1178   :  { %5771 = vadd.xlane.f32.xlu0 %v5770_v44  ;;  %v5748_v45 = vpop.xlane.xlu0 %5747  ;;  %v5848_v44 = vsel %vm333_vm1, %v5826_v43, 0.0 }
0x1179   :  { %v8734_v25 = vpop.f32.mrb[0].mxu1  ;;  %v5792_v49 = vmul.f32 0.03125, %v5748_v45  ;;  %v5830_v60 = vmul.f32 %v12988_v38, %v12988_v38 }
0x117a   :  { %v5672_v53 = vadd.f32 %v8734_v25, %v12818_v9  ;;  %v5663_v51 = vpop.f32.mrb[1].mxu1  ;;  %v12994_v25 = vsub.f32 %v12865_v21, %v5791_v12 }
0x117b   :  { %v5664_v28 = vadd.f32 %v12818_v9, %v5663_v51  ;;  %v8735_v63 = vpop.f32.mrb[2].mxu1  ;;  %v5829_v51 = vmul.f32 %v12982_v5, %v12982_v5 }
0x117c   :  { %v5675_v1 = vadd.f32 %v8735_v63, %v12818_v9  ;;  %v5666_v29 = vpop.f32.mrb[3].mxu1  ;;  %v5701_v32 = vmul.f32 %v12824_v41, %v5672_v53  ;;  %v5851_v53 = vsel %vm333_vm1, %v5827_v61, 0.0 }
0x117d   :  { %v5699_v62 = vmul.f32 %v12824_v41, %v5664_v28  ;;  %v5667_v34 = vadd.f32 %v12818_v9, %v5666_v29  ;;  %v13000_v28 = vsub.f32 %v12873_v15, %v5792_v49  ;;  %v5857_v6 = vsel %vm333_vm1, %v5829_v51, 0.0 }
0x117e   :  { %v5702_v47 = vmul.f32 %v12824_v41, %v5675_v1  ;;  %v12952_v24 = vadd.f32 %v5701_v32, %v13894_v57  ;;  %v5831_v1 = vmul.f32 %v12994_v25, %v12994_v25  ;;  %v5860_v29 = vsel %vm333_vm1, %v5830_v60, 0.0 }
0x117f   :  { %v12944_v52 = vadd.f32 %v5699_v62, %v13893_v48  ;;  %v5700_v0 = vmul.f32 %v12824_v41, %v5667_v34  ;;  %v5788_v41 = vmul.f32 0.03125, %v5736_v13  ;;  %v5832_v32 = vmul.f32 %v13000_v28, %v13000_v28  ;;  %v8966_v13 = vld [vmem:[%s13756_s2 + $0xd0] sm:$0xff]  }
0x1180   :  { %v12963_v10 = vadd.f32 %v5702_v47, %v13896_v11  ;;  %v5779_v55 = vsel %vm333_vm1, %v12952_v24, 0.0  ;;  %v5863_v62 = vsel %vm333_vm1, %v5831_v1, 0.0  ;;  %8736 = vmatprep.subr.bf16.mxu1 %v8966_v13 }
0x1181   :  { %v12955_v35 = vadd.f32 %v5700_v0, %v13895_v46  ;;  %v5773_v9 = vsel %vm333_vm1, %v12944_v52, 0.0  ;;  %v12975_v27 = vsub.f32 %v12845_v16, %v5788_v41  ;;  %v5866_v34 = vsel %vm333_vm1, %v5832_v32, 0.0  ;;  %8737 = vmatpush3.bf16.msra.mxu1 %v8966_v13 }
0x1182   :  { %5774 = vadd.xlane.f32.xlu1 %v5773_v9  ;;  %v5782_v17 = vsel %vm333_vm1, %v12963_v10, 0.0  ;;  %8738 = vmatprep.subr.bf16.mxu1 %v8967_v39 }
0x1183   :  { %v5776_v7 = vsel %vm333_vm1, %v12955_v35, 0.0  ;;  %v5828_v40 = vmul.f32 %v12975_v27, %v12975_v27 }
0x1184   :  { %5777 = vadd.xlane.f32.xlu0 %v5776_v7 }
0x1185   :  { %v5854_v63 = vsel %vm333_vm1, %v5828_v40, 0.0  ;;  %8739 = vmatpush3.bf16.msra.mxu1 %v8967_v39 }
0x1186   :  { %5780 = vadd.xlane.f32.xlu1 %v5779_v55 }
0x1188   :  { %5783 = vadd.xlane.f32.xlu0 %v5782_v17 }
0x118a   :  { %5846 = vadd.xlane.f32.xlu1 %v5845_v30 }
0x118c   :  { %5849 = vadd.xlane.f32.xlu0 %v5848_v44 }
0x118e   :  { %5852 = vadd.xlane.f32.xlu1 %v5851_v53 }
0x1190   :  { %5855 = vadd.xlane.f32.xlu0 %v5854_v63 }
0x1192   :  { %5858 = vadd.xlane.f32.xlu1 %v5857_v6 }
0x1194   :  { %5861 = vadd.xlane.f32.xlu0 %v5860_v29 }
0x1196   :  { %5864 = vadd.xlane.f32.xlu1 %v5863_v62 }
0x1198   :  { %5867 = vadd.xlane.f32.xlu0 %v5866_v34 }
0x11eb   :  { %v5751_v48 = vpop.xlane.xlu1 %5750 }
0x11ec   :  { %v5793_v47 = vmul.f32 0.03125, %v5751_v48 }
0x11ed   :  { %v5754_v0 = vpop.xlane.xlu0 %5753 }
0x11ee   :  { %v13020_v54 = vsub.f32 %v12888_v37, %v5793_v47  ;;  %v5794_v19 = vmul.f32 0.03125, %v5754_v0 }
0x11ef   :  { %v5757_v57 = vpop.xlane.xlu1 %5756 }
0x11f0   :  { %v13023_v46 = vsub.f32 %v12893_v23, %v5794_v19  ;;  %v5795_v9 = vmul.f32 0.03125, %v5757_v57  ;;  %v5833_v26 = vmul.f32 %v13020_v54, %v13020_v54 }
0x11f1   :  { %v5760_v41 = vpop.xlane.xlu0 %5759 }
0x11f2   :  { %v13028_v11 = vsub.f32 %v12898_v3, %v5795_v9  ;;  %v5796_v7 = vmul.f32 0.03125, %v5760_v41  ;;  %v5869_v8 = vsel %vm333_vm1, %v5833_v26, 0.0  ;;  %v5834_v55 = vmul.f32 %v13023_v46, %v13023_v46 }
0x11f3   :  { %5870 = vadd.xlane.f32.xlu1 %v5869_v8 }
0x11f4   :  { %v13034_v59 = vsub.f32 %v12903_v22, %v5796_v7  ;;  %v5872_v56 = vsel %vm333_vm1, %v5834_v55, 0.0  ;;  %v5835_v33 = vmul.f32 %v13028_v11, %v13028_v11 }
0x11f5   :  { %5873 = vadd.xlane.f32.xlu0 %v5872_v56 }
0x11f6   :  { %v5875_v17 = vsel %vm333_vm1, %v5835_v33, 0.0  ;;  %v5836_v3 = vmul.f32 %v13034_v59, %v13034_v59 }
0x11f7   :  { %5876 = vadd.xlane.f32.xlu1 %v5875_v17 }
0x11f8   :  { %v5878_v43 = vsel %vm333_vm1, %v5836_v3, 0.0 }
0x11f9   :  { %5879 = vadd.xlane.f32.xlu0 %v5878_v43 }
0x11ff   :  { %v5763_v45 = vpop.xlane.xlu1 %5762 }
0x1200   :  { %v5797_v12 = vmul.f32 0.03125, %v5763_v45 }
0x1201   :  { %v5766_v30 = vpop.xlane.xlu0 %5765 }
0x1202   :  { %v13044_v22 = vsub.f32 %v12916_v50, %v5797_v12  ;;  %v5798_v61 = vmul.f32 0.03125, %v5766_v30 }
0x1203   :  { %v5769_v49 = vpop.xlane.xlu1 %5768 }
0x1204   :  { %v13047_v44 = vsub.f32 %v12924_v2, %v5798_v61  ;;  %v5799_v40 = vmul.f32 0.03125, %v5769_v49  ;;  %v5837_v53 = vmul.f32 %v13044_v22, %v13044_v22 }
0x1205   :  { %v5772_v51 = vpop.xlane.xlu0 %5771 }
0x1206   :  { %v13052_v63 = vsub.f32 %v12921_v42, %v5799_v40  ;;  %v5800_v60 = vmul.f32 0.03125, %v5772_v51  ;;  %v5881_v6 = vsel %vm333_vm1, %v5837_v53, 0.0  ;;  %v5838_v1 = vmul.f32 %v13047_v44, %v13047_v44 }
0x1207   :  { %5882 = vadd.xlane.f32.xlu1 %v5881_v6 }
0x1208   :  { %v13058_v29 = vsub.f32 %v12929_v36, %v5800_v60  ;;  %v5884_v32 = vsel %vm333_vm1, %v5838_v1, 0.0  ;;  %v5839_v62 = vmul.f32 %v13052_v63, %v13052_v63 }
0x1209   :  { %5885 = vadd.xlane.f32.xlu0 %v5884_v32 }
0x120a   :  { %v5887_v34 = vsel %vm333_vm1, %v5839_v62, 0.0  ;;  %v5840_v13 = vmul.f32 %v13058_v29, %v13058_v29 }
0x120b   :  { %5888 = vadd.xlane.f32.xlu1 %v5887_v34 }
0x120c   :  { %v5890_v39 = vsel %vm333_vm1, %v5840_v13, 0.0 }
0x120d   :  { %5891 = vadd.xlane.f32.xlu0 %v5890_v39 }
0x120f   :  { %v5775_v48 = vpop.xlane.xlu1 %5774 }
0x1210   :  { %v5801_v47 = vmul.f32 0.03125, %v5775_v48 }
0x1211   :  { %v5778_v0 = vpop.xlane.xlu0 %5777 }
0x1212   :  { %v13068_v19 = vsub.f32 %v12944_v52, %v5801_v47  ;;  %v5802_v57 = vmul.f32 0.03125, %v5778_v0 }
0x1213   :  { %v5781_v9 = vpop.xlane.xlu1 %5780 }
0x1214   :  { %v13071_v26 = vsub.f32 %v12955_v35, %v5802_v57  ;;  %v5803_v41 = vmul.f32 0.03125, %v5781_v9  ;;  %v5841_v7 = vmul.f32 %v13068_v19, %v13068_v19 }
0x1215   :  { %v5784_v8 = vpop.xlane.xlu0 %5783 }
0x1216   :  { %v13076_v55 = vsub.f32 %v12952_v24, %v5803_v41  ;;  %v5804_v56 = vmul.f32 0.03125, %v5784_v8  ;;  %v5893_v33 = vsel %vm333_vm1, %v5841_v7, 0.0  ;;  %v5842_v17 = vmul.f32 %v13071_v26, %v13071_v26 }
0x1217   :  { %5894 = vadd.xlane.f32.xlu1 %v5893_v33  ;;  %v5847_v3 = vpop.xlane.xlu1 %5846 }
0x1218   :  { %v13082_v43 = vsub.f32 %v12963_v10, %v5804_v56  ;;  %v5905_v45 = vmul.f32 0.03125, %v5847_v3  ;;  %v5896_v12 = vsel %vm333_vm1, %v5842_v17, 0.0  ;;  %v5843_v30 = vmul.f32 %v13076_v55, %v13076_v55  ;;  %v13094_v17 = vld [vmem:[%s13759_s3 + $0x6b] ss:$0 sm:$0xff] }
0x1219   :  { %5897 = vadd.xlane.f32.xlu0 %v5896_v12  ;;  %v5850_v61 = vpop.xlane.xlu0 %5849 }
0x121a   :  { %v5925_v49 = vadd.f32 1e-06, %v5905_v45  ;;  %v5906_v40 = vmul.f32 0.03125, %v5850_v61  ;;  %v5899_v53 = vsel %vm333_vm1, %v5843_v30, 0.0  ;;  %v5844_v51 = vmul.f32 %v13082_v43, %v13082_v43 }
0x121b   :  { %5900 = vadd.xlane.f32.xlu1 %v5899_v53  ;;  %v5853_v60 = vpop.xlane.xlu1 %5852 }
0x121c   :  { %9462 = vrsqrt.f32 %v5925_v49  ;;  %v5926_v6 = vadd.f32 1e-06, %v5906_v40  ;;  %v5907_v1 = vmul.f32 0.03125, %v5853_v60  ;;  %v5902_v32 = vsel %vm333_vm1, %v5844_v51, 0.0  ;;  %v13102_v51 = vld [vmem:[%s13759_s3 + $0x6c] ss:$0 sm:$0xff] }
0x121d   :  { %5903 = vadd.xlane.f32.xlu0 %v5902_v32  ;;  %v5856_v62 = vpop.xlane.xlu0 %5855 }
0x121e   :  { %9464 = vrsqrt.f32 %v5926_v6  ;;  %v5927_v34 = vadd.f32 1e-06, %v5907_v1  ;;  %v5908_v13 = vmul.f32 0.03125, %v5856_v62 }
0x121f   :  { %v5859_v39 = vpop.xlane.xlu1 %5858 }
0x1220   :  { %9466 = vrsqrt.f32 %v5927_v34  ;;  %v5928_v48 = vadd.f32 1e-06, %v5908_v13  ;;  %v5909_v47 = vmul.f32 0.03125, %v5859_v39 }
0x1221   :  { %v5862_v0 = vpop.xlane.xlu0 %5861 }
0x1222   :  { %9468 = vrsqrt.f32 %v5928_v48  ;;  %v5929_v57 = vadd.f32 1e-06, %v5909_v47  ;;  %v5910_v9 = vmul.f32 0.03125, %v5862_v0 }
0x1223   :  { %v5865_v41 = vpop.xlane.xlu1 %5864 }
0x1224   :  { %9470 = vrsqrt.f32 %v5929_v57  ;;  %v5930_v7 = vadd.f32 1e-06, %v5910_v9  ;;  %v5911_v8 = vmul.f32 0.03125, %v5865_v41 }
0x1225   :  { %v5868_v56 = vpop.xlane.xlu0 %5867 }
0x1226   :  { %v9463_v33 = vpop.eup %9462  ;;  %9472 = vrsqrt.f32 %v5930_v7  ;;  %v5931_v3 = vadd.f32 1e-06, %v5911_v8  ;;  %v5912_v45 = vmul.f32 0.03125, %v5868_v56 }
0x1227   :  { %v5965_v12 = vmul.f32 %v9463_v33, %v12949_v4 }
0x1228   :  { %v9465_v30 = vpop.eup %9464  ;;  %9474 = vrsqrt.f32 %v5931_v3  ;;  %v5932_v61 = vadd.f32 1e-06, %v5912_v45 }
0x1229   :  { %v5966_v49 = vmul.f32 %v9465_v30, %v12960_v31  ;;  %v5989_v40 = vmul.f32 %v13094_v17, %v5965_v12 }
0x122a   :  { %v9467_v53 = vpop.eup %9466  ;;  %9476 = vrsqrt.f32 %v5932_v61 }
0x122b   :  { %v5967_v60 = vmul.f32 %v9467_v53, %v12968_v18  ;;  %v5990_v6 = vmul.f32 %v13094_v17, %v5966_v49  ;;  %v6013_v31 = vadd.f32 %v13102_v51, %v5989_v40 }
0x122c   :  { %v9469_v1 = vpop.eup %9468 }
0x122d   :  { %v5991_v4 = vmul.f32 %v13094_v17, %v5967_v60  ;;  %v5968_v32 = vmul.f32 %v9469_v1, %v12975_v27  ;;  %v6014_v62 = vadd.f32 %v13102_v51, %v5990_v6 }
0x122e   :  { %v9471_v34 = vpop.eup %9470 }
0x122f   :  { %v5992_v13 = vmul.f32 %v13094_v17, %v5968_v32  ;;  %v5969_v39 = vmul.f32 %v9471_v34, %v12982_v5  ;;  %v6033_v48 = vpack.c.bf16 %v6014_v62, %v6013_v31  ;;  %v6015_v18 = vadd.f32 %v13102_v51, %v5991_v4 }
0x1230   :  { %v9473_v47 = vpop.eup %9472 }
0x1231   :  { %v6016_v0 = vadd.f32 %v13102_v51, %v5992_v13  ;;  %v5970_v57 = vmul.f32 %v9473_v47, %v12988_v38  ;;  %8740 = vmatprep.mubr.msk.bf16.mxu1 %vm333_vm1, %v6033_v48  ;;  %v5993_v27 = vmul.f32 %v13094_v17, %v5969_v39  ;;  %v8968_v13 = vld [vmem:[%s13756_s2 + $0xe0] sm:$0xff]   ;;  %v8969_v47 = vld [vmem:[%s13756_s2 + $0xe8] sm:$0xff]  }
0x1232   :  { %v9475_v9 = vpop.eup %9474  ;;  %8760 = vmatprep.subr.bf16.mxu0 %v8968_v13 }
0x1233   :  { %v6034_v41 = vpack.c.bf16 %v6016_v0, %v6015_v18  ;;  %v5971_v7 = vmul.f32 %v9475_v9, %v12994_v25  ;;  %v5994_v8 = vmul.f32 %v13094_v17, %v5970_v57  ;;  %v6017_v3 = vadd.f32 %v13102_v51, %v5993_v27  ;;  %8761 = vmatpush3.bf16.msra.mxu0 %v8968_v13 }
0x1234   :  { %v9477_v56 = vpop.eup %9476  ;;  %8762 = vmatprep.subr.bf16.mxu0 %v8969_v47 }
0x1235   :  { %v5995_v5 = vmul.f32 %v13094_v17, %v5971_v7  ;;  %v5972_v33 = vmul.f32 %v9477_v56, %v13000_v28  ;;  %8741 = vmatmul.mubr.msk.bf16.vlgmr.msra.gmra.mrb[4].mxu1 %vm333_vm1, %v6034_v41  ;;  %v6018_v38 = vadd.f32 %v13102_v51, %v5994_v8 }
0x1237   :  { %v5996_v45 = vmul.f32 %v13094_v17, %v5972_v33  ;;  %v6035_v12 = vpack.c.bf16 %v6018_v38, %v6017_v3  ;;  %v6019_v30 = vadd.f32 %v13102_v51, %v5995_v5  ;;  %8763 = vmatpush3.bf16.msra.mxu0 %v8969_v47 }
0x1239   :  { %v6020_v25 = vadd.f32 %v13102_v51, %v5996_v45  ;;  %8744 = vmatprep.mubr.msk.bf16.mxu1 %vm333_vm1, %v6035_v12 }
0x123b   :  { %v6036_v61 = vpack.c.bf16 %v6020_v25, %v6019_v30 }
0x123d   :  { %8745 = vmatmul.mubr.msk.bf16.gmra.mrb[8].mxu1 %vm333_vm1, %v6036_v61  ;;  %v8971_v61 = vld [vmem:[%s13756_s2 + $0xf8] sm:$0xff]  }
0x1280   :  { %v5871_v49 = vpop.xlane.xlu1 %5870 }
0x1281   :  { %v5913_v28 = vmul.f32 0.03125, %v5871_v49 }
0x1282   :  { %v5874_v40 = vpop.xlane.xlu0 %5873 }
0x1283   :  { %v5933_v53 = vadd.f32 1e-06, %v5913_v28  ;;  %v5914_v60 = vmul.f32 0.03125, %v5874_v40 }
0x1284   :  { %v5877_v6 = vpop.xlane.xlu1 %5876 }
0x1285   :  { %9478 = vrsqrt.f32 %v5933_v53  ;;  %v5934_v1 = vadd.f32 1e-06, %v5914_v60  ;;  %v5915_v4 = vmul.f32 0.03125, %v5877_v6 }
0x1286   :  { %v5880_v32 = vpop.xlane.xlu0 %5879 }
0x1287   :  { %9480 = vrsqrt.f32 %v5934_v1  ;;  %v5935_v31 = vadd.f32 1e-06, %v5915_v4  ;;  %v5916_v62 = vmul.f32 0.03125, %v5880_v32  ;;  %v8972_v4 = vld [vmem:[%s13756_s2 + $0x100] sm:$0xff]  }
0x1289   :  { %9482 = vrsqrt.f32 %v5935_v31  ;;  %v5936_v34 = vadd.f32 1e-06, %v5916_v62  ;;  %v8973_v31 = vld [vmem:[%s13756_s2 + $0x108] sm:$0xff]  }
0x128b   :  { %9484 = vrsqrt.f32 %v5936_v34 }
0x128f   :  { %v9479_v39 = vpop.eup %9478 }
0x1290   :  { %v5973_v48 = vmul.f32 %v9479_v39, %v13020_v54  ;;  %v8970_v54 = vld [vmem:[%s13756_s2 + $0xf0] sm:$0xff]  }
0x1291   :  { %v9481_v18 = vpop.eup %9480  ;;  %8764 = vmatprep.subr.bf16.mxu0 %v8970_v54  ;;  %v8974_v39 = vld [vmem:[%s13756_s2 + $0x110] sm:$0xff]  }
0x1292   :  { %v5974_v0 = vmul.f32 %v9481_v18, %v13023_v46  ;;  %v5997_v57 = vmul.f32 %v13094_v17, %v5973_v48  ;;  %8765 = vmatpush3.bf16.msra.mxu0 %v8970_v54 }
0x1293   :  { %v9483_v27 = vpop.eup %9482  ;;  %8766 = vmatprep.subr.bf16.mxu0 %v8971_v61 }
0x1294   :  { %v5975_v9 = vmul.f32 %v9483_v27, %v13028_v11  ;;  %v5883_v41 = vpop.xlane.xlu1 %5882  ;;  %v5998_v7 = vmul.f32 %v13094_v17, %v5974_v0  ;;  %v6021_v3 = vadd.f32 %v13102_v51, %v5997_v57 }
0x1295   :  { %v9485_v8 = vpop.eup %9484  ;;  %v5917_v56 = vmul.f32 0.03125, %v5883_v41 }
0x1296   :  { %v5999_v5 = vmul.f32 %v13094_v17, %v5975_v9  ;;  %v5976_v46 = vmul.f32 %v9485_v8, %v13034_v59  ;;  %v5886_v33 = vpop.xlane.xlu0 %5885  ;;  %v6022_v38 = vadd.f32 %v13102_v51, %v5998_v7  ;;  %8767 = vmatpush3.bf16.msra.mxu0 %v8971_v61  ;;  %v8975_v8 = vld [vmem:[%s13756_s2 + $0x118] sm:$0xff]  }
0x1297   :  { %v5937_v11 = vadd.f32 1e-06, %v5917_v56  ;;  %v5918_v45 = vmul.f32 0.03125, %v5886_v33  ;;  %8768 = vmatprep.subr.bf16.mxu0 %v8972_v4 }
0x1298   :  { %v6000_v12 = vmul.f32 %v13094_v17, %v5976_v46  ;;  %v5889_v30 = vpop.xlane.xlu1 %5888  ;;  %v6037_v25 = vpack.c.bf16 %v6022_v38, %v6021_v3  ;;  %v6023_v28 = vadd.f32 %v13102_v51, %v5999_v5 }
0x1299   :  { %9486 = vrsqrt.f32 %v5937_v11  ;;  %v5938_v49 = vadd.f32 1e-06, %v5918_v45  ;;  %v5919_v59 = vmul.f32 0.03125, %v5889_v30 }
0x129a   :  { %v6024_v40 = vadd.f32 %v13102_v51, %v6000_v12  ;;  %v5892_v53 = vpop.xlane.xlu0 %5891  ;;  %8748 = vmatprep.mubr.msk.bf16.mxu1 %vm333_vm1, %v6037_v25  ;;  %8769 = vmatpush3.bf16.msra.mxu0 %v8972_v4 }
0x129b   :  { %9488 = vrsqrt.f32 %v5938_v49  ;;  %v5939_v60 = vadd.f32 1e-06, %v5919_v59  ;;  %v5920_v6 = vmul.f32 0.03125, %v5892_v53  ;;  %8770 = vmatprep.subr.bf16.mxu0 %v8973_v31 }
0x129c   :  { %v6038_v1 = vpack.c.bf16 %v6024_v40, %v6023_v28 }
0x129d   :  { %9490 = vrsqrt.f32 %v5939_v60  ;;  %v5940_v32 = vadd.f32 1e-06, %v5920_v6 }
0x129e   :  { %8749 = vmatmul.mubr.msk.bf16.gmra.mrb[12].mxu1 %vm333_vm1, %v6038_v1  ;;  %8771 = vmatpush3.bf16.msra.mxu0 %v8973_v31 }
0x129f   :  { %9492 = vrsqrt.f32 %v5940_v32  ;;  %8772 = vmatprep.subr.bf16.mxu0 %v8974_v39 }
0x12a2   :  { %8773 = vmatpush3.bf16.msra.mxu0 %v8974_v39 }
0x12a3   :  { %v9487_v62 = vpop.eup %9486  ;;  %8774 = vmatprep.subr.bf16.mxu0 %v8975_v8 }
0x12a4   :  { %v5977_v34 = vmul.f32 %v9487_v62, %v13044_v22  ;;  %v5895_v13 = vpop.xlane.xlu1 %5894 }
0x12a5   :  { %v9489_v48 = vpop.eup %9488  ;;  %v5921_v47 = vmul.f32 0.03125, %v5895_v13 }
0x12a6   :  { %v5978_v18 = vmul.f32 %v9489_v48, %v13047_v44  ;;  %v5898_v0 = vpop.xlane.xlu0 %5897  ;;  %v6001_v57 = vmul.f32 %v13094_v17, %v5977_v34  ;;  %8775 = vmatpush3.bf16.msra.mxu0 %v8975_v8 }
0x12a7   :  { %v9491_v27 = vpop.eup %9490  ;;  %v5941_v9 = vadd.f32 1e-06, %v5921_v47  ;;  %v5922_v41 = vmul.f32 0.03125, %v5898_v0 }
0x12a8   :  { %v5979_v7 = vmul.f32 %v9491_v27, %v13052_v63  ;;  %v5901_v22 = vpop.xlane.xlu1 %5900  ;;  %v6002_v54 = vmul.f32 %v13094_v17, %v5978_v18  ;;  %v6025_v38 = vadd.f32 %v13102_v51, %v6001_v57 }
0x12a9   :  { %v9493_v56 = vpop.eup %9492  ;;  %9494 = vrsqrt.f32 %v5941_v9  ;;  %v5942_v44 = vadd.f32 1e-06, %v5922_v41  ;;  %v5923_v5 = vmul.f32 0.03125, %v5901_v22 }
0x12aa   :  { %v6003_v46 = vmul.f32 %v13094_v17, %v5979_v7  ;;  %v5980_v33 = vmul.f32 %v9493_v56, %v13058_v29  ;;  %v5904_v3 = vpop.xlane.xlu0 %5903  ;;  %v6026_v63 = vadd.f32 %v13102_v51, %v6002_v54 }
0x12ab   :  { %9496 = vrsqrt.f32 %v5942_v44  ;;  %v5943_v11 = vadd.f32 1e-06, %v5923_v5  ;;  %v5924_v45 = vmul.f32 0.03125, %v5904_v3 }
0x12ac   :  { %v6004_v12 = vmul.f32 %v13094_v17, %v5980_v33  ;;  %v6039_v30 = vpack.c.bf16 %v6026_v63, %v6025_v38  ;;  %v6027_v61 = vadd.f32 %v13102_v51, %v6003_v46 }
0x12ad   :  { %9498 = vrsqrt.f32 %v5943_v11  ;;  %v5944_v25 = vadd.f32 1e-06, %v5924_v45 }
0x12ae   :  { %v6028_v49 = vadd.f32 %v13102_v51, %v6004_v12  ;;  %8752 = vmatprep.mubr.msk.bf16.mxu1 %vm333_vm1, %v6039_v30 }
0x12af   :  { %9500 = vrsqrt.f32 %v5944_v25 }
0x12b0   :  { %v6040_v29 = vpack.c.bf16 %v6028_v49, %v6027_v61 }
0x12b2   :  { %8753 = vmatmul.mubr.msk.bf16.gmra.mrb[16].mxu1 %vm333_vm1, %v6040_v29 }
0x12b3   :  { %v9495_v59 = vpop.eup %9494 }
0x12b4   :  { %v5981_v28 = vmul.f32 %v9495_v59, %v13068_v19 }
0x12b5   :  { %v9497_v40 = vpop.eup %9496 }
0x12b6   :  { %v5982_v53 = vmul.f32 %v9497_v40, %v13071_v26  ;;  %v6005_v60 = vmul.f32 %v13094_v17, %v5981_v28 }
0x12b7   :  { %v9499_v6 = vpop.eup %9498 }
0x12b8   :  { %v5983_v1 = vmul.f32 %v9499_v6, %v13076_v55  ;;  %v6006_v4 = vmul.f32 %v13094_v17, %v5982_v53  ;;  %v6029_v34 = vadd.f32 %v13102_v51, %v6005_v60 }
0x12b9   :  { %v9501_v32 = vpop.eup %9500 }
0x12ba   :  { %v6007_v31 = vmul.f32 %v13094_v17, %v5983_v1  ;;  %v5984_v62 = vmul.f32 %v9501_v32, %v13082_v43  ;;  %v6030_v13 = vadd.f32 %v13102_v51, %v6006_v4  ;;  %v13198_v43 = vld [vmem:[%s13759_s3 + $0x6d] ss:$0 sm:$0xff] }
0x12bc   :  { %v6008_v19 = vmul.f32 %v13094_v17, %v5984_v62  ;;  %v6041_v39 = vpack.c.bf16 %v6030_v13, %v6029_v34  ;;  %v6031_v26 = vadd.f32 %v13102_v51, %v6007_v31 }
0x12be   :  { %v6032_v48 = vadd.f32 %v13102_v51, %v6008_v19  ;;  %8756 = vmatprep.mubr.msk.bf16.mxu1 %vm333_vm1, %v6041_v39 }
0x12c0   :  { %v6042_v55 = vpack.c.bf16 %v6032_v48, %v6031_v26 }
0x12c2   :  { %8757 = vmatmul.mubr.msk.bf16.gmra.mrb[20].mxu1 %vm333_vm1, %v6042_v55 }
0x1308   :  { %v8742_v47 = vpop.f32.mrb[4].mxu1 }
0x1309   :  { %v13201_v18 = vadd.f32 %v8742_v47, %v13198_v43  ;;  %v6128_v17 = vpop.f32.mrb[5].mxu1 }
0x130a   :  { %v13204_v0 = vadd.f32 %v13198_v43, %v6128_v17  ;;  %v8743_v57 = vpop.f32.mrb[6].mxu1 }
0x130b   :  { %v6209_v51 = vmul.f32 %v13201_v18, %v13201_v18  ;;  %v13209_v27 = vadd.f32 %v8743_v57, %v13198_v43  ;;  %v6131_v9 = vpop.f32.mrb[7].mxu1 }
0x130c   :  { %v6207_v41 = vmul.f32 %v13204_v0, %v13204_v0  ;;  %v13214_v7 = vadd.f32 %v13198_v43, %v6131_v9 }
0x130d   :  { %v6229_v22 = vmul.f32 %v6209_v51, %v13201_v18  ;;  %v6210_v54 = vmul.f32 %v13209_v27, %v13209_v27 }
0x130e   :  { %v6227_v8 = vmul.f32 %v6207_v41, %v13204_v0  ;;  %v6208_v56 = vmul.f32 %v13214_v7, %v13214_v7 }
0x130f   :  { %v6249_v44 = vmul.f32 0.044715, %v6229_v22  ;;  %v6230_v5 = vmul.f32 %v6210_v54, %v13209_v27 }
0x1310   :  { %v6247_v46 = vmul.f32 0.044715, %v6227_v8  ;;  %v6228_v33 = vmul.f32 %v6208_v56, %v13214_v7  ;;  %v8746_v3 = vpop.f32.mrb[8].mxu1 }
0x1311   :  { %v6269_v38 = vadd.f32 %v6249_v44, %v13201_v18  ;;  %v6250_v63 = vmul.f32 0.044715, %v6230_v5  ;;  %v13226_v11 = vadd.f32 %v8746_v3, %v13198_v43  ;;  %v6144_v45 = vpop.f32.mrb[9].mxu1 }
0x1312   :  { %v6267_v12 = vadd.f32 %v6247_v46, %v13204_v0  ;;  %v6248_v30 = vmul.f32 0.044715, %v6228_v33  ;;  %v13230_v25 = vadd.f32 %v13198_v43, %v6144_v45  ;;  %v8747_v61 = vpop.f32.mrb[10].mxu1 }
0x1313   :  { %v6289_v49 = vmul.f32 0.7978846, %v6269_v38  ;;  %v6270_v29 = vadd.f32 %v6250_v63, %v13209_v27  ;;  %v6213_v59 = vmul.f32 %v13226_v11, %v13226_v11  ;;  %v13236_v28 = vadd.f32 %v8747_v61, %v13198_v43  ;;  %v6147_v40 = vpop.f32.mrb[11].mxu1 }
0x1314   :  { %v6287_v53 = vmul.f32 0.7978846, %v6267_v12  ;;  %v6268_v60 = vadd.f32 %v6248_v30, %v13214_v7  ;;  %v6211_v6 = vmul.f32 %v13230_v25, %v13230_v25  ;;  %v13242_v1 = vadd.f32 %v13198_v43, %v6147_v40 }
0x1315   :  { %9502 = vtanh.f32 %v6289_v49  ;;  %v6290_v4 = vmul.f32 0.7978846, %v6270_v29  ;;  %v6233_v32 = vmul.f32 %v6213_v59, %v13226_v11  ;;  %v6214_v31 = vmul.f32 %v13236_v28, %v13236_v28 }
0x1316   :  { %9504 = vtanh.f32 %v6287_v53  ;;  %v6288_v62 = vmul.f32 0.7978846, %v6268_v60  ;;  %v6231_v34 = vmul.f32 %v6211_v6, %v13230_v25  ;;  %v6212_v13 = vmul.f32 %v13242_v1, %v13242_v1 }
0x1317   :  { %9506 = vtanh.f32 %v6290_v4  ;;  %v6253_v19 = vmul.f32 0.044715, %v6233_v32  ;;  %v6234_v39 = vmul.f32 %v6214_v31, %v13236_v28 }
0x1318   :  { %9508 = vtanh.f32 %v6288_v62  ;;  %v6251_v26 = vmul.f32 0.044715, %v6231_v34  ;;  %v6232_v48 = vmul.f32 %v6212_v13, %v13242_v1 }
0x1319   :  { %v6273_v55 = vadd.f32 %v6253_v19, %v13226_v11  ;;  %v6254_v47 = vmul.f32 0.044715, %v6234_v39 }
0x131a   :  { %v6271_v17 = vadd.f32 %v6251_v26, %v13230_v25  ;;  %v6252_v57 = vmul.f32 0.044715, %v6232_v48 }
0x131b   :  { %v6293_v51 = vmul.f32 0.7978846, %v6273_v55  ;;  %v6274_v9 = vadd.f32 %v6254_v47, %v13236_v28 }
0x131c   :  { %v6291_v41 = vmul.f32 0.7978846, %v6271_v17  ;;  %v6272_v22 = vadd.f32 %v6252_v57, %v13242_v1 }
0x131d   :  { %9510 = vtanh.f32 %v6293_v51  ;;  %v6294_v54 = vmul.f32 0.7978846, %v6274_v9 }
0x131e   :  { %9512 = vtanh.f32 %v6291_v41  ;;  %v6292_v8 = vmul.f32 0.7978846, %v6272_v22 }
0x131f   :  { %v9503_v56 = vpop.eup %9502  ;;  %9514 = vtanh.f32 %v6294_v54 }
0x1320   :  { %v9505_v44 = vpop.eup %9504  ;;  %v6329_v5 = vadd.f32 1.0, %v9503_v56  ;;  %9516 = vtanh.f32 %v6292_v8 }
0x1321   :  { %v9507_v46 = vpop.eup %9506  ;;  %v6327_v33 = vadd.f32 1.0, %v9505_v44 }
0x1322   :  { %v9509_v3 = vpop.eup %9508  ;;  %v6349_v38 = vmul.f32 0.5, %v6329_v5  ;;  %v6330_v63 = vadd.f32 1.0, %v9507_v46 }
0x1323   :  { %v6328_v45 = vadd.f32 1.0, %v9509_v3  ;;  %v6347_v12 = vmul.f32 0.5, %v6327_v33 }
0x1324   :  { %v6350_v30 = vmul.f32 0.5, %v6330_v63  ;;  %v6369_v49 = vmul.f32 %v6349_v38, %v13201_v18 }
0x1325   :  { %v6348_v61 = vmul.f32 0.5, %v6328_v45  ;;  %v6367_v40 = vmul.f32 %v6347_v12, %v13204_v0 }
0x1326   :  { %v6370_v29 = vmul.f32 %v6350_v30, %v13209_v27 }
0x1327   :  { %v9511_v59 = vpop.eup %9510  ;;  %v6368_v53 = vmul.f32 %v6348_v61, %v13214_v7 }
0x1328   :  { %v9513_v60 = vpop.eup %9512  ;;  %v6388_v6 = vpack.c.bf16 %v6370_v29, %v6369_v49  ;;  %v6333_v4 = vadd.f32 1.0, %v9511_v59 }
0x1329   :  { %v9515_v32 = vpop.eup %9514  ;;  %v6387_v31 = vpack.c.bf16 %v6368_v53, %v6367_v40  ;;  %v6331_v62 = vadd.f32 1.0, %v9513_v60 }
0x132a   :  { %v9517_v34 = vpop.eup %9516  ;;  %v6334_v13 = vadd.f32 1.0, %v9515_v32  ;;  %v6353_v19 = vmul.f32 0.5, %v6333_v4 }
0x132b   :  { %8776 = vmatprep.mubr.bf16.mxu0 %v6387_v31  ;;  %v6332_v39 = vadd.f32 1.0, %v9517_v34  ;;  %v6351_v26 = vmul.f32 0.5, %v6331_v62 }
0x132c   :  { %8777 = vmatmul.mubr.bf16.vlgmr.msra.gmra.mrb[200].mxu0 %v6388_v6  ;;  %v6354_v18 = vmul.f32 0.5, %v6334_v13  ;;  %v6373_v48 = vmul.f32 %v6353_v19, %v13226_v11 }
0x132d   :  { %v6352_v27 = vmul.f32 0.5, %v6332_v39  ;;  %v6371_v7 = vmul.f32 %v6351_v26, %v13230_v25 }
0x132e   :  { %v6374_v0 = vmul.f32 %v6354_v18, %v13236_v28 }
0x132f   :  { %v6372_v55 = vmul.f32 %v6352_v27, %v13242_v1 }
0x1330   :  { %v6390_v47 = vpack.c.bf16 %v6374_v0, %v6373_v48 }
0x1331   :  { %v6389_v17 = vpack.c.bf16 %v6372_v55, %v6371_v7 }
0x1333   :  { %8780 = vmatprep.mubr.bf16.mxu0 %v6389_v17 }
0x1334   :  { %8781 = vmatmul.mubr.bf16.gmra.mrb[204].mxu0 %v6390_v47 }
0x1371   :  { %v8750_v57 = vpop.f32.mrb[12].mxu1 }
0x1372   :  { %v13265_v51 = vadd.f32 %v8750_v57, %v13198_v43  ;;  %v6160_v9 = vpop.f32.mrb[13].mxu1 }
0x1373   :  { %v13268_v41 = vadd.f32 %v13198_v43, %v6160_v9  ;;  %v8751_v22 = vpop.f32.mrb[14].mxu1 }
0x1374   :  { %v6217_v11 = vmul.f32 %v13265_v51, %v13265_v51  ;;  %v6172_v25 = vadd.f32 %v8751_v22, %v13198_v43  ;;  %v6163_v28 = vpop.f32.mrb[15].mxu1 }
0x1375   :  { %v6215_v1 = vmul.f32 %v13268_v41, %v13268_v41  ;;  %v6164_v54 = vadd.f32 %v13198_v43, %v6163_v28 }
0x1376   :  { %v6237_v8 = vmul.f32 %v6217_v11, %v13265_v51  ;;  %v6218_v56 = vmul.f32 %v6172_v25, %v6172_v25 }
0x1377   :  { %v6235_v44 = vmul.f32 %v6215_v1, %v13268_v41  ;;  %v6216_v5 = vmul.f32 %v6164_v54, %v6164_v54 }
0x1378   :  { %v6257_v46 = vmul.f32 0.044715, %v6237_v8  ;;  %v6238_v33 = vmul.f32 %v6218_v56, %v6172_v25 }
0x1379   :  { %v6255_v3 = vmul.f32 0.044715, %v6235_v44  ;;  %v6236_v38 = vmul.f32 %v6216_v5, %v6164_v54 }
0x137a   :  { %v6277_v63 = vadd.f32 %v6257_v46, %v13265_v51  ;;  %v6258_v45 = vmul.f32 0.044715, %v6238_v33 }
0x137b   :  { %v6275_v12 = vadd.f32 %v6255_v3, %v13268_v41  ;;  %v6256_v30 = vmul.f32 0.044715, %v6236_v38 }
0x137c   :  { %v6297_v61 = vmul.f32 0.7978846, %v6277_v63  ;;  %v6278_v49 = vadd.f32 %v6258_v45, %v6172_v25 }
0x137d   :  { %v6295_v29 = vmul.f32 0.7978846, %v6275_v12  ;;  %v6276_v59 = vadd.f32 %v6256_v30, %v6164_v54 }
0x137e   :  { %9518 = vtanh.f32 %v6297_v61  ;;  %v6298_v40 = vmul.f32 0.7978846, %v6278_v49 }
0x137f   :  { %9520 = vtanh.f32 %v6295_v29  ;;  %v6296_v53 = vmul.f32 0.7978846, %v6276_v59 }
0x1380   :  { %9522 = vtanh.f32 %v6298_v40 }
0x1381   :  { %9524 = vtanh.f32 %v6296_v53 }
0x1385   :  { %v8754_v60 = vpop.f32.mrb[16].mxu1 }
0x1386   :  { %v13281_v6 = vadd.f32 %v8754_v60, %v13198_v43  ;;  %v6176_v4 = vpop.f32.mrb[17].mxu1 }
0x1387   :  { %v13284_v32 = vadd.f32 %v13198_v43, %v6176_v4  ;;  %v8755_v31 = vpop.f32.mrb[18].mxu1 }
0x1388   :  { %v9519_v62 = vpop.eup %9518  ;;  %v6221_v34 = vmul.f32 %v13281_v6, %v13281_v6  ;;  %v13289_v13 = vadd.f32 %v8755_v31, %v13198_v43  ;;  %v6179_v19 = vpop.f32.mrb[19].mxu1 }
0x1389   :  { %v9521_v39 = vpop.eup %9520  ;;  %v6219_v26 = vmul.f32 %v13284_v32, %v13284_v32  ;;  %v13294_v18 = vadd.f32 %v13198_v43, %v6179_v19  ;;  %v6337_v27 = vadd.f32 1.0, %v9519_v62 }
0x138a   :  { %v9523_v48 = vpop.eup %9522  ;;  %v6241_v0 = vmul.f32 %v6221_v34, %v13281_v6  ;;  %v6222_v7 = vmul.f32 %v13289_v13, %v13289_v13  ;;  %v6335_v55 = vadd.f32 1.0, %v9521_v39 }
0x138b   :  { %v9525_v47 = vpop.eup %9524  ;;  %v6239_v17 = vmul.f32 %v6219_v26, %v13284_v32  ;;  %v6220_v57 = vmul.f32 %v13294_v18, %v13294_v18  ;;  %v6338_v9 = vadd.f32 1.0, %v9523_v48  ;;  %v6357_v22 = vmul.f32 0.5, %v6337_v27 }
0x138c   :  { %v6261_v11 = vmul.f32 0.044715, %v6241_v0  ;;  %v6242_v28 = vmul.f32 %v6222_v7, %v13289_v13  ;;  %v6336_v1 = vadd.f32 1.0, %v9525_v47  ;;  %v6355_v8 = vmul.f32 0.5, %v6335_v55 }
0x138d   :  { %v6259_v56 = vmul.f32 0.044715, %v6239_v17  ;;  %v6240_v44 = vmul.f32 %v6220_v57, %v13294_v18  ;;  %v6358_v5 = vmul.f32 0.5, %v6338_v9  ;;  %v6377_v45 = vmul.f32 %v6357_v22, %v13265_v51 }
0x138e   :  { %v6281_v46 = vadd.f32 %v6261_v11, %v13281_v6  ;;  %v6262_v33 = vmul.f32 0.044715, %v6242_v28  ;;  %v6356_v3 = vmul.f32 0.5, %v6336_v1  ;;  %v6375_v49 = vmul.f32 %v6355_v8, %v13268_v41 }
0x138f   :  { %v6279_v38 = vadd.f32 %v6259_v56, %v13284_v32  ;;  %v6260_v63 = vmul.f32 0.044715, %v6240_v44  ;;  %v6378_v12 = vmul.f32 %v6358_v5, %v6172_v25 }
0x1390   :  { %v6301_v30 = vmul.f32 0.7978846, %v6281_v46  ;;  %v6282_v61 = vadd.f32 %v6262_v33, %v13289_v13  ;;  %v6376_v29 = vmul.f32 %v6356_v3, %v6164_v54 }
0x1391   :  { %v6299_v59 = vmul.f32 0.7978846, %v6279_v38  ;;  %v6280_v40 = vadd.f32 %v6260_v63, %v13294_v18  ;;  %v6392_v53 = vpack.c.bf16 %v6378_v12, %v6377_v45 }
0x1392   :  { %9526 = vtanh.f32 %v6301_v30  ;;  %v6302_v60 = vmul.f32 0.7978846, %v6282_v61  ;;  %v6391_v4 = vpack.c.bf16 %v6376_v29, %v6375_v49 }
0x1393   :  { %9528 = vtanh.f32 %v6299_v59  ;;  %v6300_v31 = vmul.f32 0.7978846, %v6280_v40 }
0x1394   :  { %9530 = vtanh.f32 %v6302_v60  ;;  %8784 = vmatprep.mubr.bf16.mxu0 %v6391_v4 }
0x1395   :  { %9532 = vtanh.f32 %v6300_v31  ;;  %v8758_v51 = vpop.f32.mrb[20].mxu1  ;;  %8785 = vmatmul.mubr.bf16.gmra.mrb[208].mxu0 %v6392_v53 }
0x1396   :  { %v13311_v25 = vadd.f32 %v8758_v51, %v13198_v43  ;;  %v6192_v62 = vpop.f32.mrb[21].mxu1 }
0x1397   :  { %v13314_v41 = vadd.f32 %v13198_v43, %v6192_v62  ;;  %v8759_v54 = vpop.f32.mrb[22].mxu1 }
0x1398   :  { %v6225_v34 = vmul.f32 %v13311_v25, %v13311_v25  ;;  %v6204_v19 = vadd.f32 %v8759_v54, %v13198_v43  ;;  %v6195_v39 = vpop.f32.mrb[23].mxu1 }
0x1399   :  { %v6223_v26 = vmul.f32 %v13314_v41, %v13314_v41  ;;  %v6196_v27 = vadd.f32 %v13198_v43, %v6195_v39 }
0x139a   :  { %v6245_v48 = vmul.f32 %v6225_v34, %v13311_v25  ;;  %v6226_v0 = vmul.f32 %v6204_v19, %v6204_v19 }
0x139b   :  { %v6243_v7 = vmul.f32 %v6223_v26, %v13314_v41  ;;  %v6224_v55 = vmul.f32 %v6196_v27, %v6196_v27 }
0x139c   :  { %v9527_v47 = vpop.eup %9526  ;;  %v6265_v17 = vmul.f32 0.044715, %v6245_v48  ;;  %v6246_v57 = vmul.f32 %v6226_v0, %v6204_v19 }
0x139d   :  { %v9529_v9 = vpop.eup %9528  ;;  %v6263_v22 = vmul.f32 0.044715, %v6243_v7  ;;  %v6244_v11 = vmul.f32 %v6224_v55, %v6196_v27  ;;  %v6341_v28 = vadd.f32 1.0, %v9527_v47 }
0x139e   :  { %v9531_v1 = vpop.eup %9530  ;;  %v6285_v8 = vadd.f32 %v6265_v17, %v13311_v25  ;;  %v6266_v56 = vmul.f32 0.044715, %v6246_v57  ;;  %v6339_v44 = vadd.f32 1.0, %v9529_v9 }
0x139f   :  { %v9533_v5 = vpop.eup %9532  ;;  %v6283_v43 = vadd.f32 %v6263_v22, %v13314_v41  ;;  %v6264_v46 = vmul.f32 0.044715, %v6244_v11  ;;  %v6342_v33 = vadd.f32 1.0, %v9531_v1  ;;  %v6361_v3 = vmul.f32 0.5, %v6341_v28  ;;  %v13335_v28 = vld [vmem:[%s13759_s3 + $0x6e] ss:$0 sm:$0xff] }
0x13a0   :  { %v6305_v38 = vmul.f32 0.7978846, %v6285_v8  ;;  %v6286_v63 = vadd.f32 %v6266_v56, %v6204_v19  ;;  %v6340_v45 = vadd.f32 1.0, %v9533_v5  ;;  %v6359_v12 = vmul.f32 0.5, %v6339_v44  ;;  %v13340_v8 = vld [vmem:[%s13759_s3 + $0x6f] ss:$0 sm:$0xff] }
0x13a1   :  { %v6303_v30 = vmul.f32 0.7978846, %v6283_v43  ;;  %v6284_v61 = vadd.f32 %v6264_v46, %v6196_v27  ;;  %v6362_v49 = vmul.f32 0.5, %v6342_v33  ;;  %v6381_v53 = vmul.f32 %v6361_v3, %v13281_v6 }
0x13a2   :  { %9534 = vtanh.f32 %v6305_v38  ;;  %v6306_v29 = vmul.f32 0.7978846, %v6286_v63  ;;  %v6360_v59 = vmul.f32 0.5, %v6340_v45  ;;  %v6379_v4 = vmul.f32 %v6359_v12, %v13284_v32 }
0x13a3   :  { %9536 = vtanh.f32 %v6303_v30  ;;  %v6304_v40 = vmul.f32 0.7978846, %v6284_v61  ;;  %v6382_v60 = vmul.f32 %v6362_v49, %v13289_v13 }
0x13a4   :  { %9538 = vtanh.f32 %v6306_v29  ;;  %v6380_v31 = vmul.f32 %v6360_v59, %v13294_v18 }
0x13a5   :  { %9540 = vtanh.f32 %v6304_v40  ;;  %v6394_v51 = vpack.c.bf16 %v6382_v60, %v6381_v53 }
0x13a6   :  { %v6393_v62 = vpack.c.bf16 %v6380_v31, %v6379_v4 }
0x13a8   :  { %8788 = vmatprep.mubr.bf16.mxu0 %v6393_v62 }
0x13a9   :  { %8789 = vmatmul.mubr.bf16.gmra.mrb[212].mxu0 %v6394_v51 }
0x13ac   :  { %v9535_v54 = vpop.eup %9534 }
0x13ad   :  { %v9537_v34 = vpop.eup %9536  ;;  %v6345_v39 = vadd.f32 1.0, %v9535_v54 }
0x13ae   :  { %v9539_v26 = vpop.eup %9538  ;;  %v6343_v48 = vadd.f32 1.0, %v9537_v34 }
0x13af   :  { %v9541_v0 = vpop.eup %9540  ;;  %v6346_v7 = vadd.f32 1.0, %v9539_v26  ;;  %v6365_v6 = vmul.f32 0.5, %v6345_v39 }
0x13b0   :  { %v6344_v55 = vadd.f32 1.0, %v9541_v0  ;;  %v6363_v13 = vmul.f32 0.5, %v6343_v48 }
0x13b1   :  { %v6366_v47 = vmul.f32 0.5, %v6346_v7  ;;  %v6385_v32 = vmul.f32 %v6365_v6, %v13311_v25 }
0x13b2   :  { %v6364_v17 = vmul.f32 0.5, %v6344_v55  ;;  %v6383_v57 = vmul.f32 %v6363_v13, %v13314_v41 }
0x13b3   :  { %v6386_v18 = vmul.f32 %v6366_v47, %v6204_v19 }
0x13b4   :  { %v6384_v9 = vmul.f32 %v6364_v17, %v6196_v27 }
0x13b5   :  { %v6396_v22 = vpack.c.bf16 %v6386_v18, %v6385_v32 }
0x13b6   :  { %v6395_v11 = vpack.c.bf16 %v6384_v9, %v6383_v57 }
0x13b8   :  { %8792 = vmatprep.mubr.bf16.mxu0 %v6395_v11 }
0x13b9   :  { %8793 = vmatmul.mubr.bf16.gmra.mrb[216].mxu0 %v6396_v22 }
0x13ff   :  { %v8778_v1 = vpop.f32.mrb[200].mxu0 }
0x1400   :  { %v6507_v25 = vadd.f32 %v8778_v1, %v13335_v28  ;;  %v6500_v19 = vpop.f32.mrb[201].mxu0 }
0x1401   :  { %v8779_v41 = vpop.f32.mrb[202].mxu0 }
0x1402   :  { %v6580_v27 = vmul.f32 %v13340_v8, %v6507_v25  ;;  %v6510_v56 = vadd.f32 %v8779_v41, %v13335_v28  ;;  %v6502_v44 = vpop.f32.mrb[203].mxu0 }
0x1404   :  { %v6581_v5 = vmul.f32 %v13340_v8, %v6510_v56  ;;  %v13347_v43 = vadd.f32 %v6580_v27, %v12837_v58 }
0x1406   :  { %v6614_v46 = vsel %vm333_vm1, %v13347_v43, 0.0  ;;  %v13352_v33 = vadd.f32 %v6581_v5, %v12845_v16 }
0x1407   :  { %6615 = vadd.xlane.f32.xlu1 %v6614_v46  ;;  %v8782_v3 = vpop.f32.mrb[204].mxu0 }
0x1408   :  { %v6523_v38 = vadd.f32 %v8782_v3, %v13335_v28  ;;  %v6514_v63 = vpop.f32.mrb[205].mxu0  ;;  %v6617_v45 = vsel %vm333_vm1, %v13352_v33, 0.0 }
0x1409   :  { %v6515_v12 = vadd.f32 %v13335_v28, %v6514_v63  ;;  %6618 = vadd.xlane.f32.xlu0 %v6617_v45  ;;  %v8783_v30 = vpop.f32.mrb[206].mxu0 }
0x140a   :  { %v6526_v58 = vadd.f32 %v8783_v30, %v13335_v28  ;;  %v6517_v61 = vpop.f32.mrb[207].mxu0  ;;  %v6584_v49 = vmul.f32 %v13340_v8, %v6523_v38 }
0x140b   :  { %v6582_v16 = vmul.f32 %v13340_v8, %v6515_v12  ;;  %v6518_v29 = vadd.f32 %v13335_v28, %v6517_v61 }
0x140c   :  { %v6585_v59 = vmul.f32 %v13340_v8, %v6526_v58  ;;  %v13373_v31 = vadd.f32 %v6584_v49, %v12865_v21 }
0x140d   :  { %v6583_v40 = vmul.f32 %v13340_v8, %v6518_v29  ;;  %v13365_v53 = vadd.f32 %v6582_v16, %v12860_v20 }
0x140e   :  { %v13378_v62 = vadd.f32 %v6585_v59, %v12873_v15  ;;  %v6626_v20 = vsel %vm333_vm1, %v13373_v31, 0.0 }
0x140f   :  { %v6620_v60 = vsel %vm333_vm1, %v13365_v53, 0.0  ;;  %v13370_v4 = vadd.f32 %v6583_v40, %v12868_v14 }
0x1410   :  { %6621 = vadd.xlane.f32.xlu1 %v6620_v60  ;;  %v6629_v54 = vsel %vm333_vm1, %v13378_v62, 0.0 }
0x1411   :  { %v6623_v51 = vsel %vm333_vm1, %v13370_v4, 0.0 }
0x1412   :  { %6624 = vadd.xlane.f32.xlu0 %v6623_v51 }
0x1414   :  { %6627 = vadd.xlane.f32.xlu1 %v6626_v20 }
0x1416   :  { %6630 = vadd.xlane.f32.xlu0 %v6629_v54 }
0x1468   :  { %v8786_v14 = vpop.f32.mrb[208].mxu0 }
0x1469   :  { %v6530_v34 = vpop.f32.mrb[209].mxu0 }
0x146a   :  { %v6531_v21 = vadd.f32 %v13335_v28, %v6530_v34  ;;  %v8787_v39 = vpop.f32.mrb[210].mxu0 }
0x146b   :  { %v6533_v26 = vpop.f32.mrb[211].mxu0 }
0x146c   :  { %v6586_v48 = vmul.f32 %v13340_v8, %v6531_v21  ;;  %v6534_v15 = vadd.f32 %v13335_v28, %v6533_v26 }
0x146e   :  { %v6587_v0 = vmul.f32 %v13340_v8, %v6534_v15  ;;  %v13389_v7 = vadd.f32 %v6586_v48, %v12888_v37 }
0x1470   :  { %v6632_v6 = vsel %vm333_vm1, %v13389_v7, 0.0  ;;  %v13394_v55 = vadd.f32 %v6587_v0, %v12893_v23 }
0x1471   :  { %6633 = vadd.xlane.f32.xlu1 %v6632_v6 }
0x1472   :  { %v6635_v13 = vsel %vm333_vm1, %v13394_v55, 0.0 }
0x1473   :  { %6636 = vadd.xlane.f32.xlu0 %v6635_v13 }
0x147c   :  { %v8790_v47 = vpop.f32.mrb[212].mxu0 }
0x147d   :  { %v6553_v17 = vadd.f32 %v8790_v47, %v13335_v28  ;;  %v6544_v32 = vpop.f32.mrb[213].mxu0 }
0x147e   :  { %v6545_v18 = vadd.f32 %v13335_v28, %v6544_v32  ;;  %v8791_v57 = vpop.f32.mrb[214].mxu0 }
0x147f   :  { %v6556_v37 = vadd.f32 %v8791_v57, %v13335_v28  ;;  %v6547_v9 = vpop.f32.mrb[215].mxu0  ;;  %v6590_v22 = vmul.f32 %v13340_v8, %v6553_v17 }
0x1480   :  { %v6588_v23 = vmul.f32 %v13340_v8, %v6545_v18  ;;  %v6548_v11 = vadd.f32 %v13335_v28, %v6547_v9 }
0x1481   :  { %v6591_v1 = vmul.f32 %v13340_v8, %v6556_v37  ;;  %v13415_v56 = vadd.f32 %v6590_v22, %v12921_v42 }
0x1482   :  { %v6589_v25 = vmul.f32 %v13340_v8, %v6548_v11  ;;  %v13407_v19 = vadd.f32 %v6588_v23, %v12916_v50  ;;  %v8977_v11 = vld [vmem:[%s13756_s2 + $0x130] sm:$0xff]  }
0x1483   :  { %v13420_v5 = vadd.f32 %v6591_v1, %v12929_v36  ;;  %v6644_v50 = vsel %vm333_vm1, %v13415_v56, 0.0 }
0x1484   :  { %v6638_v41 = vsel %vm333_vm1, %v13407_v19, 0.0  ;;  %v13412_v27 = vadd.f32 %v6589_v25, %v12924_v2 }
0x1485   :  { %6639 = vadd.xlane.f32.xlu1 %v6638_v41  ;;  %v6647_v46 = vsel %vm333_vm1, %v13420_v5, 0.0 }
0x1486   :  { %v6641_v44 = vsel %vm333_vm1, %v13412_v27, 0.0 }
0x1487   :  { %6642 = vadd.xlane.f32.xlu0 %v6641_v44 }
0x1489   :  { %6645 = vadd.xlane.f32.xlu1 %v6644_v50 }
0x148b   :  { %6648 = vadd.xlane.f32.xlu0 %v6647_v46 }
0x148c   :  { %v8794_v2 = vpop.f32.mrb[216].mxu0 }
0x148d   :  { %v6569_v42 = vadd.f32 %v8794_v2, %v13335_v28  ;;  %v6560_v3 = vpop.f32.mrb[217].mxu0 }
0x148e   :  { %v6561_v38 = vadd.f32 %v13335_v28, %v6560_v3  ;;  %v8795_v63 = vpop.f32.mrb[218].mxu0 }
0x148f   :  { %v6572_v45 = vadd.f32 %v8795_v63, %v13335_v28  ;;  %v6563_v36 = vpop.f32.mrb[219].mxu0  ;;  %v6594_v12 = vmul.f32 %v13340_v8, %v6569_v42 }
0x1490   :  { %v6592_v30 = vmul.f32 %v13340_v8, %v6561_v38  ;;  %v6564_v58 = vadd.f32 %v13335_v28, %v6563_v36 }
0x1491   :  { %v6595_v61 = vmul.f32 %v13340_v8, %v6572_v45  ;;  %v13443_v60 = vadd.f32 %v6594_v12, %v12952_v24 }
0x1492   :  { %v6593_v49 = vmul.f32 %v13340_v8, %v6564_v58  ;;  %v13435_v16 = vadd.f32 %v6592_v30, %v12944_v52 }
0x1493   :  { %v13448_v8 = vadd.f32 %v6595_v61, %v12963_v10 }
0x1494   :  { %v6616_v29 = vpop.xlane.xlu1 %6615  ;;  %v6650_v59 = vsel %vm333_vm1, %v13435_v16, 0.0  ;;  %v13440_v40 = vadd.f32 %v6593_v49, %v12955_v35  ;;  %v6656_v35 = vsel %vm333_vm1, %v13443_v60, 0.0 }
0x1495   :  { %v6662_v51 = vmul.f32 0.03125, %v6616_v29  ;;  %6651 = vadd.xlane.f32.xlu1 %v6650_v59  ;;  %v6659_v34 = vsel %vm333_vm1, %v13448_v8, 0.0 }
0x1496   :  { %v6619_v28 = vpop.xlane.xlu0 %6618  ;;  %v6653_v20 = vsel %vm333_vm1, %v13440_v40, 0.0 }
0x1497   :  { %v13451_v52 = vsub.f32 %v13347_v43, %v6662_v51  ;;  %v6663_v54 = vmul.f32 0.03125, %v6619_v28  ;;  %6654 = vadd.xlane.f32.xlu0 %v6653_v20 }
0x1499   :  { %v13456_v24 = vsub.f32 %v13352_v33, %v6663_v54  ;;  %6657 = vadd.xlane.f32.xlu1 %v6656_v35  ;;  %v6694_v14 = vmul.f32 %v13451_v52, %v13451_v52 }
0x149b   :  { %6660 = vadd.xlane.f32.xlu0 %v6659_v34  ;;  %v6710_v10 = vsel %vm333_vm1, %v6694_v14, 0.0  ;;  %v6695_v43 = vmul.f32 %v13456_v24, %v13456_v24 }
0x149d   :  { %6711 = vadd.xlane.f32.xlu1 %v6710_v10  ;;  %v6622_v21 = vpop.xlane.xlu1 %6621  ;;  %v6713_v39 = vsel %vm333_vm1, %v6695_v43, 0.0 }
0x149e   :  { %v6664_v26 = vmul.f32 0.03125, %v6622_v21 }
0x149f   :  { %v6625_v33 = vpop.xlane.xlu0 %6624  ;;  %6714 = vadd.xlane.f32.xlu0 %v6713_v39 }
0x14a0   :  { %v13467_v48 = vsub.f32 %v13365_v53, %v6664_v26  ;;  %v6665_v15 = vmul.f32 0.03125, %v6625_v33 }
0x14a1   :  { %v6628_v0 = vpop.xlane.xlu1 %6627 }
0x14a2   :  { %v13470_v6 = vsub.f32 %v13370_v4, %v6665_v15  ;;  %v6666_v13 = vmul.f32 0.03125, %v6628_v0  ;;  %v6696_v47 = vmul.f32 %v13467_v48, %v13467_v48 }
0x14a3   :  { %v6631_v17 = vpop.xlane.xlu0 %6630 }
0x14a4   :  { %v13475_v32 = vsub.f32 %v13373_v31, %v6666_v13  ;;  %v6667_v18 = vmul.f32 0.03125, %v6631_v17  ;;  %v6716_v57 = vsel %vm333_vm1, %v6696_v47, 0.0  ;;  %v6697_v53 = vmul.f32 %v13470_v6, %v13470_v6 }
0x14a5   :  { %6717 = vadd.xlane.f32.xlu1 %v6716_v57 }
0x14a6   :  { %v13481_v37 = vsub.f32 %v13378_v62, %v6667_v18  ;;  %v6719_v4 = vsel %vm333_vm1, %v6697_v53, 0.0  ;;  %v6698_v9 = vmul.f32 %v13475_v32, %v13475_v32  ;;  %v8976_v62 = vld [vmem:[%s13756_s2 + $0x128] sm:$0xff]  }
0x14a7   :  { %6720 = vadd.xlane.f32.xlu0 %v6719_v4  ;;  %8796 = vmatprep.subr.bf16.mxu0 %v8976_v62 }
0x14a8   :  { %v6722_v22 = vsel %vm333_vm1, %v6698_v9, 0.0  ;;  %v6699_v31 = vmul.f32 %v13481_v37, %v13481_v37  ;;  %8840 = vmatprep.subr.bf16.mxu1 %v8976_v62  ;;  %8797 = vmatpush3.bf16.msra.mxu0 %v8976_v62 }
0x14a9   :  { %6723 = vadd.xlane.f32.xlu1 %v6722_v22  ;;  %8842 = vmatpush3.bf16.msra.mxu1 %v8976_v62 }
0x14aa   :  { %v6725_v23 = vsel %vm333_vm1, %v6699_v31, 0.0  ;;  %8798 = vmatprep.subr.bf16.mxu0 %v8977_v11  ;;  %8841 = vmatprep.subr.bf16.mxu1 %v8977_v11 }
0x14ab   :  { %6726 = vadd.xlane.f32.xlu0 %v6725_v23 }
0x14ac   :  { %8799 = vmatpush3.bf16.msra.mxu0 %v8977_v11 }
0x14ad   :  { %8843 = vmatpush3.bf16.msra.mxu1 %v8977_v11 }
0x14fe   :  { %v6634_v1 = vpop.xlane.xlu1 %6633 }
0x14ff   :  { %v6668_v25 = vmul.f32 0.03125, %v6634_v1 }
0x1500   :  { %v6637_v41 = vpop.xlane.xlu0 %6636 }
0x1501   :  { %v13497_v44 = vsub.f32 %v13389_v7, %v6668_v25  ;;  %v6669_v50 = vmul.f32 0.03125, %v6637_v41 }
0x1503   :  { %v13500_v46 = vsub.f32 %v13394_v55, %v6669_v50  ;;  %v6700_v2 = vmul.f32 %v13497_v44, %v13497_v44 }
0x1505   :  { %v6728_v42 = vsel %vm333_vm1, %v6700_v2, 0.0  ;;  %v6701_v3 = vmul.f32 %v13500_v46, %v13500_v46 }
0x1506   :  { %6729 = vadd.xlane.f32.xlu1 %v6728_v42 }
0x1507   :  { %v6731_v38 = vsel %vm333_vm1, %v6701_v3, 0.0 }
0x1508   :  { %6732 = vadd.xlane.f32.xlu0 %v6731_v38 }
0x1512   :  { %v6640_v63 = vpop.xlane.xlu1 %6639 }
0x1513   :  { %v6670_v45 = vmul.f32 0.03125, %v6640_v63  ;;  %v13559_v63 = vld [vmem:[%s13759_s3 + $0x51] ss:$0 sm:$0xff] }
0x1514   :  { %v6643_v7 = vpop.xlane.xlu0 %6642 }
0x1515   :  { %v13509_v36 = vsub.f32 %v13407_v19, %v6670_v45  ;;  %v6671_v55 = vmul.f32 0.03125, %v6643_v7 }
0x1516   :  { %v6646_v12 = vpop.xlane.xlu1 %6645 }
0x1517   :  { %v13512_v30 = vsub.f32 %v13412_v27, %v6671_v55  ;;  %v6672_v58 = vmul.f32 0.03125, %v6646_v12  ;;  %v6702_v61 = vmul.f32 %v13509_v36, %v13509_v36 }
0x1518   :  { %v6649_v49 = vpop.xlane.xlu0 %6648 }
0x1519   :  { %v13517_v29 = vsub.f32 %v13415_v56, %v6672_v58  ;;  %v6673_v59 = vmul.f32 0.03125, %v6649_v49  ;;  %v6734_v51 = vsel %vm333_vm1, %v6702_v61, 0.0  ;;  %v6703_v19 = vmul.f32 %v13512_v30, %v13512_v30 }
0x151a   :  { %6735 = vadd.xlane.f32.xlu1 %v6734_v51 }
0x151b   :  { %v13523_v28 = vsub.f32 %v13420_v5, %v6673_v59  ;;  %v6737_v27 = vsel %vm333_vm1, %v6703_v19, 0.0  ;;  %v6704_v20 = vmul.f32 %v13517_v29, %v13517_v29  ;;  %v13567_v59 = vld [vmem:[%s13759_s3 + $0x52] ss:$0 sm:$0xff] }
0x151c   :  { %6738 = vadd.xlane.f32.xlu0 %v6737_v27 }
0x151d   :  { %v6740_v54 = vsel %vm333_vm1, %v6704_v20, 0.0  ;;  %v6705_v56 = vmul.f32 %v13523_v28, %v13523_v28 }
0x151e   :  { %6741 = vadd.xlane.f32.xlu1 %v6740_v54 }
0x151f   :  { %v6743_v35 = vsel %vm333_vm1, %v6705_v56, 0.0 }
0x1520   :  { %6744 = vadd.xlane.f32.xlu0 %v6743_v35 }
0x1522   :  { %v6652_v14 = vpop.xlane.xlu1 %6651 }
0x1523   :  { %v6674_v34 = vmul.f32 0.03125, %v6652_v14 }
0x1524   :  { %v6655_v10 = vpop.xlane.xlu0 %6654 }
0x1525   :  { %v13533_v5 = vsub.f32 %v13435_v16, %v6674_v34  ;;  %v6675_v43 = vmul.f32 0.03125, %v6655_v10 }
0x1526   :  { %v6658_v21 = vpop.xlane.xlu1 %6657 }
0x1527   :  { %v13536_v39 = vsub.f32 %v13440_v40, %v6675_v43  ;;  %v6676_v26 = vmul.f32 0.03125, %v6658_v21  ;;  %v6706_v33 = vmul.f32 %v13533_v5, %v13533_v5 }
0x1528   :  { %v6661_v15 = vpop.xlane.xlu0 %6660 }
0x1529   :  { %v13541_v0 = vsub.f32 %v13443_v60, %v6676_v26  ;;  %v6677_v13 = vmul.f32 0.03125, %v6661_v15  ;;  %v6746_v47 = vsel %vm333_vm1, %v6706_v33, 0.0  ;;  %v6707_v16 = vmul.f32 %v13536_v39, %v13536_v39 }
0x152a   :  { %6747 = vadd.xlane.f32.xlu1 %v6746_v47  ;;  %v6712_v17 = vpop.xlane.xlu1 %6711 }
0x152b   :  { %v13547_v18 = vsub.f32 %v13448_v8, %v6677_v13  ;;  %v6758_v40 = vmul.f32 0.03125, %v6712_v17  ;;  %v6749_v57 = vsel %vm333_vm1, %v6707_v16, 0.0  ;;  %v6708_v53 = vmul.f32 %v13541_v0, %v13541_v0 }
0x152c   :  { %6750 = vadd.xlane.f32.xlu0 %v6749_v57  ;;  %v6715_v60 = vpop.xlane.xlu0 %6714 }
0x152d   :  { %v6774_v4 = vadd.f32 1e-06, %v6758_v40  ;;  %v6759_v9 = vmul.f32 0.03125, %v6715_v60  ;;  %v6752_v22 = vsel %vm333_vm1, %v6708_v53, 0.0  ;;  %v6709_v31 = vmul.f32 %v13547_v18, %v13547_v18 }
0x152e   :  { %6753 = vadd.xlane.f32.xlu1 %v6752_v22 }
0x152f   :  { %9542 = vrsqrt.f32 %v6774_v4  ;;  %v6775_v23 = vadd.f32 1e-06, %v6759_v9  ;;  %v6755_v8 = vsel %vm333_vm1, %v6709_v31, 0.0 }
0x1530   :  { %6756 = vadd.xlane.f32.xlu0 %v6755_v8 }
0x1531   :  { %9544 = vrsqrt.f32 %v6775_v23 }
0x1532   :  { %v6718_v62 = vpop.xlane.xlu1 %6717 }
0x1533   :  { %v6760_v11 = vmul.f32 0.03125, %v6718_v62 }
0x1534   :  { %v6721_v1 = vpop.xlane.xlu0 %6720 }
0x1535   :  { %v6776_v25 = vadd.f32 1e-06, %v6760_v11  ;;  %v6761_v41 = vmul.f32 0.03125, %v6721_v1 }
0x1536   :  { %v6724_v50 = vpop.xlane.xlu1 %6723 }
0x1537   :  { %9546 = vrsqrt.f32 %v6776_v25  ;;  %v6777_v2 = vadd.f32 1e-06, %v6761_v41  ;;  %v6762_v42 = vmul.f32 0.03125, %v6724_v50 }
0x1538   :  { %v6727_v3 = vpop.xlane.xlu0 %6726 }
0x1539   :  { %v9543_v38 = vpop.eup %9542  ;;  %9548 = vrsqrt.f32 %v6777_v2  ;;  %v6778_v45 = vadd.f32 1e-06, %v6762_v42  ;;  %v6763_v7 = vmul.f32 0.03125, %v6727_v3 }
0x153a   :  { %v6806_v55 = vmul.f32 %v9543_v38, %v13451_v52 }
0x153b   :  { %v9545_v12 = vpop.eup %9544  ;;  %9550 = vrsqrt.f32 %v6778_v45  ;;  %v6779_v58 = vadd.f32 1e-06, %v6763_v7 }
0x153c   :  { %v6807_v61 = vmul.f32 %v9545_v12, %v13456_v24  ;;  %v6826_v49 = vmul.f32 %v13559_v63, %v6806_v55  ;;  %v8978_v55 = vld [vmem:[%s13756_s2 + $0x138] sm:$0xff]  }
0x153d   :  { %9552 = vrsqrt.f32 %v6779_v58  ;;  %8816 = vmatprep.subr.bf16.mxu1 %v8978_v55 }
0x153e   :  { %v6827_v51 = vmul.f32 %v13559_v63, %v6807_v61  ;;  %v6846_v19 = vadd.f32 %v13567_v59, %v6826_v49 }
0x1540   :  { %v6847_v27 = vadd.f32 %v13567_v59, %v6827_v51 }
0x1541   :  { %v9547_v52 = vpop.eup %9546 }
0x1542   :  { %v6808_v20 = vmul.f32 %v9547_v52, %v13467_v48  ;;  %v6862_v54 = vpack.c.bf16 %v6847_v27, %v6846_v19 }
0x1543   :  { %v9549_v56 = vpop.eup %9548 }
0x1544   :  { %v6828_v24 = vmul.f32 %v13559_v63, %v6808_v20  ;;  %v6809_v35 = vmul.f32 %v9549_v56, %v13470_v6  ;;  %8800 = vmatprep.mubr.msk.bf16.mxu0 %vm333_vm1, %v6862_v54 }
0x1545   :  { %v9551_v14 = vpop.eup %9550 }
0x1546   :  { %v6829_v34 = vmul.f32 %v13559_v63, %v6809_v35  ;;  %v6810_v10 = vmul.f32 %v9551_v14, %v13475_v32  ;;  %v6848_v21 = vadd.f32 %v13567_v59, %v6828_v24 }
0x1547   :  { %v9553_v43 = vpop.eup %9552 }
0x1548   :  { %v6849_v26 = vadd.f32 %v13567_v59, %v6829_v34  ;;  %v6811_v48 = vmul.f32 %v9553_v43, %v13481_v37  ;;  %v6830_v33 = vmul.f32 %v13559_v63, %v6810_v10 }
0x154a   :  { %v6863_v15 = vpack.c.bf16 %v6849_v26, %v6848_v21  ;;  %v6831_v13 = vmul.f32 %v13559_v63, %v6811_v48  ;;  %v6850_v6 = vadd.f32 %v13567_v59, %v6830_v33 }
0x154c   :  { %8801 = vmatmul.mubr.msk.bf16.vlgmr.msra.gmra.mrb[220].mxu0 %vm333_vm1, %v6863_v15  ;;  %v6851_v47 = vadd.f32 %v13567_v59, %v6831_v13 }
0x154e   :  { %v6864_v16 = vpack.c.bf16 %v6851_v47, %v6850_v6 }
0x1550   :  { %8804 = vmatprep.mubr.msk.bf16.mxu0 %vm333_vm1, %v6864_v16 }
0x1593   :  { %v6730_v32 = vpop.xlane.xlu1 %6729 }
0x1594   :  { %v6764_v17 = vmul.f32 0.03125, %v6730_v32  ;;  %v8979_v32 = vld [vmem:[%s13756_s2 + $0x140] sm:$0xff]  }
0x1595   :  { %v6733_v40 = vpop.xlane.xlu0 %6732 }
0x1596   :  { %v6780_v57 = vadd.f32 1e-06, %v6764_v17  ;;  %v6765_v53 = vmul.f32 0.03125, %v6733_v40 }
0x1598   :  { %9554 = vrsqrt.f32 %v6780_v57  ;;  %v6781_v37 = vadd.f32 1e-06, %v6765_v53  ;;  %v8980_v57 = vld [vmem:[%s13756_s2 + $0x148] sm:$0xff]  }
0x159a   :  { %9556 = vrsqrt.f32 %v6781_v37 }
0x15a2   :  { %v9555_v60 = vpop.eup %9554 }
0x15a3   :  { %v6812_v4 = vmul.f32 %v9555_v60, %v13497_v44 }
0x15a4   :  { %v9557_v9 = vpop.eup %9556 }
0x15a5   :  { %v6813_v22 = vmul.f32 %v9557_v9, %v13500_v46  ;;  %v6832_v31 = vmul.f32 %v13559_v63, %v6812_v4 }
0x15a7   :  { %v6736_v23 = vpop.xlane.xlu1 %6735  ;;  %v6833_v8 = vmul.f32 %v13559_v63, %v6813_v22  ;;  %v6852_v1 = vadd.f32 %v13567_v59, %v6832_v31 }
0x15a8   :  { %v6766_v62 = vmul.f32 0.03125, %v6736_v23 }
0x15a9   :  { %v6739_v11 = vpop.xlane.xlu0 %6738  ;;  %v6853_v25 = vadd.f32 %v13567_v59, %v6833_v8 }
0x15aa   :  { %v6782_v41 = vadd.f32 1e-06, %v6766_v62  ;;  %v6767_v50 = vmul.f32 0.03125, %v6739_v11 }
0x15ab   :  { %v6742_v2 = vpop.xlane.xlu1 %6741  ;;  %v6865_v42 = vpack.c.bf16 %v6853_v25, %v6852_v1 }
0x15ac   :  { %9558 = vrsqrt.f32 %v6782_v41  ;;  %v6783_v44 = vadd.f32 1e-06, %v6767_v50  ;;  %v6768_v3 = vmul.f32 0.03125, %v6742_v2 }
0x15ad   :  { %v6745_v38 = vpop.xlane.xlu0 %6744  ;;  %8805 = vmatmul.mubr.msk.bf16.gmra.mrb[224].mxu0 %vm333_vm1, %v6865_v42 }
0x15ae   :  { %9560 = vrsqrt.f32 %v6783_v44  ;;  %v6784_v46 = vadd.f32 1e-06, %v6768_v3  ;;  %v6769_v45 = vmul.f32 0.03125, %v6745_v38 }
0x15b0   :  { %9562 = vrsqrt.f32 %v6784_v46  ;;  %v6785_v7 = vadd.f32 1e-06, %v6769_v45 }
0x15b2   :  { %9564 = vrsqrt.f32 %v6785_v7 }
0x15b6   :  { %v9559_v12 = vpop.eup %9558 }
0x15b7   :  { %v6814_v58 = vmul.f32 %v9559_v12, %v13509_v36  ;;  %v6748_v61 = vpop.xlane.xlu1 %6747 }
0x15b8   :  { %v9561_v49 = vpop.eup %9560  ;;  %v6770_v51 = vmul.f32 0.03125, %v6748_v61 }
0x15b9   :  { %v6815_v19 = vmul.f32 %v9561_v49, %v13512_v30  ;;  %v6751_v27 = vpop.xlane.xlu0 %6750  ;;  %v6834_v52 = vmul.f32 %v13559_v63, %v6814_v58 }
0x15ba   :  { %v9563_v20 = vpop.eup %9562  ;;  %v6786_v54 = vadd.f32 1e-06, %v6770_v51  ;;  %v6771_v56 = vmul.f32 0.03125, %v6751_v27 }
0x15bb   :  { %v6816_v24 = vmul.f32 %v9563_v20, %v13517_v29  ;;  %v6754_v35 = vpop.xlane.xlu1 %6753  ;;  %v6835_v14 = vmul.f32 %v13559_v63, %v6815_v19  ;;  %v6854_v26 = vadd.f32 %v13567_v59, %v6834_v52 }
0x15bc   :  { %v9565_v34 = vpop.eup %9564  ;;  %9566 = vrsqrt.f32 %v6786_v54  ;;  %v6787_v10 = vadd.f32 1e-06, %v6771_v56  ;;  %v6772_v36 = vmul.f32 0.03125, %v6754_v35 }
0x15bd   :  { %v6836_v43 = vmul.f32 %v13559_v63, %v6816_v24  ;;  %v6817_v21 = vmul.f32 %v9565_v34, %v13523_v28  ;;  %v6757_v30 = vpop.xlane.xlu0 %6756  ;;  %v6855_v48 = vadd.f32 %v13567_v59, %v6835_v14 }
0x15be   :  { %9568 = vrsqrt.f32 %v6787_v10  ;;  %v6788_v33 = vadd.f32 1e-06, %v6772_v36  ;;  %v6773_v15 = vmul.f32 0.03125, %v6757_v30 }
0x15bf   :  { %v6837_v29 = vmul.f32 %v13559_v63, %v6817_v21  ;;  %v6866_v13 = vpack.c.bf16 %v6855_v48, %v6854_v26  ;;  %v6856_v47 = vadd.f32 %v13567_v59, %v6836_v43 }
0x15c0   :  { %9570 = vrsqrt.f32 %v6788_v33  ;;  %v6789_v6 = vadd.f32 1e-06, %v6773_v15 }
0x15c1   :  { %v6857_v16 = vadd.f32 %v13567_v59, %v6837_v29  ;;  %8808 = vmatprep.mubr.msk.bf16.mxu1 %vm333_vm1, %v6866_v13 }
0x15c2   :  { %9572 = vrsqrt.f32 %v6789_v6 }
0x15c3   :  { %v6867_v28 = vpack.c.bf16 %v6857_v16, %v6856_v47 }
0x15c5   :  { %8809 = vmatmul.mubr.msk.bf16.vlgmr.msra.gmra.mrb[24].mxu1 %vm333_vm1, %v6867_v28 }
0x15c6   :  { %v9567_v17 = vpop.eup %9566  ;;  %8817 = vmatpush3.bf16.msra.mxu1 %v8978_v55 }
0x15c7   :  { %v6818_v40 = vmul.f32 %v9567_v17, %v13533_v5  ;;  %8818 = vmatprep.subr.bf16.mxu1 %v8979_v32  ;;  %v8981_v5 = vld [vmem:[%s13756_s2 + $0x150] sm:$0xff]  }
0x15c8   :  { %v9569_v53 = vpop.eup %9568 }
0x15c9   :  { %v6819_v37 = vmul.f32 %v9569_v53, %v13536_v39  ;;  %v6838_v60 = vmul.f32 %v13559_v63, %v6818_v40 }
0x15ca   :  { %v9571_v4 = vpop.eup %9570  ;;  %8819 = vmatpush3.bf16.msra.mxu1 %v8979_v32 }
0x15cb   :  { %v6820_v9 = vmul.f32 %v9571_v4, %v13541_v0  ;;  %v6839_v22 = vmul.f32 %v13559_v63, %v6819_v37  ;;  %8820 = vmatprep.subr.bf16.mxu1 %v8980_v57  ;;  %v6858_v39 = vadd.f32 %v13567_v59, %v6838_v60 }
0x15cc   :  { %v9573_v31 = vpop.eup %9572 }
0x15cd   :  { %v6840_v23 = vmul.f32 %v13559_v63, %v6820_v9  ;;  %v6821_v8 = vmul.f32 %v9573_v31, %v13547_v18  ;;  %v6859_v62 = vadd.f32 %v13567_v59, %v6839_v22  ;;  %v13637_v18 = vld [vmem:[%s13759_s3 + $0x55] ss:$0 sm:$0xff] }
0x15ce   :  { %8821 = vmatpush3.bf16.msra.mxu1 %v8980_v57 }
0x15cf   :  { %v6841_v11 = vmul.f32 %v13559_v63, %v6821_v8  ;;  %v6868_v0 = vpack.c.bf16 %v6859_v62, %v6858_v39  ;;  %8822 = vmatprep.subr.bf16.mxu1 %v8981_v5  ;;  %v6860_v1 = vadd.f32 %v13567_v59, %v6840_v23 }
0x15d1   :  { %v6861_v25 = vadd.f32 %v13567_v59, %v6841_v11  ;;  %8812 = vmatprep.mubr.msk.bf16.mxu1 %vm333_vm1, %v6868_v0 }
0x15d2   :  { %8823 = vmatpush3.bf16.msra.mxu1 %v8981_v5 }
0x15d3   :  { %v6869_v41 = vpack.c.bf16 %v6861_v25, %v6860_v1 }
0x15d5   :  { %8813 = vmatmul.mubr.msk.bf16.gmra.mrb[28].mxu1 %vm333_vm1, %v6869_v41 }
0x161f   :  { %v8802_v50 = vpop.f32.mrb[220].mxu0 }
0x1620   :  { %v6958_v63 = vadd.f32 %v8802_v50, %v13637_v18  ;;  %v6949_v2 = vpop.f32.mrb[221].mxu0 }
0x1621   :  { %v6950_v42 = vadd.f32 %v13637_v18, %v6949_v2  ;;  %v8803_v44 = vpop.f32.mrb[222].mxu0 }
0x1622   :  { %v7014_v3 = vmul.f32 %v6958_v63, %v6958_v63  ;;  %v6961_v59 = vadd.f32 %v8803_v44, %v13637_v18  ;;  %v6952_v38 = vpop.f32.mrb[223].mxu0 }
0x1623   :  { %v7012_v46 = vmul.f32 %v6950_v42, %v6950_v42  ;;  %v6953_v45 = vadd.f32 %v13637_v18, %v6952_v38 }
0x1624   :  { %v7030_v7 = vmul.f32 %v7014_v3, %v6958_v63  ;;  %v7015_v55 = vmul.f32 %v6961_v59, %v6961_v59 }
0x1625   :  { %v7028_v12 = vmul.f32 %v7012_v46, %v6950_v42  ;;  %v7013_v58 = vmul.f32 %v6953_v45, %v6953_v45 }
0x1626   :  { %v7046_v61 = vmul.f32 0.044715, %v7030_v7  ;;  %v7031_v49 = vmul.f32 %v7015_v55, %v6961_v59 }
0x1627   :  { %v7044_v51 = vmul.f32 0.044715, %v7028_v12  ;;  %v7029_v19 = vmul.f32 %v7013_v58, %v6953_v45 }
0x1628   :  { %v7062_v27 = vadd.f32 %v7046_v61, %v6958_v63  ;;  %v7047_v52 = vmul.f32 0.044715, %v7031_v49 }
0x1629   :  { %v7060_v20 = vadd.f32 %v7044_v51, %v6950_v42  ;;  %v7045_v54 = vmul.f32 0.044715, %v7029_v19 }
0x162a   :  { %v7078_v56 = vmul.f32 0.7978846, %v7062_v27  ;;  %v7063_v24 = vadd.f32 %v7047_v52, %v6961_v59 }
0x162b   :  { %v7076_v35 = vmul.f32 0.7978846, %v7060_v20  ;;  %v7061_v14 = vadd.f32 %v7045_v54, %v6953_v45 }
0x162c   :  { %9574 = vtanh.f32 %v7078_v56  ;;  %v7079_v34 = vmul.f32 0.7978846, %v7063_v24 }
0x162d   :  { %9576 = vtanh.f32 %v7076_v35  ;;  %v7077_v10 = vmul.f32 0.7978846, %v7061_v14 }
0x162e   :  { %9578 = vtanh.f32 %v7079_v34 }
0x162f   :  { %9580 = vtanh.f32 %v7077_v10 }
0x1636   :  { %v9575_v36 = vpop.eup %9574 }
0x1637   :  { %v9577_v43 = vpop.eup %9576  ;;  %v7110_v21 = vadd.f32 1.0, %v9575_v36 }
0x1638   :  { %v9579_v30 = vpop.eup %9578  ;;  %v7108_v26 = vadd.f32 1.0, %v9577_v43 }
0x1639   :  { %v9581_v48 = vpop.eup %9580  ;;  %v7126_v33 = vmul.f32 0.5, %v7110_v21  ;;  %v7111_v15 = vadd.f32 1.0, %v9579_v30 }
0x163a   :  { %v7124_v29 = vmul.f32 0.5, %v7108_v26  ;;  %v7109_v13 = vadd.f32 1.0, %v9581_v48 }
0x163b   :  { %v7127_v6 = vmul.f32 0.5, %v7111_v15  ;;  %v7142_v16 = vmul.f32 %v7126_v33, %v6958_v63 }
0x163c   :  { %v7125_v47 = vmul.f32 0.5, %v7109_v13  ;;  %v7140_v32 = vmul.f32 %v7124_v29, %v6950_v42 }
0x163d   :  { %v7143_v28 = vmul.f32 %v7127_v6, %v6961_v59 }
0x163e   :  { %v7141_v17 = vmul.f32 %v7125_v47, %v6953_v45 }
0x163f   :  { %v7157_v40 = vpack.c.bf16 %v7143_v28, %v7142_v16 }
0x1640   :  { %v7156_v57 = vpack.c.bf16 %v7141_v17, %v7140_v32 }
0x1642   :  { %8824 = vmatprep.mubr.msk.bf16.mxu1 %vm7201_vm12, %v7156_v57 }
0x1643   :  { %8825 = vmatmul.mubr.msk.bf16.vlgmr.msra.gmra.mrb[32].mxu1 %vm7201_vm12, %v7157_v40 }
0x1680   :  { %v8806_v53 = vpop.f32.mrb[224].mxu0 }
0x1681   :  { %v6974_v37 = vadd.f32 %v8806_v53, %v13637_v18  ;;  %v6965_v60 = vpop.f32.mrb[225].mxu0 }
0x1682   :  { %v6966_v4 = vadd.f32 %v13637_v18, %v6965_v60  ;;  %v8807_v9 = vpop.f32.mrb[226].mxu0 }
0x1683   :  { %v7018_v22 = vmul.f32 %v6974_v37, %v6974_v37  ;;  %v6977_v5 = vadd.f32 %v8807_v9, %v13637_v18  ;;  %v6968_v31 = vpop.f32.mrb[227].mxu0 }
0x1684   :  { %v7016_v23 = vmul.f32 %v6966_v4, %v6966_v4  ;;  %v6969_v8 = vadd.f32 %v13637_v18, %v6968_v31 }
0x1685   :  { %v7034_v39 = vmul.f32 %v7018_v22, %v6974_v37  ;;  %v7019_v62 = vmul.f32 %v6977_v5, %v6977_v5 }
0x1686   :  { %v7032_v11 = vmul.f32 %v7016_v23, %v6966_v4  ;;  %v7017_v0 = vmul.f32 %v6969_v8, %v6969_v8 }
0x1687   :  { %v7050_v1 = vmul.f32 0.044715, %v7034_v39  ;;  %v7035_v25 = vmul.f32 %v7019_v62, %v6977_v5 }
0x1688   :  { %v7048_v41 = vmul.f32 0.044715, %v7032_v11  ;;  %v7033_v50 = vmul.f32 %v7017_v0, %v6969_v8 }
0x1689   :  { %v7066_v63 = vadd.f32 %v7050_v1, %v6974_v37  ;;  %v7051_v2 = vmul.f32 0.044715, %v7035_v25 }
0x168a   :  { %v7064_v42 = vadd.f32 %v7048_v41, %v6966_v4  ;;  %v7049_v44 = vmul.f32 0.044715, %v7033_v50 }
0x168b   :  { %v7082_v3 = vmul.f32 0.7978846, %v7066_v63  ;;  %v7067_v59 = vadd.f32 %v7051_v2, %v6977_v5 }
0x168c   :  { %v7080_v38 = vmul.f32 0.7978846, %v7064_v42  ;;  %v7065_v46 = vadd.f32 %v7049_v44, %v6969_v8 }
0x168d   :  { %9582 = vtanh.f32 %v7082_v3  ;;  %v7083_v45 = vmul.f32 0.7978846, %v7067_v59 }
0x168e   :  { %9584 = vtanh.f32 %v7080_v38  ;;  %v7081_v7 = vmul.f32 0.7978846, %v7065_v46 }
0x168f   :  { %9586 = vtanh.f32 %v7083_v45 }
0x1690   :  { %9588 = vtanh.f32 %v7081_v7 }
0x1697   :  { %v9583_v55 = vpop.eup %9582 }
0x1698   :  { %v9585_v12 = vpop.eup %9584  ;;  %v7114_v58 = vadd.f32 1.0, %v9583_v55  ;;  %v8810_v61 = vpop.f32.mrb[24].mxu1 }
0x1699   :  { %v9587_v49 = vpop.eup %9586  ;;  %v7112_v51 = vadd.f32 1.0, %v9585_v12  ;;  %v13650_v19 = vadd.f32 %v8810_v61, %v13637_v18  ;;  %v6981_v27 = vpop.f32.mrb[25].mxu1 }
0x169a   :  { %v9589_v52 = vpop.eup %9588  ;;  %v7130_v20 = vmul.f32 0.5, %v7114_v58  ;;  %v7115_v54 = vadd.f32 1.0, %v9587_v49  ;;  %v13653_v56 = vadd.f32 %v13637_v18, %v6981_v27  ;;  %v8811_v24 = vpop.f32.mrb[26].mxu1 }
0x169b   :  { %v7128_v35 = vmul.f32 0.5, %v7112_v51  ;;  %v7113_v14 = vadd.f32 1.0, %v9589_v52  ;;  %v7022_v34 = vmul.f32 %v13650_v19, %v13650_v19  ;;  %v13658_v10 = vadd.f32 %v8811_v24, %v13637_v18  ;;  %v6984_v36 = vpop.f32.mrb[27].mxu1 }
0x169c   :  { %v7131_v43 = vmul.f32 0.5, %v7115_v54  ;;  %v7020_v21 = vmul.f32 %v13653_v56, %v13653_v56  ;;  %v13663_v30 = vadd.f32 %v13637_v18, %v6984_v36  ;;  %v7146_v15 = vmul.f32 %v7130_v20, %v6974_v37 }
0x169d   :  { %v7129_v26 = vmul.f32 0.5, %v7113_v14  ;;  %v7038_v48 = vmul.f32 %v7022_v34, %v13650_v19  ;;  %v7023_v33 = vmul.f32 %v13658_v10, %v13658_v10  ;;  %v7144_v47 = vmul.f32 %v7128_v35, %v6966_v4 }
0x169e   :  { %v7147_v29 = vmul.f32 %v7131_v43, %v6977_v5  ;;  %v7036_v13 = vmul.f32 %v7020_v21, %v13653_v56  ;;  %v7021_v6 = vmul.f32 %v13663_v30, %v13663_v30 }
0x169f   :  { %v7145_v16 = vmul.f32 %v7129_v26, %v6969_v8  ;;  %v7054_v28 = vmul.f32 0.044715, %v7038_v48  ;;  %v7039_v32 = vmul.f32 %v7023_v33, %v13658_v10 }
0x16a0   :  { %v7159_v17 = vpack.c.bf16 %v7147_v29, %v7146_v15  ;;  %v7052_v40 = vmul.f32 0.044715, %v7036_v13  ;;  %v7037_v57 = vmul.f32 %v7021_v6, %v13663_v30 }
0x16a1   :  { %v7070_v53 = vadd.f32 %v7054_v28, %v13650_v19  ;;  %v7055_v60 = vmul.f32 0.044715, %v7039_v32  ;;  %v7158_v9 = vpack.c.bf16 %v7145_v16, %v7144_v47 }
0x16a2   :  { %v7068_v37 = vadd.f32 %v7052_v40, %v13653_v56  ;;  %v7053_v22 = vmul.f32 0.044715, %v7037_v57 }
0x16a3   :  { %v7086_v5 = vmul.f32 0.7978846, %v7070_v53  ;;  %v7071_v31 = vadd.f32 %v7055_v60, %v13658_v10  ;;  %8828 = vmatprep.mubr.msk.bf16.mxu1 %vm7201_vm12, %v7158_v9 }
0x16a4   :  { %v7084_v4 = vmul.f32 0.7978846, %v7068_v37  ;;  %v7069_v23 = vadd.f32 %v7053_v22, %v13663_v30  ;;  %8829 = vmatmul.mubr.msk.bf16.gmra.mrb[36].mxu1 %vm7201_vm12, %v7159_v17 }
0x16a5   :  { %9590 = vtanh.f32 %v7086_v5  ;;  %v7087_v8 = vmul.f32 0.7978846, %v7071_v31 }
0x16a6   :  { %9592 = vtanh.f32 %v7084_v4  ;;  %v7085_v39 = vmul.f32 0.7978846, %v7069_v23 }
0x16a7   :  { %9594 = vtanh.f32 %v7087_v8 }
0x16a8   :  { %9596 = vtanh.f32 %v7085_v39  ;;  %v8814_v62 = vpop.f32.mrb[28].mxu1 }
0x16a9   :  { %v13680_v11 = vadd.f32 %v8814_v62, %v13637_v18  ;;  %v6997_v0 = vpop.f32.mrb[29].mxu1  ;;  %v7620_v62 = vld [vmem:[%s13759_s3 + $0x56] ss:$0 sm:$0xff] }
0x16aa   :  { %v13683_v1 = vadd.f32 %v13637_v18, %v6997_v0  ;;  %v8815_v25 = vpop.f32.mrb[30].mxu1 }
0x16ab   :  { %v7026_v41 = vmul.f32 %v13680_v11, %v13680_v11  ;;  %v7009_v50 = vadd.f32 %v8815_v25, %v13637_v18  ;;  %v7000_v63 = vpop.f32.mrb[31].mxu1 }
0x16ac   :  { %v7024_v2 = vmul.f32 %v13683_v1, %v13683_v1  ;;  %v7001_v42 = vadd.f32 %v13637_v18, %v7000_v63 }
0x16ad   :  { %v7042_v44 = vmul.f32 %v7026_v41, %v13680_v11  ;;  %v7027_v3 = vmul.f32 %v7009_v50, %v7009_v50 }
0x16ae   :  { %v7040_v59 = vmul.f32 %v7024_v2, %v13683_v1  ;;  %v7025_v38 = vmul.f32 %v7001_v42, %v7001_v42 }
0x16af   :  { %v9591_v46 = vpop.eup %9590  ;;  %v7058_v45 = vmul.f32 0.044715, %v7042_v44  ;;  %v7043_v7 = vmul.f32 %v7027_v3, %v7009_v50 }
0x16b0   :  { %v9593_v55 = vpop.eup %9592  ;;  %v7118_v12 = vadd.f32 1.0, %v9591_v46  ;;  %v7056_v58 = vmul.f32 0.044715, %v7040_v59  ;;  %v7041_v61 = vmul.f32 %v7025_v38, %v7001_v42 }
0x16b1   :  { %v9595_v49 = vpop.eup %9594  ;;  %v7116_v51 = vadd.f32 1.0, %v9593_v55  ;;  %v7074_v27 = vadd.f32 %v7058_v45, %v13680_v11  ;;  %v7059_v52 = vmul.f32 0.044715, %v7043_v7 }
0x16b2   :  { %v9597_v20 = vpop.eup %9596  ;;  %v7134_v18 = vmul.f32 0.5, %v7118_v12  ;;  %v7119_v54 = vadd.f32 1.0, %v9595_v49  ;;  %v7072_v24 = vadd.f32 %v7056_v58, %v13683_v1  ;;  %v7057_v35 = vmul.f32 0.044715, %v7041_v61 }
0x16b3   :  { %v7132_v14 = vmul.f32 0.5, %v7116_v51  ;;  %v7117_v34 = vadd.f32 1.0, %v9597_v20  ;;  %v7090_v36 = vmul.f32 0.7978846, %v7074_v27  ;;  %v7075_v43 = vadd.f32 %v7059_v52, %v7009_v50 }
0x16b4   :  { %v7135_v21 = vmul.f32 0.5, %v7119_v54  ;;  %v7088_v26 = vmul.f32 0.7978846, %v7072_v24  ;;  %v7073_v48 = vadd.f32 %v7057_v35, %v7001_v42  ;;  %v7150_v29 = vmul.f32 %v7134_v18, %v13650_v19 }
0x16b5   :  { %v7133_v33 = vmul.f32 0.5, %v7117_v34  ;;  %9598 = vtanh.f32 %v7090_v36  ;;  %v7091_v15 = vmul.f32 0.7978846, %v7075_v43  ;;  %v7148_v47 = vmul.f32 %v7132_v14, %v13653_v56 }
0x16b6   :  { %v7151_v13 = vmul.f32 %v7135_v21, %v13658_v10  ;;  %9600 = vtanh.f32 %v7088_v26  ;;  %v7089_v6 = vmul.f32 0.7978846, %v7073_v48 }
0x16b7   :  { %v7149_v16 = vmul.f32 %v7133_v33, %v13663_v30  ;;  %9602 = vtanh.f32 %v7091_v15 }
0x16b8   :  { %v7161_v28 = vpack.c.bf16 %v7151_v13, %v7150_v29  ;;  %9604 = vtanh.f32 %v7089_v6 }
0x16b9   :  { %v7160_v32 = vpack.c.bf16 %v7149_v16, %v7148_v47 }
0x16bb   :  { %8832 = vmatprep.mubr.msk.bf16.mxu1 %vm7201_vm12, %v7160_v32 }
0x16bc   :  { %8833 = vmatmul.mubr.msk.bf16.gmra.mrb[40].mxu1 %vm7201_vm12, %v7161_v28 }
0x16bf   :  { %v9599_v17 = vpop.eup %9598 }
0x16c0   :  { %v9601_v40 = vpop.eup %9600  ;;  %v7122_v57 = vadd.f32 1.0, %v9599_v17 }
0x16c1   :  { %v9603_v19 = vpop.eup %9602  ;;  %v7120_v53 = vadd.f32 1.0, %v9601_v40 }
0x16c2   :  { %v9605_v10 = vpop.eup %9604  ;;  %v7138_v60 = vmul.f32 0.5, %v7122_v57  ;;  %v7123_v9 = vadd.f32 1.0, %v9603_v19 }
0x16c3   :  { %v7136_v37 = vmul.f32 0.5, %v7120_v53  ;;  %v7121_v56 = vadd.f32 1.0, %v9605_v10 }
0x16c4   :  { %v7139_v22 = vmul.f32 0.5, %v7123_v9  ;;  %v7154_v5 = vmul.f32 %v7138_v60, %v13680_v11 }
0x16c5   :  { %v7137_v30 = vmul.f32 0.5, %v7121_v56  ;;  %v7152_v4 = vmul.f32 %v7136_v37, %v13683_v1 }
0x16c6   :  { %v7155_v31 = vmul.f32 %v7139_v22, %v7009_v50 }
0x16c7   :  { %v7153_v23 = vmul.f32 %v7137_v30, %v7001_v42 }
0x16c8   :  { %v7163_v8 = vpack.c.bf16 %v7155_v31, %v7154_v5 }
0x16c9   :  { %v7162_v39 = vpack.c.bf16 %v7153_v23, %v7152_v4 }
0x16cb   :  { %8836 = vmatprep.mubr.msk.bf16.mxu1 %vm7201_vm12, %v7162_v39 }
0x16cc   :  { %8837 = vmatmul.mubr.msk.bf16.gmra.mrb[44].mxu1 %vm7201_vm12, %v7163_v8 }
0x1716   :  { %v8826_v0 = vpop.f32.mrb[32].mxu1 }
0x1717   :  { %v7269_v25 = vadd.f32 %v8826_v0, %v7620_v62  ;;  %v7260_v41 = vpop.f32.mrb[33].mxu1 }
0x1718   :  { %v7261_v63 = vadd.f32 %v7620_v62, %v7260_v41  ;;  %v8827_v2 = vpop.f32.mrb[34].mxu1 }
0x1719   :  { %7325 = vst [vmem:[%s13760_s4 + $0x10] sm:$0xff] %v7269_v25  ;;  %v7272_v11 = vadd.f32 %v8827_v2, %v7620_v62  ;;  %v7263_v1 = vpop.f32.mrb[35].mxu1 }
0x171a   :  { %7323 = vst [vmem:[%s13760_s4] sm:$0xff] %v7261_v63  ;;  %v7264_v50 = vadd.f32 %v7620_v62, %v7263_v1 }
0x171b   :  { %7326 = vst [vmem:[%s13760_s4 + $0x18] sm:$0xff] %v7272_v11 }
0x171c   :  { %7324 = vst [vmem:[%s13760_s4 + $0x8] sm:$0xff] %v7264_v50 }
0x1777   :  { %v8830_v42 = vpop.f32.mrb[36].mxu1 }
0x1778   :  { %v7285_v44 = vadd.f32 %v8830_v42, %v7620_v62  ;;  %v7276_v3 = vpop.f32.mrb[37].mxu1 }
0x1779   :  { %v7277_v59 = vadd.f32 %v7620_v62, %v7276_v3  ;;  %v8831_v38 = vpop.f32.mrb[38].mxu1 }
0x177a   :  { %7329 = vst [vmem:[%s13760_s4 + $0x30] sm:$0xff] %v7285_v44  ;;  %v7288_v46 = vadd.f32 %v8831_v38, %v7620_v62  ;;  %v7279_v45 = vpop.f32.mrb[39].mxu1 }
0x177b   :  { %7327 = vst [vmem:[%s13760_s4 + $0x20] sm:$0xff] %v7277_v59  ;;  %v7280_v7 = vadd.f32 %v7620_v62, %v7279_v45 }
0x177c   :  { %7330 = vst [vmem:[%s13760_s4 + $0x38] sm:$0xff] %v7288_v46 }
0x177d   :  { %7328 = vst [vmem:[%s13760_s4 + $0x28] sm:$0xff] %v7280_v7 }
0x178f   :  { %v8834_v55 = vpop.f32.mrb[40].mxu1 }
0x1790   :  { %v7301_v12 = vadd.f32 %v8834_v55, %v7620_v62  ;;  %v7292_v58 = vpop.f32.mrb[41].mxu1 }
0x1791   :  { %v7293_v61 = vadd.f32 %v7620_v62, %v7292_v58  ;;  %v8835_v49 = vpop.f32.mrb[42].mxu1 }
0x1792   :  { %7333 = vst [vmem:[%s13760_s4 + $0x50] sm:$0xff] %v7301_v12  ;;  %v7304_v51 = vadd.f32 %v8835_v49, %v7620_v62  ;;  %v7295_v27 = vpop.f32.mrb[43].mxu1 }
0x1793   :  { %7331 = vst [vmem:[%s13760_s4 + $0x40] sm:$0xff] %v7293_v61  ;;  %v7296_v52 = vadd.f32 %v7620_v62, %v7295_v27 }
0x1794   :  { %7334 = vst [vmem:[%s13760_s4 + $0x58] sm:$0xff] %v7304_v51 }
0x1795   :  { %7332 = vst [vmem:[%s13760_s4 + $0x48] sm:$0xff] %v7296_v52 }
0x179f   :  { %v8838_v20 = vpop.f32.mrb[44].mxu1 }
0x17a0   :  { %v7317_v18 = vadd.f32 %v8838_v20, %v7620_v62  ;;  %v7308_v54 = vpop.f32.mrb[45].mxu1 }
0x17a1   :  { %v7309_v24 = vadd.f32 %v7620_v62, %v7308_v54  ;;  %v8839_v35 = vpop.f32.mrb[46].mxu1 }
0x17a2   :  { %7337 = vst [vmem:[%s13760_s4 + $0x70] sm:$0xff] %v7317_v18  ;;  %v7320_v14 = vadd.f32 %v8839_v35, %v7620_v62  ;;  %v7311_v34 = vpop.f32.mrb[47].mxu1 }
0x17a3   :  { %7335 = vst [vmem:[%s13760_s4 + $0x60] sm:$0xff] %v7309_v24  ;;  %v7312_v36 = vadd.f32 %v7620_v62, %v7311_v34 }
0x17a4   :  { %7338 = vst [vmem:[%s13760_s4 + $0x78] sm:$0xff] %v7320_v14 }
0x17a5   :  { %7336 = vst [vmem:[%s13760_s4 + $0x68] sm:$0xff] %v7312_v36 }

</bundles_post_ra>
